<compile_context>
chip_gen: v6e
topology: v6e:2x2x1
jax: 0.10.0
libtpu: 0.0.40
codegen_flags: <defaults>
</compile_context>

<pallas_src>
import functools
import math

import jax
import jax.numpy as jnp
import numpy as np
from jax.experimental import pallas as pl
from jax.experimental.pallas import tpu as pltpu

_VMEM_LIMIT = 48 * 1024 * 1024   # above default scoped limit, safe on v5e/v6e/v7x
_NEG_BIG = -1e9                  # masks padded prompt columns out of the softmax


# ---------------------------------------------------------------------------
# helpers (host / layout)
# ---------------------------------------------------------------------------
def _round_up(a, b):
    return ((a + b - 1) // b) * b


def _gelu_tanh(x):
    # tanh-form GELU: exp/tanh land on the EUP slot instead of a long VPU
    # polynomial; max abs deviation from the exact erf GELU is ~3e-4.
    c = math.sqrt(2.0 / math.pi)
    return 0.5 * x * (1.0 + jnp.tanh(c * (x + 0.044715 * x * x * x)))


def window_partition_jax(x, ws):
    B, H, W, C = x.shape
    x = x.reshape(B, H // ws, ws, W // ws, ws, C)
    x = jnp.transpose(x, (0, 1, 3, 2, 4, 5))
    return x.reshape(-1, ws * ws, C)


def window_reverse_jax(windows, ws, H, W):
    B = windows.shape[0] // ((H * W) // (ws * ws))
    x = windows.reshape(B, H // ws, W // ws, ws, ws, -1)
    x = jnp.transpose(x, (0, 1, 3, 2, 4, 5))
    return x.reshape(B, H, W, -1)


def make_relative_position_index(ws):
    coords = np.stack(np.meshgrid(np.arange(ws), np.arange(ws), indexing="ij"))
    coords_flatten = coords.reshape(2, -1)
    rel = coords_flatten[:, :, None] - coords_flatten[:, None, :]
    rel = rel.transpose(1, 2, 0).astype(np.int64)
    rel[..., 0] += ws - 1
    rel[..., 1] += ws - 1
    rel[..., 0] *= 2 * ws - 1
    return jnp.asarray(rel.sum(-1), dtype=jnp.int32)


def calculate_mask_np(H, W, ws, shift):
    # mirrors SwinTransformerBlock.calculate_mask
    img_mask = np.zeros((1, H, W, 1), np.float32)
    slices = (slice(0, -ws), slice(-ws, -shift), slice(-shift, None))
    cnt = 0
    for h in slices:
        for w in slices:
            img_mask[:, h, w, :] = cnt
            cnt += 1
    mw = img_mask.reshape(1, H // ws, ws, W // ws, ws, 1)
    mw = mw.transpose(0, 1, 3, 2, 4, 5).reshape(-1, ws * ws)
    attn_mask = mw[:, None, :] - mw[:, :, None]
    return np.where(attn_mask != 0, -100.0, 0.0).astype(np.float32)


# ---------------------------------------------------------------------------
# KERNEL A: fused norm1 + prompted window attention over a row of windows
# ---------------------------------------------------------------------------
def _window_attention_kernel(*refs, ws, num_heads, head_dim, scale, eps,
                             has_mask, compute_dtype):
    if has_mask:
        (xsp_ref, pr_ref, g1_ref, b1_ref, wq_ref, wk_ref, wv_ref,
         bq_ref, bk_ref, bv_ref, rpb_ref, wproj_ref, bproj_ref, mask_ref,
         o_ref, ctx_ref) = refs
    else:
        (xsp_ref, pr_ref, g1_ref, b1_ref, wq_ref, wk_ref, wv_ref,
         bq_ref, bk_ref, bv_ref, rpb_ref, wproj_ref, bproj_ref,
         o_ref, ctx_ref) = refs
        mask_ref = None

    _, Wd, C = xsp_ref.shape                 # (ws, W, C) row of windows
    nWc = Wd // ws
    P_pad = pr_ref.shape[1]
    fin_N = ws * ws
    N = P_pad + fin_N
    R = nWc * fin_N
    cd = compute_dtype

    # ---- window_partition folded in: (ws, W, C) -> (nWc*ws*ws, C) ----------
    xs = xsp_ref[...].astype(jnp.float32)
    xw = jnp.transpose(xs.reshape(ws, nWc, ws, C), (1, 0, 2, 3)).reshape(R, C)

    # ---- fused norm1 on spatial tokens (prompt rows stay raw) --------------
    mu = jnp.mean(xw, axis=-1, keepdims=True)
    var = jnp.mean((xw - mu) ** 2, axis=-1, keepdims=True)
    xn = (xw - mu) * jax.lax.rsqrt(var + eps) * g1_ref[...] + b1_ref[...]

    prompts = pr_ref[...].astype(jnp.float32)                 # (nWc, P_pad, C)

    # ---- per-window token stacks (prompts prepended) ------------------------
    tok = jnp.concatenate([prompts, xn.reshape(nWc, fin_N, C)], axis=1)
    tok_flat = tok.reshape(nWc * N, C).astype(cd)
    xn_c = xn.astype(cd)

    # ---- Q/K/V projections (MXU, full lane-width outputs) -------------------
    q = jnp.dot(xn_c, wq_ref[...], preferred_element_type=jnp.float32) + bq_ref[...]
    k = jnp.dot(tok_flat, wk_ref[...], preferred_element_type=jnp.float32) + bk_ref[...]
    v = jnp.dot(tok_flat, wv_ref[...], preferred_element_type=jnp.float32) + bv_ref[...]
    q = q.reshape(nWc, fin_N, C)
    k = k.reshape(nWc, N, C)
    v = v.reshape(nWc, N, C)

    rpb = rpb_ref[...]                                        # (nH, fin_N, N)
    msk = mask_ref[...] if has_mask else None                 # (nWc, fin_N, N)

    # ---- per-head, window-batched attention ---------------------------------
    for h in range(num_heads):
        lo = h * head_dim
        qh = (q[:, :, lo:lo + head_dim] * scale).astype(cd)
        kh = k[:, :, lo:lo + head_dim].astype(cd)
        vh = v[:, :, lo:lo + head_dim].astype(cd)
        logits = jnp.einsum("wqd,wkd->wqk", qh, kh,
                            preferred_element_type=jnp.float32)
        logits = logits + rpb[h]
        if has_mask:
            logits = logits + msk
        logits = logits - jnp.max(logits, axis=-1, keepdims=True)
        p = jnp.exp(logits)
        p = p * pl.reciprocal(jnp.sum(p, axis=-1, keepdims=True), approx=True)
        out_h = jnp.einsum("wqk,wkd->wqd", p.astype(cd), vh,
                           preferred_element_type=jnp.float32)
        # write per-head result into the VMEM scratch (no lane concat)
        ctx_ref[:, lo:lo + head_dim] = out_h.reshape(R, head_dim)

    # ---- output projection + window_reverse back into the spatial layout ----
    out = jnp.dot(ctx_ref[...].astype(cd), wproj_ref[...],
                  preferred_element_type=jnp.float32) + bproj_ref[...]
    out = jnp.transpose(out.reshape(nWc, ws, ws, C), (1, 0, 2, 3))
    o_ref[...] = out.reshape(ws, Wd, C).astype(o_ref.dtype)


def prompted_window_attention(xs, prompts_w, gamma1, beta1, wq, wk, wv,
                              bq, bk, bv, rpb, mask, wproj, bproj, *,
                              ws, num_heads, eps=1e-5, use_bf16=True):
    """xs: (B, H, W, C) rolled spatial tokens.  prompts_w: (B*nWr, nWc, P_pad, C)
    per-window prompt rows.  rpb: (nH, fin_N, N) prompt-padded bias.  mask:
    (nWr, nWc, fin_N, N) or None.  Returns (B, H, W, C) in the rolled frame."""
    B, H, W, C = xs.shape
    nWr, nWc = H // ws, W // ws
    P_pad = prompts_w.shape[2]
    fin_N = ws * ws
    N = P_pad + fin_N
    hd = C // num_heads
    scale = hd ** (-0.5)
    wdt = jnp.bfloat16 if use_bf16 else jnp.float32
    has_mask = mask is not None

    kernel = functools.partial(
        _window_attention_kernel, ws=ws, num_heads=num_heads, head_dim=hd,
        scale=scale, eps=eps, has_mask=has_mask, compute_dtype=wdt)

    # window-row index i is the slow grid axis so the mask block (which only
    # depends on i) is DMA'd once per row of windows, not once per step.
    grid = (nWr, B)

    def const(*block):
        return pl.BlockSpec(block, lambda i, b: (0,) * len(block))

    in_specs = [
        pl.BlockSpec((None, ws, W, C), lambda i, b: (b, i, 0, 0)),   # spatial row
        pl.BlockSpec((None, nWc, P_pad, C),
                     lambda i, b: (b * nWr + i, 0, 0, 0)),           # prompts
        const(1, C), const(1, C),                                    # norm1 g,b
        const(C, C), const(C, C), const(C, C),                       # wq, wk, wv
        const(1, C), const(1, C), const(1, C),                       # bq, bk, bv
        const(num_heads, fin_N, N),                                  # rpb (resident)
        const(C, C), const(1, C),                                    # wproj, bproj
    ]
    args = [xs, prompts_w, gamma1.reshape(1, C), beta1.reshape(1, C),
            wq.astype(wdt), wk.astype(wdt), wv.astype(wdt),
            bq.reshape(1, C), bk.reshape(1, C), bv.reshape(1, C),
            rpb, wproj.astype(wdt), bproj.reshape(1, C)]
    if has_mask:
        in_specs.append(pl.BlockSpec((None, nWc, fin_N, N),
                                     lambda i, b: (i, 0, 0, 0)))
        args.append(mask)

    flops = int(B * nWr * (2 * nWc * C * C * (fin_N + 2 * N)
                           + 4 * num_heads * nWc * fin_N * N * hd
                           + 2 * nWc * fin_N * C * C))
    cost = pl.CostEstimate(
        flops=flops,
        transcendentals=int(B * nWr * nWc * num_heads * fin_N * N),
        bytes_accessed=int(4 * (2 * B * H * W * C
                                + B * nWr * nWc * P_pad * C
                                + num_heads * fin_N * N + 4 * C * C)))

    return pl.pallas_call(
        kernel,
        out_shape=jax.ShapeDtypeStruct((B, H, W, C), xs.dtype),
        grid_spec=pltpu.PrefetchScalarGridSpec(
            num_scalar_prefetch=0,
            grid=grid,
            in_specs=in_specs,
            out_specs=pl.BlockSpec((None, ws, W, C), lambda i, b: (b, i, 0, 0)),
            scratch_shapes=[pltpu.VMEM((nWc * fin_N, C), jnp.float32)]),
        compiler_params=pltpu.CompilerParams(
            dimension_semantics=("parallel", "parallel"),
            vmem_limit_bytes=_VMEM_LIMIT),
        cost_estimate=cost,
    )(*args)


# ---------------------------------------------------------------------------
# KERNEL B: fused residual + norm2 + MLP (Hd-chunked fc1 -> GELU -> fc2) + res
# ---------------------------------------------------------------------------
def _residual_mlp_kernel(short_ref, attn_ref, g2_ref, b2_ref, w1_ref, bb1_ref,
                         w2_ref, bb2_ref, o_ref, *, eps, hd_chunk, compute_dtype):
    cd = compute_dtype
    h = short_ref[...].astype(jnp.float32) + attn_ref[...].astype(jnp.float32)
    mu = jnp.mean(h, axis=-1, keepdims=True)
    var = jnp.mean((h - mu) ** 2, axis=-1, keepdims=True)
    xn = ((h - mu) * jax.lax.rsqrt(var + eps) * g2_ref[...] + b2_ref[...]).astype(cd)

    acc = h + bb2_ref[...]                     # residual + fc2 bias, f32
    Hd = w1_ref.shape[1]
    for lo in range(0, Hd, hd_chunk):
        u = jnp.dot(xn, w1_ref[:, lo:lo + hd_chunk],
                    preferred_element_type=jnp.float32) + bb1_ref[:, lo:lo + hd_chunk]
        u = _gelu_tanh(u)
        acc = acc + jnp.dot(u.astype(cd), w2_ref[lo:lo + hd_chunk, :],
                            preferred_element_type=jnp.float32)
    o_ref[...] = acc.astype(o_ref.dtype)


def fused_residual_mlp(shortcut, attn_out, gamma2, beta2, w1, b1, w2, b2, *,
                       eps=1e-5, row_tile=512, use_bf16=True):
    R, C = shortcut.shape
    Hd = w1.shape[1]
    wdt = jnp.bfloat16 if use_bf16 else jnp.float32

    T = min(row_tile, _round_up(R, 8))
    R_pad = _round_up(R, T)
    if R_pad != R:
        pad = ((0, R_pad - R), (0, 0))
        shortcut = jnp.pad(shortcut, pad)
        attn_out = jnp.pad(attn_out, pad)

    # chunk the hidden dim so the (T, Hd) GELU intermediate never fully lives
    hd_chunk = Hd
    for c in (512, 256, 128):
        if Hd % c == 0:
            hd_chunk = c
            break

    kernel = functools.partial(_residual_mlp_kernel, eps=eps,
                               hd_chunk=hd_chunk, compute_dtype=wdt)
    cost = pl.CostEstimate(
        flops=int(4 * R_pad * C * Hd),
        transcendentals=int(R_pad * Hd),
        bytes_accessed=int(4 * 3 * R_pad * C
                           + 2 * (2 if use_bf16 else 4) * C * Hd))

    def const(*block):
        return pl.BlockSpec(block, lambda i: (0,) * len(block))

    out = pl.pallas_call(
        kernel,
        out_shape=jax.ShapeDtypeStruct((R_pad, C), shortcut.dtype),
        grid_spec=pltpu.PrefetchScalarGridSpec(
            num_scalar_prefetch=0,
            grid=(R_pad // T,),
            in_specs=[
                pl.BlockSpec((T, C), lambda i: (i, 0)),   # shortcut row tile
                pl.BlockSpec((T, C), lambda i: (i, 0)),   # attention branch tile
                const(1, C), const(1, C),                 # norm2 gamma / beta
                const(C, Hd), const(1, Hd),               # fc1 W / b
                const(Hd, C), const(1, C),                # fc2 W / b
            ],
            out_specs=pl.BlockSpec((T, C), lambda i: (i, 0)),
        ),
        compiler_params=pltpu.CompilerParams(
            dimension_semantics=("parallel",),
            vmem_limit_bytes=_VMEM_LIMIT),
        cost_estimate=cost,
    )(shortcut, attn_out, gamma2.reshape(1, C), beta2.reshape(1, C),
      w1.astype(wdt), b1.reshape(1, Hd), w2.astype(wdt), b2.reshape(1, C))
    return out[:R]


# ---------------------------------------------------------------------------
# full block forward (Pallas) and pure-JAX reference
# ---------------------------------------------------------------------------
def prompted_swin_block_forward(x, x_size, params, cfg, *, use_bf16=True):
    H, W = x_size
    B, L, C = x.shape
    P = cfg["num_prompts"]
    ws = cfg["window_size"]
    shift = cfg["shift_size"]
    nH = cfg["num_heads"]
    nWr, nWc = H // ws, W // ws
    nW = nWr * nWc
    fin_N = ws * ws
    P_pad = _round_up(max(P, 1), 8)              # sublane-align prompt rows
    N = P_pad + fin_N

    prompt_emb = x[:, :P, :]                     # (B, P, C)
    xsp = x[:, P:, :]                            # (B, H*W, C)
    shortcut = xsp

    if P_pad != P:
        prompt_emb = jnp.pad(prompt_emb, ((0, 0), (0, P_pad - P), (0, 0)))

    # Replicate the PyTorch prompt->window pairing exactly: prompts are expanded
    # nW-major / B-minor while window_partition output is B-major, so window
    # (b, w) is prepended prompts from batch element (b*nW + w) % B.
    src_batch = (jnp.arange(B)[:, None] * nW + jnp.arange(nW)[None, :]) % B
    prompts_w = prompt_emb[src_batch.reshape(-1)]            # (B*nW, P_pad, C)
    prompts_w = prompts_w.reshape(B * nWr, nWc, P_pad, C)

    xs = xsp.reshape(B, H, W, C)
    if shift > 0:
        xs = jnp.roll(xs, (-shift, -shift), axis=(1, 2))

    # prompt-padded relative position bias (nH, fin_N, N); the padded dummy
    # prompt columns get -1e9 so they receive zero attention.
    rpb = params["rpb_table"][cfg["rel_pos_index"].reshape(-1)]
    rpb = rpb.reshape(fin_N, fin_N, nH).transpose(2, 0, 1).astype(jnp.float32)
    prompt_cols = jnp.concatenate(
        [jnp.zeros((nH, fin_N, P), jnp.float32),
         jnp.full((nH, fin_N, P_pad - P), _NEG_BIG, jnp.float32)], axis=-1)
    rpb_full = jnp.concatenate([prompt_cols, rpb], axis=-1)

    mask = cfg.get("mask")                       # (nW, fin_N, fin_N) or None
    if mask is not None:
        maskp = jnp.concatenate(
            [jnp.zeros((nW, fin_N, P_pad), jnp.float32),
             mask.astype(jnp.float32)], axis=-1).reshape(nWr, nWc, fin_N, N)
    else:
        maskp = None

    qkv_w, qkv_b = params["qkv_w"], params["qkv_b"]
    attn_out = prompted_window_attention(
        xs, prompts_w, params["norm1_g"], params["norm1_b"],
        qkv_w[:, :C], qkv_w[:, C:2 * C], qkv_w[:, 2 * C:],
        qkv_b[:C], qkv_b[C:2 * C], qkv_b[2 * C:],
        rpb_full, maskp, params["proj_w"], params["proj_b"],
        ws=ws, num_heads=nH, use_bf16=use_bf16)                # (B, H, W, C)

    if shift > 0:
        attn_out = jnp.roll(attn_out, (shift, shift), axis=(1, 2))

    out = fused_residual_mlp(
        shortcut.reshape(B * H * W, C), attn_out.reshape(B * H * W, C),
        params["norm2_g"], params["norm2_b"],
        params["fc1_w"], params["fc1_b"], params["fc2_w"], params["fc2_b"],
        use_bf16=use_bf16)
    return out.reshape(B, H * W, C)


def _layernorm_ref(x, g, b, eps=1e-5):
    mu = jnp.mean(x, axis=-1, keepdims=True)
    var = jnp.mean((x - mu) ** 2, axis=-1, keepdims=True)
    return (x - mu) * jax.lax.rsqrt(var + eps) * g + b


def reference_block_forward(x, x_size, params, cfg):
    HIGH = jax.lax.Precision.HIGHEST
    H, W = x_size
    B, L, C = x.shape
    P = cfg["num_prompts"]; ws = cfg["window_size"]; shift = cfg["shift_size"]
    nH = cfg["num_heads"]; hd = C // nH
    scale = hd ** (-0.5)
    nW = (H // ws) * (W // ws)
    fin_N = ws * ws

    prompt_emb = x[:, :P, :]
    xsp = x[:, P:, :]
    shortcut = xsp
    xn = _layernorm_ref(xsp, params["norm1_g"], params["norm1_b"])
    xn = xn.reshape(B, H, W, C)
    if shift > 0:
        xn = jnp.roll(xn, (-shift, -shift), axis=(1, 2))
    xw = window_partition_jax(xn, ws)
    pw = jnp.broadcast_to(prompt_emb[None], (nW, B, P, C)).reshape(nW * B, P, C)
    xw = jnp.concatenate([pw, xw], axis=1)
    B_, N, _ = xw.shape

    qkv = jnp.einsum("bnc,cd->bnd", xw, params["qkv_w"], precision=HIGH) + params["qkv_b"]
    qkv = qkv.reshape(B_, N, 3, nH, hd).transpose(2, 0, 3, 1, 4)
    q = qkv[0][:, :, P:, :] * scale
    k, v = qkv[1], qkv[2]
    attn = jnp.einsum("bhqd,bhkd->bhqk", q, k, precision=HIGH)
    rpb = params["rpb_table"][cfg["rel_pos_index"].reshape(-1)]
    rpb = rpb.reshape(fin_N, fin_N, nH).transpose(2, 0, 1)
    rpb = jnp.concatenate([jnp.zeros((nH, fin_N, P), rpb.dtype), rpb], axis=-1)
    attn = attn + rpb[None]
    mask = cfg.get("mask")
    if mask is not None:
        maskp = jnp.concatenate(
            [jnp.zeros((nW, fin_N, N - mask.shape[-1]), mask.dtype), mask], axis=-1)
        attn = attn.reshape(B_ // nW, nW, nH, fin_N, N) + maskp[None, :, None]
        attn = attn.reshape(B_, nH, fin_N, N)
    attn = jax.nn.softmax(attn, axis=-1)
    ctx = jnp.einsum("bhqk,bhkd->bhqd", attn, v, precision=HIGH)
    ctx = ctx.transpose(0, 2, 1, 3).reshape(B_, fin_N, C)
    ctx = jnp.einsum("bnc,cd->bnd", ctx, params["proj_w"], precision=HIGH) + params["proj_b"]

    xr = window_reverse_jax(ctx.reshape(-1, ws, ws, C), ws, H, W)
    if shift > 0:
        xr = jnp.roll(xr, (shift, shift), axis=(1, 2))
    xr = xr.reshape(B, H * W, C)
    h = shortcut + xr
    hn = _layernorm_ref(h, params["norm2_g"], params["norm2_b"])
    u = jnp.einsum("blc,ch->blh", hn, params["fc1_w"], precision=HIGH) + params["fc1_b"]
    u = jax.nn.gelu(u, approximate=False)
    y = jnp.einsum("blh,hc->blc", u, params["fc2_w"], precision=HIGH) + params["fc2_b"]
    return h + y


# ---------------------------------------------------------------------------
# test
# ---------------------------------------------------------------------------
if __name__ == "__main__":
    B, C = 2, 32
    H = W = 16
    ws = 8
    P = 4                      # num_prompts, prompt_location='prepend'
    nH = 4
    Hd = int(C * 4.0)          # mlp_ratio = 4
    L = P + H * W

    key = jax.random.PRNGKey(0)
    ks = jax.random.split(key, 16)

    def rnd(k, shape, s):
        return s * jax.random.normal(k, shape, dtype=jnp.float32)

    params = {
        "norm1_g": 1.0 + rnd(ks[0], (C,), 0.1),
        "norm1_b": rnd(ks[1], (C,), 0.1),
        "qkv_w": rnd(ks[2], (C, 3 * C), 0.2),       # (in, out) layout; x @ W
        "qkv_b": rnd(ks[3], (3 * C,), 0.2),
        "proj_w": rnd(ks[4], (C, C), 0.2),
        "proj_b": rnd(ks[5], (C,), 0.2),
        "rpb_table": rnd(ks[6], ((2 * ws - 1) * (2 * ws - 1), nH), 0.5),
        "norm2_g": 1.0 + rnd(ks[7], (C,), 0.1),
        "norm2_b": rnd(ks[8], (C,), 0.1),
        "fc1_w": rnd(ks[9], (C, Hd), 0.2),
        "fc1_b": rnd(ks[10], (Hd,), 0.2),
        "fc2_w": rnd(ks[11], (Hd, C), 0.2),
        "fc2_b": rnd(ks[12], (C,), 0.2),
    }
    x = rnd(ks[13], (B, L, C), 1.0)
    rel_pos_index = make_relative_position_index(ws)

    def rel_err(a, b):
        return float(jnp.max(jnp.abs(a - b)) / (jnp.max(jnp.abs(b)) + 1e-6))

    cfg1 = dict(num_prompts=P, window_size=ws, shift_size=0, num_heads=nH,
                rel_pos_index=rel_pos_index, mask=None)
    shift = 2
    mask = jnp.asarray(calculate_mask_np(H, W, ws, shift))     # (nW, ws*ws, ws*ws)
    cfg2 = dict(num_prompts=P, window_size=ws, shift_size=shift, num_heads=nH,
                rel_pos_index=rel_pos_index, mask=mask)

    cfgs = {"no_shift": cfg1, "shift_mask": cfg2}
    refs = {name: reference_block_forward(x, (H, W), params, cfg)
            for name, cfg in cfgs.items()}

    for use_bf16, tol in ((False, 1e-2), (True, 6e-2)):
        for name, cfg in cfgs.items():
            fwd = jax.jit(functools.partial(
                prompted_swin_block_forward, x_size=(H, W), params=params,
                cfg=cfg, use_bf16=use_bf16))
            out = jax.block_until_ready(fwd(x))
            assert out.shape == (B, H * W, C)
            err = rel_err(out, refs[name])
            assert err < tol, (
                f"{name} (use_bf16={use_bf16}) mismatch: rel_err={err}")

    print("KERNEL_OK")
</pallas_src>

<mosaic_0001>
module attributes {stable_mosaic.version = 11 : i64} {
  func.func @_residual_mlp_kernel(%arg0: i32, %arg1: memref<512x32xf32, #tpu.memory_space<vmem>>, %arg2: memref<512x32xf32, #tpu.memory_space<vmem>>, %arg3: memref<1x32xf32, #tpu.memory_space<vmem>>, %arg4: memref<1x32xf32, #tpu.memory_space<vmem>>, %arg5: memref<32x128xf32, #tpu.memory_space<vmem>>, %arg6: memref<1x128xf32, #tpu.memory_space<vmem>>, %arg7: memref<128x32xf32, #tpu.memory_space<vmem>>, %arg8: memref<1x32xf32, #tpu.memory_space<vmem>>, %arg9: memref<512x32xf32, #tpu.memory_space<vmem>>) attributes {dimension_semantics = [#tpu.dimension_semantics<parallel>], iteration_bounds = array<i64: 1>, scalar_prefetch = 0 : i64, scratch_operands = 0 : i64, tpu.core_type = #tpu.core_type<tc>, window_params = [{transform_indices = @transform_0, window_bounds = array<i64: 512, 32>}, {transform_indices = @transform_1, window_bounds = array<i64: 512, 32>}, {pipeline_mode = #tpu.pipeline_mode<synchronous>, transform_indices = @transform_2, window_bounds = array<i64: 1, 32>}, {pipeline_mode = #tpu.pipeline_mode<synchronous>, transform_indices = @transform_3, window_bounds = array<i64: 1, 32>}, {pipeline_mode = #tpu.pipeline_mode<synchronous>, transform_indices = @transform_4, window_bounds = array<i64: 32, 128>}, {pipeline_mode = #tpu.pipeline_mode<synchronous>, transform_indices = @transform_5, window_bounds = array<i64: 1, 128>}, {pipeline_mode = #tpu.pipeline_mode<synchronous>, transform_indices = @transform_6, window_bounds = array<i64: 128, 32>}, {pipeline_mode = #tpu.pipeline_mode<synchronous>, transform_indices = @transform_7, window_bounds = array<i64: 1, 32>}, {transform_indices = @transform_8, window_bounds = array<i64: 512, 32>}]} {
    %c0 = arith.constant 0 : index
    %c0_0 = arith.constant 0 : index
    %0 = vector.load %arg1[%c0, %c0_0] : memref<512x32xf32, #tpu.memory_space<vmem>>, vector<512x32xf32>
    %c0_1 = arith.constant 0 : index
    %c0_2 = arith.constant 0 : index
    %1 = vector.load %arg2[%c0_1, %c0_2] : memref<512x32xf32, #tpu.memory_space<vmem>>, vector<512x32xf32>
    %2 = arith.addf %0, %1 : vector<512x32xf32>
    %cst = arith.constant dense<0.000000e+00> : vector<512xf32>
    %3 = vector.multi_reduction <add>, %2, %cst [1] : vector<512x32xf32> to vector<512xf32>
    %4 = vector.shape_cast %3 : vector<512xf32> to vector<512x1xf32>
    %cst_3 = arith.constant 3.200000e+01 : f32
    %5 = vector.broadcast %cst_3 : f32 to vector<512x1xf32>
    %6 = arith.divf %4, %5 : vector<512x1xf32>
    %7 = vector.broadcast %6 : vector<512x1xf32> to vector<512x32xf32>
    %8 = arith.subf %2, %7 : vector<512x32xf32>
    %9 = arith.mulf %8, %8 : vector<512x32xf32>
    %cst_4 = arith.constant dense<0.000000e+00> : vector<512xf32>
    %10 = vector.multi_reduction <add>, %9, %cst_4 [1] : vector<512x32xf32> to vector<512xf32>
    %11 = vector.shape_cast %10 : vector<512xf32> to vector<512x1xf32>
    %cst_5 = arith.constant 3.200000e+01 : f32
    %12 = vector.broadcast %cst_5 : f32 to vector<512x1xf32>
    %13 = arith.divf %11, %12 : vector<512x1xf32>
    %14 = vector.broadcast %6 : vector<512x1xf32> to vector<512x32xf32>
    %15 = arith.subf %2, %14 : vector<512x32xf32>
    %cst_6 = arith.constant 9.99999974E-6 : f32
    %16 = vector.broadcast %cst_6 : f32 to vector<512x1xf32>
    %17 = arith.addf %13, %16 : vector<512x1xf32>
    %18 = math.rsqrt %17 : vector<512x1xf32>
    %19 = vector.broadcast %18 : vector<512x1xf32> to vector<512x32xf32>
    %20 = arith.mulf %15, %19 : vector<512x32xf32>
    %c0_7 = arith.constant 0 : index
    %c0_8 = arith.constant 0 : index
    %21 = vector.load %arg3[%c0_7, %c0_8] : memref<1x32xf32, #tpu.memory_space<vmem>>, vector<1x32xf32>
    %22 = vector.broadcast %21 : vector<1x32xf32> to vector<512x32xf32>
    %23 = arith.mulf %20, %22 : vector<512x32xf32>
    %c0_9 = arith.constant 0 : index
    %c0_10 = arith.constant 0 : index
    %24 = vector.load %arg4[%c0_9, %c0_10] : memref<1x32xf32, #tpu.memory_space<vmem>>, vector<1x32xf32>
    %25 = vector.broadcast %24 : vector<1x32xf32> to vector<512x32xf32>
    %26 = arith.addf %23, %25 : vector<512x32xf32>
    %c0_11 = arith.constant 0 : index
    %c0_12 = arith.constant 0 : index
    %27 = vector.load %arg8[%c0_11, %c0_12] : memref<1x32xf32, #tpu.memory_space<vmem>>, vector<1x32xf32>
    %28 = vector.broadcast %27 : vector<1x32xf32> to vector<512x32xf32>
    %29 = arith.addf %2, %28 : vector<512x32xf32>
    %c0_13 = arith.constant 0 : index
    %c0_14 = arith.constant 0 : index
    %30 = vector.load %arg5[%c0_13, %c0_14] : memref<32x128xf32, #tpu.memory_space<vmem>>, vector<32x128xf32>
    %cst_15 = arith.constant dense<0.000000e+00> : vector<512x128xf32>
    %31 = tpu.matmul %26, %30, %cst_15 {dimension_numbers = #tpu.dot_dimension_numbers<[1], [0], [0], [1], [0, 0, 1, 1], [], []>} : vector<512x32xf32>, vector<32x128xf32>, vector<512x128xf32> -> vector<512x128xf32>
    %c0_16 = arith.constant 0 : index
    %c0_17 = arith.constant 0 : index
    %32 = vector.load %arg6[%c0_16, %c0_17] : memref<1x128xf32, #tpu.memory_space<vmem>>, vector<1x128xf32>
    %33 = vector.broadcast %32 : vector<1x128xf32> to vector<512x128xf32>
    %34 = arith.addf %31, %33 : vector<512x128xf32>
    %cst_18 = arith.constant 5.000000e-01 : f32
    %35 = vector.broadcast %cst_18 : f32 to vector<512x128xf32>
    %36 = arith.mulf %35, %34 : vector<512x128xf32>
    %cst_19 = arith.constant 4.471500e-02 : f32
    %37 = vector.broadcast %cst_19 : f32 to vector<512x128xf32>
    %38 = arith.mulf %37, %34 : vector<512x128xf32>
    %39 = arith.mulf %38, %34 : vector<512x128xf32>
    %40 = arith.mulf %39, %34 : vector<512x128xf32>
    %41 = arith.addf %34, %40 : vector<512x128xf32>
    %cst_20 = arith.constant 0.797884583 : f32
    %42 = vector.broadcast %cst_20 : f32 to vector<512x128xf32>
    %43 = arith.mulf %42, %41 : vector<512x128xf32>
    %44 = math.tanh %43 : vector<512x128xf32>
    %cst_21 = arith.constant 1.000000e+00 : f32
    %45 = vector.broadcast %cst_21 : f32 to vector<512x128xf32>
    %46 = arith.addf %45, %44 : vector<512x128xf32>
    %47 = arith.mulf %36, %46 : vector<512x128xf32>
    %c0_22 = arith.constant 0 : index
    %c0_23 = arith.constant 0 : index
    %48 = vector.load %arg7[%c0_22, %c0_23] : memref<128x32xf32, #tpu.memory_space<vmem>>, vector<128x32xf32>
    %cst_24 = arith.constant dense<0.000000e+00> : vector<512x32xf32>
    %49 = tpu.matmul %47, %48, %cst_24 {dimension_numbers = #tpu.dot_dimension_numbers<[1], [0], [0], [1], [0, 0, 1, 1], [], []>} : vector<512x128xf32>, vector<128x32xf32>, vector<512x32xf32> -> vector<512x32xf32>
    %50 = arith.addf %29, %49 : vector<512x32xf32>
    %c0_25 = arith.constant 0 : index
    %c0_26 = arith.constant 0 : index
    %51 = vector.load %arg9[%c0_25, %c0_26] : memref<512x32xf32, #tpu.memory_space<vmem>>, vector<512x32xf32>
    tpu.vector_store %arg9[%c0_25, %c0_26], %50 {strides = array<i32>} : memref<512x32xf32, #tpu.memory_space<vmem>>, vector<512x32xf32>,
    return
  }
  func.func @transform_0(%arg0: i32) -> (i32, i32) {
    %c0_i32 = arith.constant 0 : i32
    %c0_i32_0 = arith.constant 0 : i32
    return %arg0, %c0_i32 : i32, i32
  }
  func.func @transform_1(%arg0: i32) -> (i32, i32) {
    %c0_i32 = arith.constant 0 : i32
    %c0_i32_0 = arith.constant 0 : i32
    return %arg0, %c0_i32 : i32, i32
  }
  func.func @transform_2(%arg0: i32) -> (i32, i32) {
    %c0_i32 = arith.constant 0 : i32
    %c0_i32_0 = arith.constant 0 : i32
    %c0_i32_1 = arith.constant 0 : i32
    return %c0_i32, %c0_i32_0 : i32, i32
  }
  func.func @transform_3(%arg0: i32) -> (i32, i32) {
    %c0_i32 = arith.constant 0 : i32
    %c0_i32_0 = arith.constant 0 : i32
    %c0_i32_1 = arith.constant 0 : i32
    return %c0_i32, %c0_i32_0 : i32, i32
  }
  func.func @transform_4(%arg0: i32) -> (i32, i32) {
    %c0_i32 = arith.constant 0 : i32
    %c0_i32_0 = arith.constant 0 : i32
    %c0_i32_1 = arith.constant 0 : i32
    return %c0_i32, %c0_i32_0 : i32, i32
  }
  func.func @transform_5(%arg0: i32) -> (i32, i32) {
    %c0_i32 = arith.constant 0 : i32
    %c0_i32_0 = arith.constant 0 : i32
    %c0_i32_1 = arith.constant 0 : i32
    return %c0_i32, %c0_i32_0 : i32, i32
  }
  func.func @transform_6(%arg0: i32) -> (i32, i32) {
    %c0_i32 = arith.constant 0 : i32
    %c0_i32_0 = arith.constant 0 : i32
    %c0_i32_1 = arith.constant 0 : i32
    return %c0_i32, %c0_i32_0 : i32, i32
  }
  func.func @transform_7(%arg0: i32) -> (i32, i32) {
    %c0_i32 = arith.constant 0 : i32
    %c0_i32_0 = arith.constant 0 : i32
    %c0_i32_1 = arith.constant 0 : i32
    return %c0_i32, %c0_i32_0 : i32, i32
  }
  func.func @transform_8(%arg0: i32) -> (i32, i32) {
    %c0_i32 = arith.constant 0 : i32
    %c0_i32_0 = arith.constant 0 : i32
    return %arg0, %c0_i32 : i32, i32
  }
}

module attributes {stable_mosaic.version = 11 : i64} {
  func.func @_window_attention_kernel(%arg0: i32, %arg1: i32, %arg2: memref<1x8x16x32xf32, #tpu.memory_space<vmem>>, %arg3: memref<1x2x8x32xf32, #tpu.memory_space<vmem>>, %arg4: memref<1x32xf32, #tpu.memory_space<vmem>>, %arg5: memref<1x32xf32, #tpu.memory_space<vmem>>, %arg6: memref<32x32xf32, #tpu.memory_space<vmem>>, %arg7: memref<32x32xf32, #tpu.memory_space<vmem>>, %arg8: memref<32x32xf32, #tpu.memory_space<vmem>>, %arg9: memref<1x32xf32, #tpu.memory_space<vmem>>, %arg10: memref<1x32xf32, #tpu.memory_space<vmem>>, %arg11: memref<1x32xf32, #tpu.memory_space<vmem>>, %arg12: memref<4x64x72xf32, #tpu.memory_space<vmem>>, %arg13: memref<32x32xf32, #tpu.memory_space<vmem>>, %arg14: memref<1x32xf32, #tpu.memory_space<vmem>>, %arg15: memref<1x8x16x32xf32, #tpu.memory_space<vmem>>, %arg16: memref<128x32xf32, #tpu.memory_space<vmem>>) attributes {dimension_semantics = [#tpu.dimension_semantics<parallel>, #tpu.dimension_semantics<parallel>], iteration_bounds = array<i64: 2, 2>, scalar_prefetch = 0 : i64, scratch_operands = 1 : i64, tpu.core_type = #tpu.core_type<tc>, window_params = [{transform_indices = @transform_0, window_bounds = array<i64: 1, 8, 16, 32>}, {transform_indices = @transform_1, window_bounds = array<i64: 1, 2, 8, 32>}, {pipeline_mode = #tpu.pipeline_mode<synchronous>, transform_indices = @transform_2, window_bounds = array<i64: 1, 32>}, {pipeline_mode = #tpu.pipeline_mode<synchronous>, transform_indices = @transform_3, window_bounds = array<i64: 1, 32>}, {pipeline_mode = #tpu.pipeline_mode<synchronous>, transform_indices = @transform_4, window_bounds = array<i64: 32, 32>}, {pipeline_mode = #tpu.pipeline_mode<synchronous>, transform_indices = @transform_5, window_bounds = array<i64: 32, 32>}, {pipeline_mode = #tpu.pipeline_mode<synchronous>, transform_indices = @transform_6, window_bounds = array<i64: 32, 32>}, {pipeline_mode = #tpu.pipeline_mode<synchronous>, transform_indices = @transform_7, window_bounds = array<i64: 1, 32>}, {pipeline_mode = #tpu.pipeline_mode<synchronous>, transform_indices = @transform_8, window_bounds = array<i64: 1, 32>}, {pipeline_mode = #tpu.pipeline_mode<synchronous>, transform_indices = @transform_9, window_bounds = array<i64: 1, 32>}, {pipeline_mode = #tpu.pipeline_mode<synchronous>, transform_indices = @transform_10, window_bounds = array<i64: 4, 64, 72>}, {pipeline_mode = #tpu.pipeline_mode<synchronous>, transform_indices = @transform_11, window_bounds = array<i64: 32, 32>}, {pipeline_mode = #tpu.pipeline_mode<synchronous>, transform_indices = @transform_12, window_bounds = array<i64: 1, 32>}, {transform_indices = @transform_13, window_bounds = array<i64: 1, 8, 16, 32>}]} {
    %c0 = arith.constant 0 : index
    %c0_0 = arith.constant 0 : index
    %c0_1 = arith.constant 0 : index
    %c0_2 = arith.constant 0 : index
    %0 = vector.load %arg2[%c0, %c0_0, %c0_1, %c0_2] : memref<1x8x16x32xf32, #tpu.memory_space<vmem>>, vector<1x8x16x32xf32>
    %1 = vector.shape_cast %0 : vector<1x8x16x32xf32> to vector<8x16x32xf32>
    %2 = vector.shape_cast %1 : vector<8x16x32xf32> to vector<8x2x8x32xf32>
    %3 = tpu.transpose %2, [1, 0, 2, 3] : vector<8x2x8x32xf32> -> vector<2x8x8x32xf32>
    %4 = vector.shape_cast %3 : vector<2x8x8x32xf32> to vector<128x32xf32>
    %cst = arith.constant dense<0.000000e+00> : vector<128xf32>
    %5 = vector.multi_reduction <add>, %4, %cst [1] : vector<128x32xf32> to vector<128xf32>
    %6 = vector.shape_cast %5 : vector<128xf32> to vector<128x1xf32>
    %cst_3 = arith.constant 3.200000e+01 : f32
    %7 = vector.broadcast %cst_3 : f32 to vector<128x1xf32>
    %8 = arith.divf %6, %7 : vector<128x1xf32>
    %9 = vector.broadcast %8 : vector<128x1xf32> to vector<128x32xf32>
    %10 = arith.subf %4, %9 : vector<128x32xf32>
    %11 = arith.mulf %10, %10 : vector<128x32xf32>
    %cst_4 = arith.constant dense<0.000000e+00> : vector<128xf32>
    %12 = vector.multi_reduction <add>, %11, %cst_4 [1] : vector<128x32xf32> to vector<128xf32>
    %13 = vector.shape_cast %12 : vector<128xf32> to vector<128x1xf32>
    %cst_5 = arith.constant 3.200000e+01 : f32
    %14 = vector.broadcast %cst_5 : f32 to vector<128x1xf32>
    %15 = arith.divf %13, %14 : vector<128x1xf32>
    %16 = vector.broadcast %8 : vector<128x1xf32> to vector<128x32xf32>
    %17 = arith.subf %4, %16 : vector<128x32xf32>
    %cst_6 = arith.constant 9.99999974E-6 : f32
    %18 = vector.broadcast %cst_6 : f32 to vector<128x1xf32>
    %19 = arith.addf %15, %18 : vector<128x1xf32>
    %20 = math.rsqrt %19 : vector<128x1xf32>
    %21 = vector.broadcast %20 : vector<128x1xf32> to vector<128x32xf32>
    %22 = arith.mulf %17, %21 : vector<128x32xf32>
    %c0_7 = arith.constant 0 : index
    %c0_8 = arith.constant 0 : index
    %23 = vector.load %arg4[%c0_7, %c0_8] : memref<1x32xf32, #tpu.memory_space<vmem>>, vector<1x32xf32>
    %24 = vector.broadcast %23 : vector<1x32xf32> to vector<128x32xf32>
    %25 = arith.mulf %22, %24 : vector<128x32xf32>
    %c0_9 = arith.constant 0 : index
    %c0_10 = arith.constant 0 : index
    %26 = vector.load %arg5[%c0_9, %c0_10] : memref<1x32xf32, #tpu.memory_space<vmem>>, vector<1x32xf32>
    %27 = vector.broadcast %26 : vector<1x32xf32> to vector<128x32xf32>
    %28 = arith.addf %25, %27 : vector<128x32xf32>
    %c0_11 = arith.constant 0 : index
    %c0_12 = arith.constant 0 : index
    %c0_13 = arith.constant 0 : index
    %c0_14 = arith.constant 0 : index
    %29 = vector.load %arg3[%c0_11, %c0_12, %c0_13, %c0_14] : memref<1x2x8x32xf32, #tpu.memory_space<vmem>>, vector<1x2x8x32xf32>
    %30 = vector.shape_cast %29 : vector<1x2x8x32xf32> to vector<2x8x32xf32>
    %31 = vector.shape_cast %28 : vector<128x32xf32> to vector<2x64x32xf32>
    %32 = tpu.concatenate %30, %31 in 1 : vector<2x8x32xf32>, vector<2x64x32xf32> -> vector<2x72x32xf32>
    %33 = vector.shape_cast %32 : vector<2x72x32xf32> to vector<144x32xf32>
    %c0_15 = arith.constant 0 : index
    %c0_16 = arith.constant 0 : index
    %34 = vector.load %arg6[%c0_15, %c0_16] : memref<32x32xf32, #tpu.memory_space<vmem>>, vector<32x32xf32>
    %cst_17 = arith.constant dense<0.000000e+00> : vector<128x32xf32>
    %35 = tpu.matmul %28, %34, %cst_17 {dimension_numbers = #tpu.dot_dimension_numbers<[1], [0], [0], [1], [0, 0, 1, 1], [], []>} : vector<128x32xf32>, vector<32x32xf32>, vector<128x32xf32> -> vector<128x32xf32>
    %c0_18 = arith.constant 0 : index
    %c0_19 = arith.constant 0 : index
    %36 = vector.load %arg9[%c0_18, %c0_19] : memref<1x32xf32, #tpu.memory_space<vmem>>, vector<1x32xf32>
    %37 = vector.broadcast %36 : vector<1x32xf32> to vector<128x32xf32>
    %38 = arith.addf %35, %37 : vector<128x32xf32>
    %c0_20 = arith.constant 0 : index
    %c0_21 = arith.constant 0 : index
    %39 = vector.load %arg7[%c0_20, %c0_21] : memref<32x32xf32, #tpu.memory_space<vmem>>, vector<32x32xf32>
    %cst_22 = arith.constant dense<0.000000e+00> : vector<144x32xf32>
    %40 = tpu.matmul %33, %39, %cst_22 {dimension_numbers = #tpu.dot_dimension_numbers<[1], [0], [0], [1], [0, 0, 1, 1], [], []>} : vector<144x32xf32>, vector<32x32xf32>, vector<144x32xf32> -> vector<144x32xf32>
    %c0_23 = arith.constant 0 : index
    %c0_24 = arith.constant 0 : index
    %41 = vector.load %arg10[%c0_23, %c0_24] : memref<1x32xf32, #tpu.memory_space<vmem>>, vector<1x32xf32>
    %42 = vector.broadcast %41 : vector<1x32xf32> to vector<144x32xf32>
    %43 = arith.addf %40, %42 : vector<144x32xf32>
    %c0_25 = arith.constant 0 : index
    %c0_26 = arith.constant 0 : index
    %44 = vector.load %arg8[%c0_25, %c0_26] : memref<32x32xf32, #tpu.memory_space<vmem>>, vector<32x32xf32>
    %cst_27 = arith.constant dense<0.000000e+00> : vector<144x32xf32>
    %45 = tpu.matmul %33, %44, %cst_27 {dimension_numbers = #tpu.dot_dimension_numbers<[1], [0], [0], [1], [0, 0, 1, 1], [], []>} : vector<144x32xf32>, vector<32x32xf32>, vector<144x32xf32> -> vector<144x32xf32>
    %c0_28 = arith.constant 0 : index
    %c0_29 = arith.constant 0 : index
    %46 = vector.load %arg11[%c0_28, %c0_29] : memref<1x32xf32, #tpu.memory_space<vmem>>, vector<1x32xf32>
    %47 = vector.broadcast %46 : vector<1x32xf32> to vector<144x32xf32>
    %48 = arith.addf %45, %47 : vector<144x32xf32>
    %49 = vector.shape_cast %38 : vector<128x32xf32> to vector<2x64x32xf32>
    %50 = vector.shape_cast %43 : vector<144x32xf32> to vector<2x72x32xf32>
    %51 = vector.shape_cast %48 : vector<144x32xf32> to vector<2x72x32xf32>
    %c0_30 = arith.constant 0 : index
    %c0_31 = arith.constant 0 : index
    %c0_32 = arith.constant 0 : index
    %52 = vector.load %arg12[%c0_30, %c0_31, %c0_32] : memref<4x64x72xf32, #tpu.memory_space<vmem>>, vector<4x64x72xf32>
    %53 = vector.extract_strided_slice %49 {offsets = [0, 0, 0], sizes = [2, 64, 8], strides = [1, 1, 1]} : vector<2x64x32xf32> to vector<2x64x8xf32>
    %cst_33 = arith.constant 0.353553385 : f32
    %54 = vector.broadcast %cst_33 : f32 to vector<2x64x8xf32>
    %55 = arith.mulf %53, %54 : vector<2x64x8xf32>
    %56 = vector.extract_strided_slice %50 {offsets = [0, 0, 0], sizes = [2, 72, 8], strides = [1, 1, 1]} : vector<2x72x32xf32> to vector<2x72x8xf32>
    %57 = vector.extract_strided_slice %51 {offsets = [0, 0, 0], sizes = [2, 72, 8], strides = [1, 1, 1]} : vector<2x72x32xf32> to vector<2x72x8xf32>
    "tpu.trace_start"() <{level = 10 : i32, message = "wqd,wkd->wqk"}> : () -> ()
    %cst_34 = arith.constant dense<0.000000e+00> : vector<2x64x72xf32>
    %58 = tpu.matmul %55, %56, %cst_34 {dimension_numbers = #tpu.dot_dimension_numbers<[2], [2], [1], [1], [0, 0, 0, 1, 1, 1], [0], [0]>} : vector<2x64x8xf32>, vector<2x72x8xf32>, vector<2x64x72xf32> -> vector<2x64x72xf32>
    "tpu.trace_stop"() : () -> ()
    %59 = vector.extract_strided_slice %52 {offsets = [0, 0, 0], sizes = [1, 64, 72], strides = [1, 1, 1]} : vector<4x64x72xf32> to vector<1x64x72xf32>
    %60 = vector.shape_cast %59 : vector<1x64x72xf32> to vector<64x72xf32>
    %61 = vector.shape_cast %60 : vector<64x72xf32> to vector<1x64x72xf32>
    %62 = vector.broadcast %61 : vector<1x64x72xf32> to vector<2x64x72xf32>
    %63 = arith.addf %58, %62 : vector<2x64x72xf32>
    %cst_35 = arith.constant dense<0xFF800000> : vector<2x64xf32>
    %64 = vector.multi_reduction <maximumf>, %63, %cst_35 [2] : vector<2x64x72xf32> to vector<2x64xf32>
    %65 = vector.shape_cast %64 : vector<2x64xf32> to vector<2x64x1xf32>
    %66 = vector.broadcast %65 : vector<2x64x1xf32> to vector<2x64x72xf32>
    %67 = arith.subf %63, %66 : vector<2x64x72xf32>
    %68 = math.exp %67 : vector<2x64x72xf32>
    %cst_36 = arith.constant dense<0.000000e+00> : vector<2x64xf32>
    %69 = vector.multi_reduction <add>, %68, %cst_36 [2] : vector<2x64x72xf32> to vector<2x64xf32>
    %70 = vector.shape_cast %69 : vector<2x64xf32> to vector<2x64x1xf32>
    %71 = tpu.reciprocal %70 {approx = true} : vector<2x64x1xf32> -> vector<2x64x1xf32>
    %72 = vector.broadcast %71 : vector<2x64x1xf32> to vector<2x64x72xf32>
    %73 = arith.mulf %68, %72 : vector<2x64x72xf32>
    "tpu.trace_start"() <{level = 10 : i32, message = "wqk,wkd->wqd"}> : () -> ()
    %cst_37 = arith.constant dense<0.000000e+00> : vector<2x64x8xf32>
    %74 = tpu.matmul %73, %57, %cst_37 {dimension_numbers = #tpu.dot_dimension_numbers<[2], [1], [1], [2], [0, 0, 0, 1, 1, 2], [0], [0]>} : vector<2x64x72xf32>, vector<2x72x8xf32>, vector<2x64x8xf32> -> vector<2x64x8xf32>
    "tpu.trace_stop"() : () -> ()
    %75 = vector.shape_cast %74 : vector<2x64x8xf32> to vector<128x8xf32>
    %c0_38 = arith.constant 0 : index
    %c0_39 = arith.constant 0 : index
    %76 = vector.load %arg16[%c0_38, %c0_39] : memref<128x32xf32, #tpu.memory_space<vmem>>, vector<128x8xf32>
    tpu.vector_store %arg16[%c0_38, %c0_39], %75 {strides = array<i32>} : memref<128x32xf32, #tpu.memory_space<vmem>>, vector<128x8xf32>,
    %77 = vector.extract_strided_slice %49 {offsets = [0, 0, 8], sizes = [2, 64, 8], strides = [1, 1, 1]} : vector<2x64x32xf32> to vector<2x64x8xf32>
    %cst_40 = arith.constant 0.353553385 : f32
    %78 = vector.broadcast %cst_40 : f32 to vector<2x64x8xf32>
    %79 = arith.mulf %77, %78 : vector<2x64x8xf32>
    %80 = vector.extract_strided_slice %50 {offsets = [0, 0, 8], sizes = [2, 72, 8], strides = [1, 1, 1]} : vector<2x72x32xf32> to vector<2x72x8xf32>
    %81 = vector.extract_strided_slice %51 {offsets = [0, 0, 8], sizes = [2, 72, 8], strides = [1, 1, 1]} : vector<2x72x32xf32> to vector<2x72x8xf32>
    "tpu.trace_start"() <{level = 10 : i32, message = "wqd,wkd->wqk"}> : () -> ()
    %cst_41 = arith.constant dense<0.000000e+00> : vector<2x64x72xf32>
    %82 = tpu.matmul %79, %80, %cst_41 {dimension_numbers = #tpu.dot_dimension_numbers<[2], [2], [1], [1], [0, 0, 0, 1, 1, 1], [0], [0]>} : vector<2x64x8xf32>, vector<2x72x8xf32>, vector<2x64x72xf32> -> vector<2x64x72xf32>
    "tpu.trace_stop"() : () -> ()
    %83 = vector.extract_strided_slice %52 {offsets = [1, 0, 0], sizes = [1, 64, 72], strides = [1, 1, 1]} : vector<4x64x72xf32> to vector<1x64x72xf32>
    %84 = vector.shape_cast %83 : vector<1x64x72xf32> to vector<64x72xf32>
    %85 = vector.shape_cast %84 : vector<64x72xf32> to vector<1x64x72xf32>
    %86 = vector.broadcast %85 : vector<1x64x72xf32> to vector<2x64x72xf32>
    %87 = arith.addf %82, %86 : vector<2x64x72xf32>
    %cst_42 = arith.constant dense<0xFF800000> : vector<2x64xf32>
    %88 = vector.multi_reduction <maximumf>, %87, %cst_42 [2] : vector<2x64x72xf32> to vector<2x64xf32>
    %89 = vector.shape_cast %88 : vector<2x64xf32> to vector<2x64x1xf32>
    %90 = vector.broadcast %89 : vector<2x64x1xf32> to vector<2x64x72xf32>
    %91 = arith.subf %87, %90 : vector<2x64x72xf32>
    %92 = math.exp %91 : vector<2x64x72xf32>
    %cst_43 = arith.constant dense<0.000000e+00> : vector<2x64xf32>
    %93 = vector.multi_reduction <add>, %92, %cst_43 [2] : vector<2x64x72xf32> to vector<2x64xf32>
    %94 = vector.shape_cast %93 : vector<2x64xf32> to vector<2x64x1xf32>
    %95 = tpu.reciprocal %94 {approx = true} : vector<2x64x1xf32> -> vector<2x64x1xf32>
    %96 = vector.broadcast %95 : vector<2x64x1xf32> to vector<2x64x72xf32>
    %97 = arith.mulf %92, %96 : vector<2x64x72xf32>
    "tpu.trace_start"() <{level = 10 : i32, message = "wqk,wkd->wqd"}> : () -> ()
    %cst_44 = arith.constant dense<0.000000e+00> : vector<2x64x8xf32>
    %98 = tpu.matmul %97, %81, %cst_44 {dimension_numbers = #tpu.dot_dimension_numbers<[2], [1], [1], [2], [0, 0, 0, 1, 1, 2], [0], [0]>} : vector<2x64x72xf32>, vector<2x72x8xf32>, vector<2x64x8xf32> -> vector<2x64x8xf32>
    "tpu.trace_stop"() : () -> ()
    %99 = vector.shape_cast %98 : vector<2x64x8xf32> to vector<128x8xf32>
    %c0_45 = arith.constant 0 : index
    %c8 = arith.constant 8 : index
    %100 = vector.load %arg16[%c0_45, %c8] : memref<128x32xf32, #tpu.memory_space<vmem>>, vector<128x8xf32>
    tpu.vector_store %arg16[%c0_45, %c8], %99 {strides = array<i32>} : memref<128x32xf32, #tpu.memory_space<vmem>>, vector<128x8xf32>,
    %101 = vector.extract_strided_slice %49 {offsets = [0, 0, 16], sizes = [2, 64, 8], strides = [1, 1, 1]} : vector<2x64x32xf32> to vector<2x64x8xf32>
    %cst_46 = arith.constant 0.353553385 : f32
    %102 = vector.broadcast %cst_46 : f32 to vector<2x64x8xf32>
    %103 = arith.mulf %101, %102 : vector<2x64x8xf32>
    %104 = vector.extract_strided_slice %50 {offsets = [0, 0, 16], sizes = [2, 72, 8], strides = [1, 1, 1]} : vector<2x72x32xf32> to vector<2x72x8xf32>
    %105 = vector.extract_strided_slice %51 {offsets = [0, 0, 16], sizes = [2, 72, 8], strides = [1, 1, 1]} : vector<2x72x32xf32> to vector<2x72x8xf32>
    "tpu.trace_start"() <{level = 10 : i32, message = "wqd,wkd->wqk"}> : () -> ()
    %cst_47 = arith.constant dense<0.000000e+00> : vector<2x64x72xf32>
    %106 = tpu.matmul %103, %104, %cst_47 {dimension_numbers = #tpu.dot_dimension_numbers<[2], [2], [1], [1], [0, 0, 0, 1, 1, 1], [0], [0]>} : vector<2x64x8xf32>, vector<2x72x8xf32>, vector<2x64x72xf32> -> vector<2x64x72xf32>
    "tpu.trace_stop"() : () -> ()
    %107 = vector.extract_strided_slice %52 {offsets = [2, 0, 0], sizes = [1, 64, 72], strides = [1, 1, 1]} : vector<4x64x72xf32> to vector<1x64x72xf32>
    %108 = vector.shape_cast %107 : vector<1x64x72xf32> to vector<64x72xf32>
    %109 = vector.shape_cast %108 : vector<64x72xf32> to vector<1x64x72xf32>
    %110 = vector.broadcast %109 : vector<1x64x72xf32> to vector<2x64x72xf32>
    %111 = arith.addf %106, %110 : vector<2x64x72xf32>
    %cst_48 = arith.constant dense<0xFF800000> : vector<2x64xf32>
    %112 = vector.multi_reduction <maximumf>, %111, %cst_48 [2] : vector<2x64x72xf32> to vector<2x64xf32>
    %113 = vector.shape_cast %112 : vector<2x64xf32> to vector<2x64x1xf32>
    %114 = vector.broadcast %113 : vector<2x64x1xf32> to vector<2x64x72xf32>
    %115 = arith.subf %111, %114 : vector<2x64x72xf32>
    %116 = math.exp %115 : vector<2x64x72xf32>
    %cst_49 = arith.constant dense<0.000000e+00> : vector<2x64xf32>
    %117 = vector.multi_reduction <add>, %116, %cst_49 [2] : vector<2x64x72xf32> to vector<2x64xf32>
    %118 = vector.shape_cast %117 : vector<2x64xf32> to vector<2x64x1xf32>
    %119 = tpu.reciprocal %118 {approx = true} : vector<2x64x1xf32> -> vector<2x64x1xf32>
    %120 = vector.broadcast %119 : vector<2x64x1xf32> to vector<2x64x72xf32>
    %121 = arith.mulf %116, %120 : vector<2x64x72xf32>
    "tpu.trace_start"() <{level = 10 : i32, message = "wqk,wkd->wqd"}> : () -> ()
    %cst_50 = arith.constant dense<0.000000e+00> : vector<2x64x8xf32>
    %122 = tpu.matmul %121, %105, %cst_50 {dimension_numbers = #tpu.dot_dimension_numbers<[2], [1], [1], [2], [0, 0, 0, 1, 1, 2], [0], [0]>} : vector<2x64x72xf32>, vector<2x72x8xf32>, vector<2x64x8xf32> -> vector<2x64x8xf32>
    "tpu.trace_stop"() : () -> ()
    %123 = vector.shape_cast %122 : vector<2x64x8xf32> to vector<128x8xf32>
    %c0_51 = arith.constant 0 : index
    %c16 = arith.constant 16 : index
    %124 = vector.load %arg16[%c0_51, %c16] : memref<128x32xf32, #tpu.memory_space<vmem>>, vector<128x8xf32>
    tpu.vector_store %arg16[%c0_51, %c16], %123 {strides = array<i32>} : memref<128x32xf32, #tpu.memory_space<vmem>>, vector<128x8xf32>,
    %125 = vector.extract_strided_slice %49 {offsets = [0, 0, 24], sizes = [2, 64, 8], strides = [1, 1, 1]} : vector<2x64x32xf32> to vector<2x64x8xf32>
    %cst_52 = arith.constant 0.353553385 : f32
    %126 = vector.broadcast %cst_52 : f32 to vector<2x64x8xf32>
    %127 = arith.mulf %125, %126 : vector<2x64x8xf32>
    %128 = vector.extract_strided_slice %50 {offsets = [0, 0, 24], sizes = [2, 72, 8], strides = [1, 1, 1]} : vector<2x72x32xf32> to vector<2x72x8xf32>
    %129 = vector.extract_strided_slice %51 {offsets = [0, 0, 24], sizes = [2, 72, 8], strides = [1, 1, 1]} : vector<2x72x32xf32> to vector<2x72x8xf32>
    "tpu.trace_start"() <{level = 10 : i32, message = "wqd,wkd->wqk"}> : () -> ()
    %cst_53 = arith.constant dense<0.000000e+00> : vector<2x64x72xf32>
    %130 = tpu.matmul %127, %128, %cst_53 {dimension_numbers = #tpu.dot_dimension_numbers<[2], [2], [1], [1], [0, 0, 0, 1, 1, 1], [0], [0]>} : vector<2x64x8xf32>, vector<2x72x8xf32>, vector<2x64x72xf32> -> vector<2x64x72xf32>
    "tpu.trace_stop"() : () -> ()
    %131 = vector.extract_strided_slice %52 {offsets = [3, 0, 0], sizes = [1, 64, 72], strides = [1, 1, 1]} : vector<4x64x72xf32> to vector<1x64x72xf32>
    %132 = vector.shape_cast %131 : vector<1x64x72xf32> to vector<64x72xf32>
    %133 = vector.shape_cast %132 : vector<64x72xf32> to vector<1x64x72xf32>
    %134 = vector.broadcast %133 : vector<1x64x72xf32> to vector<2x64x72xf32>
    %135 = arith.addf %130, %134 : vector<2x64x72xf32>
    %cst_54 = arith.constant dense<0xFF800000> : vector<2x64xf32>
    %136 = vector.multi_reduction <maximumf>, %135, %cst_54 [2] : vector<2x64x72xf32> to vector<2x64xf32>
    %137 = vector.shape_cast %136 : vector<2x64xf32> to vector<2x64x1xf32>
    %138 = vector.broadcast %137 : vector<2x64x1xf32> to vector<2x64x72xf32>
    %139 = arith.subf %135, %138 : vector<2x64x72xf32>
    %140 = math.exp %139 : vector<2x64x72xf32>
    %cst_55 = arith.constant dense<0.000000e+00> : vector<2x64xf32>
    %141 = vector.multi_reduction <add>, %140, %cst_55 [2] : vector<2x64x72xf32> to vector<2x64xf32>
    %142 = vector.shape_cast %141 : vector<2x64xf32> to vector<2x64x1xf32>
    %143 = tpu.reciprocal %142 {approx = true} : vector<2x64x1xf32> -> vector<2x64x1xf32>
    %144 = vector.broadcast %143 : vector<2x64x1xf32> to vector<2x64x72xf32>
    %145 = arith.mulf %140, %144 : vector<2x64x72xf32>
    "tpu.trace_start"() <{level = 10 : i32, message = "wqk,wkd->wqd"}> : () -> ()
    %cst_56 = arith.constant dense<0.000000e+00> : vector<2x64x8xf32>
    %146 = tpu.matmul %145, %129, %cst_56 {dimension_numbers = #tpu.dot_dimension_numbers<[2], [1], [1], [2], [0, 0, 0, 1, 1, 2], [0], [0]>} : vector<2x64x72xf32>, vector<2x72x8xf32>, vector<2x64x8xf32> -> vector<2x64x8xf32>
    "tpu.trace_stop"() : () -> ()
    %147 = vector.shape_cast %146 : vector<2x64x8xf32> to vector<128x8xf32>
    %c0_57 = arith.constant 0 : index
    %c24 = arith.constant 24 : index
    %148 = vector.load %arg16[%c0_57, %c24] : memref<128x32xf32, #tpu.memory_space<vmem>>, vector<128x8xf32>
    tpu.vector_store %arg16[%c0_57, %c24], %147 {strides = array<i32>} : memref<128x32xf32, #tpu.memory_space<vmem>>, vector<128x8xf32>,
    %c0_58 = arith.constant 0 : index
    %c0_59 = arith.constant 0 : index
    %149 = vector.load %arg16[%c0_58, %c0_59] : memref<128x32xf32, #tpu.memory_space<vmem>>, vector<128x32xf32>
    %c0_60 = arith.constant 0 : index
    %c0_61 = arith.constant 0 : index
    %150 = vector.load %arg13[%c0_60, %c0_61] : memref<32x32xf32, #tpu.memory_space<vmem>>, vector<32x32xf32>
    %cst_62 = arith.constant dense<0.000000e+00> : vector<128x32xf32>
    %151 = tpu.matmul %149, %150, %cst_62 {dimension_numbers = #tpu.dot_dimension_numbers<[1], [0], [0], [1], [0, 0, 1, 1], [], []>} : vector<128x32xf32>, vector<32x32xf32>, vector<128x32xf32> -> vector<128x32xf32>
    %c0_63 = arith.constant 0 : index
    %c0_64 = arith.constant 0 : index
    %152 = vector.load %arg14[%c0_63, %c0_64] : memref<1x32xf32, #tpu.memory_space<vmem>>, vector<1x32xf32>
    %153 = vector.broadcast %152 : vector<1x32xf32> to vector<128x32xf32>
    %154 = arith.addf %151, %153 : vector<128x32xf32>
    %155 = vector.shape_cast %154 : vector<128x32xf32> to vector<2x8x8x32xf32>
    %156 = tpu.transpose %155, [1, 0, 2, 3] : vector<2x8x8x32xf32> -> vector<8x2x8x32xf32>
    %157 = vector.shape_cast %156 : vector<8x2x8x32xf32> to vector<8x16x32xf32>
    %c0_65 = arith.constant 0 : index
    %c0_66 = arith.constant 0 : index
    %c0_67 = arith.constant 0 : index
    %c0_68 = arith.constant 0 : index
    %158 = vector.load %arg15[%c0_65, %c0_66, %c0_67, %c0_68] : memref<1x8x16x32xf32, #tpu.memory_space<vmem>>, vector<1x8x16x32xf32>
    %159 = vector.shape_cast %158 : vector<1x8x16x32xf32> to vector<8x16x32xf32>
    %160 = vector.shape_cast %157 : vector<8x16x32xf32> to vector<1x8x16x32xf32>
    tpu.vector_store %arg15[%c0_65, %c0_66, %c0_67, %c0_68], %160 {strides = array<i32>} : memref<1x8x16x32xf32, #tpu.memory_space<vmem>>, vector<1x8x16x32xf32>,
    return
  }
  func.func @transform_0(%arg0: i32, %arg1: i32) -> (i32, i32, i32, i32) {
    %c0_i32 = arith.constant 0 : i32
    %c0_i32_0 = arith.constant 0 : i32
    %c0_i32_1 = arith.constant 0 : i32
    return %arg1, %arg0, %c0_i32, %c0_i32_0 : i32, i32, i32, i32
  }
  func.func @transform_1(%arg0: i32, %arg1: i32) -> (i32, i32, i32, i32) {
    %c2_i32 = arith.constant 2 : i32
    %0 = arith.muli %arg1, %c2_i32 : i32
    %1 = arith.addi %0, %arg0 : i32
    %c0_i32 = arith.constant 0 : i32
    %c0_i32_0 = arith.constant 0 : i32
    %c0_i32_1 = arith.constant 0 : i32
    %c0_i32_2 = arith.constant 0 : i32
    return %1, %c0_i32, %c0_i32_0, %c0_i32_1 : i32, i32, i32, i32
  }
  func.func @transform_2(%arg0: i32, %arg1: i32) -> (i32, i32) {
    %c0_i32 = arith.constant 0 : i32
    %c0_i32_0 = arith.constant 0 : i32
    %c0_i32_1 = arith.constant 0 : i32
    return %c0_i32, %c0_i32_0 : i32, i32
  }
  func.func @transform_3(%arg0: i32, %arg1: i32) -> (i32, i32) {
    %c0_i32 = arith.constant 0 : i32
    %c0_i32_0 = arith.constant 0 : i32
    %c0_i32_1 = arith.constant 0 : i32
    return %c0_i32, %c0_i32_0 : i32, i32
  }
  func.func @transform_4(%arg0: i32, %arg1: i32) -> (i32, i32) {
    %c0_i32 = arith.constant 0 : i32
    %c0_i32_0 = arith.constant 0 : i32
    %c0_i32_1 = arith.constant 0 : i32
    return %c0_i32, %c0_i32_0 : i32, i32
  }
  func.func @transform_5(%arg0: i32, %arg1: i32) -> (i32, i32) {
    %c0_i32 = arith.constant 0 : i32
    %c0_i32_0 = arith.constant 0 : i32
    %c0_i32_1 = arith.constant 0 : i32
    return %c0_i32, %c0_i32_0 : i32, i32
  }
  func.func @transform_6(%arg0: i32, %arg1: i32) -> (i32, i32) {
    %c0_i32 = arith.constant 0 : i32
    %c0_i32_0 = arith.constant 0 : i32
    %c0_i32_1 = arith.constant 0 : i32
    return %c0_i32, %c0_i32_0 : i32, i32
  }
  func.func @transform_7(%arg0: i32, %arg1: i32) -> (i32, i32) {
    %c0_i32 = arith.constant 0 : i32
    %c0_i32_0 = arith.constant 0 : i32
    %c0_i32_1 = arith.constant 0 : i32
    return %c0_i32, %c0_i32_0 : i32, i32
  }
  func.func @transform_8(%arg0: i32, %arg1: i32) -> (i32, i32) {
    %c0_i32 = arith.constant 0 : i32
    %c0_i32_0 = arith.constant 0 : i32
    %c0_i32_1 = arith.constant 0 : i32
    return %c0_i32, %c0_i32_0 : i32, i32
  }
  func.func @transform_9(%arg0: i32, %arg1: i32) -> (i32, i32) {
    %c0_i32 = arith.constant 0 : i32
    %c0_i32_0 = arith.constant 0 : i32
    %c0_i32_1 = arith.constant 0 : i32
    return %c0_i32, %c0_i32_0 : i32, i32
  }
  func.func @transform_10(%arg0: i32, %arg1: i32) -> (i32, i32, i32) {
    %c0_i32 = arith.constant 0 : i32
    %c0_i32_0 = arith.constant 0 : i32
    %c0_i32_1 = arith.constant 0 : i32
    %c0_i32_2 = arith.constant 0 : i32
    return %c0_i32, %c0_i32_0, %c0_i32_1 : i32, i32, i32
  }
  func.func @transform_11(%arg0: i32, %arg1: i32) -> (i32, i32) {
    %c0_i32 = arith.constant 0 : i32
    %c0_i32_0 = arith.constant 0 : i32
    %c0_i32_1 = arith.constant 0 : i32
    return %c0_i32, %c0_i32_0 : i32, i32
  }
  func.func @transform_12(%arg0: i32, %arg1: i32) -> (i32, i32) {
    %c0_i32 = arith.constant 0 : i32
    %c0_i32_0 = arith.constant 0 : i32
    %c0_i32_1 = arith.constant 0 : i32
    return %c0_i32, %c0_i32_0 : i32, i32
  }
  func.func @transform_13(%arg0: i32, %arg1: i32) -> (i32, i32, i32, i32) {
    %c0_i32 = arith.constant 0 : i32
    %c0_i32_0 = arith.constant 0 : i32
    %c0_i32_1 = arith.constant 0 : i32
    return %arg1, %arg0, %c0_i32, %c0_i32_0 : i32, i32, i32, i32
  }
}

</mosaic_0001>

<bundles_post_ra>
// kernel: prompted_swin_block_forward.3
= control target key start
LH: loop header
LB: loop body
LE: loop exit
PB: predicated region body
PF: predicated region fallthrough
CT: control target
= control target key end

     0   :  { %vm221_vm0 = vcmask 261120   ;;  %s6113_s0 = inlined_call_operand.vmem [shape: f32[512,32], index: 0, kind: input, shape index: {}]   ;;  %s6114_s1 = inlined_call_operand.vmem [shape: f32[512,32], index: 1, kind: input, shape index: {}]   ;;  %s6115_s4 = inlined_call_operand.vmem [shape: f32[32,128], index: 4, kind: input, shape index: {}]   ;;  %s6116_s2 = inlined_call_operand.vmem [shape: f32[1,32], index: 2, kind: input, shape index: {}]   ;;  %s6117_s3 = inlined_call_operand.vmem [shape: f32[1,32], index: 3, kind: input, shape index: {}]   ;;  %s6118_s6 = inlined_call_operand.vmem [shape: f32[128,32], index: 6, kind: input, shape index: {}]   ;;  %s6119_s5 = inlined_call_operand.vmem [shape: f32[1,128], index: 5, kind: input, shape index: {}]   ;;  %s6120_s7 = inlined_call_operand.vmem [shape: f32[1,32], index: 7, kind: input, shape index: {}]   ;;  %s6121_s8 = inlined_call_operand.vmem [shape: f32[512,32], index: 8, kind: output, shape index: {}]  }
   0x1   :  { %v29_v0 = vld [vmem:[%s6113_s0] sm:$0xff]  ;;  %v31_v2 = vld [vmem:[%s6113_s0 + $0x10] sm:$0xff]  ;;  %v30_v5 = vld [vmem:[%s6113_s0 + $0x8] sm:$0xff] }
   0x2   :  { %v93_v1 = vld [vmem:[%s6114_s1] sm:$0xff]  ;;  %v95_v4 = vld [vmem:[%s6114_s1 + $0x10] sm:$0xff]  ;;  %v94_v6 = vld [vmem:[%s6114_s1 + $0x8] sm:$0xff] }
   0x3   :  { %v3758_v3 = vadd.f32 %v93_v1, %v29_v0  ;;  %v3769_v7 = vadd.f32 %v95_v4, %v31_v2  ;;  %v3771_v8 = vadd.f32 %v94_v6, %v30_v5  ;;  %v32_v9 = vld [vmem:[%s6113_s0 + $0x18] sm:$0xff]  ;;  %v33_v11 = vld [vmem:[%s6113_s0 + $0x20] sm:$0xff]  ;;  %v34_v15 = vld [vmem:[%s6113_s0 + $0x28] sm:$0xff] }
   0x4   :  { %v96_v10 = vld [vmem:[%s6114_s1 + $0x18] sm:$0xff]  ;;  %v97_v14 = vld [vmem:[%s6114_s1 + $0x20] sm:$0xff]  ;;  %v98_v16 = vld [vmem:[%s6114_s1 + $0x28] sm:$0xff] }
   0x5   :  { %6207 = vst [vmem:[#allocation2_spill] sm:$0xff] %v3758_v3  ;;  %6208 = vst [vmem:[#allocation3_spill] sm:$0xff] %v3769_v7  ;;  %v222_v12 = vsel %vm221_vm0, %v3758_v3, 0.0  ;;  %v3784_v13 = vadd.f32 %v96_v10, %v32_v9  ;;  %v228_v17 = vsel %vm221_vm0, %v3769_v7, 0.0  ;;  %v225_v18 = vsel %vm221_vm0, %v3771_v8, 0.0  ;;  %v35_v22 = vld [vmem:[%s6113_s0 + $0x30] sm:$0xff] }
   0x6   :  { %6209 = vst [vmem:[#allocation4_spill] sm:$0xff] %v3771_v8  ;;  %223 = vadd.xlane.f32.xlu0 %v222_v12  ;;  %229 = vadd.xlane.f32.xlu1 %v228_v17  ;;  %v3799_v19 = vadd.f32 %v97_v14, %v33_v11  ;;  %v3803_v21 = vadd.f32 %v98_v16, %v34_v15  ;;  %v99_v23 = vld [vmem:[%s6114_s1 + $0x30] sm:$0xff]  ;;  %v36_v24 = vld [vmem:[%s6113_s0 + $0x38] sm:$0xff]  ;;  %v37_v30 = vld [vmem:[%s6113_s0 + $0x40] sm:$0xff] }
   0x7   :  { %6210 = vst [vmem:[#allocation5_spill] sm:$0xff] %v3784_v13  ;;  %v231_v20 = vsel %vm221_vm0, %v3784_v13, 0.0  ;;  %v100_v25 = vld [vmem:[%s6114_s1 + $0x38] sm:$0xff]  ;;  %v3819_v27 = vadd.f32 %v99_v23, %v35_v22  ;;  %v101_v31 = vld [vmem:[%s6114_s1 + $0x40] sm:$0xff]  ;;  %v38_v32 = vld [vmem:[%s6113_s0 + $0x48] sm:$0xff] }
   0x8   :  { %6211 = vst [vmem:[#allocation6_spill] sm:$0xff] %v3799_v19  ;;  %6212 = vst [vmem:[#allocation7_spill] sm:$0xff] %v3803_v21  ;;  %v234_v26 = vsel %vm221_vm0, %v3799_v19, 0.0  ;;  %v237_v28 = vsel %vm221_vm0, %v3803_v21, 0.0  ;;  %v3823_v29 = vadd.f32 %v100_v25, %v36_v24  ;;  %v102_v33 = vld [vmem:[%s6114_s1 + $0x48] sm:$0xff]  ;;  %v3839_v35 = vadd.f32 %v101_v31, %v37_v30  ;;  %v39_v38 = vld [vmem:[%s6113_s0 + $0x50] sm:$0xff] }
   0x9   :  { %6213 = vst [vmem:[#allocation8_spill] sm:$0xff] %v3819_v27  ;;  %v240_v34 = vsel %vm221_vm0, %v3819_v27, 0.0  ;;  %v3843_v37 = vadd.f32 %v102_v33, %v38_v32  ;;  %v103_v39 = vld [vmem:[%s6114_s1 + $0x50] sm:$0xff]  ;;  %v40_v40 = vld [vmem:[%s6113_s0 + $0x58] sm:$0xff]  ;;  %v41_v46 = vld [vmem:[%s6113_s0 + $0x60] sm:$0xff] }
   0xa   :  { %226 = vadd.xlane.f32.xlu0 %v225_v18  ;;  %232 = vadd.xlane.f32.xlu1 %v231_v20  ;;  %6214 = vst [vmem:[#allocation9_spill] sm:$0xff] %v3823_v29  ;;  %6215 = vst [vmem:[#allocation10_spill] sm:$0xff] %v3839_v35  ;;  %v243_v36 = vsel %vm221_vm0, %v3823_v29, 0.0  ;;  %v104_v41 = vld [vmem:[%s6114_s1 + $0x58] sm:$0xff]  ;;  %v246_v42 = vsel %vm221_vm0, %v3839_v35, 0.0  ;;  %v3859_v43 = vadd.f32 %v103_v39, %v39_v38  ;;  %v105_v47 = vld [vmem:[%s6114_s1 + $0x60] sm:$0xff] }
   0xb   :  { %6216 = vst [vmem:[#allocation11_spill] sm:$0xff] %v3843_v37  ;;  %v249_v44 = vsel %vm221_vm0, %v3843_v37, 0.0  ;;  %v3863_v45 = vadd.f32 %v104_v41, %v40_v40  ;;  %v42_v48 = vld [vmem:[%s6113_s0 + $0x68] sm:$0xff]  ;;  %v3879_v51 = vadd.f32 %v105_v47, %v41_v46  ;;  %v43_v54 = vld [vmem:[%s6113_s0 + $0x70] sm:$0xff]  ;;  %v44_v56 = vld [vmem:[%s6113_s0 + $0x78] sm:$0xff] }
   0xc   :  { %6217 = vst [vmem:[#allocation12_spill] sm:$0xff] %v3859_v43  ;;  %v106_v49 = vld [vmem:[%s6114_s1 + $0x68] sm:$0xff]  ;;  %v252_v50 = vsel %vm221_vm0, %v3859_v43, 0.0  ;;  %v107_v55 = vld [vmem:[%s6114_s1 + $0x70] sm:$0xff]  ;;  %v108_v57 = vld [vmem:[%s6114_s1 + $0x78] sm:$0xff] }
   0xd   :  { %6218 = vst [vmem:[#allocation13_spill] sm:$0xff] %v3863_v45  ;;  %6219 = vst [vmem:[#allocation14_spill] sm:$0xff] %v3879_v51  ;;  %v255_v52 = vsel %vm221_vm0, %v3863_v45, 0.0  ;;  %v3883_v53 = vadd.f32 %v106_v49, %v42_v48  ;;  %v258_v58 = vsel %vm221_vm0, %v3879_v51, 0.0  ;;  %v3899_v59 = vadd.f32 %v107_v55, %v43_v54  ;;  %v45_v62 = vld [vmem:[%s6113_s0 + $0x80] sm:$0xff]  ;;  %v46_v0 = vld [vmem:[%s6113_s0 + $0x88] sm:$0xff] }
   0xe   :  { %235 = vadd.xlane.f32.xlu0 %v234_v26  ;;  %238 = vadd.xlane.f32.xlu1 %v237_v28  ;;  %v3903_v61 = vadd.f32 %v108_v57, %v44_v56  ;;  %v109_v63 = vld [vmem:[%s6114_s1 + $0x80] sm:$0xff]  ;;  %v110_v1 = vld [vmem:[%s6114_s1 + $0x88] sm:$0xff]  ;;  %v47_v9 = vld [vmem:[%s6113_s0 + $0x90] sm:$0xff] }
   0xf   :  { %6220 = vst [vmem:[#allocation15_spill] sm:$0xff] %v3883_v53  ;;  %6221 = vst [vmem:[#allocation16_spill] sm:$0xff] %v3899_v59  ;;  %v261_v60 = vsel %vm221_vm0, %v3883_v53, 0.0  ;;  %v264_v2 = vsel %vm221_vm0, %v3899_v59, 0.0  ;;  %v3919_v4 = vadd.f32 %v109_v63, %v45_v62  ;;  %v3923_v6 = vadd.f32 %v110_v1, %v46_v0  ;;  %v111_v10 = vld [vmem:[%s6114_s1 + $0x90] sm:$0xff]  ;;  %v48_v11 = vld [vmem:[%s6113_s0 + $0x98] sm:$0xff] }
  0x10   :  { %6222 = vst [vmem:[#allocation17_spill] sm:$0xff] %v3903_v61  ;;  %v267_v5 = vsel %vm221_vm0, %v3903_v61, 0.0  ;;  %v112_v12 = vld [vmem:[%s6114_s1 + $0x98] sm:$0xff]  ;;  %v3939_v15 = vadd.f32 %v111_v10, %v47_v9  ;;  %v49_v18 = vld [vmem:[%s6113_s0 + $0xa0] sm:$0xff]  ;;  %v50_v22 = vld [vmem:[%s6113_s0 + $0xa8] sm:$0xff] }
  0x11   :  { %6223 = vst [vmem:[#allocation18_spill] sm:$0xff] %v3919_v4  ;;  %6224 = vst [vmem:[#allocation19_spill] sm:$0xff] %v3923_v6  ;;  %v270_v14 = vsel %vm221_vm0, %v3919_v4, 0.0  ;;  %v273_v16 = vsel %vm221_vm0, %v3923_v6, 0.0  ;;  %v3943_v17 = vadd.f32 %v112_v12, %v48_v11  ;;  %v113_v20 = vld [vmem:[%s6114_s1 + $0xa0] sm:$0xff]  ;;  %v114_v23 = vld [vmem:[%s6114_s1 + $0xa8] sm:$0xff] }
  0x12   :  { %241 = vadd.xlane.f32.xlu0 %v240_v34  ;;  %244 = vadd.xlane.f32.xlu1 %v243_v36  ;;  %6225 = vst [vmem:[#allocation20_spill] sm:$0xff] %v3939_v15  ;;  %v276_v24 = vsel %vm221_vm0, %v3939_v15, 0.0  ;;  %v3959_v25 = vadd.f32 %v113_v20, %v49_v18  ;;  %v3963_v28 = vadd.f32 %v114_v23, %v50_v22  ;;  %v51_v30 = vld [vmem:[%s6113_s0 + $0xb0] sm:$0xff]  ;;  %v52_v32 = vld [vmem:[%s6113_s0 + $0xb8] sm:$0xff]  ;;  %v53_v40 = vld [vmem:[%s6113_s0 + $0xc0] sm:$0xff] }
  0x13   :  { %6226 = vst [vmem:[#allocation21_spill] sm:$0xff] %v3943_v17  ;;  %v279_v26 = vsel %vm221_vm0, %v3943_v17, 0.0  ;;  %v115_v31 = vld [vmem:[%s6114_s1 + $0xb0] sm:$0xff]  ;;  %v116_v33 = vld [vmem:[%s6114_s1 + $0xb8] sm:$0xff]  ;;  %v117_v41 = vld [vmem:[%s6114_s1 + $0xc0] sm:$0xff] }
  0x14   :  { %6227 = vst [vmem:[#allocation22_spill] sm:$0xff] %v3959_v25  ;;  %6228 = vst [vmem:[#allocation23_spill] sm:$0xff] %v3963_v28  ;;  %v282_v34 = vsel %vm221_vm0, %v3959_v25, 0.0  ;;  %v3979_v36 = vadd.f32 %v115_v31, %v51_v30  ;;  %v285_v38 = vsel %vm221_vm0, %v3963_v28, 0.0  ;;  %v3983_v39 = vadd.f32 %v116_v33, %v52_v32  ;;  %v56_v54 = vld [vmem:[%s6113_s0 + $0xd8] sm:$0xff]  ;;  %v57_v62 = vld [vmem:[%s6113_s0 + $0xe0] sm:$0xff] }
  0x15   :  { %v3999_v47 = vadd.f32 %v117_v41, %v53_v40  ;;  %v120_v55 = vld [vmem:[%s6114_s1 + $0xd8] sm:$0xff]  ;;  %v121_v63 = vld [vmem:[%s6114_s1 + $0xe0] sm:$0xff]  ;;  %v58_v0 = vld [vmem:[%s6113_s0 + $0xe8] sm:$0xff] }
  0x16   :  { %247 = vadd.xlane.f32.xlu0 %v246_v42  ;;  %250 = vadd.xlane.f32.xlu1 %v249_v44  ;;  %6229 = vst [vmem:[#allocation24_spill] sm:$0xff] %v3979_v36  ;;  %6230 = vst [vmem:[#allocation25_spill] sm:$0xff] %v3983_v39  ;;  %v54_v42 = vld [vmem:[%s6113_s0 + $0xc8] sm:$0xff]  ;;  %v288_v46 = vsel %vm221_vm0, %v3979_v36, 0.0  ;;  %v291_v48 = vsel %vm221_vm0, %v3983_v39, 0.0  ;;  %v59_v11 = vld [vmem:[%s6113_s0 + $0xf0] sm:$0xff] }
  0x17   :  { %v118_v44 = vld [vmem:[%s6114_s1 + $0xc8] sm:$0xff]  ;;  %6231 = vst [vmem:[#allocation26_spill] sm:$0xff] %v3999_v47  ;;  %v294_v56 = vsel %vm221_vm0, %v3999_v47, 0.0  ;;  %v123_v12 = vld [vmem:[%s6114_s1 + $0xf0] sm:$0xff] }
  0x18   :  { %v4003_v49 = vadd.f32 %v118_v44, %v54_v42  ;;  %v122_v1 = vld [vmem:[%s6114_s1 + $0xe8] sm:$0xff]  ;;  %v4059_v20 = vadd.f32 %v123_v12, %v59_v11  ;;  %v63_v40 = vld [vmem:[%s6113_s0 + $0x110] sm:$0xff]  ;;  %v64_v42 = vld [vmem:[%s6113_s0 + $0x118] sm:$0xff] }
  0x19   :  { %v4043_v10 = vadd.f32 %v122_v1, %v58_v0  ;;  %v62_v30 = vld [vmem:[%s6113_s0 + $0x108] sm:$0xff]  ;;  %v127_v41 = vld [vmem:[%s6114_s1 + $0x110] sm:$0xff]  ;;  %v128_v44 = vld [vmem:[%s6114_s1 + $0x118] sm:$0xff] }
  0x1a   :  { %253 = vadd.xlane.f32.xlu0 %v252_v50  ;;  %256 = vadd.xlane.f32.xlu1 %v255_v52  ;;  %6232 = vst [vmem:[#allocation27_spill] sm:$0xff] %v4003_v49  ;;  %v55_v50 = vld [vmem:[%s6113_s0 + $0xd0] sm:$0xff]  ;;  %6237 = vst [vmem:[#allocation32_spill] sm:$0xff] %v4059_v20  ;;  %v126_v31 = vld [vmem:[%s6114_s1 + $0x108] sm:$0xff]  ;;  %v312_v32 = vsel %vm221_vm0, %v4059_v20, 0.0 }
  0x1b   :  { %v119_v52 = vld [vmem:[%s6114_s1 + $0xd0] sm:$0xff]  ;;  %6236 = vst [vmem:[#allocation31_spill] sm:$0xff] %v4043_v10  ;;  %v309_v22 = vsel %vm221_vm0, %v4043_v10, 0.0  ;;  %v68_v11 = vld [vmem:[%s6113_s0 + $0x138] sm:$0xff] }
  0x1c   :  { %v4019_v57 = vadd.f32 %v119_v52, %v55_v50  ;;  %v4103_v52 = vadd.f32 %v128_v44, %v64_v42  ;;  %v132_v12 = vld [vmem:[%s6114_s1 + $0x138] sm:$0xff]  ;;  %v71_v42 = vld [vmem:[%s6113_s0 + $0x150] sm:$0xff] }
  0x1d   :  { %v135_v44 = vld [vmem:[%s6114_s1 + $0x150] sm:$0xff] }
  0x1e   :  { %259 = vadd.xlane.f32.xlu0 %v258_v58  ;;  %262 = vadd.xlane.f32.xlu1 %v261_v60  ;;  %6233 = vst [vmem:[#allocation28_spill] sm:$0xff] %v4019_v57  ;;  %v297_v58 = vsel %vm221_vm0, %v4003_v49, 0.0  ;;  %v4023_v60 = vadd.f32 %v120_v55, %v56_v54  ;;  %6242 = vst [vmem:[#allocation37_spill] sm:$0xff] %v4103_v52  ;;  %v65_v54 = vld [vmem:[%s6113_s0 + $0x120] sm:$0xff]  ;;  %v327_v0 = vsel %vm221_vm0, %v4103_v52, 0.0 }
  0x1f   :  { %v129_v55 = vld [vmem:[%s6114_s1 + $0x120] sm:$0xff] }
  0x20   :  { %6234 = vst [vmem:[#allocation29_spill] sm:$0xff] %v4023_v60  ;;  %v303_v9 = vsel %vm221_vm0, %v4023_v60, 0.0 }
  0x22   :  { %265 = vadd.xlane.f32.xlu0 %v264_v2  ;;  %268 = vadd.xlane.f32.xlu1 %v267_v5  ;;  %v300_v2 = vsel %vm221_vm0, %v4019_v57, 0.0  ;;  %v4039_v5 = vadd.f32 %v121_v63, %v57_v62  ;;  %v4119_v63 = vadd.f32 %v129_v55, %v65_v54  ;;  %v4179_v55 = vadd.f32 %v135_v44, %v71_v42 }
  0x24   :  { %6235 = vst [vmem:[#allocation30_spill] sm:$0xff] %v4039_v5  ;;  %v306_v18 = vsel %vm221_vm0, %v4039_v5, 0.0  ;;  %6243 = vst [vmem:[#allocation38_spill] sm:$0xff] %v4119_v63 }
  0x25   :  { %6249 = vst [vmem:[#allocation44_spill] sm:$0xff] %v4179_v55 }
  0x26   :  { %271 = vadd.xlane.f32.xlu0 %v270_v14  ;;  %274 = vadd.xlane.f32.xlu1 %v273_v16  ;;  %v60_v14 = vld [vmem:[%s6113_s0 + $0xf8] sm:$0xff] }
  0x27   :  { %v124_v16 = vld [vmem:[%s6114_s1 + $0xf8] sm:$0xff] }
  0x28   :  { %v4063_v23 = vadd.f32 %v124_v16, %v60_v14  ;;  %v330_v14 = vsel %vm221_vm0, %v4119_v63, 0.0 }
  0x2a   :  { %277 = vadd.xlane.f32.xlu0 %v276_v24  ;;  %280 = vadd.xlane.f32.xlu1 %v279_v26  ;;  %6238 = vst [vmem:[#allocation33_spill] sm:$0xff] %v4063_v23  ;;  %v61_v24 = vld [vmem:[%s6113_s0 + $0x100] sm:$0xff] }
  0x2b   :  { %v125_v26 = vld [vmem:[%s6114_s1 + $0x100] sm:$0xff] }
  0x2c   :  { %v4079_v33 = vadd.f32 %v125_v26, %v61_v24  ;;  %v69_v24 = vld [vmem:[%s6113_s0 + $0x140] sm:$0xff] }
  0x2d   :  { %v133_v26 = vld [vmem:[%s6114_s1 + $0x140] sm:$0xff] }
  0x2e   :  { %283 = vadd.xlane.f32.xlu0 %v282_v34  ;;  %286 = vadd.xlane.f32.xlu1 %v285_v38  ;;  %6239 = vst [vmem:[#allocation34_spill] sm:$0xff] %v4079_v33  ;;  %v315_v34 = vsel %vm221_vm0, %v4063_v23, 0.0  ;;  %v4083_v38 = vadd.f32 %v126_v31, %v62_v30  ;;  %v70_v30 = vld [vmem:[%s6113_s0 + $0x148] sm:$0xff] }
  0x2f   :  { %v134_v31 = vld [vmem:[%s6114_s1 + $0x148] sm:$0xff] }
  0x30   :  { %6240 = vst [vmem:[#allocation35_spill] sm:$0xff] %v4083_v38  ;;  %v321_v50 = vsel %vm221_vm0, %v4083_v38, 0.0 }
  0x32   :  { %289 = vadd.xlane.f32.xlu0 %v288_v46  ;;  %292 = vadd.xlane.f32.xlu1 %v291_v48  ;;  %v318_v46 = vsel %vm221_vm0, %v4079_v33, 0.0  ;;  %v4099_v48 = vadd.f32 %v127_v41, %v63_v40  ;;  %v4163_v41 = vadd.f32 %v134_v31, %v70_v30  ;;  %v76_v30 = vld [vmem:[%s6113_s0 + $0x178] sm:$0xff] }
  0x33   :  { %v140_v31 = vld [vmem:[%s6114_s1 + $0x178] sm:$0xff] }
  0x34   :  { %6241 = vst [vmem:[#allocation36_spill] sm:$0xff] %v4099_v48  ;;  %v324_v62 = vsel %vm221_vm0, %v4099_v48, 0.0  ;;  %6248 = vst [vmem:[#allocation43_spill] sm:$0xff] %v4163_v41  ;;  %v4223_v44 = vadd.f32 %v140_v31, %v76_v30 }
  0x36   :  { %295 = vadd.xlane.f32.xlu0 %v294_v56  ;;  %298 = vadd.xlane.f32.xlu1 %v297_v58  ;;  %v66_v56 = vld [vmem:[%s6113_s0 + $0x128] sm:$0xff]  ;;  %6254 = vst [vmem:[#allocation49_spill] sm:$0xff] %v4223_v44 }
  0x37   :  { %v130_v58 = vld [vmem:[%s6114_s1 + $0x128] sm:$0xff] }
  0x38   :  { %v4123_v1 = vadd.f32 %v130_v58, %v66_v56  ;;  %v345_v56 = vsel %vm221_vm0, %v4163_v41, 0.0 }
  0x3a   :  { %301 = vadd.xlane.f32.xlu0 %v300_v2  ;;  %304 = vadd.xlane.f32.xlu1 %v303_v9  ;;  %6244 = vst [vmem:[#allocation39_spill] sm:$0xff] %v4123_v1  ;;  %v67_v2 = vld [vmem:[%s6113_s0 + $0x130] sm:$0xff] }
  0x3b   :  { %v131_v9 = vld [vmem:[%s6114_s1 + $0x130] sm:$0xff] }
  0x3c   :  { %v4139_v16 = vadd.f32 %v131_v9, %v67_v2  ;;  %v74_v2 = vld [vmem:[%s6113_s0 + $0x168] sm:$0xff] }
  0x3d   :  { %v138_v9 = vld [vmem:[%s6114_s1 + $0x168] sm:$0xff] }
  0x3e   :  { %307 = vadd.xlane.f32.xlu0 %v306_v18  ;;  %310 = vadd.xlane.f32.xlu1 %v309_v22  ;;  %6245 = vst [vmem:[#allocation40_spill] sm:$0xff] %v4139_v16  ;;  %v333_v18 = vsel %vm221_vm0, %v4123_v1, 0.0  ;;  %v4143_v22 = vadd.f32 %v132_v12, %v68_v11  ;;  %v348_v11 = vsel %vm221_vm0, %v4179_v55, 0.0 }
  0x40   :  { %6246 = vst [vmem:[#allocation41_spill] sm:$0xff] %v4143_v22  ;;  %v339_v40 = vsel %vm221_vm0, %v4143_v22, 0.0 }
  0x42   :  { %313 = vadd.xlane.f32.xlu0 %v312_v32  ;;  %316 = vadd.xlane.f32.xlu1 %v315_v34  ;;  %v336_v32 = vsel %vm221_vm0, %v4139_v16, 0.0  ;;  %v4159_v34 = vadd.f32 %v133_v26, %v69_v24  ;;  %v75_v24 = vld [vmem:[%s6113_s0 + $0x170] sm:$0xff] }
  0x43   :  { %v139_v26 = vld [vmem:[%s6114_s1 + $0x170] sm:$0xff] }
  0x44   :  { %6247 = vst [vmem:[#allocation42_spill] sm:$0xff] %v4159_v34  ;;  %v342_v54 = vsel %vm221_vm0, %v4159_v34, 0.0 }
  0x46   :  { %319 = vadd.xlane.f32.xlu0 %v318_v46  ;;  %322 = vadd.xlane.f32.xlu1 %v321_v50  ;;  %v72_v46 = vld [vmem:[%s6113_s0 + $0x158] sm:$0xff] }
  0x47   :  { %v136_v50 = vld [vmem:[%s6114_s1 + $0x158] sm:$0xff] }
  0x48   :  { %v4183_v58 = vadd.f32 %v136_v50, %v72_v46  ;;  %v77_v46 = vld [vmem:[%s6113_s0 + $0x180] sm:$0xff] }
  0x49   :  { %v141_v50 = vld [vmem:[%s6114_s1 + $0x180] sm:$0xff] }
  0x4a   :  { %325 = vadd.xlane.f32.xlu0 %v324_v62  ;;  %328 = vadd.xlane.f32.xlu1 %v327_v0  ;;  %6250 = vst [vmem:[#allocation45_spill] sm:$0xff] %v4183_v58  ;;  %v73_v62 = vld [vmem:[%s6113_s0 + $0x160] sm:$0xff] }
  0x4b   :  { %v137_v0 = vld [vmem:[%s6114_s1 + $0x160] sm:$0xff] }
  0x4c   :  { %v4199_v12 = vadd.f32 %v137_v0, %v73_v62  ;;  %v4239_v0 = vadd.f32 %v141_v50, %v77_v46  ;;  %v81_v46 = vld [vmem:[%s6113_s0 + $0x1a0] sm:$0xff] }
  0x4d   :  { %v145_v50 = vld [vmem:[%s6114_s1 + $0x1a0] sm:$0xff] }
  0x4e   :  { %331 = vadd.xlane.f32.xlu0 %v330_v14  ;;  %334 = vadd.xlane.f32.xlu1 %v333_v18  ;;  %6251 = vst [vmem:[#allocation46_spill] sm:$0xff] %v4199_v12  ;;  %v351_v14 = vsel %vm221_vm0, %v4183_v58, 0.0  ;;  %v4203_v18 = vadd.f32 %v138_v9, %v74_v2  ;;  %6255 = vst [vmem:[#allocation50_spill] sm:$0xff] %v4239_v0  ;;  %v363_v2 = vsel %vm221_vm0, %v4223_v44, 0.0  ;;  %v366_v30 = vsel %vm221_vm0, %v4239_v0, 0.0 }
  0x50   :  { %6252 = vst [vmem:[#allocation47_spill] sm:$0xff] %v4203_v18  ;;  %v357_v42 = vsel %vm221_vm0, %v4203_v18, 0.0 }
  0x52   :  { %337 = vadd.xlane.f32.xlu0 %v336_v32  ;;  %340 = vadd.xlane.f32.xlu1 %v339_v40  ;;  %v354_v32 = vsel %vm221_vm0, %v4199_v12, 0.0  ;;  %v4219_v40 = vadd.f32 %v139_v26, %v75_v24  ;;  %v80_v24 = vld [vmem:[%s6113_s0 + $0x198] sm:$0xff] }
  0x53   :  { %v144_v26 = vld [vmem:[%s6114_s1 + $0x198] sm:$0xff] }
  0x54   :  { %6253 = vst [vmem:[#allocation48_spill] sm:$0xff] %v4219_v40  ;;  %v360_v62 = vsel %vm221_vm0, %v4219_v40, 0.0 }
  0x56   :  { %343 = vadd.xlane.f32.xlu0 %v342_v54  ;;  %346 = vadd.xlane.f32.xlu1 %v345_v56  ;;  %v78_v54 = vld [vmem:[%s6113_s0 + $0x188] sm:$0xff] }
  0x57   :  { %v142_v56 = vld [vmem:[%s6114_s1 + $0x188] sm:$0xff] }
  0x58   :  { %v4243_v9 = vadd.f32 %v142_v56, %v78_v54  ;;  %v82_v54 = vld [vmem:[%s6113_s0 + $0x1a8] sm:$0xff] }
  0x59   :  { %v146_v56 = vld [vmem:[%s6114_s1 + $0x1a8] sm:$0xff] }
  0x5a   :  { %349 = vadd.xlane.f32.xlu0 %v348_v11  ;;  %352 = vadd.xlane.f32.xlu1 %v351_v14  ;;  %6256 = vst [vmem:[#allocation51_spill] sm:$0xff] %v4243_v9  ;;  %v79_v11 = vld [vmem:[%s6113_s0 + $0x190] sm:$0xff] }
  0x5b   :  { %v143_v14 = vld [vmem:[%s6114_s1 + $0x190] sm:$0xff] }
  0x5c   :  { %v4259_v31 = vadd.f32 %v143_v14, %v79_v11  ;;  %v4283_v14 = vadd.f32 %v146_v56, %v82_v54 }
  0x5e   :  { %355 = vadd.xlane.f32.xlu0 %v354_v32  ;;  %358 = vadd.xlane.f32.xlu1 %v357_v42  ;;  %6257 = vst [vmem:[#allocation52_spill] sm:$0xff] %v4259_v31  ;;  %v369_v32 = vsel %vm221_vm0, %v4243_v9, 0.0  ;;  %v4263_v42 = vadd.f32 %v144_v26, %v80_v24  ;;  %6260 = vst [vmem:[#allocation55_spill] sm:$0xff] %v4283_v14  ;;  %v83_v24 = vld [vmem:[%s6113_s0 + $0x1b0] sm:$0xff]  ;;  %v381_v54 = vsel %vm221_vm0, %v4283_v14, 0.0 }
  0x5f   :  { %v147_v26 = vld [vmem:[%s6114_s1 + $0x1b0] sm:$0xff] }
  0x60   :  { %6258 = vst [vmem:[#allocation53_spill] sm:$0xff] %v4263_v42  ;;  %v375_v11 = vsel %vm221_vm0, %v4263_v42, 0.0  ;;  %v85_v42 = vld [vmem:[%s6113_s0 + $0x1c0] sm:$0xff] }
  0x62   :  { %361 = vadd.xlane.f32.xlu0 %v360_v62  ;;  %364 = vadd.xlane.f32.xlu1 %v363_v2  ;;  %v372_v62 = vsel %vm221_vm0, %v4259_v31, 0.0  ;;  %v4279_v2 = vadd.f32 %v145_v50, %v81_v46  ;;  %v4299_v50 = vadd.f32 %v147_v26, %v83_v24  ;;  %v149_v31 = vld [vmem:[%s6114_s1 + $0x1c0] sm:$0xff] }
  0x63   :  { %v4319_v26 = vadd.f32 %v149_v31, %v85_v42 }
  0x64   :  { %6259 = vst [vmem:[#allocation54_spill] sm:$0xff] %v4279_v2  ;;  %v378_v46 = vsel %vm221_vm0, %v4279_v2, 0.0  ;;  %6261 = vst [vmem:[#allocation56_spill] sm:$0xff] %v4299_v50  ;;  %v384_v24 = vsel %vm221_vm0, %v4299_v50, 0.0 }
  0x65   :  { %6263 = vst [vmem:[#allocation58_spill] sm:$0xff] %v4319_v26  ;;  %v390_v14 = vsel %vm221_vm0, %v4319_v26, 0.0 }
  0x66   :  { %367 = vadd.xlane.f32.xlu0 %v366_v30  ;;  %370 = vadd.xlane.f32.xlu1 %v369_v32  ;;  %v84_v30 = vld [vmem:[%s6113_s0 + $0x1b8] sm:$0xff] }
  0x67   :  { %v148_v32 = vld [vmem:[%s6114_s1 + $0x1b8] sm:$0xff] }
  0x68   :  { %v4303_v56 = vadd.f32 %v148_v32, %v84_v30 }
  0x6a   :  { %373 = vadd.xlane.f32.xlu0 %v372_v62  ;;  %376 = vadd.xlane.f32.xlu1 %v375_v11  ;;  %6262 = vst [vmem:[#allocation57_spill] sm:$0xff] %v4303_v56  ;;  %v86_v62 = vld [vmem:[%s6113_s0 + $0x1c8] sm:$0xff]  ;;  %v387_v30 = vsel %vm221_vm0, %v4303_v56, 0.0 }
  0x6b   :  { %v150_v11 = vld [vmem:[%s6114_s1 + $0x1c8] sm:$0xff] }
  0x6c   :  { %v4323_v32 = vadd.f32 %v150_v11, %v86_v62 }
  0x6e   :  { %379 = vadd.xlane.f32.xlu0 %v378_v46  ;;  %382 = vadd.xlane.f32.xlu1 %v381_v54  ;;  %6264 = vst [vmem:[#allocation59_spill] sm:$0xff] %v4323_v32  ;;  %v393_v2 = vsel %vm221_vm0, %v4323_v32, 0.0 }
  0x72   :  { %385 = vadd.xlane.f32.xlu0 %v384_v24  ;;  %388 = vadd.xlane.f32.xlu1 %v387_v30 }
  0x76   :  { %391 = vadd.xlane.f32.xlu0 %v390_v14  ;;  %394 = vadd.xlane.f32.xlu1 %v393_v2 }
  0x8f   :  { %v224_v46 = vpop.xlane.xlu0 %223  ;;  %v230_v50 = vpop.xlane.xlu1 %229 }
  0x90   :  { %v415_v54 = vmul.f32 0.03125, %v224_v46  ;;  %v417_v31 = vmul.f32 0.03125, %v230_v50 }
  0x92   :  { %v4330_v42 = vsub.f32 %v3758_v3, %v415_v54  ;;  %v4333_v62 = vsub.f32 %v3769_v7, %v417_v31 }
  0x93   :  { %v227_v11 = vpop.xlane.xlu0 %226  ;;  %v233_v30 = vpop.xlane.xlu1 %232 }
  0x94   :  { %6265 = vst [vmem:[#allocation60_spill] sm:$0xff] %v4333_v62  ;;  %v416_v24 = vmul.f32 0.03125, %v227_v11  ;;  %v543_v26 = vmul.f32 %v4330_v42, %v4330_v42  ;;  %v418_v56 = vmul.f32 0.03125, %v233_v30  ;;  %v545_v2 = vmul.f32 %v4333_v62, %v4333_v62 }
  0x96   :  { %v4340_v14 = vsub.f32 %v3771_v8, %v416_v24  ;;  %v607_v50 = vsel %vm221_vm0, %v543_v26, 0.0  ;;  %v4344_v46 = vsub.f32 %v3784_v13, %v418_v56  ;;  %v613_v7 = vsel %vm221_vm0, %v545_v2, 0.0 }
  0x97   :  { %608 = vadd.xlane.f32.xlu0 %v607_v50  ;;  %v236_v54 = vpop.xlane.xlu0 %235  ;;  %v239_v11 = vpop.xlane.xlu1 %238 }
  0x98   :  { %v419_v31 = vmul.f32 0.03125, %v236_v54  ;;  %v544_v30 = vmul.f32 %v4340_v14, %v4340_v14  ;;  %v420_v3 = vmul.f32 0.03125, %v239_v11  ;;  %v546_v62 = vmul.f32 %v4344_v46, %v4344_v46 }
  0x9a   :  { %v4352_v24 = vsub.f32 %v3799_v19, %v419_v31  ;;  %v610_v26 = vsel %vm221_vm0, %v544_v30, 0.0  ;;  %v4356_v56 = vsub.f32 %v3803_v21, %v420_v3  ;;  %v616_v13 = vsel %vm221_vm0, %v546_v62, 0.0 }
  0x9b   :  { %614 = vadd.xlane.f32.xlu0 %v613_v7  ;;  %611 = vadd.xlane.f32.xlu1 %v610_v26  ;;  %v242_v50 = vpop.xlane.xlu0 %241  ;;  %v245_v2 = vpop.xlane.xlu1 %244 }
  0x9c   :  { %v421_v54 = vmul.f32 0.03125, %v242_v50  ;;  %v547_v11 = vmul.f32 %v4352_v24, %v4352_v24  ;;  %v422_v8 = vmul.f32 0.03125, %v245_v2  ;;  %v548_v31 = vmul.f32 %v4356_v56, %v4356_v56 }
  0x9e   :  { %v4364_v19 = vsub.f32 %v3819_v27, %v421_v54  ;;  %v619_v3 = vsel %vm221_vm0, %v547_v11, 0.0  ;;  %v4368_v7 = vsub.f32 %v3823_v29, %v422_v8  ;;  %v622_v50 = vsel %vm221_vm0, %v548_v31, 0.0 }
  0x9f   :  { %617 = vadd.xlane.f32.xlu1 %v616_v13  ;;  %620 = vadd.xlane.f32.xlu0 %v619_v3  ;;  %v248_v30 = vpop.xlane.xlu0 %247  ;;  %v251_v62 = vpop.xlane.xlu1 %250 }
  0xa0   :  { %v423_v26 = vmul.f32 0.03125, %v248_v30  ;;  %v549_v2 = vmul.f32 %v4364_v19, %v4364_v19  ;;  %v424_v21 = vmul.f32 0.03125, %v251_v62  ;;  %v550_v54 = vmul.f32 %v4368_v7, %v4368_v7 }
  0xa2   :  { %v4376_v27 = vsub.f32 %v3839_v35, %v423_v26  ;;  %v625_v8 = vsel %vm221_vm0, %v549_v2, 0.0  ;;  %v4380_v13 = vsub.f32 %v3843_v37, %v424_v21  ;;  %v628_v30 = vsel %vm221_vm0, %v550_v54, 0.0 }
  0xa3   :  { %623 = vadd.xlane.f32.xlu1 %v622_v50  ;;  %626 = vadd.xlane.f32.xlu0 %v625_v8  ;;  %v254_v11 = vpop.xlane.xlu0 %253  ;;  %v257_v31 = vpop.xlane.xlu1 %256 }
  0xa4   :  { %v425_v3 = vmul.f32 0.03125, %v254_v11  ;;  %v551_v62 = vmul.f32 %v4376_v27, %v4376_v27  ;;  %v426_v29 = vmul.f32 0.03125, %v257_v31  ;;  %v552_v26 = vmul.f32 %v4380_v13, %v4380_v13 }
  0xa6   :  { %v4388_v35 = vsub.f32 %v3859_v43, %v425_v3  ;;  %v631_v21 = vsel %vm221_vm0, %v551_v62, 0.0  ;;  %v4392_v50 = vsub.f32 %v3863_v45, %v426_v29  ;;  %v634_v11 = vsel %vm221_vm0, %v552_v26, 0.0 }
  0xa7   :  { %629 = vadd.xlane.f32.xlu1 %v628_v30  ;;  %632 = vadd.xlane.f32.xlu0 %v631_v21  ;;  %v260_v2 = vpop.xlane.xlu0 %259  ;;  %v263_v54 = vpop.xlane.xlu1 %262 }
  0xa8   :  { %v427_v8 = vmul.f32 0.03125, %v260_v2  ;;  %v553_v31 = vmul.f32 %v4388_v35, %v4388_v35  ;;  %v428_v37 = vmul.f32 0.03125, %v263_v54  ;;  %v554_v3 = vmul.f32 %v4392_v50, %v4392_v50 }
  0xaa   :  { %v4400_v43 = vsub.f32 %v3879_v51, %v427_v8  ;;  %v637_v29 = vsel %vm221_vm0, %v553_v31, 0.0  ;;  %v4404_v30 = vsub.f32 %v3883_v53, %v428_v37  ;;  %v640_v2 = vsel %vm221_vm0, %v554_v3, 0.0 }
  0xab   :  { %635 = vadd.xlane.f32.xlu1 %v634_v11  ;;  %638 = vadd.xlane.f32.xlu0 %v637_v29  ;;  %v266_v62 = vpop.xlane.xlu0 %265  ;;  %v269_v26 = vpop.xlane.xlu1 %268 }
  0xac   :  { %v429_v21 = vmul.f32 0.03125, %v266_v62  ;;  %v555_v54 = vmul.f32 %v4400_v43, %v4400_v43  ;;  %v430_v45 = vmul.f32 0.03125, %v269_v26  ;;  %v556_v8 = vmul.f32 %v4404_v30, %v4404_v30 }
  0xae   :  { %v4412_v51 = vsub.f32 %v3899_v59, %v429_v21  ;;  %v643_v37 = vsel %vm221_vm0, %v555_v54, 0.0  ;;  %v4416_v11 = vsub.f32 %v3903_v61, %v430_v45  ;;  %v646_v62 = vsel %vm221_vm0, %v556_v8, 0.0  ;;  %v1270_v61 = vld [vmem:[%s6115_s4 + $0x10] sm:$0xff] }
  0xaf   :  { %641 = vadd.xlane.f32.xlu1 %v640_v2  ;;  %644 = vadd.xlane.f32.xlu0 %v643_v37  ;;  %v272_v31 = vpop.xlane.xlu0 %271  ;;  %v275_v3 = vpop.xlane.xlu1 %274 }
  0xb0   :  { %6266 = vst [vmem:[#allocation61_spill] sm:$0xff] %v4416_v11  ;;  %v431_v29 = vmul.f32 0.03125, %v272_v31  ;;  %v557_v26 = vmul.f32 %v4412_v51, %v4412_v51  ;;  %v432_v53 = vmul.f32 0.03125, %v275_v3  ;;  %v558_v21 = vmul.f32 %v4416_v11, %v4416_v11 }
  0xb2   :  { %v4424_v59 = vsub.f32 %v3919_v4, %v431_v29  ;;  %v649_v45 = vsel %vm221_vm0, %v557_v26, 0.0  ;;  %v4428_v2 = vsub.f32 %v3923_v6, %v432_v53  ;;  %v652_v31 = vsel %vm221_vm0, %v558_v21, 0.0  ;;  %v87_v29 = vld [vmem:[%s6113_s0 + $0x1d0] sm:$0xff] }
  0xb3   :  { %647 = vadd.xlane.f32.xlu1 %v646_v62  ;;  %650 = vadd.xlane.f32.xlu0 %v649_v45  ;;  %v278_v54 = vpop.xlane.xlu0 %277  ;;  %v281_v8 = vpop.xlane.xlu1 %280  ;;  %v151_v26 = vld [vmem:[%s6114_s1 + $0x1d0] sm:$0xff]  ;;  %v1271_v45 = vld [vmem:[%s6115_s4 + $0x18] sm:$0xff] }
  0xb4   :  { %6267 = vst [vmem:[#allocation62_spill] sm:$0xff] %v4424_v59  ;;  %6268 = vst [vmem:[#allocation63_spill] sm:$0xff] %v4428_v2  ;;  %v433_v37 = vmul.f32 0.03125, %v278_v54  ;;  %v559_v3 = vmul.f32 %v4424_v59, %v4424_v59  ;;  %v434_v53 = vmul.f32 0.03125, %v281_v8  ;;  %v560_v62 = vmul.f32 %v4428_v2, %v4428_v2  ;;  %3181 = vmatprep.subr.mxu0 %v1271_v45 }
  0xb5   :  { %v4451_v8 = vadd.f32 %v151_v26, %v87_v29  ;;  %3182 = vmatpush3.msra.mxu0 %v1271_v45 }
  0xb6   :  { %v4445_v21 = vsub.f32 %v3939_v15, %v433_v37  ;;  %v655_v54 = vsel %vm221_vm0, %v559_v3, 0.0  ;;  %v4449_v4 = vsub.f32 %v3943_v17, %v434_v53  ;;  %v658_v2 = vsel %vm221_vm0, %v560_v62, 0.0  ;;  %v88_v53 = vld [vmem:[%s6113_s0 + $0x1d8] sm:$0xff]  ;;  %3183 = vmatprep.subr.mxu0 %v1270_v61  ;;  %v1269_v62 = vld [vmem:[%s6115_s4 + $0x8] sm:$0xff] }
  0xb7   :  { %653 = vadd.xlane.f32.xlu1 %v652_v31  ;;  %656 = vadd.xlane.f32.xlu0 %v655_v54  ;;  %v284_v6 = vpop.xlane.xlu0 %283  ;;  %v287_v3 = vpop.xlane.xlu1 %286  ;;  %v152_v31 = vld [vmem:[%s6114_s1 + $0x1d8] sm:$0xff]  ;;  %v396_v45 = vsel %vm221_vm0, %v4451_v8, 0.0 }
  0xb8   :  { %6269 = vst [vmem:[#allocation64_spill] sm:$0xff] %v4445_v21  ;;  %6270 = vst [vmem:[#allocation65_spill] sm:$0xff] %v4449_v4  ;;  %v561_v37 = vmul.f32 %v4445_v21, %v4445_v21  ;;  %v435_v15 = vmul.f32 0.03125, %v284_v6  ;;  %v436_v29 = vmul.f32 0.03125, %v287_v3  ;;  %v562_v26 = vmul.f32 %v4449_v4, %v4449_v4  ;;  %3184 = vmatpush3.msra.mxu0 %v1270_v61  ;;  %v1268_v4 = vld [vmem:[%s6115_s4] sm:$0xff] }
  0xb9   :  { %v4476_v3 = vadd.f32 %v152_v31, %v88_v53  ;;  %v89_v53 = vld [vmem:[%s6113_s0 + $0x1e0] sm:$0xff]  ;;  %3185 = vmatprep.subr.mxu0 %v1269_v62 }
  0xba   :  { %v661_v6 = vsel %vm221_vm0, %v561_v37, 0.0  ;;  %v4472_v54 = vsub.f32 %v3959_v25, %v435_v15  ;;  %v4482_v21 = vsub.f32 %v3963_v28, %v436_v29  ;;  %v664_v37 = vsel %vm221_vm0, %v562_v26, 0.0  ;;  %v153_v31 = vld [vmem:[%s6114_s1 + $0x1e0] sm:$0xff]  ;;  %3186 = vmatpush3.msra.mxu0 %v1269_v62  ;;  %v90_v62 = vld [vmem:[%s6113_s0 + $0x1e8] sm:$0xff] }
  0xbb   :  { %659 = vadd.xlane.f32.xlu1 %v658_v2  ;;  %662 = vadd.xlane.f32.xlu0 %v661_v6  ;;  %v290_v17 = vpop.xlane.xlu0 %289  ;;  %v293_v2 = vpop.xlane.xlu1 %292  ;;  %v399_v29 = vsel %vm221_vm0, %v4476_v3, 0.0  ;;  %v4495_v26 = vadd.f32 %v153_v31, %v89_v53 }
  0xbc   :  { %6271 = vst [vmem:[#allocation66_spill] sm:$0xff] %v4472_v54  ;;  %6272 = vst [vmem:[#allocation67_spill] sm:$0xff] %v4482_v21  ;;  %v563_v61 = vmul.f32 %v4472_v54, %v4472_v54  ;;  %v437_v15 = vmul.f32 0.03125, %v290_v17  ;;  %3187 = vmatprep.subr.mxu0 %v1268_v4  ;;  %v438_v28 = vmul.f32 0.03125, %v293_v2  ;;  %v564_v54 = vmul.f32 %v4482_v21, %v4482_v21 }
  0xbd   :  { %3188 = vmatpush3.msra.mxu0 %v1268_v4  ;;  %v91_v4 = vld [vmem:[%s6113_s0 + $0x1f0] sm:$0xff] }
  0xbe   :  { %v667_v6 = vsel %vm221_vm0, %v563_v61, 0.0  ;;  %v4499_v25 = vsub.f32 %v3979_v36, %v437_v15  ;;  %v402_v61 = vsel %vm221_vm0, %v4495_v26, 0.0  ;;  %v4514_v53 = vsub.f32 %v3983_v39, %v438_v28 }
  0xbf   :  { %665 = vadd.xlane.f32.xlu1 %v664_v37  ;;  %397 = vadd.xlane.f32.xlu0 %v396_v45  ;;  %v296_v17 = vpop.xlane.xlu0 %295  ;;  %v154_v45 = vld [vmem:[%s6114_s1 + $0x1e8] sm:$0xff]  ;;  %v299_v37 = vpop.xlane.xlu1 %298  ;;  %v670_v31 = vsel %vm221_vm0, %v564_v54, 0.0 }
  0xc0   :  { %6273 = vst [vmem:[#allocation68_spill] sm:$0xff] %v4499_v25  ;;  %v4511_v15 = vadd.f32 %v154_v45, %v90_v62  ;;  %6274 = vst [vmem:[#allocation69_spill] sm:$0xff] %v4514_v53  ;;  %v565_v36 = vmul.f32 %v4499_v25, %v4499_v25  ;;  %v439_v21 = vmul.f32 0.03125, %v296_v17  ;;  %v440_v62 = vmul.f32 0.03125, %v299_v37  ;;  %v156_v37 = vld [vmem:[%s6114_s1 + $0x1f8] sm:$0xff] }
  0xc1   :  { %v566_v25 = vmul.f32 %v4514_v53, %v4514_v53 }
  0xc2   :  { %v405_v28 = vsel %vm221_vm0, %v4511_v15, 0.0  ;;  %v673_v17 = vsel %vm221_vm0, %v565_v36, 0.0  ;;  %v4531_v39 = vsub.f32 %v3999_v47, %v439_v21  ;;  %v4542_v36 = vsub.f32 %v4003_v49, %v440_v62 }
  0xc3   :  { %400 = vadd.xlane.f32.xlu1 %v399_v29  ;;  %668 = vadd.xlane.f32.xlu0 %v667_v6  ;;  %v302_v2 = vpop.xlane.xlu0 %301  ;;  %v155_v29 = vld [vmem:[%s6114_s1 + $0x1f0] sm:$0xff]  ;;  %v305_v6 = vpop.xlane.xlu1 %304 }
  0xc4   :  { %v4527_v54 = vadd.f32 %v155_v29, %v91_v4  ;;  %v441_v59 = vmul.f32 0.03125, %v302_v2  ;;  %v676_v29 = vsel %vm221_vm0, %v566_v25, 0.0  ;;  %v568_v25 = vmul.f32 %v4542_v36, %v4542_v36 }
  0xc6   :  { %v408_v21 = vsel %vm221_vm0, %v4527_v54, 0.0  ;;  %v4548_v47 = vsub.f32 %v4019_v57, %v441_v59 }
  0xc7   :  { %671 = vadd.xlane.f32.xlu1 %v670_v31  ;;  %403 = vadd.xlane.f32.xlu0 %v402_v61  ;;  %v308_v45 = vpop.xlane.xlu0 %307  ;;  %v311_v11 = vpop.xlane.xlu1 %310  ;;  %v92_v61 = vld [vmem:[%s6113_s0 + $0x1f8] sm:$0xff]  ;;  %v442_v31 = vmul.f32 0.03125, %v305_v6 }
  0xc8   :  { %v443_v4 = vmul.f32 0.03125, %v308_v45  ;;  %6275 = vst [vmem:[#allocation70_spill] sm:$0xff] %v4548_v47  ;;  %v4550_v53 = vadd.f32 %v156_v37, %v92_v61  ;;  %v444_v45 = vmul.f32 0.03125, %v311_v11  ;;  %v682_v11 = vsel %vm221_vm0, %v568_v25, 0.0 }
  0xc9   :  { %v4555_v62 = vsub.f32 %v4023_v60, %v442_v31 }
  0xca   :  { %v4558_v6 = vsub.f32 %v4039_v5, %v443_v4  ;;  %v411_v61 = vsel %vm221_vm0, %v4550_v53, 0.0  ;;  %v4568_v31 = vsub.f32 %v4043_v10, %v444_v45 }
  0xcb   :  { %406 = vadd.xlane.f32.xlu1 %v405_v28  ;;  %674 = vadd.xlane.f32.xlu0 %v673_v17  ;;  %v314_v2 = vpop.xlane.xlu0 %313  ;;  %v567_v28 = vmul.f32 %v4531_v39, %v4531_v39  ;;  %v317_v17 = vpop.xlane.xlu1 %316  ;;  %6276 = vst [vmem:[#allocation71_spill] sm:$0xff] %v4555_v62  ;;  %v570_v4 = vmul.f32 %v4555_v62, %v4555_v62 }
  0xcc   :  { %6277 = vst [vmem:[#allocation72_spill] sm:$0xff] %v4558_v6  ;;  %v571_v5 = vmul.f32 %v4558_v6, %v4558_v6  ;;  %v572_v62 = vmul.f32 %v4568_v31, %v4568_v31 }
  0xcd   :  { %v679_v37 = vsel %vm221_vm0, %v567_v28, 0.0  ;;  %v688_v45 = vsel %vm221_vm0, %v570_v4, 0.0 }
  0xce   :  { %v691_v25 = vsel %vm221_vm0, %v571_v5, 0.0 }
  0xcf   :  { %677 = vadd.xlane.f32.xlu1 %v676_v29  ;;  %409 = vadd.xlane.f32.xlu0 %v408_v21  ;;  %v320_v59 = vpop.xlane.xlu0 %319  ;;  %v569_v29 = vmul.f32 %v4548_v47, %v4548_v47  ;;  %v445_v21 = vmul.f32 0.03125, %v314_v2  ;;  %v323_v57 = vpop.xlane.xlu1 %322  ;;  %v446_v2 = vmul.f32 0.03125, %v317_v17 }
  0xd0   :  { %v448_v10 = vmul.f32 0.03125, %v323_v57  ;;  %v694_v57 = vsel %vm221_vm0, %v572_v62, 0.0 }
  0xd1   :  { %v685_v28 = vsel %vm221_vm0, %v569_v29, 0.0  ;;  %v4577_v49 = vsub.f32 %v4059_v20, %v445_v21  ;;  %v4584_v47 = vsub.f32 %v4063_v23, %v446_v2 }
  0xd2   :  { %v4592_v5 = vsub.f32 %v4083_v38, %v448_v10 }
  0xd3   :  { %412 = vadd.xlane.f32.xlu1 %v411_v61  ;;  %680 = vadd.xlane.f32.xlu0 %v679_v37  ;;  %v326_v60 = vpop.xlane.xlu0 %325  ;;  %v447_v61 = vmul.f32 0.03125, %v320_v59  ;;  %v329_v37 = vpop.xlane.xlu1 %328  ;;  %v573_v17 = vmul.f32 %v4577_v49, %v4577_v49 }
  0xd4   :  { %v449_v59 = vmul.f32 0.03125, %v326_v60 }
  0xd5   :  { %v4587_v29 = vsub.f32 %v4079_v33, %v447_v61  ;;  %v697_v2 = vsel %vm221_vm0, %v573_v17, 0.0  ;;  %v574_v33 = vmul.f32 %v4584_v47, %v4584_v47 }
  0xd6   :  { %v4597_v61 = vsub.f32 %v4099_v48, %v449_v59 }
  0xd7   :  { %683 = vadd.xlane.f32.xlu1 %v682_v11  ;;  %686 = vadd.xlane.f32.xlu0 %v685_v28  ;;  %v332_v6 = vpop.xlane.xlu0 %331  ;;  %v335_v21 = vpop.xlane.xlu1 %334  ;;  %v450_v11 = vmul.f32 0.03125, %v329_v37  ;;  %v575_v60 = vmul.f32 %v4587_v29, %v4587_v29  ;;  %v576_v37 = vmul.f32 %v4592_v5, %v4592_v5  ;;  %v700_v17 = vsel %vm221_vm0, %v574_v33, 0.0 }
  0xd8   :  { %v451_v4 = vmul.f32 0.03125, %v332_v6  ;;  %v452_v6 = vmul.f32 0.03125, %v335_v21  ;;  %v577_v48 = vmul.f32 %v4597_v61, %v4597_v61 }
  0xd9   :  { %v4604_v10 = vsub.f32 %v4103_v52, %v450_v11  ;;  %v703_v59 = vsel %vm221_vm0, %v575_v60, 0.0  ;;  %v706_v21 = vsel %vm221_vm0, %v576_v37, 0.0 }
  0xda   :  { %v4607_v62 = vsub.f32 %v4119_v63, %v451_v4  ;;  %v4616_v11 = vsub.f32 %v4123_v1, %v452_v6  ;;  %v709_v60 = vsel %vm221_vm0, %v577_v48, 0.0 }
  0xdb   :  { %689 = vadd.xlane.f32.xlu1 %v688_v45  ;;  %692 = vadd.xlane.f32.xlu0 %v691_v25  ;;  %v338_v28 = vpop.xlane.xlu0 %337  ;;  %v341_v45 = vpop.xlane.xlu1 %340  ;;  %v578_v4 = vmul.f32 %v4604_v10, %v4604_v10 }
  0xdc   :  { %v579_v33 = vmul.f32 %v4607_v62, %v4607_v62  ;;  %v580_v38 = vmul.f32 %v4616_v11, %v4616_v11 }
  0xdd   :  { %v712_v6 = vsel %vm221_vm0, %v578_v4, 0.0 }
  0xde   :  { %v715_v37 = vsel %vm221_vm0, %v579_v33, 0.0 }
  0xdf   :  { %695 = vadd.xlane.f32.xlu1 %v694_v57  ;;  %698 = vadd.xlane.f32.xlu0 %v697_v2  ;;  %v344_v25 = vpop.xlane.xlu0 %343  ;;  %v453_v57 = vmul.f32 0.03125, %v338_v28  ;;  %v347_v2 = vpop.xlane.xlu1 %346  ;;  %v454_v28 = vmul.f32 0.03125, %v341_v45 }
  0xe0   :  { %v456_v1 = vmul.f32 0.03125, %v347_v2  ;;  %v718_v2 = vsel %vm221_vm0, %v580_v38, 0.0 }
  0xe1   :  { %v4625_v52 = vsub.f32 %v4139_v16, %v453_v57  ;;  %v4632_v23 = vsub.f32 %v4143_v22, %v454_v28 }
  0xe3   :  { %701 = vadd.xlane.f32.xlu1 %v700_v17  ;;  %704 = vadd.xlane.f32.xlu0 %v703_v59  ;;  %v350_v63 = vpop.xlane.xlu0 %349  ;;  %v455_v17 = vmul.f32 0.03125, %v344_v25  ;;  %v353_v59 = vpop.xlane.xlu1 %352  ;;  %v581_v45 = vmul.f32 %v4625_v52, %v4625_v52 }
  0xe4   :  { %v457_v25 = vmul.f32 0.03125, %v350_v63  ;;  %v458_v4 = vmul.f32 0.03125, %v353_v59 }
  0xe5   :  { %v4635_v48 = vsub.f32 %v4159_v34, %v455_v17  ;;  %v721_v28 = vsel %vm221_vm0, %v581_v45, 0.0  ;;  %v582_v34 = vmul.f32 %v4632_v23, %v4632_v23 }
  0xe6   :  { %v4645_v17 = vsub.f32 %v4179_v55, %v457_v25 }
  0xe7   :  { %707 = vadd.xlane.f32.xlu1 %v706_v21  ;;  %710 = vadd.xlane.f32.xlu0 %v709_v60  ;;  %v356_v20 = vpop.xlane.xlu0 %355  ;;  %v359_v57 = vpop.xlane.xlu1 %358  ;;  %v4640_v21 = vsub.f32 %v4163_v41, %v456_v1  ;;  %v583_v63 = vmul.f32 %v4635_v48, %v4635_v48  ;;  %v4652_v1 = vsub.f32 %v4183_v58, %v458_v4  ;;  %v724_v45 = vsel %vm221_vm0, %v582_v34, 0.0 }
  0xe8   :  { %v459_v33 = vmul.f32 0.03125, %v356_v20  ;;  %v460_v38 = vmul.f32 0.03125, %v359_v57  ;;  %v585_v55 = vmul.f32 %v4645_v17, %v4645_v17 }
  0xe9   :  { %v584_v59 = vmul.f32 %v4640_v21, %v4640_v21  ;;  %v727_v25 = vsel %vm221_vm0, %v583_v63, 0.0 }
  0xea   :  { %v4655_v20 = vsub.f32 %v4199_v12, %v459_v33  ;;  %v4664_v4 = vsub.f32 %v4203_v18, %v460_v38  ;;  %v586_v33 = vmul.f32 %v4652_v1, %v4652_v1  ;;  %v733_v63 = vsel %vm221_vm0, %v585_v55, 0.0 }
  0xeb   :  { %713 = vadd.xlane.f32.xlu1 %v712_v6  ;;  %716 = vadd.xlane.f32.xlu0 %v715_v37  ;;  %v362_v60 = vpop.xlane.xlu0 %361  ;;  %v365_v6 = vpop.xlane.xlu1 %364  ;;  %v730_v57 = vsel %vm221_vm0, %v584_v59, 0.0 }
  0xec   :  { %v587_v34 = vmul.f32 %v4655_v20, %v4655_v20  ;;  %v736_v38 = vsel %vm221_vm0, %v586_v33, 0.0  ;;  %v588_v41 = vmul.f32 %v4664_v4, %v4664_v4 }
  0xee   :  { %v739_v59 = vsel %vm221_vm0, %v587_v34, 0.0 }
  0xef   :  { %719 = vadd.xlane.f32.xlu1 %v718_v2  ;;  %722 = vadd.xlane.f32.xlu0 %v721_v28  ;;  %v368_v37 = vpop.xlane.xlu0 %367  ;;  %v461_v2 = vmul.f32 0.03125, %v362_v60  ;;  %v371_v28 = vpop.xlane.xlu1 %370  ;;  %v462_v60 = vmul.f32 0.03125, %v365_v6 }
  0xf0   :  { %v464_v18 = vmul.f32 0.03125, %v371_v28  ;;  %v742_v28 = vsel %vm221_vm0, %v588_v41, 0.0  ;;  %v6282_v41 = vld [vmem:[#allocation54_spill] sm:$0xff] }
  0xf1   :  { %v4673_v58 = vsub.f32 %v4219_v40, %v461_v2  ;;  %v4680_v22 = vsub.f32 %v4223_v44, %v462_v60  ;;  %v6278_v40 = vld [vmem:[#allocation52_spill] sm:$0xff] }
  0xf3   :  { %725 = vadd.xlane.f32.xlu1 %v724_v45  ;;  %728 = vadd.xlane.f32.xlu0 %v727_v25  ;;  %v374_v12 = vpop.xlane.xlu0 %373  ;;  %v463_v45 = vmul.f32 0.03125, %v368_v37  ;;  %v377_v25 = vpop.xlane.xlu1 %376  ;;  %v589_v6 = vmul.f32 %v4673_v58, %v4673_v58 }
  0xf4   :  { %v465_v37 = vmul.f32 0.03125, %v374_v12  ;;  %v466_v33 = vmul.f32 0.03125, %v377_v25 }
  0xf5   :  { %v4683_v55 = vsub.f32 %v4239_v0, %v463_v45  ;;  %v745_v60 = vsel %vm221_vm0, %v589_v6, 0.0  ;;  %v590_v0 = vmul.f32 %v4680_v22, %v4680_v22 }
  0xf6   :  { %v4693_v45 = vsub.f32 %v6278_v40, %v465_v37 }
  0xf7   :  { %731 = vadd.xlane.f32.xlu1 %v730_v57  ;;  %734 = vadd.xlane.f32.xlu0 %v733_v63  ;;  %v380_v16 = vpop.xlane.xlu0 %379  ;;  %v383_v2 = vpop.xlane.xlu1 %382  ;;  %v4688_v57 = vsub.f32 %v4243_v9, %v464_v18  ;;  %v591_v12 = vmul.f32 %v4683_v55, %v4683_v55  ;;  %v6280_v18 = vld [vmem:[#allocation53_spill] sm:$0xff]  ;;  %v748_v37 = vsel %vm221_vm0, %v590_v0, 0.0 }
  0xf8   :  { %v467_v34 = vmul.f32 0.03125, %v380_v16  ;;  %6279 = vst [vmem:[#allocation73_spill] sm:$0xff] %v4693_v45  ;;  %v468_v16 = vmul.f32 0.03125, %v383_v2  ;;  %v593_v9 = vmul.f32 %v4693_v45, %v4693_v45 }
  0xf9   :  { %v751_v40 = vsel %vm221_vm0, %v591_v12, 0.0 }
  0xfa   :  { %v4703_v25 = vsub.f32 %v6282_v41, %v467_v34  ;;  %v757_v12 = vsel %vm221_vm0, %v593_v9, 0.0  ;;  %v6285_v41 = vld [vmem:[#allocation56_spill] sm:$0xff] }
  0xfb   :  { %737 = vadd.xlane.f32.xlu1 %v736_v38  ;;  %740 = vadd.xlane.f32.xlu0 %v739_v59  ;;  %v386_v63 = vpop.xlane.xlu0 %385  ;;  %v4700_v38 = vsub.f32 %v6280_v18, %v466_v33  ;;  %v592_v59 = vmul.f32 %v4688_v57, %v4688_v57  ;;  %v389_v6 = vpop.xlane.xlu1 %388  ;;  %v6284_v33 = vld [vmem:[#allocation55_spill] sm:$0xff] }
  0xfc   :  { %6283 = vst [vmem:[#allocation75_spill] sm:$0xff] %v4703_v25  ;;  %v4712_v18 = vsub.f32 %v6284_v33, %v468_v16  ;;  %v595_v0 = vmul.f32 %v4703_v25, %v4703_v25  ;;  %v6287_v33 = vld [vmem:[#allocation57_spill] sm:$0xff]  ;;  %v6289_v25 = vld [vmem:[#allocation58_spill] sm:$0xff] }
  0xfd   :  { %6281 = vst [vmem:[#allocation74_spill] sm:$0xff] %v4700_v38  ;;  %v754_v2 = vsel %vm221_vm0, %v592_v59, 0.0  ;;  %v594_v34 = vmul.f32 %v4700_v38, %v4700_v38 }
  0xfe   :  { %v763_v16 = vsel %vm221_vm0, %v595_v0, 0.0  ;;  %v596_v59 = vmul.f32 %v4712_v18, %v4712_v18 }
  0xff   :  { %743 = vadd.xlane.f32.xlu1 %v742_v28  ;;  %746 = vadd.xlane.f32.xlu0 %v745_v60  ;;  %v469_v28 = vmul.f32 0.03125, %v386_v63  ;;  %v392_v60 = vpop.xlane.xlu0 %391  ;;  %v470_v63 = vmul.f32 0.03125, %v389_v6 }
 0x100   :  { %v471_v45 = vmul.f32 0.03125, %v392_v60  ;;  %v766_v60 = vsel %vm221_vm0, %v596_v59, 0.0 }
 0x101   :  { %v4721_v44 = vsub.f32 %v6285_v41, %v469_v28  ;;  %v4728_v38 = vsub.f32 %v6287_v33, %v470_v63 }
 0x102   :  { %v4731_v9 = vsub.f32 %v6289_v25, %v471_v45 }
 0x103   :  { %749 = vadd.xlane.f32.xlu1 %v748_v37  ;;  %752 = vadd.xlane.f32.xlu0 %v751_v40  ;;  %6286 = vst [vmem:[#allocation76_spill] sm:$0xff] %v4721_v44  ;;  %v395_v37 = vpop.xlane.xlu1 %394  ;;  %v760_v40 = vsel %vm221_vm0, %v594_v34, 0.0  ;;  %6288 = vst [vmem:[#allocation77_spill] sm:$0xff] %v4728_v38  ;;  %v597_v6 = vmul.f32 %v4721_v44, %v4721_v44  ;;  %v598_v0 = vmul.f32 %v4728_v38, %v4728_v38 }
 0x104   :  { %6290 = vst [vmem:[#allocation78_spill] sm:$0xff] %v4731_v9  ;;  %v472_v28 = vmul.f32 0.03125, %v395_v37  ;;  %v599_v45 = vmul.f32 %v4731_v9, %v4731_v9 }
 0x105   :  { %v769_v34 = vsel %vm221_vm0, %v597_v6, 0.0 }
 0x106   :  { %v775_v63 = vsel %vm221_vm0, %v599_v45, 0.0 }
 0x107   :  { %755 = vadd.xlane.f32.xlu1 %v754_v2  ;;  %758 = vadd.xlane.f32.xlu0 %v757_v12  ;;  %v4737_v2 = vsub.f32 %v4323_v32, %v472_v28  ;;  %v772_v12 = vsel %vm221_vm0, %v598_v0, 0.0 }
 0x109   :  { %6291 = vst [vmem:[#allocation79_spill] sm:$0xff] %v4737_v2  ;;  %v600_v37 = vmul.f32 %v4737_v2, %v4737_v2 }
 0x10b   :  { %761 = vadd.xlane.f32.xlu1 %v760_v40  ;;  %764 = vadd.xlane.f32.xlu0 %v763_v16  ;;  %v778_v40 = vsel %vm221_vm0, %v600_v37, 0.0 }
 0x10f   :  { %767 = vadd.xlane.f32.xlu1 %v766_v60  ;;  %770 = vadd.xlane.f32.xlu0 %v769_v34 }
 0x113   :  { %773 = vadd.xlane.f32.xlu1 %v772_v12  ;;  %776 = vadd.xlane.f32.xlu0 %v775_v63 }
 0x117   :  { %779 = vadd.xlane.f32.xlu1 %v778_v40 }
 0x120   :  { %v609_v16 = vpop.xlane.xlu0 %608 }
 0x121   :  { %v799_v59 = vmul.f32 0.03125, %v609_v16 }
 0x123   :  { %v863_v28 = vadd.f32 1e-05, %v799_v59 }
 0x124   :  { %v612_v6 = vpop.xlane.xlu1 %611  ;;  %v615_v25 = vpop.xlane.xlu0 %614 }
 0x125   :  { %3445 = vrsqrt.f32 %v863_v28  ;;  %v800_v60 = vmul.f32 0.03125, %v612_v6  ;;  %v801_v34 = vmul.f32 0.03125, %v615_v25 }
 0x127   :  { %v864_v32 = vadd.f32 1e-05, %v800_v60  ;;  %v865_v0 = vadd.f32 1e-05, %v801_v34 }
 0x128   :  { %v618_v41 = vpop.xlane.xlu1 %617  ;;  %v621_v45 = vpop.xlane.xlu0 %620 }
 0x129   :  { %3447 = vrsqrt.f32 %v864_v32  ;;  %v802_v33 = vmul.f32 0.03125, %v618_v41  ;;  %v803_v2 = vmul.f32 0.03125, %v621_v45  ;;  %v4752_v32 = vld [vmem:[%s6116_s2] ss:$0 sm:$0xff] }
 0x12a   :  { %3449 = vrsqrt.f32 %v865_v0 }
 0x12b   :  { %v866_v12 = vadd.f32 1e-05, %v802_v33  ;;  %v867_v63 = vadd.f32 1e-05, %v803_v2 }
 0x12c   :  { %v624_v37 = vpop.xlane.xlu1 %623  ;;  %v627_v40 = vpop.xlane.xlu0 %626 }
 0x12d   :  { %3451 = vrsqrt.f32 %v866_v12  ;;  %v804_v16 = vmul.f32 0.03125, %v624_v37  ;;  %v805_v59 = vmul.f32 0.03125, %v627_v40  ;;  %v4758_v12 = vld [vmem:[%s6117_s3] ss:$0 sm:$0xff] }
 0x12e   :  { %3453 = vrsqrt.f32 %v867_v63 }
 0x12f   :  { %v868_v9 = vadd.f32 1e-05, %v804_v16  ;;  %v869_v28 = vadd.f32 1e-05, %v805_v59 }
 0x130   :  { %v630_v6 = vpop.xlane.xlu1 %629  ;;  %v633_v25 = vpop.xlane.xlu0 %632 }
 0x131   :  { %3455 = vrsqrt.f32 %v868_v9  ;;  %v806_v60 = vmul.f32 0.03125, %v630_v6  ;;  %v807_v34 = vmul.f32 0.03125, %v633_v25 }
 0x132   :  { %v3446_v38 = vpop.eup %3445  ;;  %3457 = vrsqrt.f32 %v869_v28 }
 0x133   :  { %v870_v41 = vadd.f32 1e-05, %v806_v60  ;;  %v871_v33 = vadd.f32 1e-05, %v807_v34  ;;  %v991_v2 = vmul.f32 %v3446_v38, %v4330_v42  ;;  %v6292_v60 = vld [vmem:[#allocation60_spill] sm:$0xff] }
 0x134   :  { %v636_v0 = vpop.xlane.xlu1 %635  ;;  %v639_v45 = vpop.xlane.xlu0 %638 }
 0x135   :  { %3459 = vrsqrt.f32 %v870_v41  ;;  %v808_v9 = vmul.f32 0.03125, %v636_v0  ;;  %v809_v63 = vmul.f32 0.03125, %v639_v45  ;;  %v1062_v37 = vmul.f32 %v4752_v32, %v991_v2 }
 0x136   :  { %v3448_v40 = vpop.eup %3447  ;;  %3461 = vrsqrt.f32 %v871_v33 }
 0x137   :  { %v3450_v16 = vpop.eup %3449  ;;  %v872_v59 = vadd.f32 1e-05, %v808_v9  ;;  %v873_v28 = vadd.f32 1e-05, %v809_v63  ;;  %v1133_v6 = vadd.f32 %v4758_v12, %v1062_v37  ;;  %v992_v42 = vmul.f32 %v3448_v40, %v4340_v14 }
 0x138   :  { %v642_v38 = vpop.xlane.xlu1 %641  ;;  %v645_v25 = vpop.xlane.xlu0 %644  ;;  %v993_v34 = vmul.f32 %v3450_v16, %v6292_v60 }
 0x139   :  { %3463 = vrsqrt.f32 %v872_v59  ;;  %v810_v44 = vmul.f32 0.03125, %v642_v38  ;;  %v811_v41 = vmul.f32 0.03125, %v645_v25  ;;  %3189 = vmatprep.mubr.msk.f32.mxu0 %vm221_vm0, %v1133_v6  ;;  %v1063_v2 = vmul.f32 %v4752_v32, %v992_v42 }
 0x13a   :  { %v3452_v0 = vpop.eup %3451  ;;  %3465 = vrsqrt.f32 %v873_v28  ;;  %v1064_v33 = vmul.f32 %v4752_v32, %v993_v34 }
 0x13b   :  { %v3454_v45 = vpop.eup %3453  ;;  %v874_v9 = vadd.f32 1e-05, %v810_v44  ;;  %v875_v63 = vadd.f32 1e-05, %v811_v41  ;;  %v1134_v14 = vadd.f32 %v4758_v12, %v1063_v2  ;;  %v994_v37 = vmul.f32 %v3452_v0, %v4344_v46 }
 0x13c   :  { %v648_v40 = vpop.xlane.xlu1 %647  ;;  %v651_v16 = vpop.xlane.xlu0 %650  ;;  %v1135_v59 = vadd.f32 %v4758_v12, %v1064_v33  ;;  %v995_v38 = vmul.f32 %v3454_v45, %v4352_v24 }
 0x13d   :  { %3467 = vrsqrt.f32 %v874_v9  ;;  %v812_v6 = vmul.f32 0.03125, %v648_v40  ;;  %v813_v42 = vmul.f32 0.03125, %v651_v16  ;;  %3190 = vmatmul.mubr.msk.f32.vlgmr.msra.gmra.mxu0 %vm221_vm0, %v1134_v14  ;;  %v1065_v28 = vmul.f32 %v4752_v32, %v994_v37 }
 0x13e   :  { %v3456_v25 = vpop.eup %3455  ;;  %3469 = vrsqrt.f32 %v875_v63  ;;  %3192 = vmatprep.mubr.msk.f32.mxu0 %vm221_vm0, %v1135_v59  ;;  %v1066_v44 = vmul.f32 %v4752_v32, %v995_v38 }
 0x13f   :  { %v3458_v46 = vpop.eup %3457  ;;  %v876_v60 = vadd.f32 1e-05, %v812_v6  ;;  %v877_v34 = vadd.f32 1e-05, %v813_v42  ;;  %v1136_v41 = vadd.f32 %v4758_v12, %v1065_v28  ;;  %v996_v24 = vmul.f32 %v3456_v25, %v4356_v56 }
 0x140   :  { %v654_v2 = vpop.xlane.xlu1 %653  ;;  %v657_v0 = vpop.xlane.xlu0 %656  ;;  %v1137_v33 = vadd.f32 %v4758_v12, %v1066_v44  ;;  %v997_v45 = vmul.f32 %v3458_v46, %v4364_v19 }
 0x141   :  { %3471 = vrsqrt.f32 %v876_v60  ;;  %v814_v9 = vmul.f32 0.03125, %v654_v2  ;;  %v815_v63 = vmul.f32 0.03125, %v657_v0  ;;  %3193 = vmatmul.mubr.msk.f32.gmra.mxu0 %vm221_vm0, %v1136_v41  ;;  %v1067_v14 = vmul.f32 %v4752_v32, %v996_v24 }
 0x142   :  { %v3460_v37 = vpop.eup %3459  ;;  %3473 = vrsqrt.f32 %v877_v34  ;;  %3195 = vmatprep.mubr.msk.f32.mxu0 %vm221_vm0, %v1137_v33  ;;  %v1068_v40 = vmul.f32 %v4752_v32, %v997_v45 }
 0x143   :  { %v3462_v56 = vpop.eup %3461  ;;  %v878_v16 = vadd.f32 1e-05, %v814_v9  ;;  %v879_v59 = vadd.f32 1e-05, %v815_v63  ;;  %v1138_v38 = vadd.f32 %v4758_v12, %v1067_v14  ;;  %v998_v19 = vmul.f32 %v3460_v37, %v4368_v7 }
 0x144   :  { %v660_v6 = vpop.xlane.xlu1 %659  ;;  %v663_v42 = vpop.xlane.xlu0 %662  ;;  %v1139_v28 = vadd.f32 %v4758_v12, %v1068_v40  ;;  %v999_v25 = vmul.f32 %v3462_v56, %v4376_v27 }
 0x145   :  { %3475 = vrsqrt.f32 %v878_v16  ;;  %v816_v44 = vmul.f32 0.03125, %v660_v6  ;;  %v817_v46 = vmul.f32 0.03125, %v663_v42  ;;  %3196 = vmatmul.mubr.msk.f32.gmra.mxu0 %vm221_vm0, %v1138_v38  ;;  %v1069_v60 = vmul.f32 %v4752_v32, %v998_v19 }
 0x146   :  { %v3464_v34 = vpop.eup %3463  ;;  %3477 = vrsqrt.f32 %v879_v59  ;;  %3198 = vmatprep.mubr.msk.f32.mxu0 %vm221_vm0, %v1139_v28  ;;  %v1070_v41 = vmul.f32 %v4752_v32, %v999_v25 }
 0x147   :  { %v3466_v7 = vpop.eup %3465  ;;  %v880_v24 = vadd.f32 1e-05, %v816_v44  ;;  %v881_v2 = vadd.f32 1e-05, %v817_v46  ;;  %v1140_v0 = vadd.f32 %v4758_v12, %v1069_v60  ;;  %v1000_v27 = vmul.f32 %v3464_v34, %v4380_v13 }
 0x148   :  { %v666_v33 = vpop.xlane.xlu1 %665  ;;  %v398_v45 = vpop.xlane.xlu0 %397  ;;  %v1141_v9 = vadd.f32 %v4758_v12, %v1070_v41  ;;  %v1001_v63 = vmul.f32 %v3466_v7, %v4388_v35 }
 0x149   :  { %3479 = vrsqrt.f32 %v880_v24  ;;  %v818_v14 = vmul.f32 0.03125, %v666_v33  ;;  %v473_v37 = vmul.f32 0.03125, %v398_v45  ;;  %3199 = vmatmul.mubr.msk.f32.gmra.mxu0 %vm221_vm0, %v1140_v0  ;;  %v1071_v40 = vmul.f32 %v4752_v32, %v1000_v27 }
 0x14a   :  { %v3468_v56 = vpop.eup %3467  ;;  %3481 = vrsqrt.f32 %v881_v2  ;;  %3201 = vmatprep.mubr.msk.f32.mxu0 %vm221_vm0, %v1141_v9  ;;  %v1072_v16 = vmul.f32 %v4752_v32, %v1001_v63 }
 0x14b   :  { %v3470_v13 = vpop.eup %3469  ;;  %v882_v59 = vadd.f32 1e-05, %v818_v14  ;;  %v4800_v38 = vsub.f32 %v4451_v8, %v473_v37  ;;  %v1142_v35 = vadd.f32 %v4758_v12, %v1071_v40  ;;  %v1002_v19 = vmul.f32 %v3468_v56, %v4392_v50 }
 0x14c   :  { %v401_v6 = vpop.xlane.xlu1 %400  ;;  %v669_v42 = vpop.xlane.xlu0 %668  ;;  %v1143_v28 = vadd.f32 %v4758_v12, %v1072_v16  ;;  %v1003_v25 = vmul.f32 %v3470_v13, %v4400_v43 }
 0x14d   :  { %3483 = vrsqrt.f32 %v882_v59  ;;  %v474_v44 = vmul.f32 0.03125, %v401_v6  ;;  %v819_v46 = vmul.f32 0.03125, %v669_v42  ;;  %3202 = vmatmul.mubr.msk.f32.gmra.mxu0 %vm221_vm0, %v1142_v35  ;;  %v601_v60 = vmul.f32 %v4800_v38, %v4800_v38 }
 0x14e   :  { %v3472_v34 = vpop.eup %3471  ;;  %3204 = vmatprep.mubr.msk.f32.mxu0 %vm221_vm0, %v1143_v28  ;;  %v1073_v41 = vmul.f32 %v4752_v32, %v1002_v19  ;;  %v1074_v50 = vmul.f32 %v4752_v32, %v1003_v25  ;;  %v6293_v19 = vld [vmem:[#allocation61_spill] sm:$0xff] }
 0x14f   :  { %v3474_v7 = vpop.eup %3473  ;;  %v4813_v24 = vsub.f32 %v4476_v3, %v474_v44  ;;  %v883_v43 = vadd.f32 1e-05, %v819_v46  ;;  %v781_v2 = vsel %vm221_vm0, %v601_v60, 0.0  ;;  %v1004_v0 = vmul.f32 %v3472_v34, %v4404_v30  ;;  %v6294_v46 = vld [vmem:[#allocation62_spill] sm:$0xff] }
 0x150   :  { %v672_v27 = vpop.xlane.xlu1 %671  ;;  %782 = vadd.xlane.f32.xlu0 %v781_v2  ;;  %v404_v33 = vpop.xlane.xlu0 %403  ;;  %v1144_v45 = vadd.f32 %v4758_v12, %v1073_v41  ;;  %v1145_v9 = vadd.f32 %v4758_v12, %v1074_v50  ;;  %v1005_v63 = vmul.f32 %v3474_v7, %v4412_v51 }
 0x151   :  { %3485 = vrsqrt.f32 %v883_v43  ;;  %v820_v14 = vmul.f32 0.03125, %v672_v27  ;;  %v475_v37 = vmul.f32 0.03125, %v404_v33  ;;  %v602_v40 = vmul.f32 %v4813_v24, %v4813_v24 }
 0x152   :  { %v3476_v56 = vpop.eup %3475  ;;  %3205 = vmatmul.mubr.msk.f32.gmra.mxu0 %vm221_vm0, %v1144_v45  ;;  %v1075_v30 = vmul.f32 %v4752_v32, %v1004_v0  ;;  %v1076_v16 = vmul.f32 %v4752_v32, %v1005_v63 }
 0x153   :  { %v3478_v13 = vpop.eup %3477  ;;  %v884_v59 = vadd.f32 1e-05, %v820_v14  ;;  %v4826_v35 = vsub.f32 %v4495_v26, %v475_v37  ;;  %3207 = vmatprep.mubr.msk.f32.mxu0 %vm221_vm0, %v1145_v9  ;;  %v784_v51 = vsel %vm221_vm0, %v602_v40, 0.0  ;;  %v1006_v6 = vmul.f32 %v3476_v56, %v6293_v19  ;;  %v6295_v9 = vld [vmem:[#allocation63_spill] sm:$0xff] }
 0x154   :  { %785 = vadd.xlane.f32.xlu1 %v784_v51  ;;  %v407_v42 = vpop.xlane.xlu1 %406  ;;  %v675_v28 = vpop.xlane.xlu0 %674  ;;  %v1146_v25 = vadd.f32 %v4758_v12, %v1075_v30  ;;  %v1147_v44 = vadd.f32 %v4758_v12, %v1076_v16  ;;  %v1007_v60 = vmul.f32 %v3478_v13, %v6294_v46  ;;  %v6296_v30 = vld [vmem:[#allocation64_spill] sm:$0xff]  ;;  %v6297_v46 = vld [vmem:[#allocation65_spill] sm:$0xff] }
 0x155   :  { %3487 = vrsqrt.f32 %v884_v59  ;;  %v476_v34 = vmul.f32 0.03125, %v407_v42  ;;  %v821_v41 = vmul.f32 0.03125, %v675_v28  ;;  %v603_v50 = vmul.f32 %v4826_v35, %v4826_v35 }
 0x156   :  { %v3480_v7 = vpop.eup %3479  ;;  %3208 = vmatmul.mubr.msk.f32.gmra.mxu0 %vm221_vm0, %v1146_v25  ;;  %v1077_v43 = vmul.f32 %v4752_v32, %v1006_v6  ;;  %v1078_v2 = vmul.f32 %v4752_v32, %v1007_v60 }
 0x157   :  { %v3482_v0 = vpop.eup %3481  ;;  %v4840_v27 = vsub.f32 %v4511_v15, %v476_v34  ;;  %v885_v33 = vadd.f32 1e-05, %v821_v41  ;;  %3210 = vmatprep.mubr.msk.f32.mxu0 %vm221_vm0, %v1147_v44  ;;  %v787_v45 = vsel %vm221_vm0, %v603_v50, 0.0  ;;  %v1008_v63 = vmul.f32 %v3480_v7, %v6295_v9 }
 0x158   :  { %v678_v14 = vpop.xlane.xlu1 %677  ;;  %788 = vadd.xlane.f32.xlu0 %v787_v45  ;;  %v410_v37 = vpop.xlane.xlu0 %409  ;;  %v1148_v40 = vadd.f32 %v4758_v12, %v1077_v43  ;;  %v1149_v56 = vadd.f32 %v4758_v12, %v1078_v2  ;;  %v1009_v16 = vmul.f32 %v3482_v0, %v6296_v30 }
 0x159   :  { %3489 = vrsqrt.f32 %v885_v33  ;;  %v822_v13 = vmul.f32 0.03125, %v678_v14  ;;  %v477_v59 = vmul.f32 0.03125, %v410_v37  ;;  %v604_v51 = vmul.f32 %v4840_v27, %v4840_v27  ;;  %v6298_v37 = vld [vmem:[#allocation66_spill] sm:$0xff] }
 0x15a   :  { %v3484_v19 = vpop.eup %3483  ;;  %3211 = vmatmul.mubr.msk.f32.gmra.mxu0 %vm221_vm0, %v1148_v40  ;;  %v1079_v6 = vmul.f32 %v4752_v32, %v1008_v63  ;;  %v1080_v42 = vmul.f32 %v4752_v32, %v1009_v16 }
 0x15b   :  { %v886_v28 = vadd.f32 1e-05, %v822_v13  ;;  %v4854_v25 = vsub.f32 %v4527_v54, %v477_v59  ;;  %3213 = vmatprep.mubr.msk.f32.mxu0 %vm221_vm0, %v1149_v56  ;;  %v790_v44 = vsel %vm221_vm0, %v604_v51, 0.0  ;;  %v1010_v60 = vmul.f32 %v3484_v19, %v6297_v46  ;;  %v6299_v46 = vld [vmem:[#allocation67_spill] sm:$0xff] }
 0x15c   :  { %791 = vadd.xlane.f32.xlu1 %v790_v44  ;;  %v413_v34 = vpop.xlane.xlu1 %412  ;;  %v681_v41 = vpop.xlane.xlu0 %680  ;;  %v1150_v50 = vadd.f32 %v4758_v12, %v1079_v6  ;;  %v1151_v7 = vadd.f32 %v4758_v12, %v1080_v42 }
 0x15d   :  { %3491 = vrsqrt.f32 %v886_v28  ;;  %v478_v43 = vmul.f32 0.03125, %v413_v34  ;;  %v823_v2 = vmul.f32 0.03125, %v681_v41  ;;  %v605_v0 = vmul.f32 %v4854_v25, %v4854_v25 }
 0x15e   :  { %v3486_v33 = vpop.eup %3485  ;;  %3214 = vmatmul.mubr.msk.f32.gmra.mxu0 %vm221_vm0, %v1150_v50  ;;  %v1081_v45 = vmul.f32 %v4752_v32, %v1010_v60 }
 0x15f   :  { %v4866_v9 = vsub.f32 %v4550_v53, %v478_v43  ;;  %v887_v63 = vadd.f32 1e-05, %v823_v2  ;;  %3216 = vmatprep.mubr.msk.f32.mxu0 %vm221_vm0, %v1151_v7  ;;  %v793_v14 = vsel %vm221_vm0, %v605_v0, 0.0  ;;  %v1011_v40 = vmul.f32 %v3486_v33, %v6298_v37 }
 0x160   :  { %v684_v56 = vpop.xlane.xlu1 %683  ;;  %794 = vadd.xlane.f32.xlu0 %v793_v14  ;;  %v687_v30 = vpop.xlane.xlu0 %686  ;;  %v1152_v16 = vadd.f32 %v4758_v12, %v1081_v45  ;;  %v6300_v14 = vld [vmem:[#allocation68_spill] sm:$0xff] }
 0x161   :  { %3493 = vrsqrt.f32 %v887_v63  ;;  %v824_v13 = vmul.f32 0.03125, %v684_v56  ;;  %v825_v59 = vmul.f32 0.03125, %v687_v30  ;;  %v606_v51 = vmul.f32 %v4866_v9, %v4866_v9 }
 0x162   :  { %v3488_v19 = vpop.eup %3487  ;;  %3217 = vmatmul.mubr.msk.f32.gmra.mxu0 %vm221_vm0, %v1152_v16  ;;  %v1082_v6 = vmul.f32 %v4752_v32, %v1011_v40 }
 0x163   :  { %v888_v42 = vadd.f32 1e-05, %v824_v13  ;;  %v889_v28 = vadd.f32 1e-05, %v825_v59  ;;  %v796_v44 = vsel %vm221_vm0, %v606_v51, 0.0  ;;  %v1012_v60 = vmul.f32 %v3488_v19, %v6299_v46 }
 0x164   :  { %797 = vadd.xlane.f32.xlu1 %v796_v44  ;;  %v690_v34 = vpop.xlane.xlu1 %689  ;;  %v693_v41 = vpop.xlane.xlu0 %692  ;;  %v1153_v50 = vadd.f32 %v4758_v12, %v1082_v6 }
 0x165   :  { %3495 = vrsqrt.f32 %v888_v42  ;;  %v826_v7 = vmul.f32 0.03125, %v690_v34  ;;  %v827_v43 = vmul.f32 0.03125, %v693_v41  ;;  %v1083_v2 = vmul.f32 %v4752_v32, %v1012_v60  ;;  %v6301_v42 = vld [vmem:[#allocation69_spill] sm:$0xff] }
 0x166   :  { %v3490_v0 = vpop.eup %3489  ;;  %3497 = vrsqrt.f32 %v889_v28  ;;  %3219 = vmatprep.mubr.msk.f32.mxu0 %vm221_vm0, %v1153_v50 }
 0x167   :  { %v890_v33 = vadd.f32 1e-05, %v826_v7  ;;  %v891_v45 = vadd.f32 1e-05, %v827_v43  ;;  %v1154_v63 = vadd.f32 %v4758_v12, %v1083_v2  ;;  %v1013_v37 = vmul.f32 %v3490_v0, %v6300_v14 }
 0x168   :  { %v696_v40 = vpop.xlane.xlu1 %695  ;;  %v699_v56 = vpop.xlane.xlu0 %698 }
 0x169   :  { %3499 = vrsqrt.f32 %v890_v33  ;;  %v828_v30 = vmul.f32 0.03125, %v696_v40  ;;  %v829_v16 = vmul.f32 0.03125, %v699_v56  ;;  %3220 = vmatmul.mubr.msk.f32.gmra.mxu0 %vm221_vm0, %v1154_v63  ;;  %v1084_v13 = vmul.f32 %v4752_v32, %v1013_v37 }
 0x16a   :  { %v3492_v59 = vpop.eup %3491  ;;  %3501 = vrsqrt.f32 %v891_v45 }
 0x16b   :  { %v892_v51 = vadd.f32 1e-05, %v828_v30  ;;  %v893_v19 = vadd.f32 1e-05, %v829_v16  ;;  %v1155_v6 = vadd.f32 %v4758_v12, %v1084_v13  ;;  %v1014_v28 = vmul.f32 %v3492_v59, %v6301_v42 }
 0x16c   :  { %v702_v44 = vpop.xlane.xlu1 %701  ;;  %v705_v46 = vpop.xlane.xlu0 %704 }
 0x16d   :  { %3503 = vrsqrt.f32 %v892_v51  ;;  %v830_v60 = vmul.f32 0.03125, %v702_v44  ;;  %v831_v34 = vmul.f32 0.03125, %v705_v46  ;;  %3222 = vmatprep.mubr.msk.f32.mxu0 %vm221_vm0, %v1155_v6  ;;  %v1085_v41 = vmul.f32 %v4752_v32, %v1014_v28 }
 0x16e   :  { %v3494_v50 = vpop.eup %3493  ;;  %3505 = vrsqrt.f32 %v893_v19  ;;  %v6302_v19 = vld [vmem:[#allocation70_spill] sm:$0xff] }
 0x16f   :  { %v894_v7 = vadd.f32 1e-05, %v830_v60  ;;  %v895_v43 = vadd.f32 1e-05, %v831_v34  ;;  %v1156_v2 = vadd.f32 %v4758_v12, %v1085_v41  ;;  %v1015_v0 = vmul.f32 %v3494_v50, %v4531_v39 }
 0x170   :  { %v708_v33 = vpop.xlane.xlu1 %707  ;;  %v711_v45 = vpop.xlane.xlu0 %710 }
 0x171   :  { %3507 = vrsqrt.f32 %v894_v7  ;;  %v832_v63 = vmul.f32 0.03125, %v708_v33  ;;  %v833_v14 = vmul.f32 0.03125, %v711_v45  ;;  %3223 = vmatmul.mubr.msk.f32.gmra.mxu0 %vm221_vm0, %v1156_v2  ;;  %v1086_v37 = vmul.f32 %v4752_v32, %v1015_v0  ;;  %v6303_v7 = vld [vmem:[#allocation71_spill] sm:$0xff]  ;;  %v6304_v45 = vld [vmem:[#allocation72_spill] sm:$0xff] }
 0x172   :  { %v3496_v40 = vpop.eup %3495  ;;  %3509 = vrsqrt.f32 %v895_v43 }
 0x173   :  { %v3498_v56 = vpop.eup %3497  ;;  %v896_v30 = vadd.f32 1e-05, %v832_v63  ;;  %v897_v16 = vadd.f32 1e-05, %v833_v14  ;;  %v1157_v13 = vadd.f32 %v4758_v12, %v1086_v37  ;;  %v1016_v59 = vmul.f32 %v3496_v40, %v4542_v36 }
 0x174   :  { %v714_v51 = vpop.xlane.xlu1 %713  ;;  %v717_v39 = vpop.xlane.xlu0 %716  ;;  %v1017_v6 = vmul.f32 %v3498_v56, %v6302_v19 }
 0x175   :  { %3511 = vrsqrt.f32 %v896_v30  ;;  %v834_v42 = vmul.f32 0.03125, %v714_v51  ;;  %v835_v28 = vmul.f32 0.03125, %v717_v39  ;;  %3225 = vmatprep.mubr.msk.f32.mxu0 %vm221_vm0, %v1157_v13  ;;  %v1087_v44 = vmul.f32 %v4752_v32, %v1016_v59 }
 0x176   :  { %v3500_v46 = vpop.eup %3499  ;;  %3513 = vrsqrt.f32 %v897_v16  ;;  %v1088_v60 = vmul.f32 %v4752_v32, %v1017_v6 }
 0x177   :  { %v3502_v34 = vpop.eup %3501  ;;  %v898_v41 = vadd.f32 1e-05, %v834_v42  ;;  %v899_v50 = vadd.f32 1e-05, %v835_v28  ;;  %v1158_v36 = vadd.f32 %v4758_v12, %v1087_v44  ;;  %v1018_v43 = vmul.f32 %v3500_v46, %v6303_v7 }
 0x178   :  { %v720_v2 = vpop.xlane.xlu1 %719  ;;  %v723_v0 = vpop.xlane.xlu0 %722  ;;  %v1159_v33 = vadd.f32 %v4758_v12, %v1088_v60  ;;  %v1019_v63 = vmul.f32 %v3502_v34, %v6304_v45 }
 0x179   :  { %3515 = vrsqrt.f32 %v898_v41  ;;  %v836_v14 = vmul.f32 0.03125, %v720_v2  ;;  %v837_v37 = vmul.f32 0.03125, %v723_v0  ;;  %3226 = vmatmul.mubr.msk.f32.gmra.mxu0 %vm221_vm0, %v1158_v36  ;;  %v1089_v40 = vmul.f32 %v4752_v32, %v1018_v43  ;;  %v2447_v43 = vld [vmem:[%s6118_s6 + $0x78] sm:$0xff] }
 0x17a   :  { %v3504_v56 = vpop.eup %3503  ;;  %3517 = vrsqrt.f32 %v899_v50  ;;  %3228 = vmatprep.mubr.msk.f32.mxu0 %vm221_vm0, %v1159_v33  ;;  %v1090_v30 = vmul.f32 %v4752_v32, %v1019_v63  ;;  %3285 = vmatprep.subr.mxu0 %v2447_v43 }
 0x17b   :  { %v3506_v16 = vpop.eup %3505  ;;  %v900_v13 = vadd.f32 1e-05, %v836_v14  ;;  %v901_v59 = vadd.f32 1e-05, %v837_v37  ;;  %v1160_v51 = vadd.f32 %v4758_v12, %v1089_v40  ;;  %v1020_v39 = vmul.f32 %v3504_v56, %v4568_v31  ;;  %3413 = vmatprep.subr.mxu1 %v2447_v43  ;;  %3286 = vmatpush3.msra.mxu0 %v2447_v43 }
 0x17c   :  { %v726_v19 = vpop.xlane.xlu1 %725  ;;  %v729_v6 = vpop.xlane.xlu0 %728  ;;  %v1161_v42 = vadd.f32 %v4758_v12, %v1090_v30  ;;  %v1021_v28 = vmul.f32 %v3506_v16, %v4577_v49  ;;  %3429 = vmatpush3.msra.mxu1 %v2447_v43 }
 0x17d   :  { %3519 = vrsqrt.f32 %v900_v13  ;;  %v838_v44 = vmul.f32 0.03125, %v726_v19  ;;  %v839_v46 = vmul.f32 0.03125, %v729_v6  ;;  %3229 = vmatmul.mubr.msk.f32.gmra.mxu0 %vm221_vm0, %v1160_v51  ;;  %v1091_v60 = vmul.f32 %v4752_v32, %v1020_v39  ;;  %v2445_v51 = vld [vmem:[%s6118_s6 + $0x68] sm:$0xff] }
 0x17e   :  { %v3508_v34 = vpop.eup %3507  ;;  %3521 = vrsqrt.f32 %v901_v59  ;;  %3231 = vmatprep.mubr.msk.f32.mxu0 %vm221_vm0, %v1161_v42  ;;  %v1092_v41 = vmul.f32 %v4752_v32, %v1021_v28 }
 0x17f   :  { %v3510_v31 = vpop.eup %3509  ;;  %v902_v50 = vadd.f32 1e-05, %v838_v44  ;;  %v903_v36 = vadd.f32 1e-05, %v839_v46  ;;  %v1162_v7 = vadd.f32 %v4758_v12, %v1091_v60  ;;  %v1022_v49 = vmul.f32 %v3508_v34, %v4584_v47  ;;  %v2446_v47 = vld [vmem:[%s6118_s6 + $0x70] sm:$0xff]  ;;  %v2444_v46 = vld [vmem:[%s6118_s6 + $0x60] sm:$0xff] }
 0x180   :  { %v732_v2 = vpop.xlane.xlu1 %731  ;;  %v735_v0 = vpop.xlane.xlu0 %734  ;;  %v1163_v33 = vadd.f32 %v4758_v12, %v1092_v41  ;;  %v1023_v45 = vmul.f32 %v3510_v31, %v4587_v29  ;;  %3287 = vmatprep.subr.mxu0 %v2446_v47  ;;  %3414 = vmatprep.subr.mxu1 %v2446_v47 }
 0x181   :  { %3523 = vrsqrt.f32 %v902_v50  ;;  %v840_v63 = vmul.f32 0.03125, %v732_v2  ;;  %v841_v14 = vmul.f32 0.03125, %v735_v0  ;;  %3232 = vmatmul.mubr.msk.f32.gmra.mxu0 %vm221_vm0, %v1162_v7  ;;  %v1093_v37 = vmul.f32 %v4752_v32, %v1022_v49  ;;  %3430 = vmatpush3.msra.mxu1 %v2446_v47  ;;  %v2443_v7 = vld [vmem:[%s6118_s6 + $0x58] sm:$0xff] }
 0x182   :  { %v3512_v40 = vpop.eup %3511  ;;  %3525 = vrsqrt.f32 %v903_v36  ;;  %3234 = vmatprep.mubr.msk.f32.mxu0 %vm221_vm0, %v1163_v33  ;;  %v1094_v29 = vmul.f32 %v4752_v32, %v1023_v45  ;;  %3288 = vmatpush3.msra.mxu0 %v2446_v47 }
 0x183   :  { %v3514_v56 = vpop.eup %3513  ;;  %v904_v30 = vadd.f32 1e-05, %v840_v63  ;;  %v905_v16 = vadd.f32 1e-05, %v841_v14  ;;  %v1164_v13 = vadd.f32 %v4758_v12, %v1093_v37  ;;  %v1024_v59 = vmul.f32 %v3512_v40, %v4592_v5  ;;  %3289 = vmatprep.subr.mxu0 %v2445_v51  ;;  %3415 = vmatprep.subr.mxu1 %v2445_v51  ;;  %v4955_v63 = vld [vmem:[%s6118_s6 + $0x50] sm:$0xff] }
 0x184   :  { %v738_v39 = vpop.xlane.xlu1 %737  ;;  %v741_v19 = vpop.xlane.xlu0 %740  ;;  %v1165_v6 = vadd.f32 %v4758_v12, %v1094_v29  ;;  %v1025_v42 = vmul.f32 %v3514_v56, %v4597_v61  ;;  %3290 = vmatpush3.msra.mxu0 %v2445_v51  ;;  %3431 = vmatpush3.msra.mxu1 %v2445_v51 }
 0x185   :  { %3527 = vrsqrt.f32 %v904_v30  ;;  %v842_v28 = vmul.f32 0.03125, %v738_v39  ;;  %v843_v44 = vmul.f32 0.03125, %v741_v19  ;;  %3235 = vmatmul.mubr.msk.f32.gmra.mxu0 %vm221_vm0, %v1164_v13  ;;  %v1095_v5 = vmul.f32 %v4752_v32, %v1024_v59  ;;  %3291 = vmatprep.subr.mxu0 %v2444_v46  ;;  %v4965_v30 = vld [vmem:[%s6118_s6 + $0x48] sm:$0xff] }
 0x186   :  { %v3516_v60 = vpop.eup %3515  ;;  %3529 = vrsqrt.f32 %v905_v16  ;;  %3237 = vmatprep.mubr.msk.f32.mxu0 %vm221_vm0, %v1165_v6  ;;  %v1096_v61 = vmul.f32 %v4752_v32, %v1025_v42  ;;  %3292 = vmatpush3.msra.mxu0 %v2444_v46  ;;  %v4976_v6 = vld [vmem:[%s6118_s6 + $0x40] sm:$0xff] }
 0x187   :  { %v3518_v34 = vpop.eup %3517  ;;  %v906_v41 = vadd.f32 1e-05, %v842_v28  ;;  %v907_v31 = vadd.f32 1e-05, %v843_v44  ;;  %v1166_v50 = vadd.f32 %v4758_v12, %v1095_v5  ;;  %v1026_v36 = vmul.f32 %v3516_v60, %v4604_v10  ;;  %3293 = vmatprep.subr.mxu0 %v2443_v7  ;;  %3416 = vmatprep.subr.mxu1 %v2444_v46 }
 0x188   :  { %v744_v49 = vpop.xlane.xlu1 %743  ;;  %v747_v43 = vpop.xlane.xlu0 %746  ;;  %v1167_v2 = vadd.f32 %v4758_v12, %v1096_v61  ;;  %v1027_v0 = vmul.f32 %v3518_v34, %v4607_v62  ;;  %3294 = vmatpush3.msra.mxu0 %v2443_v7  ;;  %3432 = vmatpush3.msra.mxu1 %v2444_v46  ;;  %v4987_v61 = vld [vmem:[%s6118_s6 + $0x38] sm:$0xff] }
 0x189   :  { %3531 = vrsqrt.f32 %v906_v41  ;;  %v844_v33 = vmul.f32 0.03125, %v744_v49  ;;  %v845_v45 = vmul.f32 0.03125, %v747_v43  ;;  %3238 = vmatmul.mubr.msk.f32.gmra.mxu0 %vm221_vm0, %v1166_v50  ;;  %v1097_v10 = vmul.f32 %v4752_v32, %v1026_v36  ;;  %3295 = vmatprep.subr.mxu0 %v4955_v63  ;;  %v4998_v43 = vld [vmem:[%s6118_s6 + $0x30] sm:$0xff] }
 0x18a   :  { %v3520_v14 = vpop.eup %3519  ;;  %3533 = vrsqrt.f32 %v907_v31  ;;  %3240 = vmatprep.mubr.msk.f32.mxu0 %vm221_vm0, %v1167_v2  ;;  %v1098_v62 = vmul.f32 %v4752_v32, %v1027_v0  ;;  %3296 = vmatpush3.msra.mxu0 %v4955_v63 }
 0x18b   :  { %v3522_v37 = vpop.eup %3521  ;;  %v908_v47 = vadd.f32 1e-05, %v844_v33  ;;  %v909_v40 = vadd.f32 1e-05, %v845_v45  ;;  %v1168_v29 = vadd.f32 %v4758_v12, %v1097_v10  ;;  %v1028_v56 = vmul.f32 %v3520_v14, %v4616_v11  ;;  %3297 = vmatprep.subr.mxu0 %v4965_v30  ;;  %3417 = vmatprep.subr.mxu1 %v2443_v7  ;;  %v5009_v14 = vld [vmem:[%s6118_s6 + $0x28] sm:$0xff] }
 0x18c   :  { %v750_v16 = vpop.xlane.xlu1 %749  ;;  %v753_v13 = vpop.xlane.xlu0 %752  ;;  %v1169_v59 = vadd.f32 %v4758_v12, %v1098_v62  ;;  %v1029_v51 = vmul.f32 %v3522_v37, %v4625_v52  ;;  %3298 = vmatpush3.msra.mxu0 %v4965_v30  ;;  %3433 = vmatpush3.msra.mxu1 %v2443_v7 }
 0x18d   :  { %3535 = vrsqrt.f32 %v908_v47  ;;  %v846_v39 = vmul.f32 0.03125, %v750_v16  ;;  %v847_v11 = vmul.f32 0.03125, %v753_v13  ;;  %3241 = vmatmul.mubr.msk.f32.gmra.mxu0 %vm221_vm0, %v1168_v29  ;;  %v1099_v19 = vmul.f32 %v4752_v32, %v1028_v56  ;;  %3299 = vmatprep.subr.mxu0 %v4976_v6  ;;  %v5022_v16 = vld [vmem:[%s6118_s6 + $0x20] sm:$0xff] }
 0x18e   :  { %v3524_v42 = vpop.eup %3523  ;;  %3537 = vrsqrt.f32 %v909_v40  ;;  %3243 = vmatprep.mubr.msk.f32.mxu0 %vm221_vm0, %v1169_v59  ;;  %v1100_v52 = vmul.f32 %v4752_v32, %v1029_v51  ;;  %3300 = vmatpush3.msra.mxu0 %v4976_v6 }
 0x18f   :  { %v3526_v28 = vpop.eup %3525  ;;  %v910_v44 = vadd.f32 1e-05, %v846_v39  ;;  %v911_v5 = vadd.f32 1e-05, %v847_v11  ;;  %v1170_v46 = vadd.f32 %v4758_v12, %v1099_v19  ;;  %v1030_v60 = vmul.f32 %v3524_v42, %v4632_v23  ;;  %3301 = vmatprep.subr.mxu0 %v4987_v61  ;;  %3418 = vmatprep.subr.mxu1 %v4955_v63  ;;  %v5034_v19 = vld [vmem:[%s6118_s6 + $0x18] sm:$0xff] }
 0x190   :  { %v756_v34 = vpop.xlane.xlu1 %755  ;;  %v759_v41 = vpop.xlane.xlu0 %758  ;;  %v1171_v31 = vadd.f32 %v4758_v12, %v1100_v52  ;;  %v1031_v50 = vmul.f32 %v3526_v28, %v4635_v48  ;;  %3302 = vmatpush3.msra.mxu0 %v4987_v61  ;;  %3434 = vmatpush3.msra.mxu1 %v4955_v63 }
 0x191   :  { %3539 = vrsqrt.f32 %v910_v44  ;;  %v848_v36 = vmul.f32 0.03125, %v756_v34  ;;  %v849_v23 = vmul.f32 0.03125, %v759_v41  ;;  %3244 = vmatmul.mubr.msk.f32.gmra.mxu0 %vm221_vm0, %v1170_v46  ;;  %v1101_v49 = vmul.f32 %v4752_v32, %v1030_v60  ;;  %3303 = vmatprep.subr.mxu0 %v4998_v43  ;;  %v5046_v60 = vld [vmem:[%s6118_s6 + $0x10] sm:$0xff] }
 0x192   :  { %v3528_v2 = vpop.eup %3527  ;;  %3541 = vrsqrt.f32 %v911_v5  ;;  %3246 = vmatprep.mubr.msk.f32.mxu0 %vm221_vm0, %v1171_v31  ;;  %v1102_v48 = vmul.f32 %v4752_v32, %v1031_v50  ;;  %3304 = vmatpush3.msra.mxu0 %v4998_v43 }
 0x193   :  { %v3530_v7 = vpop.eup %3529  ;;  %v912_v0 = vadd.f32 1e-05, %v848_v36  ;;  %v913_v33 = vadd.f32 1e-05, %v849_v23  ;;  %v1172_v45 = vadd.f32 %v4758_v12, %v1101_v49  ;;  %v1032_v10 = vmul.f32 %v3528_v2, %v4640_v21  ;;  %3305 = vmatprep.subr.mxu0 %v5009_v14  ;;  %3419 = vmatprep.subr.mxu1 %v4965_v30  ;;  %v5058_v23 = vld [vmem:[%s6118_s6 + $0x8] sm:$0xff] }
 0x194   :  { %v762_v62 = vpop.xlane.xlu1 %761  ;;  %v765_v37 = vpop.xlane.xlu0 %764  ;;  %v1173_v47 = vadd.f32 %v4758_v12, %v1102_v48  ;;  %v1033_v40 = vmul.f32 %v3530_v7, %v4645_v17  ;;  %3306 = vmatpush3.msra.mxu0 %v5009_v14  ;;  %3435 = vmatpush3.msra.mxu1 %v4965_v30 }
 0x195   :  { %3543 = vrsqrt.f32 %v912_v0  ;;  %v850_v21 = vmul.f32 0.03125, %v762_v62  ;;  %v851_v29 = vmul.f32 0.03125, %v765_v37  ;;  %3247 = vmatmul.mubr.msk.f32.gmra.mxu0 %vm221_vm0, %v1172_v45  ;;  %v1103_v56 = vmul.f32 %v4752_v32, %v1032_v10  ;;  %3307 = vmatprep.subr.mxu0 %v5022_v16  ;;  %v5068_v0 = vld [vmem:[%s6116_s2] ss:$0 sm:$0xff] }
 0x196   :  { %v3532_v13 = vpop.eup %3531  ;;  %3545 = vrsqrt.f32 %v913_v33  ;;  %3249 = vmatprep.mubr.msk.f32.mxu0 %vm221_vm0, %v1173_v47  ;;  %v1104_v17 = vmul.f32 %v4752_v32, %v1033_v40  ;;  %3308 = vmatpush3.msra.mxu0 %v5022_v16  ;;  %v5083_v37 = vld [vmem:[%s6117_s3] ss:$0 sm:$0xff] }
 0x197   :  { %v3534_v63 = vpop.eup %3533  ;;  %v914_v59 = vadd.f32 1e-05, %v850_v21  ;;  %v915_v51 = vadd.f32 1e-05, %v851_v29  ;;  %v1174_v39 = vadd.f32 %v4758_v12, %v1103_v56  ;;  %v1034_v11 = vmul.f32 %v3532_v13, %v4652_v1  ;;  %3309 = vmatprep.subr.mxu0 %v5034_v19  ;;  %3420 = vmatprep.subr.mxu1 %v4976_v6 }
 0x198   :  { %v768_v42 = vpop.xlane.xlu1 %767  ;;  %v771_v52 = vpop.xlane.xlu0 %770  ;;  %v1175_v28 = vadd.f32 %v4758_v12, %v1104_v17  ;;  %v1035_v44 = vmul.f32 %v3534_v63, %v4655_v20  ;;  %3310 = vmatpush3.msra.mxu0 %v5034_v19  ;;  %3436 = vmatpush3.msra.mxu1 %v4976_v6 }
 0x199   :  { %3547 = vrsqrt.f32 %v914_v59  ;;  %v852_v1 = vmul.f32 0.03125, %v768_v42  ;;  %v853_v5 = vmul.f32 0.03125, %v771_v52  ;;  %3250 = vmatmul.mubr.msk.f32.gmra.mxu0 %vm221_vm0, %v1174_v39  ;;  %v1105_v46 = vmul.f32 %v4752_v32, %v1034_v11  ;;  %3311 = vmatprep.subr.mxu0 %v5046_v60  ;;  %v6305_v11 = vld [vmem:[#allocation73_spill] sm:$0xff] }
 0x19a   :  { %v3536_v34 = vpop.eup %3535  ;;  %3549 = vrsqrt.f32 %v915_v51  ;;  %3252 = vmatprep.mubr.msk.f32.mxu0 %vm221_vm0, %v1175_v28  ;;  %v1106_v20 = vmul.f32 %v4752_v32, %v1035_v44  ;;  %3312 = vmatpush3.msra.mxu0 %v5046_v60 }
 0x19b   :  { %v3538_v30 = vpop.eup %3537  ;;  %v916_v41 = vadd.f32 1e-05, %v852_v1  ;;  %v917_v31 = vadd.f32 1e-05, %v853_v5  ;;  %v1176_v50 = vadd.f32 %v4758_v12, %v1105_v46  ;;  %v1036_v36 = vmul.f32 %v3536_v34, %v4664_v4  ;;  %3421 = vmatprep.subr.mxu1 %v4987_v61  ;;  %3313 = vmatprep.subr.mxu0 %v5058_v23  ;;  %v6306_v1 = vld [vmem:[#allocation74_spill] sm:$0xff]  ;;  %v6307_v46 = vld [vmem:[#allocation75_spill] sm:$0xff] }
 0x19c   :  { %v774_v49 = vpop.xlane.xlu1 %773  ;;  %v777_v32 = vpop.xlane.xlu0 %776  ;;  %v1177_v2 = vadd.f32 %v4758_v12, %v1106_v20  ;;  %v1037_v48 = vmul.f32 %v3538_v30, %v4673_v58  ;;  %v5075_v58 = vld [vmem:[%s6118_s6] sm:$0xff]  ;;  %3437 = vmatpush3.msra.mxu1 %v4987_v61  ;;  %3314 = vmatpush3.msra.mxu0 %v5058_v23 }
 0x19d   :  { %3551 = vrsqrt.f32 %v916_v41  ;;  %v854_v4 = vmul.f32 0.03125, %v774_v49  ;;  %v855_v7 = vmul.f32 0.03125, %v777_v32  ;;  %3253 = vmatmul.mubr.msk.f32.gmra.mxu0 %vm221_vm0, %v1176_v50  ;;  %v1107_v33 = vmul.f32 %v5068_v0, %v1036_v36  ;;  %3422 = vmatprep.subr.mxu1 %v4998_v43  ;;  %v6308_v36 = vld [vmem:[#allocation76_spill] sm:$0xff] }
 0x19e   :  { %v3540_v12 = vpop.eup %3539  ;;  %3553 = vrsqrt.f32 %v917_v31  ;;  %3255 = vmatprep.mubr.msk.f32.mxu0 %vm221_vm0, %v1177_v2  ;;  %v1108_v6 = vmul.f32 %v5068_v0, %v1037_v48  ;;  %3315 = vmatprep.subr.mxu0 %v5075_v58 }
 0x19f   :  { %v3542_v45 = vpop.eup %3541  ;;  %v918_v10 = vadd.f32 1e-05, %v854_v4  ;;  %v919_v62 = vadd.f32 1e-05, %v855_v7  ;;  %v1178_v47 = vadd.f32 %v5083_v37, %v1107_v33  ;;  %v1038_v40 = vmul.f32 %v3540_v12, %v4680_v22  ;;  %3438 = vmatpush3.msra.mxu1 %v4998_v43  ;;  %3316 = vmatpush3.msra.mxu0 %v5075_v58  ;;  %v6309_v4 = vld [vmem:[#allocation77_spill] sm:$0xff]  ;;  %v6310_v33 = vld [vmem:[#allocation78_spill] sm:$0xff] }
 0x1a0   :  { %v780_v21 = vpop.xlane.xlu1 %779  ;;  %v1179_v29 = vadd.f32 %v5083_v37, %v1108_v6  ;;  %v1039_v56 = vmul.f32 %v3542_v45, %v4683_v55  ;;  %3423 = vmatprep.subr.mxu1 %v5009_v14 }
 0x1a1   :  { %3555 = vrsqrt.f32 %v918_v10  ;;  %v856_v13 = vmul.f32 0.03125, %v780_v21  ;;  %3256 = vmatmul.mubr.msk.f32.gmra.mxu0 %vm221_vm0, %v1178_v47  ;;  %v1109_v17 = vmul.f32 %v5068_v0, %v1038_v40  ;;  %3439 = vmatpush3.msra.mxu1 %v5009_v14 }
 0x1a2   :  { %v3544_v22 = vpop.eup %3543  ;;  %3557 = vrsqrt.f32 %v919_v62  ;;  %3258 = vmatprep.mubr.msk.f32.mxu0 %vm221_vm0, %v1179_v29  ;;  %v1110_v61 = vmul.f32 %v5068_v0, %v1039_v56  ;;  %3424 = vmatprep.subr.mxu1 %v5022_v16  ;;  %v6311_v62 = vld [vmem:[#allocation79_spill] sm:$0xff] }
 0x1a3   :  { %v3546_v55 = vpop.eup %3545  ;;  %v920_v63 = vadd.f32 1e-05, %v856_v13  ;;  %v1180_v59 = vadd.f32 %v5083_v37, %v1109_v17  ;;  %v1040_v51 = vmul.f32 %v3544_v22, %v4688_v57  ;;  %3440 = vmatpush3.msra.mxu1 %v5022_v16 }
 0x1a4   :  { %v1181_v39 = vadd.f32 %v5083_v37, %v1110_v61  ;;  %v1041_v43 = vmul.f32 %v3546_v55, %v6305_v11  ;;  %3425 = vmatprep.subr.mxu1 %v5034_v19 }
 0x1a5   :  { %3559 = vrsqrt.f32 %v920_v63  ;;  %3259 = vmatmul.mubr.msk.f32.gmra.mxu0 %vm221_vm0, %v1180_v59  ;;  %v1111_v42 = vmul.f32 %v5068_v0, %v1040_v51  ;;  %3441 = vmatpush3.msra.mxu1 %v5034_v19 }
 0x1a6   :  { %v3548_v52 = vpop.eup %3547  ;;  %3261 = vmatprep.mubr.msk.f32.mxu0 %vm221_vm0, %v1181_v39  ;;  %v1112_v57 = vmul.f32 %v5068_v0, %v1041_v43  ;;  %3426 = vmatprep.subr.mxu1 %v5046_v60 }
 0x1a7   :  { %v3550_v28 = vpop.eup %3549  ;;  %v1182_v44 = vadd.f32 %v5083_v37, %v1111_v42  ;;  %v1042_v5 = vmul.f32 %v3548_v52, %v6306_v1  ;;  %3442 = vmatpush3.msra.mxu1 %v5046_v60 }
 0x1a8   :  { %v1183_v14 = vadd.f32 %v5083_v37, %v1112_v57  ;;  %v1043_v34 = vmul.f32 %v3550_v28, %v6307_v46  ;;  %3427 = vmatprep.subr.mxu1 %v5058_v23 }
 0x1a9   :  { %3262 = vmatmul.mubr.msk.f32.gmra.mxu0 %vm221_vm0, %v1182_v44  ;;  %v1113_v20 = vmul.f32 %v5068_v0, %v1042_v5  ;;  %3443 = vmatpush3.msra.mxu1 %v5058_v23 }
 0x1aa   :  { %v3552_v16 = vpop.eup %3551  ;;  %3264 = vmatprep.mubr.msk.f32.mxu0 %vm221_vm0, %v1183_v14  ;;  %v1114_v30 = vmul.f32 %v5068_v0, %v1043_v34  ;;  %3428 = vmatprep.subr.mxu1 %v5075_v58 }
 0x1ab   :  { %v3554_v41 = vpop.eup %3553  ;;  %v1184_v31 = vadd.f32 %v5083_v37, %v1113_v20  ;;  %v1044_v50 = vmul.f32 %v3552_v16, %v4712_v18  ;;  %3444 = vmatpush3.msra.mxu1 %v5075_v58 }
 0x1ac   :  { %v1185_v19 = vadd.f32 %v5083_v37, %v1114_v30  ;;  %v1045_v49 = vmul.f32 %v3554_v41, %v6308_v36 }
 0x1ad   :  { %3265 = vmatmul.mubr.msk.f32.gmra.mxu0 %vm221_vm0, %v1184_v31  ;;  %v1115_v32 = vmul.f32 %v5068_v0, %v1044_v50 }
 0x1ae   :  { %v3556_v60 = vpop.eup %3555  ;;  %3267 = vmatprep.mubr.msk.f32.mxu0 %vm221_vm0, %v1185_v19  ;;  %v1116_v2 = vmul.f32 %v5068_v0, %v1045_v49 }
 0x1af   :  { %v3558_v18 = vpop.eup %3557  ;;  %v1186_v48 = vadd.f32 %v5083_v37, %v1115_v32  ;;  %v1046_v7 = vmul.f32 %v3556_v60, %v6309_v4  ;;  %v5168_v60 = vld [vmem:[%s6119_s5] ss:$0 sm:$0xff] }
 0x1b0   :  { %v1187_v23 = vadd.f32 %v5083_v37, %v1116_v2  ;;  %v1047_v12 = vmul.f32 %v3558_v18, %v6310_v33 }
 0x1b1   :  { %3268 = vmatmul.mubr.msk.f32.gmra.mxu0 %vm221_vm0, %v1186_v48  ;;  %v1117_v6 = vmul.f32 %v5068_v0, %v1046_v7 }
 0x1b2   :  { %v3560_v45 = vpop.eup %3559  ;;  %3270 = vmatprep.mubr.msk.f32.mxu0 %vm221_vm0, %v1187_v23  ;;  %v1118_v10 = vmul.f32 %v5068_v0, %v1047_v12 }
 0x1b3   :  { %v1188_v58 = vadd.f32 %v5083_v37, %v1117_v6  ;;  %v1048_v47 = vmul.f32 %v3560_v45, %v6311_v62 }
 0x1b4   :  { %v1189_v40 = vadd.f32 %v5083_v37, %v1118_v10 }
 0x1b5   :  { %3271 = vmatmul.mubr.msk.f32.gmra.mxu0 %vm221_vm0, %v1188_v58  ;;  %v1119_v21 = vmul.f32 %v5068_v0, %v1048_v47 }
 0x1b6   :  { %3273 = vmatprep.mubr.msk.f32.mxu0 %vm221_vm0, %v1189_v40 }
 0x1b7   :  { %v1190_v29 = vadd.f32 %v5083_v37, %v1119_v21 }
 0x1b9   :  { %3274 = vmatmul.mubr.msk.f32.gmra.mxu0 %vm221_vm0, %v1190_v29 }
 0x1d9   :  { %v783_v56 = vpop.xlane.xlu0 %782 }
 0x1da   :  { %v857_v13 = vmul.f32 0.03125, %v783_v56 }
 0x1dc   :  { %v921_v17 = vadd.f32 1e-05, %v857_v13 }
 0x1dd   :  { %v786_v22 = vpop.xlane.xlu1 %785 }
 0x1de   :  { %3561 = vrsqrt.f32 %v921_v17  ;;  %v858_v61 = vmul.f32 0.03125, %v786_v22 }
 0x1e0   :  { %v922_v55 = vadd.f32 1e-05, %v858_v61 }
 0x1e1   :  { %v789_v63 = vpop.xlane.xlu0 %788 }
 0x1e2   :  { %3563 = vrsqrt.f32 %v922_v55  ;;  %v859_v59 = vmul.f32 0.03125, %v789_v63 }
 0x1e4   :  { %v923_v51 = vadd.f32 1e-05, %v859_v59 }
 0x1e5   :  { %v792_v39 = vpop.xlane.xlu1 %791 }
 0x1e6   :  { %3565 = vrsqrt.f32 %v923_v51  ;;  %v860_v11 = vmul.f32 0.03125, %v792_v39 }
 0x1e8   :  { %v924_v43 = vadd.f32 1e-05, %v860_v11 }
 0x1e9   :  { %v795_v42 = vpop.xlane.xlu0 %794 }
 0x1ea   :  { %3567 = vrsqrt.f32 %v924_v43  ;;  %v861_v52 = vmul.f32 0.03125, %v795_v42 }
 0x1eb   :  { %v3562_v57 = vpop.eup %3561 }
 0x1ec   :  { %v925_v28 = vadd.f32 1e-05, %v861_v52  ;;  %v1049_v44 = vmul.f32 %v3562_v57, %v4800_v38 }
 0x1ed   :  { %v798_v1 = vpop.xlane.xlu1 %797 }
 0x1ee   :  { %3569 = vrsqrt.f32 %v925_v28  ;;  %v862_v5 = vmul.f32 0.03125, %v798_v1  ;;  %v1120_v14 = vmul.f32 %v5068_v0, %v1049_v44 }
 0x1ef   :  { %v3564_v46 = vpop.eup %3563 }
 0x1f0   :  { %v926_v34 = vadd.f32 1e-05, %v862_v5  ;;  %v1191_v20 = vadd.f32 %v5083_v37, %v1120_v14  ;;  %v1050_v16 = vmul.f32 %v3564_v46, %v4813_v24 }
 0x1f2   :  { %3571 = vrsqrt.f32 %v926_v34  ;;  %3276 = vmatprep.mubr.msk.f32.mxu0 %vm221_vm0, %v1191_v20  ;;  %v1121_v30 = vmul.f32 %v5068_v0, %v1050_v16 }
 0x1f3   :  { %v3566_v41 = vpop.eup %3565 }
 0x1f4   :  { %v1192_v31 = vadd.f32 %v5083_v37, %v1121_v30  ;;  %v1051_v38 = vmul.f32 %v3566_v41, %v4826_v35 }
 0x1f6   :  { %3277 = vmatmul.mubr.msk.f32.gmra.mxu0 %vm221_vm0, %v1192_v31  ;;  %v1122_v50 = vmul.f32 %v5068_v0, %v1051_v38 }
 0x1f7   :  { %v3568_v19 = vpop.eup %3567 }
 0x1f8   :  { %v1193_v36 = vadd.f32 %v5083_v37, %v1122_v50  ;;  %v1052_v49 = vmul.f32 %v3568_v19, %v4840_v27 }
 0x1fa   :  { %3279 = vmatprep.mubr.msk.f32.mxu0 %vm221_vm0, %v1193_v36  ;;  %v1123_v24 = vmul.f32 %v5068_v0, %v1052_v49 }
 0x1fb   :  { %v3570_v32 = vpop.eup %3569 }
 0x1fc   :  { %v1194_v35 = vadd.f32 %v5083_v37, %v1123_v24  ;;  %v1053_v2 = vmul.f32 %v3570_v32, %v4854_v25 }
 0x1fd   :  { %v3191_v18 = vpop.f32.mrf.mxu0 }
 0x1fe   :  { %v5173_v48 = vadd.f32 %v3191_v18, %v5168_v60  ;;  %3280 = vmatmul.mubr.msk.f32.gmra.mxu0 %vm221_vm0, %v1194_v35  ;;  %v1124_v27 = vmul.f32 %v5068_v0, %v1053_v2 }
 0x1ff   :  { %v3572_v4 = vpop.eup %3571  ;;  %v1537_v7 = vpop.f32.mrf.mxu0 }
 0x200   :  { %v1921_v23 = vmul.f32 0.044715, %v5173_v48  ;;  %v5179_v33 = vadd.f32 %v5168_v60, %v1537_v7  ;;  %v1195_v12 = vadd.f32 %v5083_v37, %v1124_v27  ;;  %v1054_v25 = vmul.f32 %v3572_v4, %v4866_v9 }
 0x201   :  { %v3194_v6 = vpop.f32.mrf.mxu0 }
 0x202   :  { %v1985_v45 = vmul.f32 %v1921_v23, %v5173_v48  ;;  %v1920_v10 = vmul.f32 0.044715, %v5179_v33  ;;  %v5186_v58 = vadd.f32 %v3194_v6, %v5168_v60  ;;  %3282 = vmatprep.mubr.msk.f32.mxu0 %vm221_vm0, %v1195_v12  ;;  %v1125_v47 = vmul.f32 %v5068_v0, %v1054_v25 }
 0x203   :  { %v1547_v62 = vpop.f32.mrf.mxu0 }
 0x204   :  { %v2049_v40 = vmul.f32 %v1985_v45, %v5173_v48  ;;  %v1984_v21 = vmul.f32 %v1920_v10, %v5179_v33  ;;  %v1923_v29 = vmul.f32 0.044715, %v5186_v58  ;;  %v5194_v9 = vadd.f32 %v5168_v60, %v1547_v62 }
 0x205   :  { %v3197_v56 = vpop.f32.mrf.mxu0  ;;  %v1196_v13 = vadd.f32 %v5083_v37, %v1125_v47 }
 0x206   :  { %v2113_v17 = vadd.f32 %v2049_v40, %v5173_v48  ;;  %v1987_v22 = vmul.f32 %v1923_v29, %v5186_v58  ;;  %v1922_v61 = vmul.f32 0.044715, %v5194_v9  ;;  %v5201_v0 = vadd.f32 %v3197_v56, %v5168_v60 }
 0x207   :  { %3283 = vmatmul.mubr.msk.f32.gmra.mxu0 %vm221_vm0, %v1196_v13  ;;  %v1557_v55 = vpop.f32.mrf.mxu0  ;;  %v2048_v63 = vmul.f32 %v1984_v21, %v5179_v33 }
 0x208   :  { %v2177_v59 = vmul.f32 0.7978846, %v2113_v17  ;;  %v1986_v51 = vmul.f32 %v1922_v61, %v5194_v9  ;;  %v1925_v39 = vmul.f32 0.044715, %v5201_v0  ;;  %v5208_v37 = vadd.f32 %v5168_v60, %v1557_v55 }
 0x209   :  { %v3200_v11 = vpop.f32.mrf.mxu0  ;;  %v2112_v43 = vadd.f32 %v2048_v63, %v5179_v33  ;;  %v2051_v42 = vmul.f32 %v1987_v22, %v5186_v58  ;;  %v1857_v22 = vmul.f32 0.5, %v5173_v48  ;;  %v1856_v55 = vmul.f32 0.5, %v5179_v33 }
 0x20a   :  { %3573 = vtanh.f32 %v2177_v59  ;;  %v1989_v52 = vmul.f32 %v1925_v39, %v5201_v0  ;;  %v1924_v57 = vmul.f32 0.044715, %v5208_v37  ;;  %v5215_v28 = vadd.f32 %v3200_v11, %v5168_v60 }
 0x20b   :  { %v1567_v44 = vpop.f32.mrf.mxu0  ;;  %v2176_v1 = vmul.f32 0.7978846, %v2112_v43  ;;  %v2050_v5 = vmul.f32 %v1986_v51, %v5194_v9  ;;  %v2115_v14 = vadd.f32 %v2051_v42, %v5186_v58  ;;  %v1859_v43 = vmul.f32 0.5, %v5186_v58 }
 0x20c   :  { %v1988_v46 = vmul.f32 %v1924_v57, %v5208_v37  ;;  %v1927_v34 = vmul.f32 0.044715, %v5215_v28  ;;  %v5222_v20 = vadd.f32 %v5168_v60, %v1567_v44  ;;  %v2053_v16 = vmul.f32 %v1989_v52, %v5201_v0 }
 0x20d   :  { %v3203_v30 = vpop.f32.mrf.mxu0  ;;  %3575 = vtanh.f32 %v2176_v1  ;;  %v2114_v41 = vadd.f32 %v2050_v5, %v5194_v9  ;;  %v2179_v31 = vmul.f32 0.7978846, %v2115_v14  ;;  %v1861_v58 = vmul.f32 0.5, %v5201_v0 }
 0x20e   :  { %v1991_v38 = vmul.f32 %v1927_v34, %v5215_v28  ;;  %v5228_v50 = vadd.f32 %v3203_v30, %v5168_v60  ;;  %v2052_v19 = vmul.f32 %v1988_v46, %v5208_v37  ;;  %v2117_v36 = vadd.f32 %v2053_v16, %v5201_v0 }
 0x20f   :  { %v1577_v49 = vpop.f32.mrf.mxu0  ;;  %v2178_v24 = vmul.f32 0.7978846, %v2114_v41  ;;  %3577 = vtanh.f32 %v2179_v31  ;;  %v1926_v32 = vmul.f32 0.044715, %v5222_v20  ;;  %v1858_v34 = vmul.f32 0.5, %v5194_v9 }
 0x210   :  { %v1929_v35 = vmul.f32 0.044715, %v5228_v50  ;;  %v5235_v2 = vadd.f32 %v5168_v60, %v1577_v49  ;;  %v2116_v18 = vadd.f32 %v2052_v19, %v5208_v37  ;;  %v2181_v27 = vmul.f32 0.7978846, %v2117_v36 }
 0x211   :  { %3579 = vtanh.f32 %v2178_v24  ;;  %v1990_v4 = vmul.f32 %v1926_v32, %v5222_v20  ;;  %v2055_v7 = vmul.f32 %v1991_v38, %v5215_v28  ;;  %v1860_v38 = vmul.f32 0.5, %v5208_v37 }
 0x212   :  { %v1993_v23 = vmul.f32 %v1929_v35, %v5228_v50  ;;  %v1928_v12 = vmul.f32 0.044715, %v5235_v2  ;;  %v3206_v6 = vpop.f32.mrf.mxu0  ;;  %v2180_v25 = vmul.f32 0.7978846, %v2116_v18  ;;  %3581 = vtanh.f32 %v2181_v27 }
 0x213   :  { %v5243_v45 = vadd.f32 %v3206_v6, %v5168_v60  ;;  %v2054_v10 = vmul.f32 %v1990_v4, %v5222_v20  ;;  %v2119_v62 = vadd.f32 %v2055_v7, %v5215_v28  ;;  %v1863_v18 = vmul.f32 0.5, %v5215_v28 }
 0x214   :  { %v1992_v47 = vmul.f32 %v1928_v12, %v5235_v2  ;;  %v1587_v40 = vpop.f32.mrf.mxu0  ;;  %3583 = vtanh.f32 %v2180_v25  ;;  %v2057_v21 = vmul.f32 %v1993_v23, %v5228_v50 }
 0x215   :  { %v1931_v29 = vmul.f32 0.044715, %v5243_v45  ;;  %v5251_v56 = vadd.f32 %v5168_v60, %v1587_v40  ;;  %v2118_v13 = vadd.f32 %v2054_v10, %v5222_v20  ;;  %v2183_v17 = vmul.f32 0.7978846, %v2119_v62 }
 0x216   :  { %v3209_v61 = vpop.f32.mrf.mxu0  ;;  %v2056_v63 = vmul.f32 %v1992_v47, %v5235_v2  ;;  %v2121_v59 = vadd.f32 %v2057_v21, %v5228_v50  ;;  %v1862_v47 = vmul.f32 0.5, %v5222_v20 }
 0x217   :  { %v3574_v51 = vpop.eup %3573  ;;  %v1930_v39 = vmul.f32 0.044715, %v5251_v56  ;;  %v5260_v11 = vadd.f32 %v3209_v61, %v5168_v60  ;;  %v2182_v42 = vmul.f32 0.7978846, %v2118_v13  ;;  %v1995_v52 = vmul.f32 %v1931_v29, %v5243_v45 }
 0x218   :  { %v1597_v57 = vpop.f32.mrf.mxu0  ;;  %3585 = vtanh.f32 %v2183_v17  ;;  %v2120_v48 = vadd.f32 %v2056_v63, %v5235_v2  ;;  %v2185_v33 = vmul.f32 0.7978846, %v2121_v59  ;;  %v2305_v5 = vadd.f32 1.0, %v3574_v51 }
 0x219   :  { %v1994_v44 = vmul.f32 %v1930_v39, %v5251_v56  ;;  %v5267_v1 = vadd.f32 %v5168_v60, %v1597_v57  ;;  %3587 = vtanh.f32 %v2182_v42  ;;  %v1933_v30 = vmul.f32 0.044715, %v5260_v11 }
 0x21a   :  { %v3576_v14 = vpop.eup %3575  ;;  %v3212_v46 = vpop.f32.mrf.mxu0  ;;  %v2184_v16 = vmul.f32 0.7978846, %v2120_v48  ;;  %3589 = vtanh.f32 %v2185_v33  ;;  %v2059_v9 = vmul.f32 %v1995_v52, %v5243_v45  ;;  %v2369_v35 = vmul.f32 %v2305_v5, %v1857_v22 }
 0x21b   :  { %v1932_v41 = vmul.f32 0.044715, %v5267_v1  ;;  %v2304_v31 = vadd.f32 1.0, %v3576_v14  ;;  %v5275_v36 = vadd.f32 %v3212_v46, %v5168_v60  ;;  %v2058_v24 = vmul.f32 %v1994_v44, %v5251_v56 }
 0x21c   :  { %v3578_v19 = vpop.eup %3577  ;;  %v1607_v49 = vpop.f32.mrf.mxu0  ;;  %3591 = vtanh.f32 %v2184_v16  ;;  %v2123_v12 = vadd.f32 %v2059_v9, %v5243_v45  ;;  %v1997_v25 = vmul.f32 %v1933_v30, %v5260_v11  ;;  %v1864_v57 = vmul.f32 0.5, %v5235_v2 }
 0x21d   :  { %v5280_v0 = vadd.f32 %v5168_v60, %v1607_v49  ;;  %v2368_v32 = vmul.f32 %v2304_v31, %v1856_v55  ;;  %v1996_v37 = vmul.f32 %v1932_v41, %v5267_v1  ;;  %v2307_v7 = vadd.f32 1.0, %v3578_v19 }
 0x21e   :  { %v3580_v27 = vpop.eup %3579  ;;  %v3215_v4 = vpop.f32.mrf.mxu0  ;;  %v2122_v23 = vadd.f32 %v2058_v24, %v5251_v56  ;;  %v1935_v28 = vmul.f32 0.044715, %v5275_v36  ;;  %v2187_v13 = vmul.f32 0.7978846, %v2123_v12  ;;  %v2061_v5 = vmul.f32 %v1997_v25, %v5260_v11 }
 0x21f   :  { %v3582_v6 = vpop.eup %3581  ;;  %v1934_v10 = vmul.f32 0.044715, %v5280_v0  ;;  %3317 = vmatprep.mubr.f32.mxu0 %v2368_v32  ;;  %v2306_v62 = vadd.f32 1.0, %v3580_v27  ;;  %v5291_v40 = vadd.f32 %v3215_v4, %v5168_v60  ;;  %v2371_v51 = vmul.f32 %v2307_v7, %v1859_v43 }
 0x220   :  { %v1617_v21 = vpop.f32.mrf.mxu0  ;;  %3318 = vmatmul.mubr.f32.vlgmr.msra.gmra.mxu0 %v2369_v35  ;;  %v2186_v29 = vmul.f32 0.7978846, %v2122_v23  ;;  %v2309_v63 = vadd.f32 1.0, %v3582_v6  ;;  %v2060_v39 = vmul.f32 %v1996_v37, %v5267_v1  ;;  %v1999_v46 = vmul.f32 %v1935_v28, %v5275_v36 }
 0x221   :  { %v3584_v17 = vpop.eup %3583  ;;  %v1998_v22 = vmul.f32 %v1934_v10, %v5280_v0  ;;  %v5295_v61 = vadd.f32 %v5168_v60, %v1617_v21  ;;  %v2370_v55 = vmul.f32 %v2306_v62, %v1858_v34  ;;  %v1937_v48 = vmul.f32 0.044715, %v5291_v40 }
 0x222   :  { %v3218_v59 = vpop.f32.mrf.mxu0  ;;  %v2308_v20 = vadd.f32 1.0, %v3584_v17  ;;  %3593 = vtanh.f32 %v2186_v29  ;;  %v2124_v43 = vadd.f32 %v2060_v39, %v5267_v1  ;;  %v2373_v16 = vmul.f32 %v2309_v63, %v1861_v58 }
 0x223   :  { %v1936_v42 = vmul.f32 0.044715, %v5295_v61  ;;  %v5300_v52 = vadd.f32 %v3218_v59, %v5168_v60  ;;  %3320 = vmatprep.mubr.f32.mxu0 %v2370_v55  ;;  %3595 = vtanh.f32 %v2187_v13  ;;  %v2062_v30 = vmul.f32 %v1998_v22, %v5280_v0 }
 0x224   :  { %v1627_v33 = vpop.f32.mrf.mxu0  ;;  %3321 = vmatmul.mubr.f32.gmra.mxu0 %v2371_v51  ;;  %v2372_v44 = vmul.f32 %v2308_v20, %v1860_v38  ;;  %v2188_v19 = vmul.f32 0.7978846, %v2124_v43  ;;  %v2125_v38 = vadd.f32 %v2061_v5, %v5260_v11  ;;  %v2001_v58 = vmul.f32 %v1937_v48, %v5291_v40 }
 0x225   :  { %v3586_v14 = vpop.eup %3585  ;;  %v5308_v34 = vadd.f32 %v5168_v60, %v1627_v33  ;;  %v2000_v41 = vmul.f32 %v1936_v42, %v5295_v61  ;;  %v1939_v24 = vmul.f32 0.044715, %v5300_v52  ;;  %v2126_v35 = vadd.f32 %v2062_v30, %v5280_v0 }
 0x226   :  { %v3588_v2 = vpop.eup %3587  ;;  %3323 = vmatprep.mubr.f32.mxu0 %v2372_v44  ;;  %v2311_v31 = vadd.f32 1.0, %v3586_v14  ;;  %3597 = vtanh.f32 %v2188_v19  ;;  %v2189_v37 = vmul.f32 0.7978846, %v2125_v38  ;;  %v2063_v25 = vmul.f32 %v1999_v46, %v5275_v36 }
 0x227   :  { %v3590_v49 = vpop.eup %3589  ;;  %v1938_v9 = vmul.f32 0.044715, %v5308_v34  ;;  %v2310_v32 = vadd.f32 1.0, %v3588_v2  ;;  %v2190_v6 = vmul.f32 0.7978846, %v2126_v35  ;;  %v2003_v21 = vmul.f32 %v1939_v24, %v5300_v52 }
 0x228   :  { %3324 = vmatmul.mubr.f32.gmra.mxu0 %v2373_v16  ;;  %v2375_v27 = vmul.f32 %v2311_v31, %v1863_v18  ;;  %v2313_v12 = vadd.f32 1.0, %v3590_v49  ;;  %3599 = vtanh.f32 %v2189_v37  ;;  %v2127_v29 = vadd.f32 %v2063_v25, %v5275_v36 }
 0x229   :  { %v3592_v4 = vpop.eup %3591  ;;  %v3221_v7 = vpop.f32.mrf.mxu0  ;;  %v2374_v23 = vmul.f32 %v2310_v32, %v1862_v47  ;;  %v2002_v10 = vmul.f32 %v1938_v9, %v5308_v34  ;;  %3601 = vtanh.f32 %v2190_v6  ;;  %v2064_v47 = vmul.f32 %v2000_v41, %v5295_v61 }
 0x22a   :  { %v5320_v62 = vadd.f32 %v3221_v7, %v5168_v60  ;;  %v2312_v28 = vadd.f32 1.0, %v3592_v4  ;;  %v1865_v55 = vmul.f32 0.5, %v5228_v50  ;;  %v1867_v63 = vmul.f32 0.5, %v5243_v45 }
 0x22b   :  { %3326 = vmatprep.mubr.f32.mxu1 %v2374_v23  ;;  %v1637_v18 = vpop.f32.mrf.mxu0  ;;  %v2191_v59 = vmul.f32 0.7978846, %v2127_v29  ;;  %v2128_v51 = vadd.f32 %v2064_v47, %v5295_v61  ;;  %v2065_v20 = vmul.f32 %v2001_v58, %v5291_v40  ;;  %v1866_v48 = vmul.f32 0.5, %v5251_v56 }
 0x22c   :  { %v1941_v13 = vmul.f32 0.044715, %v5320_v62  ;;  %v5327_v17 = vadd.f32 %v5168_v60, %v1637_v18  ;;  %3327 = vmatmul.mubr.f32.vlgmr.msra.gmra.mxu1 %v2375_v27  ;;  %v2376_v22 = vmul.f32 %v2312_v28, %v1864_v57  ;;  %v2377_v42 = vmul.f32 %v2313_v12, %v1865_v55 }
 0x22d   :  { %v2066_v33 = vmul.f32 %v2002_v10, %v5308_v34  ;;  %3603 = vtanh.f32 %v2191_v59  ;;  %v2192_v57 = vmul.f32 0.7978846, %v2128_v51  ;;  %v2129_v50 = vadd.f32 %v2065_v20, %v5291_v40 }
 0x22e   :  { %v1940_v39 = vmul.f32 0.044715, %v5327_v17  ;;  %3329 = vmatprep.mubr.f32.mxu1 %v2376_v22  ;;  %v2067_v45 = vmul.f32 %v2003_v21, %v5300_v52  ;;  %v2005_v5 = vmul.f32 %v1941_v13, %v5320_v62  ;;  %v1868_v4 = vmul.f32 0.5, %v5267_v1 }
 0x22f   :  { %v3594_v44 = vpop.eup %3593  ;;  %v2130_v16 = vadd.f32 %v2066_v33, %v5308_v34  ;;  %3605 = vtanh.f32 %v2192_v57  ;;  %v2193_v2 = vmul.f32 0.7978846, %v2129_v50  ;;  %v1869_v28 = vmul.f32 0.5, %v5260_v11 }
 0x230   :  { %v3596_v43 = vpop.eup %3595  ;;  %v2004_v14 = vmul.f32 %v1940_v39, %v5327_v17  ;;  %3330 = vmatmul.mubr.f32.gmra.mxu1 %v2377_v42  ;;  %v2314_v46 = vadd.f32 1.0, %v3594_v44  ;;  %v2131_v41 = vadd.f32 %v2067_v45, %v5300_v52  ;;  %v2069_v7 = vmul.f32 %v2005_v5, %v5320_v62 }
 0x231   :  { %v3224_v30 = vpop.f32.mrf.mxu0  ;;  %v2315_v56 = vadd.f32 1.0, %v3596_v43  ;;  %v2194_v38 = vmul.f32 0.7978846, %v2130_v16  ;;  %3607 = vtanh.f32 %v2193_v2  ;;  %v1870_v22 = vmul.f32 0.5, %v5280_v0 }
 0x232   :  { %v5343_v31 = vadd.f32 %v3224_v30, %v5168_v60  ;;  %v2378_v19 = vmul.f32 %v2314_v46, %v1866_v48  ;;  %v2068_v49 = vmul.f32 %v2004_v14, %v5327_v17  ;;  %v2195_v32 = vmul.f32 0.7978846, %v2131_v41 }
 0x233   :  { %v1647_v24 = vpop.f32.mrf.mxu0  ;;  %v2379_v9 = vmul.f32 %v2315_v56, %v1867_v63  ;;  %3609 = vtanh.f32 %v2194_v38  ;;  %v3598_v37 = vpop.eup %3597  ;;  %v2133_v21 = vadd.f32 %v2069_v7, %v5320_v62  ;;  %v1871_v57 = vmul.f32 0.5, %v5275_v36 }
 0x234   :  { %v1943_v35 = vmul.f32 0.044715, %v5343_v31  ;;  %3332 = vmatprep.mubr.f32.mxu1 %v2378_v19  ;;  %v5348_v58 = vadd.f32 %v5168_v60, %v1647_v24  ;;  %v2132_v27 = vadd.f32 %v2068_v49, %v5327_v17  ;;  %3611 = vtanh.f32 %v2195_v32 }
 0x235   :  { %3333 = vmatmul.mubr.f32.gmra.mxu1 %v2379_v9  ;;  %v2316_v6 = vadd.f32 1.0, %v3598_v37  ;;  %v3600_v10 = vpop.eup %3599  ;;  %v2197_v63 = vmul.f32 0.7978846, %v2133_v21  ;;  %v1872_v5 = vmul.f32 0.5, %v5295_v61  ;;  %v1873_v14 = vmul.f32 0.5, %v5291_v40 }
 0x236   :  { %v2007_v23 = vmul.f32 %v1943_v35, %v5343_v31  ;;  %v1942_v12 = vmul.f32 0.044715, %v5348_v58  ;;  %v2196_v25 = vmul.f32 0.7978846, %v2132_v27  ;;  %v3602_v18 = vpop.eup %3601  ;;  %v2317_v13 = vadd.f32 1.0, %v3600_v10 }
 0x237   :  { %v2380_v47 = vmul.f32 %v2316_v6, %v1868_v4  ;;  %v2318_v55 = vadd.f32 1.0, %v3602_v18  ;;  %v1874_v49 = vmul.f32 0.5, %v5308_v34  ;;  %v1875_v4 = vmul.f32 0.5, %v5300_v52 }
 0x238   :  { %v2006_v29 = vmul.f32 %v1942_v12, %v5348_v58  ;;  %3613 = vtanh.f32 %v2196_v25  ;;  %v2071_v59 = vmul.f32 %v2007_v23, %v5343_v31  ;;  %v2381_v51 = vmul.f32 %v2317_v13, %v1869_v28 }
 0x239   :  { %v3227_v1 = vpop.f32.mrf.mxu0  ;;  %3335 = vmatprep.mubr.f32.mxu1 %v2380_v47  ;;  %v2382_v39 = vmul.f32 %v2318_v55, %v1870_v22  ;;  %3615 = vtanh.f32 %v2197_v63  ;;  %v1876_v63 = vmul.f32 0.5, %v5327_v17 }
 0x23a   :  { %v5361_v20 = vadd.f32 %v3227_v1, %v5168_v60  ;;  %v2070_v11 = vmul.f32 %v2006_v29, %v5348_v58  ;;  %v2135_v48 = vadd.f32 %v2071_v59, %v5343_v31  ;;  %v3604_v33 = vpop.eup %3603  ;;  %3336 = vmatmul.mubr.f32.gmra.mxu1 %v2381_v51  ;;  %v1877_v59 = vmul.f32 0.5, %v5320_v62 }
 0x23b   :  { %v1657_v42 = vpop.f32.mrf.mxu0  ;;  %3338 = vmatprep.mubr.f32.mxu1 %v2382_v39  ;;  %v2319_v45 = vadd.f32 1.0, %v3604_v33 }
 0x23c   :  { %v1945_v0 = vmul.f32 0.044715, %v5361_v20  ;;  %v5367_v44 = vadd.f32 %v5168_v60, %v1657_v42  ;;  %v2134_v50 = vadd.f32 %v2070_v11, %v5348_v58  ;;  %v2199_v46 = vmul.f32 0.7978846, %v2135_v48  ;;  %v3606_v16 = vpop.eup %3605 }
 0x23d   :  { %v3230_v43 = vpop.f32.mrf.mxu0  ;;  %v2383_v36 = vmul.f32 %v2319_v45, %v1871_v57  ;;  %v2320_v19 = vadd.f32 1.0, %v3606_v16 }
 0x23e   :  { %v2009_v30 = vmul.f32 %v1945_v0, %v5361_v20  ;;  %v1944_v56 = vmul.f32 0.044715, %v5367_v44  ;;  %v5376_v2 = vadd.f32 %v3230_v43, %v5168_v60  ;;  %v2198_v41 = vmul.f32 0.7978846, %v2134_v50  ;;  %v3608_v24 = vpop.eup %3607 }
 0x23f   :  { %v1667_v38 = vpop.f32.mrf.mxu0  ;;  %3617 = vtanh.f32 %v2199_v46  ;;  %3339 = vmatmul.mubr.f32.gmra.mxu1 %v2383_v36  ;;  %v2384_v35 = vmul.f32 %v2320_v19, %v1872_v5  ;;  %v2321_v27 = vadd.f32 1.0, %v3608_v24 }
 0x240   :  { %v2008_v61 = vmul.f32 %v1944_v56, %v5367_v44  ;;  %v1947_v40 = vmul.f32 0.044715, %v5376_v2  ;;  %v5382_v9 = vadd.f32 %v5168_v60, %v1667_v38  ;;  %3619 = vtanh.f32 %v2198_v41  ;;  %v3610_v32 = vpop.eup %3609 }
 0x241   :  { %v3233_v37 = vpop.f32.mrf.mxu0  ;;  %v2073_v7 = vmul.f32 %v2009_v30, %v5361_v20  ;;  %v3612_v34 = vpop.eup %3611  ;;  %v2322_v25 = vadd.f32 1.0, %v3610_v32  ;;  %3341 = vmatprep.mubr.f32.mxu1 %v2384_v35  ;;  %v2385_v10 = vmul.f32 %v2321_v27, %v1873_v14 }
 0x242   :  { %v2011_v23 = vmul.f32 %v1947_v40, %v5376_v2  ;;  %v1946_v12 = vmul.f32 0.044715, %v5382_v9  ;;  %v5389_v6 = vadd.f32 %v3233_v37, %v5168_v60  ;;  %v2323_v21 = vadd.f32 1.0, %v3612_v34 }
 0x243   :  { %v1677_v28 = vpop.f32.mrf.mxu0  ;;  %v2072_v18 = vmul.f32 %v2008_v61, %v5367_v44  ;;  %v2137_v29 = vadd.f32 %v2073_v7, %v5361_v20  ;;  %v2386_v13 = vmul.f32 %v2322_v25, %v1874_v49  ;;  %3342 = vmatmul.mubr.f32.gmra.mxu1 %v2385_v10  ;;  %v1879_v37 = vmul.f32 0.5, %v5343_v31 }
 0x244   :  { %v2010_v52 = vmul.f32 %v1946_v12, %v5382_v9  ;;  %v1949_v47 = vmul.f32 0.044715, %v5389_v6  ;;  %v5396_v1 = vadd.f32 %v5168_v60, %v1677_v28  ;;  %v2387_v42 = vmul.f32 %v2323_v21, %v1875_v4 }
 0x245   :  { %v3614_v22 = vpop.eup %3613  ;;  %v3236_v55 = vpop.f32.mrf.mxu0  ;;  %v2136_v51 = vadd.f32 %v2072_v18, %v5367_v44  ;;  %v2201_v11 = vmul.f32 0.7978846, %v2137_v29  ;;  %3344 = vmatprep.mubr.f32.mxu1 %v2386_v13  ;;  %v2075_v17 = vmul.f32 %v2011_v23, %v5376_v2  ;;  %v1878_v28 = vmul.f32 0.5, %v5348_v58 }
 0x246   :  { %v1948_v39 = vmul.f32 0.044715, %v5396_v1  ;;  %v5403_v48 = vadd.f32 %v3236_v55, %v5168_v60  ;;  %v2324_v33 = vadd.f32 1.0, %v3614_v22  ;;  %v2074_v50 = vmul.f32 %v2010_v52, %v5382_v9  ;;  %v3616_v45 = vpop.eup %3615 }
 0x247   :  { %v1687_v0 = vpop.f32.mrf.mxu0  ;;  %v2200_v57 = vmul.f32 0.7978846, %v2136_v51  ;;  %3621 = vtanh.f32 %v2201_v11  ;;  %v2013_v62 = vmul.f32 %v1949_v47, %v5389_v6  ;;  %3345 = vmatmul.mubr.f32.gmra.mxu1 %v2387_v42  ;;  %v2325_v16 = vadd.f32 1.0, %v3616_v45 }
 0x248   :  { %v2012_v43 = vmul.f32 %v1948_v39, %v5396_v1  ;;  %v5410_v5 = vadd.f32 %v5168_v60, %v1687_v0  ;;  %v2388_v14 = vmul.f32 %v2324_v33, %v1876_v63  ;;  %v2138_v30 = vadd.f32 %v2074_v50, %v5382_v9 }
 0x249   :  { %v3239_v46 = vpop.f32.mrf.mxu0  ;;  %3623 = vtanh.f32 %v2200_v57  ;;  %v2139_v56 = vadd.f32 %v2075_v17, %v5376_v2  ;;  %v1951_v41 = vmul.f32 0.044715, %v5403_v48  ;;  %v2389_v49 = vmul.f32 %v2325_v16, %v1877_v59 }
 0x24a   :  { %v1950_v36 = vmul.f32 0.044715, %v5410_v5  ;;  %v5417_v19 = vadd.f32 %v3239_v46, %v5168_v60  ;;  %3347 = vmatprep.mubr.f32.mxu1 %v2388_v14  ;;  %v2202_v24 = vmul.f32 0.7978846, %v2138_v30  ;;  %v2076_v40 = vmul.f32 %v2012_v43, %v5396_v1 }
 0x24b   :  { %v1697_v38 = vpop.f32.mrf.mxu0  ;;  %v2203_v61 = vmul.f32 0.7978846, %v2139_v56  ;;  %3348 = vmatmul.mubr.f32.gmra.mxu1 %v2389_v49  ;;  %v2077_v12 = vmul.f32 %v2013_v62, %v5389_v6  ;;  %v2015_v25 = vmul.f32 %v1951_v41, %v5403_v48  ;;  %v1880_v11 = vmul.f32 0.5, %v5367_v44 }
 0x24c   :  { %v3618_v32 = vpop.eup %3617  ;;  %v2014_v35 = vmul.f32 %v1950_v36, %v5410_v5  ;;  %v5422_v27 = vadd.f32 %v5168_v60, %v1697_v38  ;;  %3625 = vtanh.f32 %v2202_v24  ;;  %v2140_v23 = vadd.f32 %v2076_v40, %v5396_v1 }
 0x24d   :  { %v3620_v4 = vpop.eup %3619  ;;  %v3242_v7 = vpop.f32.mrf.mxu0  ;;  %v2327_v34 = vadd.f32 1.0, %v3618_v32  ;;  %v1953_v18 = vmul.f32 0.044715, %v5417_v19  ;;  %3627 = vtanh.f32 %v2203_v61  ;;  %v2141_v52 = vadd.f32 %v2077_v12, %v5389_v6 }
 0x24e   :  { %v1952_v10 = vmul.f32 0.044715, %v5422_v27  ;;  %v2326_v21 = vadd.f32 1.0, %v3620_v4  ;;  %v2204_v31 = vmul.f32 0.7978846, %v2140_v23  ;;  %v5434_v13 = vadd.f32 %v3242_v7, %v5168_v60 }
 0x24f   :  { %v1707_v29 = vpop.f32.mrf.mxu0  ;;  %v2391_v59 = vmul.f32 %v2327_v34, %v1879_v37  ;;  %v2205_v58 = vmul.f32 0.7978846, %v2141_v52  ;;  %v2078_v51 = vmul.f32 %v2014_v35, %v5410_v5  ;;  %v1881_v39 = vmul.f32 0.5, %v5361_v20 }
 0x250   :  { %v2016_v47 = vmul.f32 %v1952_v10, %v5422_v27  ;;  %v5437_v22 = vadd.f32 %v5168_v60, %v1707_v29  ;;  %v2390_v55 = vmul.f32 %v2326_v21, %v1878_v28  ;;  %3629 = vtanh.f32 %v2204_v31 }
 0x251   :  { %v3245_v63 = vpop.f32.mrf.mxu0  ;;  %v5443_v42 = vmul.f32 0.5, %v5376_v2  ;;  %3631 = vtanh.f32 %v2205_v58  ;;  %v2142_v57 = vadd.f32 %v2078_v51, %v5410_v5  ;;  %v2079_v50 = vmul.f32 %v2015_v25, %v5403_v48 }
 0x252   :  { %3350 = vmatprep.mubr.f32.mxu1 %v2390_v55  ;;  %v1954_v33 = vmul.f32 0.044715, %v5437_v22  ;;  %v1955_v45 = vmul.f32 0.044715, %v5434_v13  ;;  %v5450_v62 = vadd.f32 %v3245_v63, %v5168_v60  ;;  %v1882_v20 = vmul.f32 0.5, %v5382_v9 }
 0x253   :  { %v1717_v0 = vpop.f32.mrf.mxu0  ;;  %3351 = vmatmul.mubr.f32.gmra.mxu1 %v2391_v59  ;;  %v2080_v44 = vmul.f32 %v2016_v47, %v5422_v27  ;;  %v2017_v2 = vmul.f32 %v1953_v18, %v5417_v19  ;;  %v5456_v14 = vmul.f32 0.5, %v5396_v1  ;;  %v2206_v46 = vmul.f32 0.7978846, %v2142_v57 }
 0x254   :  { %v3622_v17 = vpop.eup %3621  ;;  %v2143_v16 = vadd.f32 %v2079_v50, %v5403_v48  ;;  %v5460_v56 = vadd.f32 %v5168_v60, %v1717_v0  ;;  %v5463_v36 = vmul.f32 0.5, %v5389_v6  ;;  %v2018_v38 = vmul.f32 %v1954_v33, %v5437_v22 }
 0x255   :  { %v3248_v43 = vpop.f32.mrf.mxu0  ;;  %v2329_v41 = vadd.f32 1.0, %v3622_v17  ;;  %v2144_v9 = vadd.f32 %v2080_v44, %v5422_v27  ;;  %3633 = vtanh.f32 %v2206_v46  ;;  %v2019_v61 = vmul.f32 %v1955_v45, %v5434_v13 }
 0x256   :  { %v3624_v30 = vpop.eup %3623  ;;  %v2207_v1 = vmul.f32 0.7978846, %v2143_v16  ;;  %v1957_v40 = vmul.f32 0.044715, %v5450_v62  ;;  %v5473_v6 = vmul.f32 0.5, %v5410_v5  ;;  %v2081_v7 = vmul.f32 %v2017_v2, %v5417_v19 }
 0x257   :  { %v1727_v49 = vpop.f32.mrf.mxu0  ;;  %v2328_v24 = vadd.f32 1.0, %v3624_v30  ;;  %v2208_v35 = vmul.f32 0.7978846, %v2144_v9  ;;  %v1956_v23 = vmul.f32 0.044715, %v5460_v56  ;;  %v2393_v12 = vmul.f32 %v2329_v41, %v1881_v39 }
 0x258   :  { %v5470_v32 = vadd.f32 %v5168_v60, %v1727_v49  ;;  %3635 = vtanh.f32 %v2207_v1  ;;  %v5478_v25 = vmul.f32 0.5, %v5403_v48  ;;  %v5481_v21 = vmul.f32 0.5, %v5422_v27 }
 0x259   :  { %v3251_v37 = vpop.f32.mrf.mxu0  ;;  %v2392_v4 = vmul.f32 %v2328_v24, %v1880_v11  ;;  %v3626_v34 = vpop.eup %3625  ;;  %3637 = vtanh.f32 %v2208_v35  ;;  %v2145_v5 = vadd.f32 %v2081_v7, %v5417_v19  ;;  %v2082_v18 = vmul.f32 %v2018_v38, %v5437_v22 }
 0x25a   :  { %v2330_v28 = vadd.f32 1.0, %v3626_v34  ;;  %v3628_v29 = vpop.eup %3627  ;;  %v2021_v31 = vmul.f32 %v1957_v40, %v5450_v62  ;;  %v5487_v52 = vadd.f32 %v3248_v43, %v5168_v60  ;;  %v1958_v48 = vmul.f32 0.044715, %v5470_v32 }
 0x25b   :  { %3353 = vmatprep.mubr.f32.mxu1 %v2392_v4  ;;  %v1737_v10 = vpop.f32.mrf.mxu0  ;;  %v2083_v47 = vmul.f32 %v2019_v61, %v5434_v13  ;;  %v2331_v59 = vadd.f32 1.0, %v3628_v29  ;;  %v2209_v27 = vmul.f32 0.7978846, %v2145_v5  ;;  %v2146_v58 = vadd.f32 %v2082_v18, %v5437_v22 }
 0x25c   :  { %3354 = vmatmul.mubr.f32.gmra.mxu1 %v2393_v12  ;;  %v2394_v63 = vmul.f32 %v2330_v28, %v1882_v20  ;;  %v2020_v11 = vmul.f32 %v1956_v23, %v5460_v56  ;;  %v5494_v39 = vadd.f32 %v3251_v37, %v5168_v60  ;;  %v5497_v33 = vadd.f32 %v5168_v60, %v1737_v10 }
 0x25d   :  { %v3254_v55 = vpop.f32.mrf.mxu0  ;;  %v3630_v51 = vpop.eup %3629  ;;  %v2147_v0 = vadd.f32 %v2083_v47, %v5434_v13  ;;  %v2395_v50 = vmul.f32 %v2331_v59, %v5443_v42  ;;  %3639 = vtanh.f32 %v2209_v27  ;;  %v2210_v45 = vmul.f32 0.7978846, %v2146_v58 }
 0x25e   :  { %3356 = vmatprep.mubr.f32.mxu1 %v2394_v63  ;;  %v2332_v17 = vadd.f32 1.0, %v3630_v51  ;;  %v3632_v20 = vpop.eup %3631  ;;  %v1959_v44 = vmul.f32 0.044715, %v5487_v52  ;;  %v5503_v2 = vadd.f32 %v3254_v55, %v5168_v60  ;;  %v5506_v43 = vmul.f32 0.5, %v5417_v19 }
 0x25f   :  { %v1747_v57 = vpop.f32.mrf.mxu0  ;;  %v2211_v46 = vmul.f32 0.7978846, %v2147_v0  ;;  %v2022_v16 = vmul.f32 %v1958_v48, %v5470_v32  ;;  %v2333_v42 = vadd.f32 1.0, %v3632_v20  ;;  %3641 = vtanh.f32 %v2210_v45 }
 0x260   :  { %3357 = vmatmul.mubr.f32.gmra.mxu1 %v2395_v50  ;;  %v2396_v41 = vmul.f32 %v2332_v17, %v5456_v14  ;;  %v1961_v9 = vmul.f32 0.044715, %v5494_v39  ;;  %v1960_v38 = vmul.f32 0.044715, %v5497_v33  ;;  %v5513_v49 = vadd.f32 %v5168_v60, %v1747_v57  ;;  %v5552_v57 = vld [vmem:[%s6119_s5] ss:$0 sm:$0xff] }
 0x261   :  { %v3257_v30 = vpop.f32.mrf.mxu0  ;;  %3643 = vtanh.f32 %v2211_v46  ;;  %v2397_v24 = vmul.f32 %v2333_v42, %v5463_v36  ;;  %v5517_v1 = vmul.f32 0.5, %v5437_v22  ;;  %v2084_v61 = vmul.f32 %v2020_v11, %v5460_v56 }
 0x262   :  { %3359 = vmatprep.mubr.f32.mxu1 %v2396_v41  ;;  %v2085_v14 = vmul.f32 %v2021_v31, %v5450_v62  ;;  %v3634_v40 = vpop.eup %3633  ;;  %v2023_v35 = vmul.f32 %v1959_v44, %v5487_v52  ;;  %v1963_v37 = vmul.f32 0.044715, %v5503_v2  ;;  %v5524_v4 = vadd.f32 %v3257_v30, %v5168_v60 }
 0x263   :  { %v1757_v19 = vpop.f32.mrf.mxu0  ;;  %v5527_v7 = vmul.f32 0.5, %v5434_v13  ;;  %v2334_v34 = vadd.f32 1.0, %v3634_v40  ;;  %v2148_v22 = vadd.f32 %v2084_v61, %v5460_v56  ;;  %v2086_v12 = vmul.f32 %v2022_v16, %v5470_v32 }
 0x264   :  { %3360 = vmatmul.mubr.f32.gmra.mxu1 %v2397_v24  ;;  %v2149_v23 = vadd.f32 %v2085_v14, %v5450_v62  ;;  %v2025_v28 = vmul.f32 %v1961_v9, %v5494_v39  ;;  %v2024_v5 = vmul.f32 %v1960_v38, %v5497_v33  ;;  %v1962_v18 = vmul.f32 0.044715, %v5513_v49 }
 0x265   :  { %v3260_v36 = vpop.f32.mrf.mxu0  ;;  %v3636_v10 = vpop.eup %3635  ;;  %v5536_v29 = vmul.f32 0.5, %v5460_v56  ;;  %v2398_v31 = vmul.f32 %v2334_v34, %v5473_v6  ;;  %v2212_v55 = vmul.f32 0.7978846, %v2148_v22  ;;  %v5540_v59 = vmul.f32 %v1963_v37, %v5503_v2 }
 0x266   :  { %v3638_v13 = vpop.eup %3637  ;;  %v2335_v47 = vadd.f32 1.0, %v3636_v10  ;;  %v2213_v63 = vmul.f32 0.7978846, %v2149_v23  ;;  %v1965_v27 = vmul.f32 0.044715, %v5524_v4  ;;  %v5544_v58 = vadd.f32 %v5168_v60, %v1757_v19 }
 0x267   :  { %v1767_v48 = vpop.f32.mrf.mxu0  ;;  %v2336_v51 = vadd.f32 1.0, %v3638_v13  ;;  %3362 = vmatprep.mubr.f32.mxu1 %v2398_v31  ;;  %3645 = vtanh.f32 %v2212_v55  ;;  %v2150_v6 = vadd.f32 %v2086_v12, %v5470_v32  ;;  %v2087_v0 = vmul.f32 %v2023_v35, %v5487_v52 }
 0x268   :  { %v2399_v56 = vmul.f32 %v2335_v47, %v5478_v25  ;;  %v5555_v50 = vadd.f32 %v5552_v57, %v3260_v36  ;;  %v5558_v60 = vadd.f32 %v5552_v57, %v1767_v48  ;;  %v5562_v25 = vmul.f32 0.5, %v5450_v62 }
 0x269   :  { %v3263_v11 = vpop.f32.mrf.mxu0  ;;  %v2400_v17 = vmul.f32 %v2336_v51, %v5481_v21  ;;  %v2026_v45 = vmul.f32 %v1962_v18, %v5513_v49  ;;  %3647 = vtanh.f32 %v2213_v63  ;;  %v2214_v44 = vmul.f32 0.7978846, %v2150_v6 }
 0x26a   :  { %3363 = vmatmul.mubr.f32.gmra.mxu1 %v2399_v56  ;;  %v2151_v46 = vadd.f32 %v2087_v0, %v5487_v52  ;;  %v3640_v16 = vpop.eup %3639  ;;  %v5567_v30 = vmul.f32 %v1965_v27, %v5524_v4  ;;  %v1964_v41 = vmul.f32 0.044715, %v5544_v58  ;;  %v5571_v21 = vmul.f32 0.5, %v5470_v32 }
 0x26b   :  { %v1777_v20 = vpop.f32.mrf.mxu0  ;;  %3365 = vmatprep.mubr.f32.mxu1 %v2400_v17  ;;  %v2088_v62 = vmul.f32 %v2024_v5, %v5497_v33  ;;  %v5575_v42 = vadd.f32 %v5552_v57, %v3263_v11  ;;  %v2337_v9 = vadd.f32 1.0, %v3640_v16  ;;  %3649 = vtanh.f32 %v2214_v44 }
 0x26c   :  { %v2215_v19 = vmul.f32 0.7978846, %v2151_v46  ;;  %v3642_v24 = vpop.eup %3641  ;;  %v1967_v61 = vmul.f32 0.044715, %v5555_v50  ;;  %v1966_v14 = vmul.f32 0.044715, %v5558_v60  ;;  %v5580_v40 = vadd.f32 %v5552_v57, %v1777_v20 }
 0x26d   :  { %v3266_v38 = vpop.f32.mrf.mxu0  ;;  %v2152_v32 = vadd.f32 %v2088_v62, %v5497_v33  ;;  %v2401_v37 = vmul.f32 %v2337_v9, %v5506_v43  ;;  %v2338_v36 = vadd.f32 1.0, %v3642_v24  ;;  %v2089_v22 = vmul.f32 %v2025_v28, %v5494_v39 }
 0x26e   :  { %v3644_v35 = vpop.eup %3643  ;;  %3651 = vtanh.f32 %v2215_v19  ;;  %v2028_v23 = vmul.f32 %v1964_v41, %v5544_v58  ;;  %v5587_v12 = vadd.f32 %v5552_v57, %v3266_v38  ;;  %v5590_v5 = vmul.f32 0.5, %v5487_v52 }
 0x26f   :  { %v1787_v34 = vpop.f32.mrf.mxu0  ;;  %v2339_v10 = vadd.f32 1.0, %v3644_v35  ;;  %v1969_v18 = vmul.f32 0.044715, %v5575_v42  ;;  %3366 = vmatmul.mubr.f32.gmra.mxu1 %v2401_v37  ;;  %v2402_v13 = vmul.f32 %v2338_v36, %v5517_v1  ;;  %v2216_v31 = vmul.f32 0.7978846, %v2152_v32 }
 0x270   :  { %v2153_v48 = vadd.f32 %v2089_v22, %v5494_v39  ;;  %v5596_v28 = vmul.f32 %v1967_v61, %v5555_v50  ;;  %v2030_v47 = vmul.f32 %v1966_v14, %v5558_v60  ;;  %v1968_v55 = vmul.f32 0.044715, %v5580_v40 }
 0x271   :  { %v3269_v43 = vpop.f32.mrf.mxu0  ;;  %v5601_v63 = vmul.f32 0.5, %v5497_v33  ;;  %3368 = vmatprep.mubr.f32.mxu1 %v2402_v13  ;;  %v2403_v52 = vmul.f32 %v2339_v10, %v5527_v7  ;;  %3653 = vtanh.f32 %v2216_v31  ;;  %v2090_v51 = vmul.f32 %v2026_v45, %v5513_v49 }
 0x272   :  { %v2217_v1 = vmul.f32 0.7978846, %v2153_v48  ;;  %v1971_v56 = vmul.f32 0.044715, %v5587_v12  ;;  %v5607_v11 = vadd.f32 %v5552_v57, %v1787_v34  ;;  %v5610_v6 = vmul.f32 0.5, %v5494_v39 }
 0x273   :  { %v1797_v27 = vpop.f32.mrf.mxu0  ;;  %v2091_v33 = vmul.f32 %v5540_v59, %v5503_v2  ;;  %v5615_v0 = vmul.f32 %v1969_v18, %v5575_v42  ;;  %3369 = vmatmul.mubr.f32.gmra.mxu1 %v2403_v52  ;;  %v2154_v17 = vadd.f32 %v2090_v51, %v5513_v49  ;;  %v2092_v45 = vmul.f32 %v2028_v23, %v5544_v58 }
 0x274   :  { %3655 = vtanh.f32 %v2217_v1  ;;  %v3646_v20 = vpop.eup %3645  ;;  %v5620_v44 = vadd.f32 %v5552_v57, %v3269_v43  ;;  %v5623_v39 = vadd.f32 %v5552_v57, %v1797_v27  ;;  %v2032_v16 = vmul.f32 %v1968_v55, %v5580_v40 }
 0x275   :  { %v3272_v7 = vpop.f32.mrf.mxu0  ;;  %v2155_v59 = vadd.f32 %v2091_v33, %v5503_v2  ;;  %v2340_v41 = vadd.f32 1.0, %v3646_v20  ;;  %v2218_v9 = vmul.f32 0.7978846, %v2154_v17  ;;  %v2156_v38 = vadd.f32 %v2092_v45, %v5544_v58 }
 0x276   :  { %v5626_v46 = vadd.f32 %v5552_v57, %v3272_v7  ;;  %v3648_v19 = vpop.eup %3647  ;;  %v5632_v24 = vmul.f32 %v1971_v56, %v5587_v12  ;;  %v1970_v61 = vmul.f32 0.044715, %v5607_v11  ;;  %v5636_v14 = vmul.f32 0.5, %v5513_v49 }
 0x277   :  { %v1807_v62 = vpop.f32.mrf.mxu0  ;;  %v2219_v32 = vmul.f32 0.7978846, %v2155_v59  ;;  %v2404_v35 = vmul.f32 %v2340_v41, %v5536_v29  ;;  %v2341_v37 = vadd.f32 1.0, %v3648_v19  ;;  %3657 = vtanh.f32 %v2218_v9 }
 0x278   :  { %v2220_v34 = vmul.f32 0.7978846, %v2156_v38  ;;  %v3650_v22 = vpop.eup %3649  ;;  %v1973_v23 = vmul.f32 0.044715, %v5620_v44  ;;  %v1972_v10 = vmul.f32 0.044715, %v5623_v39  ;;  %v2093_v29 = vmul.f32 %v5567_v30, %v5524_v4 }
 0x279   :  { %v3275_v36 = vpop.f32.mrf.mxu0  ;;  %v1975_v18 = vmul.f32 0.044715, %v5626_v46  ;;  %3659 = vtanh.f32 %v2219_v32  ;;  %3371 = vmatprep.mubr.f32.mxu1 %v2404_v35  ;;  %v2405_v13 = vmul.f32 %v2341_v37, %v5562_v25  ;;  %v2342_v49 = vadd.f32 1.0, %v3650_v22 }
 0x27a   :  { %3661 = vtanh.f32 %v2220_v34  ;;  %v2034_v31 = vmul.f32 %v1970_v61, %v5607_v11  ;;  %v5647_v48 = vadd.f32 %v5552_v57, %v1807_v62  ;;  %v5650_v55 = vmul.f32 0.5, %v5503_v2 }
 0x27b   :  { %v3652_v43 = vpop.eup %3651  ;;  %v5653_v52 = vmul.f32 0.5, %v5544_v58  ;;  %3372 = vmatmul.mubr.f32.gmra.mxu1 %v2405_v13  ;;  %v2406_v25 = vmul.f32 %v2342_v49, %v5571_v21  ;;  %v1817_v1 = vpop.f32.mrf.mxu0  ;;  %v2157_v51 = vadd.f32 %v2093_v29, %v5524_v4  ;;  %v2094_v30 = vmul.f32 %v2030_v47, %v5558_v60 }
 0x27c   :  { %v2343_v27 = vadd.f32 1.0, %v3652_v43  ;;  %v2037_v56 = vmul.f32 %v1973_v23, %v5620_v44  ;;  %v2036_v33 = vmul.f32 %v1972_v10, %v5623_v39  ;;  %v5661_v7 = vadd.f32 %v5552_v57, %v3275_v36 }
 0x27d   :  { %v2095_v2 = vmul.f32 %v5596_v28, %v5555_v50  ;;  %v2039_v58 = vmul.f32 %v1975_v18, %v5626_v46  ;;  %3374 = vmatprep.mubr.f32.mxu1 %v2406_v25  ;;  %v2221_v17 = vmul.f32 0.7978846, %v2157_v51  ;;  %v2158_v45 = vadd.f32 %v2094_v30, %v5558_v60 }
 0x27e   :  { %v2407_v21 = vmul.f32 %v2343_v27, %v5590_v5  ;;  %v3654_v20 = vpop.eup %3653  ;;  %v1974_v47 = vmul.f32 0.044715, %v5647_v48  ;;  %v5670_v59 = vadd.f32 %v5552_v57, %v1817_v1  ;;  %v2096_v62 = vmul.f32 %v2032_v16, %v5580_v40 }
 0x27f   :  { %v2159_v41 = vadd.f32 %v2095_v2, %v5555_v50  ;;  %v2344_v28 = vadd.f32 1.0, %v3654_v20  ;;  %3663 = vtanh.f32 %v2221_v17  ;;  %v2222_v9 = vmul.f32 0.7978846, %v2158_v45 }
 0x280   :  { %3375 = vmatmul.mubr.f32.gmra.mxu1 %v2407_v21  ;;  %v2097_v5 = vmul.f32 %v5615_v0, %v5575_v42  ;;  %v1977_v19 = vmul.f32 0.044715, %v5661_v7  ;;  %v2160_v32 = vadd.f32 %v2096_v62, %v5580_v40  ;;  %v2098_v35 = vmul.f32 %v2034_v31, %v5607_v11 }
 0x281   :  { %v3656_v38 = vpop.eup %3655  ;;  %v2223_v61 = vmul.f32 0.7978846, %v2159_v41  ;;  %v2408_v37 = vmul.f32 %v2344_v28, %v5601_v63  ;;  %3665 = vtanh.f32 %v2222_v9  ;;  %v1976_v34 = vmul.f32 0.044715, %v5670_v59 }
 0x282   :  { %v2345_v36 = vadd.f32 1.0, %v3656_v38  ;;  %v2161_v16 = vadd.f32 %v2097_v5, %v5575_v42  ;;  %v2224_v22 = vmul.f32 0.7978846, %v2160_v32  ;;  %v2162_v0 = vadd.f32 %v2098_v35, %v5607_v11 }
 0x283   :  { %3667 = vtanh.f32 %v2223_v61  ;;  %v2038_v23 = vmul.f32 %v1974_v47, %v5647_v48  ;;  %3377 = vmatprep.mubr.f32.mxu1 %v2408_v37  ;;  %v2099_v13 = vmul.f32 %v5632_v24, %v5587_v12  ;;  %v2041_v49 = vmul.f32 %v1977_v19, %v5661_v7 }
 0x284   :  { %v2409_v10 = vmul.f32 %v2345_v36, %v5610_v6  ;;  %v2225_v18 = vmul.f32 0.7978846, %v2161_v16  ;;  %v3658_v63 = vpop.eup %3657  ;;  %3669 = vtanh.f32 %v2224_v22  ;;  %v2226_v29 = vmul.f32 0.7978846, %v2162_v0 }
 0x285   :  { %v2100_v43 = vmul.f32 %v2036_v33, %v5623_v39  ;;  %v2346_v25 = vadd.f32 1.0, %v3658_v63  ;;  %v2163_v27 = vadd.f32 %v2099_v13, %v5587_v12  ;;  %v2101_v1 = vmul.f32 %v2037_v56, %v5620_v44 }
 0x286   :  { %v3660_v31 = vpop.eup %3659  ;;  %3378 = vmatmul.mubr.f32.gmra.mxu1 %v2409_v10  ;;  %3671 = vtanh.f32 %v2225_v18  ;;  %v2040_v51 = vmul.f32 %v1976_v34, %v5670_v59  ;;  %v2102_v47 = vmul.f32 %v2038_v23, %v5647_v48  ;;  %v2103_v62 = vmul.f32 %v2039_v58, %v5626_v46 }
 0x287   :  { %v3662_v6 = vpop.eup %3661  ;;  %v2347_v30 = vadd.f32 1.0, %v3660_v31  ;;  %3673 = vtanh.f32 %v2226_v29  ;;  %v2164_v24 = vadd.f32 %v2100_v43, %v5623_v39  ;;  %v2410_v2 = vmul.f32 %v2346_v25, %v5636_v14 }
 0x288   :  { %v2348_v21 = vadd.f32 1.0, %v3662_v6  ;;  %v2227_v17 = vmul.f32 0.7978846, %v2163_v27  ;;  %v2165_v33 = vadd.f32 %v2101_v1, %v5620_v44  ;;  %v2166_v14 = vadd.f32 %v2102_v47, %v5647_v48 }
 0x289   :  { %v2411_v45 = vmul.f32 %v2347_v30, %v5650_v55  ;;  %v2228_v20 = vmul.f32 0.7978846, %v2164_v24  ;;  %3380 = vmatprep.mubr.f32.mxu1 %v2410_v2  ;;  %v2104_v28 = vmul.f32 %v2040_v51, %v5670_v59  ;;  %v2167_v55 = vadd.f32 %v2103_v62, %v5626_v46 }
 0x28a   :  { %v2412_v56 = vmul.f32 %v2348_v21, %v5653_v52  ;;  %3675 = vtanh.f32 %v2227_v17  ;;  %v2229_v41 = vmul.f32 0.7978846, %v2165_v33  ;;  %v2105_v9 = vmul.f32 %v2041_v49, %v5661_v7 }
 0x28b   :  { %3381 = vmatmul.mubr.f32.gmra.mxu1 %v2411_v45  ;;  %3677 = vtanh.f32 %v2228_v20  ;;  %v2230_v38 = vmul.f32 0.7978846, %v2166_v14  ;;  %v2168_v52 = vadd.f32 %v2104_v28, %v5670_v59  ;;  %v1901_v19 = vmul.f32 0.5, %v5524_v4 }
 0x28c   :  { %3383 = vmatprep.mubr.f32.mxu1 %v2412_v56  ;;  %3679 = vtanh.f32 %v2229_v41  ;;  %v3664_v5 = vpop.eup %3663  ;;  %v2231_v58 = vmul.f32 0.7978846, %v2167_v55  ;;  %v2169_v32 = vadd.f32 %v2105_v9, %v5661_v7  ;;  %v1902_v37 = vmul.f32 0.5, %v5558_v60 }
 0x28d   :  { %v2349_v61 = vadd.f32 1.0, %v3664_v5  ;;  %3681 = vtanh.f32 %v2230_v38  ;;  %v2232_v36 = vmul.f32 0.7978846, %v2168_v52  ;;  %v1903_v4 = vmul.f32 0.5, %v5555_v50 }
 0x28e   :  { %v3666_v35 = vpop.eup %3665  ;;  %3683 = vtanh.f32 %v2231_v58  ;;  %v2233_v0 = vmul.f32 0.7978846, %v2169_v32  ;;  %v1904_v63 = vmul.f32 0.5, %v5580_v40  ;;  %v1906_v25 = vmul.f32 0.5, %v5607_v11 }
 0x28f   :  { %v2413_v34 = vmul.f32 %v2349_v61, %v1901_v19  ;;  %v2350_v22 = vadd.f32 1.0, %v3666_v35  ;;  %3685 = vtanh.f32 %v2232_v36  ;;  %v1905_v1 = vmul.f32 0.5, %v5575_v42 }
 0x290   :  { %v3668_v16 = vpop.eup %3667  ;;  %3687 = vtanh.f32 %v2233_v0  ;;  %v1908_v2 = vmul.f32 0.5, %v5623_v39  ;;  %v1907_v17 = vmul.f32 0.5, %v5587_v12  ;;  %v1910_v42 = vmul.f32 0.5, %v5647_v48 }
 0x291   :  { %v2351_v23 = vadd.f32 1.0, %v3668_v16  ;;  %v3670_v10 = vpop.eup %3669  ;;  %3384 = vmatmul.mubr.f32.gmra.mxu1 %v2413_v34  ;;  %v2414_v18 = vmul.f32 %v2350_v22, %v1902_v37  ;;  %v1909_v62 = vmul.f32 0.5, %v5620_v44  ;;  %v1912_v12 = vmul.f32 0.5, %v5670_v59 }
 0x292   :  { %v2352_v49 = vadd.f32 1.0, %v3670_v10  ;;  %v1911_v5 = vmul.f32 0.5, %v5626_v46  ;;  %v1913_v19 = vmul.f32 0.5, %v5661_v7 }
 0x293   :  { %v3672_v13 = vpop.eup %3671  ;;  %3386 = vmatprep.mubr.f32.mxu1 %v2414_v18  ;;  %v2415_v60 = vmul.f32 %v2351_v23, %v1903_v4 }
 0x294   :  { %v3674_v29 = vpop.eup %3673  ;;  %v2353_v43 = vadd.f32 1.0, %v3672_v13  ;;  %v2416_v31 = vmul.f32 %v2352_v49, %v1904_v63 }
 0x295   :  { %v2354_v27 = vadd.f32 1.0, %v3674_v29  ;;  %3387 = vmatmul.mubr.f32.gmra.mxu1 %v2415_v60 }
 0x296   :  { %3389 = vmatprep.mubr.f32.mxu1 %v2416_v31  ;;  %v2417_v30 = vmul.f32 %v2353_v43, %v1905_v1 }
 0x297   :  { %v3676_v6 = vpop.eup %3675  ;;  %v2418_v51 = vmul.f32 %v2354_v27, %v1906_v25 }
 0x298   :  { %v3678_v50 = vpop.eup %3677  ;;  %v2355_v24 = vadd.f32 1.0, %v3676_v6 }
 0x299   :  { %v3680_v40 = vpop.eup %3679  ;;  %v2356_v21 = vadd.f32 1.0, %v3678_v50  ;;  %3390 = vmatmul.mubr.f32.gmra.mxu1 %v2417_v30 }
 0x29a   :  { %3392 = vmatprep.mubr.f32.mxu1 %v2418_v51  ;;  %v3682_v11 = vpop.eup %3681  ;;  %v2419_v45 = vmul.f32 %v2355_v24, %v1907_v17  ;;  %v2357_v20 = vadd.f32 1.0, %v3680_v40 }
 0x29b   :  { %v2420_v33 = vmul.f32 %v2356_v21, %v1908_v2  ;;  %v3684_v47 = vpop.eup %3683  ;;  %v2358_v56 = vadd.f32 1.0, %v3682_v11 }
 0x29c   :  { %v3686_v41 = vpop.eup %3685  ;;  %v2421_v28 = vmul.f32 %v2357_v20, %v1909_v62  ;;  %v2359_v55 = vadd.f32 1.0, %v3684_v47 }
 0x29d   :  { %3393 = vmatmul.mubr.f32.gmra.mxu1 %v2419_v45  ;;  %v2422_v14 = vmul.f32 %v2358_v56, %v1910_v42  ;;  %v2360_v39 = vadd.f32 1.0, %v3686_v41  ;;  %v3688_v9 = vpop.eup %3687 }
 0x29e   :  { %3395 = vmatprep.mubr.f32.mxu1 %v2420_v33  ;;  %v2423_v52 = vmul.f32 %v2359_v55, %v1911_v5  ;;  %v2361_v48 = vadd.f32 1.0, %v3688_v9  ;;  %v5727_v5 = vld [vmem:[%s6120_s7] ss:$0 sm:$0xff] }
 0x29f   :  { %v2424_v38 = vmul.f32 %v2360_v39, %v1912_v12 }
 0x2a0   :  { %v2425_v44 = vmul.f32 %v2361_v48, %v1913_v19 }
 0x2a1   :  { %3396 = vmatmul.mubr.f32.gmra.mxu1 %v2421_v28 }
 0x2a2   :  { %3398 = vmatprep.mubr.f32.mxu1 %v2422_v14 }
 0x2a5   :  { %3399 = vmatmul.mubr.f32.gmra.mxu1 %v2423_v52 }
 0x2a6   :  { %3401 = vmatprep.mubr.f32.mxu1 %v2424_v38 }
 0x2a9   :  { %3402 = vmatmul.mubr.f32.gmra.mxu1 %v2425_v44  ;;  %v6312_v44 = vld [vmem:[#allocation4_spill] sm:$0xff] }
 0x2b6   :  { %v3278_v61 = vpop.f32.mrf.mxu0 }
 0x2b7   :  { %v1833_v58 = vadd.f32 %v5552_v57, %v3278_v61  ;;  %v1205_v61 = vadd.f32 %v5727_v5, %v6312_v44 }
 0x2b8   :  { %v1827_v32 = vpop.f32.mrf.mxu0 }
 0x2b9   :  { %v1979_v35 = vmul.f32 0.044715, %v1833_v58  ;;  %v1828_v59 = vadd.f32 %v5552_v57, %v1827_v32  ;;  %v1915_v39 = vmul.f32 0.5, %v1833_v58 }
 0x2bb   :  { %v2043_v37 = vmul.f32 %v1979_v35, %v1833_v58  ;;  %v1978_v36 = vmul.f32 0.044715, %v1828_v59  ;;  %v1914_v62 = vmul.f32 0.5, %v1828_v59  ;;  %v6313_v35 = vld [vmem:[#allocation2_spill] sm:$0xff] }
 0x2bd   :  { %v2042_v46 = vmul.f32 %v1978_v36, %v1828_v59  ;;  %v2107_v16 = vmul.f32 %v2043_v37, %v1833_v58 }
 0x2be   :  { %v3281_v34 = vpop.f32.mrf.mxu0 }
 0x2bf   :  { %v1843_v22 = vadd.f32 %v5552_v57, %v3281_v34  ;;  %v2106_v0 = vmul.f32 %v2042_v46, %v1828_v59  ;;  %v2171_v23 = vadd.f32 %v2107_v16, %v1833_v58  ;;  %v6314_v16 = vld [vmem:[#allocation5_spill] sm:$0xff] }
 0x2c0   :  { %v1837_v7 = vpop.f32.mrf.mxu0  ;;  %v1207_v34 = vadd.f32 %v5727_v5, %v6314_v16 }
 0x2c1   :  { %v1981_v10 = vmul.f32 0.044715, %v1843_v22  ;;  %v1838_v18 = vadd.f32 %v5552_v57, %v1837_v7  ;;  %v2170_v4 = vadd.f32 %v2106_v0, %v1828_v59  ;;  %v2235_v13 = vmul.f32 0.7978846, %v2171_v23  ;;  %v6315_v7 = vld [vmem:[#allocation3_spill] sm:$0xff] }
 0x2c2   :  { %v1917_v19 = vmul.f32 0.5, %v1843_v22  ;;  %v1204_v59 = vadd.f32 %v5727_v5, %v6313_v35 }
 0x2c3   :  { %v2045_v63 = vmul.f32 %v1981_v10, %v1843_v22  ;;  %v1980_v49 = vmul.f32 0.044715, %v1838_v18  ;;  %v2234_v29 = vmul.f32 0.7978846, %v2170_v4  ;;  %3689 = vtanh.f32 %v2235_v13 }
 0x2c4   :  { %v1916_v52 = vmul.f32 0.5, %v1838_v18  ;;  %v1206_v10 = vadd.f32 %v5727_v5, %v6315_v7 }
 0x2c5   :  { %v2044_v60 = vmul.f32 %v1980_v49, %v1838_v18  ;;  %3691 = vtanh.f32 %v2234_v29  ;;  %v2109_v43 = vmul.f32 %v2045_v63, %v1843_v22  ;;  %v6316_v29 = vld [vmem:[#allocation7_spill] sm:$0xff] }
 0x2c7   :  { %v3284_v31 = vpop.f32.mrf.mxu0  ;;  %v2108_v25 = vmul.f32 %v2044_v60, %v1838_v18  ;;  %v2173_v27 = vadd.f32 %v2109_v43, %v1843_v22  ;;  %v1209_v60 = vadd.f32 %v5727_v5, %v6316_v29 }
 0x2c8   :  { %v1853_v1 = vadd.f32 %v5552_v57, %v3284_v31 }
 0x2c9   :  { %v1847_v6 = vpop.f32.mrf.mxu0  ;;  %v2172_v51 = vadd.f32 %v2108_v25, %v1838_v18  ;;  %v2237_v50 = vmul.f32 0.7978846, %v2173_v27 }
 0x2ca   :  { %v1983_v30 = vmul.f32 0.044715, %v1853_v1  ;;  %v1848_v24 = vadd.f32 %v5552_v57, %v1847_v6  ;;  %v1919_v43 = vmul.f32 0.5, %v1853_v1 }
 0x2cb   :  { %v2236_v40 = vmul.f32 0.7978846, %v2172_v51  ;;  %3693 = vtanh.f32 %v2237_v50  ;;  %v6317_v51 = vld [vmem:[#allocation6_spill] sm:$0xff] }
 0x2cc   :  { %v2047_v2 = vmul.f32 %v1983_v30, %v1853_v1  ;;  %v1982_v21 = vmul.f32 0.044715, %v1848_v24  ;;  %v1918_v13 = vmul.f32 0.5, %v1848_v24  ;;  %v1208_v50 = vadd.f32 %v5727_v5, %v6317_v51 }
 0x2cd   :  { %3695 = vtanh.f32 %v2236_v40 }
 0x2ce   :  { %v2046_v17 = vmul.f32 %v1982_v21, %v1848_v24  ;;  %v2111_v33 = vmul.f32 %v2047_v2, %v1853_v1 }
 0x2d0   :  { %v3690_v11 = vpop.eup %3689  ;;  %v2110_v45 = vmul.f32 %v2046_v17, %v1848_v24  ;;  %v2175_v20 = vadd.f32 %v2111_v33, %v1853_v1  ;;  %v6319_v17 = vld [vmem:[#allocation8_spill] sm:$0xff] }
 0x2d1   :  { %v2363_v42 = vadd.f32 1.0, %v3690_v11  ;;  %v1210_v33 = vadd.f32 %v5727_v5, %v6319_v17 }
 0x2d2   :  { %v3692_v47 = vpop.eup %3691  ;;  %v2174_v56 = vadd.f32 %v2110_v45, %v1848_v24  ;;  %v2239_v41 = vmul.f32 0.7978846, %v2175_v20  ;;  %v6318_v24 = vld [vmem:[#allocation9_spill] sm:$0xff]  ;;  %v6320_v20 = vld [vmem:[#allocation11_spill] sm:$0xff] }
 0x2d3   :  { %v2362_v14 = vadd.f32 1.0, %v3692_v47  ;;  %v2427_v55 = vmul.f32 %v2363_v42, %v1915_v39  ;;  %v1211_v40 = vadd.f32 %v5727_v5, %v6318_v24  ;;  %v1213_v47 = vadd.f32 %v5727_v5, %v6320_v20 }
 0x2d4   :  { %v2238_v28 = vmul.f32 0.7978846, %v2174_v56  ;;  %3697 = vtanh.f32 %v2239_v41  ;;  %v6321_v41 = vld [vmem:[#allocation10_spill] sm:$0xff] }
 0x2d5   :  { %v2426_v57 = vmul.f32 %v2362_v14, %v1914_v62  ;;  %v1212_v62 = vadd.f32 %v5727_v5, %v6321_v41 }
 0x2d6   :  { %3699 = vtanh.f32 %v2238_v28 }
 0x2d7   :  { %3404 = vmatprep.mubr.f32.mxu1 %v2426_v57  ;;  %v6322_v57 = vld [vmem:[#allocation13_spill] sm:$0xff] }
 0x2d8   :  { %v3694_v9 = vpop.eup %3693  ;;  %3405 = vmatmul.mubr.f32.gmra.mxu1 %v2427_v55  ;;  %v1215_v55 = vadd.f32 %v5727_v5, %v6322_v57  ;;  %v6336_v57 = vld [vmem:[#allocation27_spill] sm:$0xff] }
 0x2d9   :  { %v2365_v38 = vadd.f32 1.0, %v3694_v9 }
 0x2da   :  { %v3696_v12 = vpop.eup %3695 }
 0x2db   :  { %v2364_v48 = vadd.f32 1.0, %v3696_v12  ;;  %v2429_v32 = vmul.f32 %v2365_v38, %v1917_v19  ;;  %v6323_v12 = vld [vmem:[#allocation12_spill] sm:$0xff] }
 0x2dc   :  { %v1214_v38 = vadd.f32 %v5727_v5, %v6323_v12 }
 0x2dd   :  { %v2428_v58 = vmul.f32 %v2364_v48, %v1916_v52 }
 0x2df   :  { %3407 = vmatprep.mubr.f32.mxu1 %v2428_v58 }
 0x2e0   :  { %v3319_v37 = vpop.f32.mrf.mxu0  ;;  %3408 = vmatmul.mubr.f32.gmra.mxu1 %v2429_v32  ;;  %v6325_v32 = vld [vmem:[#allocation14_spill] sm:$0xff] }
 0x2e1   :  { %v3698_v36 = vpop.eup %3697  ;;  %v2834_v46 = vadd.f32 %v3319_v37, %v1205_v61  ;;  %v6324_v61 = vld [vmem:[#allocation15_spill] sm:$0xff]  ;;  %v1216_v35 = vadd.f32 %v5727_v5, %v6325_v32 }
 0x2e2   :  { %v2514_v0 = vpop.f32.mrf.mxu0  ;;  %v2367_v18 = vadd.f32 1.0, %v3698_v36  ;;  %v1217_v58 = vadd.f32 %v5727_v5, %v6324_v61 }
 0x2e3   :  { %v3700_v23 = vpop.eup %3699  ;;  %2898 = vst.msk [vmem:[%s6121_s8 + $0x8] sm:$0xff] %vm221_vm0, %v2834_v46  ;;  %v2833_v22 = vadd.f32 %v2514_v0, %v1204_v59  ;;  %v6326_v46 = vld [vmem:[#allocation17_spill] sm:$0xff]  ;;  %v6327_v0 = vld [vmem:[#allocation16_spill] sm:$0xff] }
 0x2e4   :  { %v3322_v4 = vpop.f32.mrf.mxu0  ;;  %v2366_v63 = vadd.f32 1.0, %v3700_v23  ;;  %v2431_v6 = vmul.f32 %v2367_v18, %v1919_v43  ;;  %v1219_v16 = vadd.f32 %v5727_v5, %v6326_v46  ;;  %v1218_v23 = vadd.f32 %v5727_v5, %v6327_v0  ;;  %v6330_v43 = vld [vmem:[#allocation21_spill] sm:$0xff] }
 0x2e5   :  { %2897 = vst.msk [vmem:[%s6121_s8] sm:$0xff] %vm221_vm0, %v2833_v22  ;;  %v2836_v49 = vadd.f32 %v3322_v4, %v1207_v34 }
 0x2e6   :  { %v2524_v31 = vpop.f32.mrf.mxu0  ;;  %v2430_v25 = vmul.f32 %v2366_v63, %v1918_v13  ;;  %v6329_v63 = vld [vmem:[#allocation18_spill] sm:$0xff] }
 0x2e7   :  { %2900 = vst.msk [vmem:[%s6121_s8 + $0x18] sm:$0xff] %vm221_vm0, %v2836_v49  ;;  %v2835_v27 = vadd.f32 %v2524_v31, %v1206_v10  ;;  %v6328_v10 = vld [vmem:[#allocation19_spill] sm:$0xff]  ;;  %v1220_v49 = vadd.f32 %v5727_v5, %v6329_v63  ;;  %v1223_v31 = vadd.f32 %v5727_v5, %v6330_v43 }
 0x2e8   :  { %v3325_v30 = vpop.f32.mrf.mxu0  ;;  %3410 = vmatprep.mubr.f32.mxu1 %v2430_v25  ;;  %v1221_v18 = vadd.f32 %v5727_v5, %v6328_v10 }
 0x2e9   :  { %2899 = vst.msk [vmem:[%s6121_s8 + $0x10] sm:$0xff] %vm221_vm0, %v2835_v27  ;;  %v2838_v1 = vadd.f32 %v3325_v30, %v1209_v60  ;;  %3411 = vmatmul.mubr.f32.gmra.mxu1 %v2431_v6  ;;  %v6331_v6 = vld [vmem:[#allocation20_spill] sm:$0xff] }
 0x2ea   :  { %v2534_v2 = vpop.f32.mrf.mxu0  ;;  %v1222_v51 = vadd.f32 %v5727_v5, %v6331_v6 }
 0x2eb   :  { %2902 = vst.msk [vmem:[%s6121_s8 + $0x28] sm:$0xff] %vm221_vm0, %v2838_v1  ;;  %v2837_v21 = vadd.f32 %v2534_v2, %v1208_v50  ;;  %v6332_v1 = vld [vmem:[#allocation23_spill] sm:$0xff] }
 0x2ec   :  { %v3328_v11 = vpop.f32.mrf.mxu1  ;;  %v1225_v24 = vadd.f32 %v5727_v5, %v6332_v1 }
 0x2ed   :  { %2901 = vst.msk [vmem:[%s6121_s8 + $0x20] sm:$0xff] %vm221_vm0, %v2837_v21  ;;  %v2840_v45 = vadd.f32 %v3328_v11, %v1211_v40  ;;  %v6333_v21 = vld [vmem:[#allocation22_spill] sm:$0xff] }
 0x2ee   :  { %v2544_v42 = vpop.f32.mrf.mxu1  ;;  %v1224_v17 = vadd.f32 %v5727_v5, %v6333_v21 }
 0x2ef   :  { %2904 = vst.msk [vmem:[%s6121_s8 + $0x38] sm:$0xff] %vm221_vm0, %v2840_v45  ;;  %v2839_v56 = vadd.f32 %v2544_v42, %v1210_v33 }
 0x2f0   :  { %v3331_v14 = vpop.f32.mrf.mxu1 }
 0x2f1   :  { %2903 = vst.msk [vmem:[%s6121_s8 + $0x30] sm:$0xff] %vm221_vm0, %v2839_v56  ;;  %v2842_v39 = vadd.f32 %v3331_v14, %v1213_v47  ;;  %v6334_v47 = vld [vmem:[#allocation25_spill] sm:$0xff]  ;;  %v6335_v56 = vld [vmem:[#allocation24_spill] sm:$0xff] }
 0x2f2   :  { %v2554_v28 = vpop.f32.mrf.mxu1  ;;  %v1227_v42 = vadd.f32 %v5727_v5, %v6334_v47  ;;  %v1226_v41 = vadd.f32 %v5727_v5, %v6335_v56 }
 0x2f3   :  { %2906 = vst.msk [vmem:[%s6121_s8 + $0x48] sm:$0xff] %vm221_vm0, %v2842_v39  ;;  %v2841_v9 = vadd.f32 %v2554_v28, %v1212_v62 }
 0x2f5   :  { %2905 = vst.msk [vmem:[%s6121_s8 + $0x40] sm:$0xff] %vm221_vm0, %v2841_v9  ;;  %v3334_v52 = vpop.f32.mrf.mxu1  ;;  %v6337_v9 = vld [vmem:[#allocation26_spill] sm:$0xff] }
 0x2f6   :  { %v2844_v48 = vadd.f32 %v3334_v52, %v1215_v55  ;;  %v1229_v55 = vadd.f32 %v5727_v5, %v6336_v57  ;;  %v1228_v12 = vadd.f32 %v5727_v5, %v6337_v9 }
 0x2f7   :  { %v2564_v19 = vpop.f32.mrf.mxu1 }
 0x2f8   :  { %2908 = vst.msk [vmem:[%s6121_s8 + $0x58] sm:$0xff] %vm221_vm0, %v2844_v48  ;;  %v2843_v44 = vadd.f32 %v2564_v19, %v1214_v38  ;;  %v6338_v19 = vld [vmem:[#allocation29_spill] sm:$0xff] }
 0x2fa   :  { %2907 = vst.msk [vmem:[%s6121_s8 + $0x50] sm:$0xff] %vm221_vm0, %v2843_v44  ;;  %v3337_v59 = vpop.f32.mrf.mxu1  ;;  %v1231_v44 = vadd.f32 %v5727_v5, %v6338_v19  ;;  %v6352_v19 = vld [vmem:[#allocation43_spill] sm:$0xff] }
 0x2fb   :  { %v2846_v37 = vadd.f32 %v3337_v59, %v1217_v58  ;;  %v6339_v58 = vld [vmem:[#allocation28_spill] sm:$0xff] }
 0x2fc   :  { %v2574_v36 = vpop.f32.mrf.mxu1  ;;  %v1230_v32 = vadd.f32 %v5727_v5, %v6339_v58 }
 0x2fd   :  { %2910 = vst.msk [vmem:[%s6121_s8 + $0x68] sm:$0xff] %vm221_vm0, %v2846_v37  ;;  %v2845_v34 = vadd.f32 %v2574_v36, %v1216_v35  ;;  %v6340_v37 = vld [vmem:[#allocation31_spill] sm:$0xff] }
 0x2fe   :  { %v1233_v36 = vadd.f32 %v5727_v5, %v6340_v37  ;;  %v6354_v37 = vld [vmem:[#allocation45_spill] sm:$0xff] }
 0x2ff   :  { %2909 = vst.msk [vmem:[%s6121_s8 + $0x60] sm:$0xff] %vm221_vm0, %v2845_v34  ;;  %v3340_v22 = vpop.f32.mrf.mxu1  ;;  %v6341_v34 = vld [vmem:[#allocation30_spill] sm:$0xff] }
 0x300   :  { %v2848_v7 = vadd.f32 %v3340_v22, %v1219_v16  ;;  %v1232_v0 = vadd.f32 %v5727_v5, %v6341_v34 }
 0x301   :  { %v2584_v4 = vpop.f32.mrf.mxu1 }
 0x302   :  { %2912 = vst.msk [vmem:[%s6121_s8 + $0x78] sm:$0xff] %vm221_vm0, %v2848_v7  ;;  %v2847_v13 = vadd.f32 %v2584_v4, %v1218_v23 }
 0x303   :  { %v3343_v29 = vpop.f32.mrf.mxu1 }
 0x304   :  { %2911 = vst.msk [vmem:[%s6121_s8 + $0x70] sm:$0xff] %vm221_vm0, %v2847_v13  ;;  %v2850_v60 = vadd.f32 %v3343_v29, %v1221_v18  ;;  %v6342_v18 = vld [vmem:[#allocation33_spill] sm:$0xff]  ;;  %v6343_v13 = vld [vmem:[#allocation32_spill] sm:$0xff] }
 0x305   :  { %v2594_v25 = vpop.f32.mrf.mxu1  ;;  %v1235_v4 = vadd.f32 %v5727_v5, %v6342_v18  ;;  %v1234_v63 = vadd.f32 %v5727_v5, %v6343_v13 }
 0x306   :  { %2914 = vst.msk [vmem:[%s6121_s8 + $0x88] sm:$0xff] %vm221_vm0, %v2850_v60  ;;  %v2849_v27 = vadd.f32 %v2594_v25, %v1220_v49 }
 0x307   :  { %v3346_v50 = vpop.f32.mrf.mxu1 }
 0x308   :  { %2913 = vst.msk [vmem:[%s6121_s8 + $0x80] sm:$0xff] %vm221_vm0, %v2849_v27  ;;  %v2852_v30 = vadd.f32 %v3346_v50, %v1223_v31  ;;  %v6344_v31 = vld [vmem:[#allocation35_spill] sm:$0xff]  ;;  %v6345_v27 = vld [vmem:[#allocation34_spill] sm:$0xff] }
 0x309   :  { %v2604_v40 = vpop.f32.mrf.mxu1  ;;  %v1237_v25 = vadd.f32 %v5727_v5, %v6344_v31  ;;  %v1236_v6 = vadd.f32 %v5727_v5, %v6345_v27 }
 0x30a   :  { %2916 = vst.msk [vmem:[%s6121_s8 + $0x98] sm:$0xff] %vm221_vm0, %v2852_v30  ;;  %v2851_v2 = vadd.f32 %v2604_v40, %v1222_v51  ;;  %v6346_v30 = vld [vmem:[#allocation37_spill] sm:$0xff] }
 0x30b   :  { %v3349_v33 = vpop.f32.mrf.mxu1  ;;  %v1239_v1 = vadd.f32 %v5727_v5, %v6346_v30 }
 0x30c   :  { %2915 = vst.msk [vmem:[%s6121_s8 + $0x90] sm:$0xff] %vm221_vm0, %v2851_v2  ;;  %v2854_v11 = vadd.f32 %v3349_v33, %v1225_v24  ;;  %v6347_v2 = vld [vmem:[#allocation36_spill] sm:$0xff] }
 0x30d   :  { %v2614_v45 = vpop.f32.mrf.mxu1  ;;  %v1238_v21 = vadd.f32 %v5727_v5, %v6347_v2 }
 0x30e   :  { %2918 = vst.msk [vmem:[%s6121_s8 + $0xa8] sm:$0xff] %vm221_vm0, %v2854_v11  ;;  %v2853_v20 = vadd.f32 %v2614_v45, %v1224_v17 }
 0x310   :  { %2917 = vst.msk [vmem:[%s6121_s8 + $0xa0] sm:$0xff] %vm221_vm0, %v2853_v20  ;;  %v6348_v20 = vld [vmem:[#allocation39_spill] sm:$0xff] }
 0x311   :  { %v1241_v47 = vadd.f32 %v5727_v5, %v6348_v20 }
 0x313   :  { %v3352_v62 = vpop.f32.mrf.mxu1 }
 0x314   :  { %v2856_v14 = vadd.f32 %v3352_v62, %v1227_v42  ;;  %v6349_v42 = vld [vmem:[#allocation38_spill] sm:$0xff] }
 0x315   :  { %v2624_v39 = vpop.f32.mrf.mxu1  ;;  %v1240_v56 = vadd.f32 %v5727_v5, %v6349_v42 }
 0x316   :  { %2920 = vst.msk [vmem:[%s6121_s8 + $0xb8] sm:$0xff] %vm221_vm0, %v2856_v14  ;;  %v2855_v28 = vadd.f32 %v2624_v39, %v1226_v41  ;;  %v6350_v14 = vld [vmem:[#allocation41_spill] sm:$0xff] }
 0x317   :  { %v1243_v39 = vadd.f32 %v5727_v5, %v6350_v14 }
 0x318   :  { %2919 = vst.msk [vmem:[%s6121_s8 + $0xb0] sm:$0xff] %vm221_vm0, %v2855_v28 }
 0x31c   :  { %v3355_v38 = vpop.f32.mrf.mxu1 }
 0x31d   :  { %v2858_v52 = vadd.f32 %v3355_v38, %v1229_v55  ;;  %v6351_v55 = vld [vmem:[#allocation40_spill] sm:$0xff] }
 0x31e   :  { %v2634_v48 = vpop.f32.mrf.mxu1  ;;  %v1242_v9 = vadd.f32 %v5727_v5, %v6351_v55 }
 0x31f   :  { %2922 = vst.msk [vmem:[%s6121_s8 + $0xc8] sm:$0xff] %vm221_vm0, %v2858_v52  ;;  %v2857_v61 = vadd.f32 %v2634_v48, %v1228_v12 }
 0x320   :  { %v3358_v35 = vpop.f32.mrf.mxu1 }
 0x321   :  { %2921 = vst.msk [vmem:[%s6121_s8 + $0xc0] sm:$0xff] %vm221_vm0, %v2857_v61  ;;  %v2860_v59 = vadd.f32 %v3358_v35, %v1231_v44  ;;  %v1245_v44 = vadd.f32 %v5727_v5, %v6352_v19  ;;  %v6353_v61 = vld [vmem:[#allocation42_spill] sm:$0xff] }
 0x322   :  { %v2644_v46 = vpop.f32.mrf.mxu1  ;;  %v1244_v58 = vadd.f32 %v5727_v5, %v6353_v61 }
 0x323   :  { %2924 = vst.msk [vmem:[%s6121_s8 + $0xd8] sm:$0xff] %vm221_vm0, %v2860_v59  ;;  %v2859_v16 = vadd.f32 %v2644_v46, %v1230_v32 }
 0x324   :  { %v3361_v23 = vpop.f32.mrf.mxu1 }
 0x325   :  { %2923 = vst.msk [vmem:[%s6121_s8 + $0xd0] sm:$0xff] %vm221_vm0, %v2859_v16  ;;  %v2862_v22 = vadd.f32 %v3361_v23, %v1233_v36  ;;  %v1247_v36 = vadd.f32 %v5727_v5, %v6354_v37  ;;  %v6355_v16 = vld [vmem:[#allocation44_spill] sm:$0xff] }
 0x326   :  { %v2654_v7 = vpop.f32.mrf.mxu1  ;;  %v1246_v34 = vadd.f32 %v5727_v5, %v6355_v16 }
 0x327   :  { %2926 = vst.msk [vmem:[%s6121_s8 + $0xe8] sm:$0xff] %vm221_vm0, %v2862_v22  ;;  %v2861_v10 = vadd.f32 %v2654_v7, %v1232_v0 }
 0x329   :  { %2925 = vst.msk [vmem:[%s6121_s8 + $0xe0] sm:$0xff] %vm221_vm0, %v2861_v10  ;;  %v6356_v10 = vld [vmem:[#allocation47_spill] sm:$0xff] }
 0x32a   :  { %v3364_v49 = vpop.f32.mrf.mxu1  ;;  %v1249_v18 = vadd.f32 %v5727_v5, %v6356_v10  ;;  %v1262_v10 = vadd.f32 %v5727_v5, %v4451_v8  ;;  %v1264_v8 = vadd.f32 %v5727_v5, %v4495_v26  ;;  %v1266_v26 = vadd.f32 %v5727_v5, %v4527_v54 }
 0x32b   :  { %v2864_v29 = vadd.f32 %v3364_v49, %v1235_v4  ;;  %v6357_v4 = vld [vmem:[#allocation46_spill] sm:$0xff] }
 0x32c   :  { %v2664_v60 = vpop.f32.mrf.mxu1  ;;  %v1248_v13 = vadd.f32 %v5727_v5, %v6357_v4 }
 0x32d   :  { %2928 = vst.msk [vmem:[%s6121_s8 + $0xf8] sm:$0xff] %vm221_vm0, %v2864_v29  ;;  %v2863_v43 = vadd.f32 %v2664_v60, %v1234_v63  ;;  %v6358_v29 = vld [vmem:[#allocation49_spill] sm:$0xff] }
 0x32e   :  { %v1251_v60 = vadd.f32 %v5727_v5, %v6358_v29 }
 0x32f   :  { %2927 = vst.msk [vmem:[%s6121_s8 + $0xf0] sm:$0xff] %vm221_vm0, %v2863_v43  ;;  %v3367_v51 = vpop.f32.mrf.mxu1 }
 0x330   :  { %v2866_v50 = vadd.f32 %v3367_v51, %v1237_v25  ;;  %v6359_v25 = vld [vmem:[#allocation48_spill] sm:$0xff] }
 0x331   :  { %v2674_v24 = vpop.f32.mrf.mxu1  ;;  %v1250_v27 = vadd.f32 %v5727_v5, %v6359_v25 }
 0x332   :  { %2930 = vst.msk [vmem:[%s6121_s8 + $0x108] sm:$0xff] %vm221_vm0, %v2866_v50  ;;  %v2865_v40 = vadd.f32 %v2674_v24, %v1236_v6  ;;  %v6360_v50 = vld [vmem:[#allocation51_spill] sm:$0xff] }
 0x333   :  { %v3370_v17 = vpop.f32.mrf.mxu1  ;;  %v1253_v30 = vadd.f32 %v5727_v5, %v6360_v50 }
 0x334   :  { %2929 = vst.msk [vmem:[%s6121_s8 + $0x100] sm:$0xff] %vm221_vm0, %v2865_v40  ;;  %v2868_v33 = vadd.f32 %v3370_v17, %v1239_v1  ;;  %v6361_v40 = vld [vmem:[#allocation50_spill] sm:$0xff] }
 0x335   :  { %v2684_v11 = vpop.f32.mrf.mxu1  ;;  %v1252_v2 = vadd.f32 %v5727_v5, %v6361_v40 }
 0x336   :  { %2932 = vst.msk [vmem:[%s6121_s8 + $0x118] sm:$0xff] %vm221_vm0, %v2868_v33  ;;  %v2867_v45 = vadd.f32 %v2684_v11, %v1238_v21  ;;  %v6362_v33 = vld [vmem:[#allocation53_spill] sm:$0xff] }
 0x337   :  { %v1255_v11 = vadd.f32 %v5727_v5, %v6362_v33 }
 0x338   :  { %2931 = vst.msk [vmem:[%s6121_s8 + $0x110] sm:$0xff] %vm221_vm0, %v2867_v45 }
 0x33b   :  { %v3373_v41 = vpop.f32.mrf.mxu1 }
 0x33c   :  { %v2870_v62 = vadd.f32 %v3373_v41, %v1241_v47  ;;  %v6363_v47 = vld [vmem:[#allocation52_spill] sm:$0xff] }
 0x33d   :  { %v2694_v28 = vpop.f32.mrf.mxu1  ;;  %v1254_v42 = vadd.f32 %v5727_v5, %v6363_v47 }
 0x33e   :  { %2934 = vst.msk [vmem:[%s6121_s8 + $0x128] sm:$0xff] %vm221_vm0, %v2870_v62  ;;  %v2869_v57 = vadd.f32 %v2694_v28, %v1240_v56  ;;  %v6364_v62 = vld [vmem:[#allocation55_spill] sm:$0xff] }
 0x33f   :  { %v1257_v14 = vadd.f32 %v5727_v5, %v6364_v62 }
 0x340   :  { %v3376_v12 = vpop.f32.mrf.mxu1  ;;  %2933 = vst.msk [vmem:[%s6121_s8 + $0x120] sm:$0xff] %vm221_vm0, %v2869_v57  ;;  %v6365_v57 = vld [vmem:[#allocation54_spill] sm:$0xff] }
 0x341   :  { %v2872_v38 = vadd.f32 %v3376_v12, %v1243_v39  ;;  %v1256_v55 = vadd.f32 %v5727_v5, %v6365_v57 }
 0x342   :  { %v2704_v52 = vpop.f32.mrf.mxu1 }
 0x343   :  { %2936 = vst.msk [vmem:[%s6121_s8 + $0x138] sm:$0xff] %vm221_vm0, %v2872_v38  ;;  %v2871_v48 = vadd.f32 %v2704_v52, %v1242_v9  ;;  %v6366_v38 = vld [vmem:[#allocation57_spill] sm:$0xff] }
 0x344   :  { %v1259_v52 = vadd.f32 %v5727_v5, %v6366_v38 }
 0x345   :  { %2935 = vst.msk [vmem:[%s6121_s8 + $0x130] sm:$0xff] %vm221_vm0, %v2871_v48 }
 0x346   :  { %v3379_v32 = vpop.f32.mrf.mxu1 }
 0x347   :  { %v2874_v35 = vadd.f32 %v3379_v32, %v1245_v44  ;;  %v6367_v44 = vld [vmem:[#allocation56_spill] sm:$0xff] }
 0x348   :  { %v2714_v59 = vpop.f32.mrf.mxu1  ;;  %v1258_v61 = vadd.f32 %v5727_v5, %v6367_v44 }
 0x349   :  { %2938 = vst.msk [vmem:[%s6121_s8 + $0x148] sm:$0xff] %vm221_vm0, %v2874_v35  ;;  %v2873_v46 = vadd.f32 %v2714_v59, %v1244_v58  ;;  %v6368_v35 = vld [vmem:[#allocation59_spill] sm:$0xff] }
 0x34a   :  { %v1261_v59 = vadd.f32 %v5727_v5, %v6368_v35 }
 0x34b   :  { %2937 = vst.msk [vmem:[%s6121_s8 + $0x140] sm:$0xff] %vm221_vm0, %v2873_v46  ;;  %v3382_v0 = vpop.f32.mrf.mxu1  ;;  %v6369_v46 = vld [vmem:[#allocation58_spill] sm:$0xff] }
 0x34c   :  { %v2876_v23 = vadd.f32 %v3382_v0, %v1247_v36  ;;  %v1260_v16 = vadd.f32 %v5727_v5, %v6369_v46 }
 0x34d   :  { %v2724_v22 = vpop.f32.mrf.mxu1 }
 0x34e   :  { %2940 = vst.msk [vmem:[%s6121_s8 + $0x158] sm:$0xff] %vm221_vm0, %v2876_v23  ;;  %v2875_v7 = vadd.f32 %v2724_v22, %v1246_v34 }
 0x350   :  { %2939 = vst.msk [vmem:[%s6121_s8 + $0x150] sm:$0xff] %vm221_vm0, %v2875_v7  ;;  %v1263_v7 = vadd.f32 %v5727_v5, %v4476_v3  ;;  %v1265_v3 = vadd.f32 %v5727_v5, %v4511_v15  ;;  %v1267_v15 = vadd.f32 %v5727_v5, %v4550_v53 }
 0x351   :  { %v3385_v63 = vpop.f32.mrf.mxu1 }
 0x352   :  { %v2878_v49 = vadd.f32 %v3385_v63, %v1249_v18 }
 0x353   :  { %v2734_v43 = vpop.f32.mrf.mxu1 }
 0x354   :  { %2942 = vst.msk [vmem:[%s6121_s8 + $0x168] sm:$0xff] %vm221_vm0, %v2878_v49  ;;  %v2877_v31 = vadd.f32 %v2734_v43, %v1248_v13 }
 0x355   :  { %v3388_v6 = vpop.f32.mrf.mxu1 }
 0x356   :  { %2941 = vst.msk [vmem:[%s6121_s8 + $0x160] sm:$0xff] %vm221_vm0, %v2877_v31  ;;  %v2880_v51 = vadd.f32 %v3388_v6, %v1251_v60 }
 0x357   :  { %v2744_v1 = vpop.f32.mrf.mxu1 }
 0x358   :  { %2944 = vst.msk [vmem:[%s6121_s8 + $0x178] sm:$0xff] %vm221_vm0, %v2880_v51  ;;  %v2879_v24 = vadd.f32 %v2744_v1, %v1250_v27 }
 0x359   :  { %v3391_v21 = vpop.f32.mrf.mxu1 }
 0x35a   :  { %2943 = vst.msk [vmem:[%s6121_s8 + $0x170] sm:$0xff] %vm221_vm0, %v2879_v24  ;;  %v2882_v17 = vadd.f32 %v3391_v21, %v1253_v30 }
 0x35b   :  { %v2754_v45 = vpop.f32.mrf.mxu1 }
 0x35c   :  { %2946 = vst.msk [vmem:[%s6121_s8 + $0x188] sm:$0xff] %vm221_vm0, %v2882_v17  ;;  %v2881_v20 = vadd.f32 %v2754_v45, %v1252_v2 }
 0x35d   :  { %v3394_v56 = vpop.f32.mrf.mxu1 }
 0x35e   :  { %2945 = vst.msk [vmem:[%s6121_s8 + $0x180] sm:$0xff] %vm221_vm0, %v2881_v20  ;;  %v2884_v41 = vadd.f32 %v3394_v56, %v1255_v11 }
 0x35f   :  { %v2764_v39 = vpop.f32.mrf.mxu1 }
 0x360   :  { %2948 = vst.msk [vmem:[%s6121_s8 + $0x198] sm:$0xff] %vm221_vm0, %v2884_v41  ;;  %v2883_v28 = vadd.f32 %v2764_v39, %v1254_v42 }
 0x361   :  { %v3397_v9 = vpop.f32.mrf.mxu1 }
 0x362   :  { %2947 = vst.msk [vmem:[%s6121_s8 + $0x190] sm:$0xff] %vm221_vm0, %v2883_v28  ;;  %v2886_v12 = vadd.f32 %v3397_v9, %v1257_v14 }
 0x363   :  { %v2774_v48 = vpop.f32.mrf.mxu1 }
 0x364   :  { %2950 = vst.msk [vmem:[%s6121_s8 + $0x1a8] sm:$0xff] %vm221_vm0, %v2886_v12  ;;  %v2885_v19 = vadd.f32 %v2774_v48, %v1256_v55 }
 0x365   :  { %v3400_v58 = vpop.f32.mrf.mxu1 }
 0x366   :  { %2949 = vst.msk [vmem:[%s6121_s8 + $0x1a0] sm:$0xff] %vm221_vm0, %v2885_v19  ;;  %v2888_v32 = vadd.f32 %v3400_v58, %v1259_v52 }
 0x367   :  { %v2784_v37 = vpop.f32.mrf.mxu1 }
 0x368   :  { %2952 = vst.msk [vmem:[%s6121_s8 + $0x1b8] sm:$0xff] %vm221_vm0, %v2888_v32  ;;  %v2887_v36 = vadd.f32 %v2784_v37, %v1258_v61 }
 0x369   :  { %v3403_v34 = vpop.f32.mrf.mxu1 }
 0x36a   :  { %2951 = vst.msk [vmem:[%s6121_s8 + $0x1b0] sm:$0xff] %vm221_vm0, %v2887_v36  ;;  %v2890_v0 = vadd.f32 %v3403_v34, %v1261_v59 }
 0x36b   :  { %v2794_v23 = vpop.f32.mrf.mxu1 }
 0x36c   :  { %2954 = vst.msk [vmem:[%s6121_s8 + $0x1c8] sm:$0xff] %vm221_vm0, %v2890_v0  ;;  %v2889_v22 = vadd.f32 %v2794_v23, %v1260_v16 }
 0x36e   :  { %2953 = vst.msk [vmem:[%s6121_s8 + $0x1c0] sm:$0xff] %vm221_vm0, %v2889_v22 }
 0x398   :  { %v3406_v18 = vpop.f32.mrf.mxu1 }
 0x399   :  { %v2892_v4 = vadd.f32 %v3406_v18, %v1263_v7 }
 0x39a   :  { %v2804_v13 = vpop.f32.mrf.mxu1 }
 0x39b   :  { %2956 = vst.msk [vmem:[%s6121_s8 + $0x1d8] sm:$0xff] %vm221_vm0, %v2892_v4  ;;  %v2891_v63 = vadd.f32 %v2804_v13, %v1262_v10 }
 0x39d   :  { %2955 = vst.msk [vmem:[%s6121_s8 + $0x1d0] sm:$0xff] %vm221_vm0, %v2891_v63 }
 0x3a0   :  { %v3409_v49 = vpop.f32.mrf.mxu1 }
 0x3a1   :  { %v2894_v29 = vadd.f32 %v3409_v49, %v1265_v3 }
 0x3a2   :  { %v2814_v60 = vpop.f32.mrf.mxu1 }
 0x3a3   :  { %2958 = vst.msk [vmem:[%s6121_s8 + $0x1e8] sm:$0xff] %vm221_vm0, %v2894_v29  ;;  %v2893_v43 = vadd.f32 %v2814_v60, %v1264_v8 }
 0x3a5   :  { %2957 = vst.msk [vmem:[%s6121_s8 + $0x1e0] sm:$0xff] %vm221_vm0, %v2893_v43 }
 0x3a9   :  { %v3412_v31 = vpop.f32.mrf.mxu1 }
 0x3aa   :  { %v2896_v25 = vadd.f32 %v3412_v31, %v1267_v15 }
 0x3ab   :  { %v2824_v27 = vpop.f32.mrf.mxu1 }
 0x3ac   :  { %2960 = vst.msk [vmem:[%s6121_s8 + $0x1f8] sm:$0xff] %vm221_vm0, %v2896_v25  ;;  %v2895_v6 = vadd.f32 %v2824_v27, %v1266_v26 }
 0x3ae   :  { %2959 = vst.msk [vmem:[%s6121_s8 + $0x1f0] sm:$0xff] %vm221_vm0, %v2895_v6 }

// kernel: prompted_swin_block_forward.2
= control target key start
LH: loop header
LB: loop body
LE: loop exit
PB: predicated region body
PF: predicated region fallthrough
CT: control target
= control target key end

     0   :  { %s6980_s25 = smov 0   ;;  %s6982_s26 = smov 0   ;;  %s9555_s0 = inlined_call_operand.vmem [shape: f32[2,16,16,32], index: 0, kind: input, shape index: {}]   ;;  %s9556_s1 = inlined_call_operand.vmem [shape: f32[4,2,8,32], index: 1, kind: input, shape index: {}]   ;;  %s9557_s2 = inlined_call_operand.vmem [shape: f32[1,32], index: 2, kind: input, shape index: {}]   ;;  %s9558_s3 = inlined_call_operand.vmem [shape: f32[1,32], index: 3, kind: input, shape index: {}]   ;;  %s9559_s4 = inlined_call_operand.vmem [shape: f32[32,32], index: 4, kind: input, shape index: {}]   ;;  %s9560_s5 = inlined_call_operand.vmem [shape: f32[32,32], index: 5, kind: input, shape index: {}]   ;;  %s9561_s6 = inlined_call_operand.vmem [shape: f32[32,32], index: 6, kind: input, shape index: {}]   ;;  %s9562_s7 = inlined_call_operand.vmem [shape: f32[1,32], index: 7, kind: input, shape index: {}]   ;;  %s9563_s8 = inlined_call_operand.vmem [shape: f32[1,32], index: 8, kind: input, shape index: {}]   ;;  %s9564_s9 = inlined_call_operand.vmem [shape: f32[1,32], index: 9, kind: input, shape index: {}]   ;;  %s9565_s10 = inlined_call_operand.vmem [shape: f32[4,64,72], index: 10, kind: input, shape index: {}]   ;;  %s9566_s11 = inlined_call_operand.vmem [shape: f32[32,32], index: 11, kind: input, shape index: {}]   ;;  %s9567_s12 = inlined_call_operand.vmem [shape: f32[1,32], index: 12, kind: input, shape index: {}]   ;;  %s9568_s13 = inlined_call_operand.vmem [shape: f32[2,16,16,32], index: 13, kind: output, shape index: {}]  }
   0x1   :  { %s6984_s27 = smov 0   ;;  %s6986_s28 = smov 0  }
   0x2   :  { %s6988_s29 = smov 0  }
   0x3 LB: > { %s32_s30 = sadd.s32 1, %s6894_s27  ;;  %s35_s14 = sadd.s32 1, %s6898_s28  ;;  %s6902_s29 = sphi %s6988_s29, %s23_s29   ;;  %s6898_s28 = sphi %s6986_s28, %s9765_s28   ;;  %s6894_s27 = sphi %s6984_s27, %s9764_s27   ;;  %s6890_s26 = sphi %s6982_s26, %s9763_s26   ;;  %s6886_s25 = sphi %s6980_s25, %s9762_s25  }
   0x4   : > { %p33_p0 = scmp.ge.s32.totalorder %s32_s30, 2  ;;  %p5263_p1 = scmp.ge.s32.totalorder %s6902_s29, 1 }
   0x5   : > { %p427_p2 = scmp.lt.s32.totalorder %s6902_s29, 5 }
   0x6   : > { %s9767_s30 = smov (%p33_p0, %s32_s30), 0  ;;  %s9769_s14 = smov (!%p33_p0, %s35_s14), %s6898_s28 }
   0x7   : > { %p428_p3 = pnand %p5263_p1, %p427_p2  ;;  %p37_p4 = scmp.ge.s32.totalorder %s9769_s14, 2 }
   0x9   : > { %s9771_s14 = smov (%p37_p4, %s9769_s14), 0  ;;  %431 = sbr.rel (%p428_p3) target bundleno = 3853 (0xf0d), region = 72 }
   0xe   : > { %s5264_s15 = sshll.u32 %s6890_s26, 3  ;;  %p489_p5 = scmp.lt.s32.totalorder %s6886_s25, 1  ;;  %vm535_vm0 = vcmask 261120   ;;  %vm1383_vm1 = vcmask 64512   ;;  %vm1696_vm2 = vcmask 588800   ;;  %vm3063_vm3 = vcmask 130112  }
   0xf   : > { %p491_p6 = scmp.lt.s32.totalorder %s5264_s15, 15  ;;  %s6906_s22 = smov 104   ;;  %vm3978_vm4 = vcmask 195712   ;;  %vm4893_vm5 = vcmask 261312  }
  0x10   : > { %s490_s16 = scalar_select %p489_p5, %s6886_s25, 1 }
  0x11   : > { %s9773_s15 = smov (!%p491_p6, %s5264_s15), 15  ;;  %s6908_s21 = smov 16  }
  0x12   : > { %s5266_s17 = sshll.u32 %s490_s16, 5  ;;  %s5265_s18 = sshll.u32 %s9773_s15, 1 }
  0x13   : > { %s7017_s19 = sadd.s32 %s5266_s17, %s5265_s18  ;;  %s5268_s18 = sshll.u32 %s6886_s25, 1 }
  0x14   : > { %s5267_s20 = sshll.u32 %s7017_s19, 3  ;;  %s6905_s25 = smov 112  }
  0x15   : > { %s7025_s23 = scalar_lea.vmem %s9555_s0, %s5267_s20 }
  0x16   : > { %v524_v0 = vld [vmem:[%s7025_s23 + $0x28] sm:$0xff]  ;;  %v526_v2 = vld [vmem:[%s7025_s23 + $0x38] sm:$0xff]  ;;  %v7040_v12 = vld [vmem:[%s7025_s23] sm:$0xff] }
  0x17   : > { %v528_v1 = vld [vmem:[%s7025_s23 + $0x48] sm:$0xff]  ;;  %v566_v3 = vsel %vm535_vm0, %v524_v0, 0.0  ;;  %v530_v5 = vld [vmem:[%s7025_s23 + $0x58] sm:$0xff]  ;;  %v569_v6 = vsel %vm535_vm0, %v526_v2, 0.0  ;;  %v7043_v13 = vld [vmem:[%s7025_s23 + $0x10] sm:$0xff]  ;;  %v536_v14 = vsel %vm535_vm0, %v7040_v12, 0.0 }
  0x18   : > { %v572_v4 = vsel %vm535_vm0, %v528_v1, 0.0  ;;  %567 = vadd.xlane.f32.xlu0 %v566_v3  ;;  %v575_v7 = vsel %vm535_vm0, %v530_v5, 0.0  ;;  %v532_v8 = vld [vmem:[%s7025_s23 + $0x68] sm:$0xff]  ;;  %v534_v9 = vld [vmem:[%s7025_s23 + $0x78] sm:$0xff]  ;;  %v539_v15 = vsel %vm535_vm0, %v7043_v13, 0.0  ;;  %v7050_v16 = vld [vmem:[%s7025_s23 + $0x20] sm:$0xff] }
  0x19   : > { %573 = vadd.xlane.f32.xlu1 %v572_v4  ;;  %v578_v10 = vsel %vm535_vm0, %v532_v8, 0.0  ;;  %v581_v11 = vsel %vm535_vm0, %v534_v9, 0.0  ;;  %v7053_v17 = vld [vmem:[%s7025_s23 + $0x30] sm:$0xff]  ;;  %v542_v18 = vsel %vm535_vm0, %v7050_v16, 0.0  ;;  %v7060_v20 = vld [vmem:[%s7025_s23 + $0x40] sm:$0xff]  ;;  %v7080_v28 = vld [vmem:[%s7025_s23 + $0x8] sm:$0xff] }
  0x1a   : > { %v545_v19 = vsel %vm535_vm0, %v7053_v17, 0.0  ;;  %v7063_v21 = vld [vmem:[%s7025_s23 + $0x50] sm:$0xff]  ;;  %v548_v22 = vsel %vm535_vm0, %v7060_v20, 0.0  ;;  %v7070_v24 = vld [vmem:[%s7025_s23 + $0x60] sm:$0xff]  ;;  %v7083_v29 = vld [vmem:[%s7025_s23 + $0x18] sm:$0xff]  ;;  %v560_v30 = vsel %vm535_vm0, %v7080_v28, 0.0 }
  0x1b   : > { %v551_v23 = vsel %vm535_vm0, %v7063_v21, 0.0  ;;  %v7073_v25 = vld [vmem:[%s7025_s23 + $0x70] sm:$0xff]  ;;  %v554_v26 = vsel %vm535_vm0, %v7070_v24, 0.0  ;;  %v563_v31 = vsel %vm535_vm0, %v7083_v29, 0.0  ;;  %s500_s23 = sadd.s32 %s6890_s26, %s5268_s18  ;;  %s6904_s26 = smov 120  }
  0x1c   : > { %570 = vadd.xlane.f32.xlu0 %v569_v6  ;;  %v557_v27 = vsel %vm535_vm0, %v7073_v25, 0.0  ;;  %p501_p7 = scmp.lt.s32.totalorder %s500_s23, 3  ;;  %s6907_s18 = smov 8  }
  0x1d   : > { %576 = vadd.xlane.f32.xlu1 %v575_v7 }
  0x1e   : > { %s9775_s23 = smov (!%p501_p7, %s500_s23), 3 }
  0x1f   : > { %s5551_s16 = sshll.u32 %s9775_s23, 4 }
  0x20   : > { %579 = vadd.xlane.f32.xlu0 %v578_v10  ;;  %s7265_s24 = scalar_lea.vmem %s9556_s1, %s5551_s16 }
  0x21   : > { %582 = vadd.xlane.f32.xlu1 %v581_v11 }
  0x24   : > { %537 = vadd.xlane.f32.xlu0 %v536_v14 }
  0x25   : > { %540 = vadd.xlane.f32.xlu1 %v539_v15 }
  0x28   : > { %543 = vadd.xlane.f32.xlu0 %v542_v18 }
  0x29   : > { %546 = vadd.xlane.f32.xlu1 %v545_v19 }
  0x2c   : > { %549 = vadd.xlane.f32.xlu0 %v548_v22 }
  0x2d   : > { %552 = vadd.xlane.f32.xlu1 %v551_v23 }
  0x30   : > { %555 = vadd.xlane.f32.xlu0 %v554_v26 }
  0x31   : > { %558 = vadd.xlane.f32.xlu1 %v557_v27 }
  0x34   : > { %561 = vadd.xlane.f32.xlu0 %v560_v30 }
  0x35   : > { %564 = vadd.xlane.f32.xlu1 %v563_v31 }
  0xa1   : > { %v568_v32 = vpop.xlane.xlu0 %567 }
  0xa2   : > { %v574_v33 = vpop.xlane.xlu1 %573  ;;  %v595_v34 = vmul.f32 0.03125, %v568_v32 }
  0xa3   : > { %v597_v35 = vmul.f32 0.03125, %v574_v33 }
  0xa4   : > { %v7089_v36 = vsub.f32 %v524_v0, %v595_v34 }
  0xa5   : > { %v7091_v37 = vsub.f32 %v528_v1, %v597_v35  ;;  %v571_v38 = vpop.xlane.xlu0 %570 }
  0xa6   : > { %v577_v39 = vpop.xlane.xlu1 %576  ;;  %v596_v40 = vmul.f32 0.03125, %v571_v38  ;;  %v627_v42 = vmul.f32 %v7089_v36, %v7089_v36 }
  0xa7   : > { %v598_v41 = vmul.f32 0.03125, %v577_v39  ;;  %v629_v43 = vmul.f32 %v7091_v37, %v7091_v37 }
  0xa8   : > { %v7097_v44 = vsub.f32 %v526_v2, %v596_v40  ;;  %v663_v46 = vsel %vm535_vm0, %v627_v42, 0.0 }
  0xa9   : > { %v7099_v45 = vsub.f32 %v530_v5, %v598_v41  ;;  %v580_v47 = vpop.xlane.xlu0 %579  ;;  %664 = vadd.xlane.f32.xlu0 %v663_v46  ;;  %v669_v49 = vsel %vm535_vm0, %v629_v43, 0.0 }
  0xaa   : > { %v583_v48 = vpop.xlane.xlu1 %582  ;;  %v599_v50 = vmul.f32 0.03125, %v580_v47  ;;  %v628_v52 = vmul.f32 %v7097_v44, %v7097_v44 }
  0xab   : > { %v600_v51 = vmul.f32 0.03125, %v583_v48  ;;  %v630_v53 = vmul.f32 %v7099_v45, %v7099_v45 }
  0xac   : > { %v7107_v54 = vsub.f32 %v532_v8, %v599_v50  ;;  %v666_v56 = vsel %vm535_vm0, %v628_v52, 0.0 }
  0xad   : > { %v7109_v55 = vsub.f32 %v534_v9, %v600_v51  ;;  %667 = vadd.xlane.f32.xlu1 %v666_v56  ;;  %670 = vadd.xlane.f32.xlu0 %v669_v49  ;;  %v538_v57 = vpop.xlane.xlu0 %537  ;;  %v672_v58 = vsel %vm535_vm0, %v630_v53, 0.0  ;;  %v795_v53 = vld [vmem:[%s9559_s4 + $0x10] sm:$0xff]  ;;  %v794_v56 = vld [vmem:[%s9559_s4 + $0x8] sm:$0xff] }
  0xae   : > { %v541_v59 = vpop.xlane.xlu1 %540  ;;  %v585_v60 = vmul.f32 0.03125, %v538_v57  ;;  %v631_v62 = vmul.f32 %v7107_v54, %v7107_v54  ;;  %v793_v57 = vld [vmem:[%s9559_s4] sm:$0xff] }
  0xaf   : > { %v586_v61 = vmul.f32 0.03125, %v541_v59  ;;  %v632_v63 = vmul.f32 %v7109_v55, %v7109_v55  ;;  %v7200_v59 = vld [vmem:[%s9561_s6 + $0x18] sm:$0xff] }
  0xb0   : > { %v7118_v0 = vsub.f32 %v7040_v12, %v585_v60  ;;  %v675_v2 = vsel %vm535_vm0, %v631_v62, 0.0 }
  0xb1   : > { %v7121_v1 = vsub.f32 %v7043_v13, %v586_v61  ;;  %673 = vadd.xlane.f32.xlu1 %v672_v58  ;;  %676 = vadd.xlane.f32.xlu0 %v675_v2  ;;  %v544_v3 = vpop.xlane.xlu0 %543  ;;  %v678_v4 = vsel %vm535_vm0, %v632_v63, 0.0  ;;  %v7194_v58 = vld [vmem:[%s9560_s5 + $0x18] sm:$0xff] }
  0xb2   : > { %v547_v5 = vpop.xlane.xlu1 %546  ;;  %v587_v6 = vmul.f32 0.03125, %v544_v3  ;;  %v617_v8 = vmul.f32 %v7118_v0, %v7118_v0 }
  0xb3   : > { %v588_v7 = vmul.f32 0.03125, %v547_v5  ;;  %v618_v9 = vmul.f32 %v7121_v1, %v7121_v1 }
  0xb4   : > { %v7130_v10 = vsub.f32 %v7050_v16, %v587_v6  ;;  %v633_v12 = vsel %vm535_vm0, %v617_v8, 0.0 }
  0xb5   : > { %v7133_v11 = vsub.f32 %v7053_v17, %v588_v7  ;;  %679 = vadd.xlane.f32.xlu1 %v678_v4  ;;  %634 = vadd.xlane.f32.xlu0 %v633_v12  ;;  %v550_v13 = vpop.xlane.xlu0 %549  ;;  %v636_v14 = vsel %vm535_vm0, %v618_v9, 0.0 }
  0xb6   : > { %v553_v15 = vpop.xlane.xlu1 %552  ;;  %v589_v18 = vmul.f32 0.03125, %v550_v13  ;;  %v619_v22 = vmul.f32 %v7130_v10, %v7130_v10 }
  0xb7   : > { %v590_v19 = vmul.f32 0.03125, %v553_v15  ;;  %v620_v16 = vmul.f32 %v7133_v11, %v7133_v11 }
  0xb8   : > { %v7142_v23 = vsub.f32 %v7060_v20, %v589_v18  ;;  %v639_v26 = vsel %vm535_vm0, %v619_v22, 0.0 }
  0xb9   : > { %v7145_v17 = vsub.f32 %v7063_v21, %v590_v19  ;;  %637 = vadd.xlane.f32.xlu1 %v636_v14  ;;  %640 = vadd.xlane.f32.xlu0 %v639_v26  ;;  %v556_v27 = vpop.xlane.xlu0 %555  ;;  %v642_v30 = vsel %vm535_vm0, %v620_v16, 0.0 }
  0xba   : > { %v559_v31 = vpop.xlane.xlu1 %558  ;;  %v591_v32 = vmul.f32 0.03125, %v556_v27  ;;  %v621_v34 = vmul.f32 %v7142_v23, %v7142_v23 }
  0xbb   : > { %v592_v33 = vmul.f32 0.03125, %v559_v31  ;;  %v622_v20 = vmul.f32 %v7145_v17, %v7145_v17 }
  0xbc   : > { %v7154_v35 = vsub.f32 %v7070_v24, %v591_v32  ;;  %v645_v38 = vsel %vm535_vm0, %v621_v34, 0.0  ;;  %v7207_v34 = vld [vmem:[%s9557_s2] ss:$0 sm:$0xff] }
  0xbd   : > { %v7157_v21 = vsub.f32 %v7073_v25, %v592_v33  ;;  %643 = vadd.xlane.f32.xlu1 %v642_v30  ;;  %646 = vadd.xlane.f32.xlu0 %v645_v38  ;;  %v562_v39 = vpop.xlane.xlu0 %561  ;;  %v648_v40 = vsel %vm535_vm0, %v622_v20, 0.0 }
  0xbe   : > { %v565_v41 = vpop.xlane.xlu1 %564  ;;  %v593_v42 = vmul.f32 0.03125, %v562_v39  ;;  %v623_v46 = vmul.f32 %v7154_v35, %v7154_v35 }
  0xbf   : > { %v594_v43 = vmul.f32 0.03125, %v565_v41  ;;  %v624_v24 = vmul.f32 %v7157_v21, %v7157_v21 }
  0xc0   : > { %v7166_v47 = vsub.f32 %v7080_v28, %v593_v42  ;;  %v651_v48 = vsel %vm535_vm0, %v623_v46, 0.0  ;;  %v7214_v42 = vld [vmem:[%s9558_s3] ss:$0 sm:$0xff] }
  0xc1   : > { %v7169_v25 = vsub.f32 %v7083_v29, %v594_v43  ;;  %649 = vadd.xlane.f32.xlu1 %v648_v40  ;;  %652 = vadd.xlane.f32.xlu0 %v651_v48  ;;  %v654_v49 = vsel %vm535_vm0, %v624_v24, 0.0  ;;  %v796_v29 = vld [vmem:[%s9559_s4 + $0x18] sm:$0xff] }
  0xc2   : > { %v625_v50 = vmul.f32 %v7166_v47, %v7166_v47  ;;  %6522 = vmatprep.subr.mxu1 %v796_v29  ;;  %5908 = vmatprep.subr.mxu0 %v796_v29 }
  0xc3   : > { %v626_v51 = vmul.f32 %v7169_v25, %v7169_v25  ;;  %6526 = vmatpush3.msra.mxu1 %v796_v29  ;;  %5909 = vmatpush3.msra.mxu0 %v796_v29 }
  0xc4   : > { %v657_v52 = vsel %vm535_vm0, %v625_v50, 0.0  ;;  %6523 = vmatprep.subr.mxu1 %v795_v53  ;;  %5910 = vmatprep.subr.mxu0 %v795_v53 }
  0xc5   : > { %655 = vadd.xlane.f32.xlu1 %v654_v49  ;;  %658 = vadd.xlane.f32.xlu0 %v657_v52  ;;  %v660_v28 = vsel %vm535_vm0, %v626_v51, 0.0 }
  0xc6   : > { %6527 = vmatpush3.msra.mxu1 %v795_v53  ;;  %5911 = vmatpush3.msra.mxu0 %v795_v53 }
  0xc7   : > { %6524 = vmatprep.subr.mxu1 %v794_v56  ;;  %5912 = vmatprep.subr.mxu0 %v794_v56 }
  0xc8   : > { %6528 = vmatpush3.msra.mxu1 %v794_v56  ;;  %5913 = vmatpush3.msra.mxu0 %v794_v56 }
  0xc9   : > { %661 = vadd.xlane.f32.xlu1 %v660_v28  ;;  %6525 = vmatprep.subr.mxu1 %v793_v57 }
  0xca   : > { %6529 = vmatpush3.msra.mxu1 %v793_v57  ;;  %5914 = vmatprep.subr.mxu0 %v793_v57 }
  0xcb   : > { %5915 = vmatpush3.msra.mxu0 %v793_v57  ;;  %5940 = vmatprep.subr.mxu1 %v7194_v58 }
  0xcc   : > { %5975 = vmatprep.subr.mxu0 %v7200_v59 }
 0x132   : > { %v665_v60 = vpop.xlane.xlu0 %664 }
 0x133   : > { %v691_v61 = vmul.f32 0.03125, %v665_v60 }
 0x135   : > { %v707_v62 = vadd.f32 1e-05, %v691_v61 }
 0x136   : > { %v668_v63 = vpop.xlane.xlu1 %667  ;;  %v671_v2 = vpop.xlane.xlu0 %670 }
 0x137   : > { %6576 = vrsqrt.f32 %v707_v62  ;;  %v692_v3 = vmul.f32 0.03125, %v668_v63  ;;  %v693_v4 = vmul.f32 0.03125, %v671_v2 }
 0x139   : > { %v708_v5 = vadd.f32 1e-05, %v692_v3  ;;  %v709_v6 = vadd.f32 1e-05, %v693_v4 }
 0x13a   : > { %v674_v7 = vpop.xlane.xlu1 %673  ;;  %v677_v8 = vpop.xlane.xlu0 %676 }
 0x13b   : > { %6578 = vrsqrt.f32 %v708_v5  ;;  %v694_v9 = vmul.f32 0.03125, %v674_v7  ;;  %v695_v12 = vmul.f32 0.03125, %v677_v8  ;;  %v999_v7 = vld [vmem:[%s9560_s5 + $0x10] sm:$0xff] }
 0x13c   : > { %6580 = vrsqrt.f32 %v709_v6 }
 0x13d   : > { %v710_v13 = vadd.f32 1e-05, %v694_v9  ;;  %v711_v14 = vadd.f32 1e-05, %v695_v12 }
 0x13e   : > { %v680_v15 = vpop.xlane.xlu1 %679  ;;  %v635_v18 = vpop.xlane.xlu0 %634 }
 0x13f   : > { %6582 = vrsqrt.f32 %v710_v13  ;;  %v696_v19 = vmul.f32 0.03125, %v680_v15  ;;  %v681_v22 = vmul.f32 0.03125, %v635_v18 }
 0x140   : > { %6584 = vrsqrt.f32 %v711_v14 }
 0x141   : > { %v712_v16 = vadd.f32 1e-05, %v696_v19  ;;  %v697_v26 = vadd.f32 1e-05, %v681_v22 }
 0x142   : > { %v638_v27 = vpop.xlane.xlu1 %637  ;;  %v641_v30 = vpop.xlane.xlu0 %640 }
 0x143   : > { %6586 = vrsqrt.f32 %v712_v16  ;;  %v682_v31 = vmul.f32 0.03125, %v638_v27  ;;  %v683_v32 = vmul.f32 0.03125, %v641_v30  ;;  %v997_v30 = vld [vmem:[%s9560_s5] sm:$0xff] }
 0x144   : > { %v6577_v33 = vpop.eup %6576  ;;  %6588 = vrsqrt.f32 %v697_v26 }
 0x145   : > { %v698_v20 = vadd.f32 1e-05, %v682_v31  ;;  %v699_v38 = vadd.f32 1e-05, %v683_v32  ;;  %v739_v39 = vmul.f32 %v6577_v33, %v7089_v36 }
 0x146   : > { %v644_v40 = vpop.xlane.xlu1 %643  ;;  %v647_v41 = vpop.xlane.xlu0 %646 }
 0x147   : > { %6590 = vrsqrt.f32 %v698_v20  ;;  %v684_v43 = vmul.f32 0.03125, %v644_v40  ;;  %v685_v46 = vmul.f32 0.03125, %v647_v41  ;;  %v762_v24 = vmul.f32 %v7207_v34, %v739_v39  ;;  %v7277_v39 = vld [vmem:[%s7265_s24] sm:$0xff] }
 0x148   : > { %v6579_v48 = vpop.eup %6578  ;;  %6592 = vrsqrt.f32 %v699_v38 }
 0x149   : > { %v6581_v49 = vpop.eup %6580  ;;  %v700_v50 = vadd.f32 1e-05, %v684_v43  ;;  %v701_v51 = vadd.f32 1e-05, %v685_v46  ;;  %v7218_v36 = vadd.f32 %v7214_v42, %v762_v24  ;;  %v740_v52 = vmul.f32 %v6579_v48, %v7097_v44 }
 0x14a   : > { %v650_v28 = vpop.xlane.xlu1 %649  ;;  %v653_v29 = vpop.xlane.xlu0 %652  ;;  %v741_v53 = vmul.f32 %v6581_v49, %v7091_v37 }
 0x14b   : > { %6594 = vrsqrt.f32 %v700_v50  ;;  %v686_v56 = vmul.f32 0.03125, %v650_v28  ;;  %v687_v57 = vmul.f32 0.03125, %v653_v29  ;;  %5931 = vmatprep.mubr.msk.f32.mxu1 %vm535_vm0, %v7218_v36  ;;  %v763_v60 = vmul.f32 %v7207_v34, %v740_v52  ;;  %v1171_v28 = vld [vmem:[%s9561_s6 + $0x10] sm:$0xff] }
 0x14c   : > { %v6583_v61 = vpop.eup %6582  ;;  %6596 = vrsqrt.f32 %v701_v51  ;;  %v764_v62 = vmul.f32 %v7207_v34, %v741_v53 }
 0x14d   : > { %v6585_v44 = vpop.eup %6584  ;;  %v702_v63 = vadd.f32 1e-05, %v686_v56  ;;  %v703_v2 = vadd.f32 1e-05, %v687_v57  ;;  %v7230_v37 = vadd.f32 %v7214_v42, %v763_v60  ;;  %v742_v3 = vmul.f32 %v6583_v61, %v7099_v45 }
 0x14e   : > { %v656_v4 = vpop.xlane.xlu1 %655  ;;  %v659_v5 = vpop.xlane.xlu0 %658  ;;  %v7234_v6 = vadd.f32 %v7214_v42, %v764_v62  ;;  %v743_v8 = vmul.f32 %v6585_v44, %v7107_v54  ;;  %v998_v54 = vld [vmem:[%s9560_s5 + $0x8] sm:$0xff] }
 0x14f   : > { %6598 = vrsqrt.f32 %v702_v63  ;;  %v688_v9 = vmul.f32 0.03125, %v656_v4  ;;  %v689_v12 = vmul.f32 0.03125, %v659_v5  ;;  %5932 = vmatmul.mubr.msk.f32.vlgmr.msra.gmra.mxu1 %vm535_vm0, %v7230_v37  ;;  %v765_v13 = vmul.f32 %v7207_v34, %v742_v3  ;;  %v1170_v62 = vld [vmem:[%s9561_s6 + $0x8] sm:$0xff]  ;;  %v1169_v5 = vld [vmem:[%s9561_s6] sm:$0xff] }
 0x150   : > { %v6587_v45 = vpop.eup %6586  ;;  %6600 = vrsqrt.f32 %v703_v2  ;;  %5934 = vmatprep.mubr.msk.f32.mxu1 %vm535_vm0, %v7234_v6  ;;  %5941 = vmatpush3.msra.mxu1 %v7194_v58  ;;  %v766_v14 = vmul.f32 %v7207_v34, %v743_v8 }
 0x151   : > { %v6589_v15 = vpop.eup %6588  ;;  %v704_v18 = vadd.f32 1e-05, %v688_v9  ;;  %v705_v19 = vadd.f32 1e-05, %v689_v12  ;;  %5942 = vmatprep.subr.mxu1 %v999_v7  ;;  %v7252_v22 = vadd.f32 %v7214_v42, %v765_v13  ;;  %v744_v16 = vmul.f32 %v6587_v45, %v7109_v55  ;;  %v792_v13 = vld [vmem:[%s7265_s24 + $0x8] sm:$0xff] }
 0x152   : > { %v662_v26 = vpop.xlane.xlu1 %661  ;;  %5943 = vmatpush3.msra.mxu1 %v999_v7  ;;  %v7256_v27 = vadd.f32 %v7214_v42, %v766_v14  ;;  %v729_v58 = vmul.f32 %v6589_v15, %v7118_v0 }
 0x153   : > { %6602 = vrsqrt.f32 %v704_v18  ;;  %v690_v31 = vmul.f32 0.03125, %v662_v26  ;;  %5935 = vmatmul.mubr.msk.f32.gmra.mxu1 %vm535_vm0, %v7252_v22  ;;  %5944 = vmatprep.subr.mxu1 %v998_v54  ;;  %v767_v55 = vmul.f32 %v7207_v34, %v744_v16  ;;  %v7408_v16 = vld [vmem:[%s9563_s8] ss:$0 sm:$0xff] }
 0x154   : > { %v6591_v32 = vpop.eup %6590  ;;  %6604 = vrsqrt.f32 %v705_v19  ;;  %5937 = vmatprep.mubr.msk.f32.mxu1 %vm535_vm0, %v7256_v27  ;;  %5945 = vmatpush3.msra.mxu1 %v998_v54  ;;  %v752_v0 = vmul.f32 %v7207_v34, %v729_v58 }
 0x155   : > { %v6593_v33 = vpop.eup %6592  ;;  %v706_v20 = vadd.f32 1e-05, %v690_v31  ;;  %v7274_v38 = vadd.f32 %v7214_v42, %v767_v55  ;;  %5946 = vmatprep.subr.mxu1 %v997_v30  ;;  %v730_v40 = vmul.f32 %v6591_v32, %v7121_v1 }
 0x156   : > { %v7281_v41 = vadd.f32 %v7214_v42, %v752_v0  ;;  %5947 = vmatpush3.msra.mxu1 %v997_v30  ;;  %v731_v43 = vmul.f32 %v6593_v33, %v7130_v10 }
 0x157   : > { %6606 = vrsqrt.f32 %v706_v20  ;;  %5938 = vmatmul.mubr.msk.f32.gmra.mxu1 %vm535_vm0, %v7274_v38  ;;  %v753_v46 = vmul.f32 %v7207_v34, %v730_v40 }
 0x158   : > { %v6595_v24 = vpop.eup %6594  ;;  %5916 = vmatprep.mubr.msk.f32.mxu0 %vm535_vm0, %v7281_v41  ;;  %5948 = vmatprep.mubr.msk.f32.mxu1 %vm535_vm0, %v7277_v39  ;;  %v754_v1 = vmul.f32 %v7207_v34, %v731_v43 }
 0x159   : > { %v6597_v48 = vpop.eup %6596  ;;  %v776_v49 = vadd.f32 %v7214_v42, %v753_v46  ;;  %v732_v10 = vmul.f32 %v6595_v24, %v7133_v11 }
 0x15a   : > { %v777_v50 = vadd.f32 %v7214_v42, %v754_v1  ;;  %v733_v51 = vmul.f32 %v6597_v48, %v7142_v23 }
 0x15b   : > { %5917 = vmatmul.mubr.msk.f32.vlgmr.msra.gmra.mxu0 %vm535_vm0, %v776_v49  ;;  %5949 = vmatmul.mubr.msk.f32.vlgmr.msra.gmra.mxu1 %vm535_vm0, %v7281_v41  ;;  %v755_v52 = vmul.f32 %v7207_v34, %v732_v10 }
 0x15c   : > { %v6599_v29 = vpop.eup %6598  ;;  %5919 = vmatprep.mubr.msk.f32.mxu0 %vm535_vm0, %v777_v50  ;;  %5951 = vmatprep.mubr.msk.f32.mxu1 %vm535_vm0, %v776_v49  ;;  %v756_v11 = vmul.f32 %v7207_v34, %v733_v51 }
 0x15d   : > { %v6601_v53 = vpop.eup %6600  ;;  %v778_v23 = vadd.f32 %v7214_v42, %v755_v52  ;;  %v734_v56 = vmul.f32 %v6599_v29, %v7145_v17  ;;  %5976 = vmatpush3.msra.mxu0 %v7200_v59 }
 0x15e   : > { %v779_v57 = vadd.f32 %v7214_v42, %v756_v11  ;;  %v735_v60 = vmul.f32 %v6601_v53, %v7154_v35  ;;  %5977 = vmatprep.subr.mxu0 %v1171_v28 }
 0x15f   : > { %5920 = vmatmul.mubr.msk.f32.gmra.mxu0 %vm535_vm0, %v778_v23  ;;  %5952 = vmatmul.mubr.msk.f32.gmra.mxu1 %vm535_vm0, %v777_v50  ;;  %v757_v61 = vmul.f32 %v7207_v34, %v734_v56 }
 0x160   : > { %v6603_v44 = vpop.eup %6602  ;;  %5922 = vmatprep.mubr.msk.f32.mxu0 %vm535_vm0, %v779_v57  ;;  %5954 = vmatprep.mubr.msk.f32.mxu1 %vm535_vm0, %v778_v23  ;;  %v758_v17 = vmul.f32 %v7207_v34, %v735_v60 }
 0x161   : > { %v6605_v59 = vpop.eup %6604  ;;  %v780_v35 = vadd.f32 %v7214_v42, %v757_v61  ;;  %v736_v63 = vmul.f32 %v6603_v44, %v7157_v21  ;;  %5978 = vmatpush3.msra.mxu0 %v1171_v28 }
 0x162   : > { %v781_v2 = vadd.f32 %v7214_v42, %v758_v17  ;;  %v737_v3 = vmul.f32 %v6605_v59, %v7166_v47  ;;  %5979 = vmatprep.subr.mxu0 %v1170_v62 }
 0x163   : > { %5923 = vmatmul.mubr.msk.f32.gmra.mxu0 %vm535_vm0, %v780_v35  ;;  %5955 = vmatmul.mubr.msk.f32.gmra.mxu1 %vm535_vm0, %v779_v57  ;;  %v759_v4 = vmul.f32 %v7207_v34, %v736_v63 }
 0x164   : > { %v6607_v7 = vpop.eup %6606  ;;  %5925 = vmatprep.mubr.msk.f32.mxu0 %vm535_vm0, %v781_v2  ;;  %5957 = vmatprep.mubr.msk.f32.mxu1 %vm535_vm0, %v780_v35  ;;  %v760_v21 = vmul.f32 %v7207_v34, %v737_v3 }
 0x165   : > { %v782_v47 = vadd.f32 %v7214_v42, %v759_v4  ;;  %v738_v8 = vmul.f32 %v6607_v7, %v7169_v25  ;;  %5980 = vmatpush3.msra.mxu0 %v1170_v62  ;;  %v7388_v25 = vld [vmem:[%s9562_s7] ss:$0 sm:$0xff] }
 0x166   : > { %v783_v9 = vadd.f32 %v7214_v42, %v760_v21  ;;  %5981 = vmatprep.subr.mxu0 %v1169_v5 }
 0x167   : > { %5926 = vmatmul.mubr.msk.f32.gmra.mxu0 %vm535_vm0, %v782_v47  ;;  %5958 = vmatmul.mubr.msk.f32.gmra.mxu1 %vm535_vm0, %v781_v2  ;;  %v761_v12 = vmul.f32 %v7207_v34, %v738_v8 }
 0x168   : > { %5928 = vmatprep.mubr.msk.f32.mxu0 %vm535_vm0, %v783_v9  ;;  %5960 = vmatprep.mubr.msk.f32.mxu1 %vm535_vm0, %v782_v47 }
 0x169   : > { %v784_v45 = vadd.f32 %v7214_v42, %v761_v12  ;;  %5982 = vmatpush3.msra.mxu0 %v1169_v5 }
 0x16b   : > { %5929 = vmatmul.mubr.msk.f32.gmra.mxu0 %vm535_vm0, %v784_v45  ;;  %5961 = vmatmul.mubr.msk.f32.gmra.mxu1 %vm535_vm0, %v792_v13 }
 0x16c   : > { %5963 = vmatprep.mubr.msk.f32.mxu1 %vm535_vm0, %v783_v9  ;;  %5983 = vmatprep.mubr.msk.f32.mxu0 %vm535_vm0, %v7277_v39 }
 0x16f   : > { %5964 = vmatmul.mubr.msk.f32.gmra.mxu1 %vm535_vm0, %v784_v45  ;;  %5984 = vmatmul.mubr.msk.f32.vlgmr.msra.gmra.mxu0 %vm535_vm0, %v7281_v41 }
 0x170   : > { %5966 = vmatprep.mubr.msk.f32.mxu1 %vm535_vm0, %v7218_v36  ;;  %5986 = vmatprep.mubr.msk.f32.mxu0 %vm535_vm0, %v776_v49 }
 0x173   : > { %5967 = vmatmul.mubr.msk.f32.gmra.mxu1 %vm535_vm0, %v7230_v37  ;;  %5987 = vmatmul.mubr.msk.f32.gmra.mxu0 %vm535_vm0, %v777_v50 }
 0x174   : > { %5969 = vmatprep.mubr.msk.f32.mxu1 %vm535_vm0, %v7234_v6  ;;  %5989 = vmatprep.mubr.msk.f32.mxu0 %vm535_vm0, %v778_v23 }
 0x177   : > { %5970 = vmatmul.mubr.msk.f32.gmra.mxu1 %vm535_vm0, %v7252_v22  ;;  %5990 = vmatmul.mubr.msk.f32.gmra.mxu0 %vm535_vm0, %v779_v57 }
 0x178   : > { %5972 = vmatprep.mubr.msk.f32.mxu1 %vm535_vm0, %v7256_v27  ;;  %5992 = vmatprep.mubr.msk.f32.mxu0 %vm535_vm0, %v780_v35 }
 0x17b   : > { %5973 = vmatmul.mubr.msk.f32.gmra.mxu1 %vm535_vm0, %v7274_v38  ;;  %5993 = vmatmul.mubr.msk.f32.gmra.mxu0 %vm535_vm0, %v781_v2 }
 0x17c   : > { %5995 = vmatprep.mubr.msk.f32.mxu0 %vm535_vm0, %v782_v47 }
 0x17f   : > { %5996 = vmatmul.mubr.msk.f32.gmra.mxu0 %vm535_vm0, %v792_v13 }
 0x180   : > { %5998 = vmatprep.mubr.msk.f32.mxu0 %vm535_vm0, %v783_v9 }
 0x183   : > { %5999 = vmatmul.mubr.msk.f32.gmra.mxu0 %vm535_vm0, %v784_v45 }
 0x184   : > { %6001 = vmatprep.mubr.msk.f32.mxu0 %vm535_vm0, %v7218_v36 }
 0x187   : > { %6002 = vmatmul.mubr.msk.f32.gmra.mxu0 %vm535_vm0, %v7230_v37 }
 0x188   : > { %6004 = vmatprep.mubr.msk.f32.mxu0 %vm535_vm0, %v7234_v6 }
 0x18b   : > { %6005 = vmatmul.mubr.msk.f32.gmra.mxu0 %vm535_vm0, %v7252_v22 }
 0x18c   : > { %6007 = vmatprep.mubr.msk.f32.mxu0 %vm535_vm0, %v7256_v27 }
 0x18f   : > { %6008 = vmatmul.mubr.msk.f32.gmra.mxu0 %vm535_vm0, %v7274_v38 }
 0x20f   : > { %v5933_v34 = vpop.f32.mrf.mxu1 }
 0x210   : > { %v7391_v42 = vadd.f32 %v5933_v34, %v7388_v25 }
 0x211   : > { %v968_v36 = vpop.f32.mrf.mxu1 }
 0x212   : > { %v7394_v37 = vadd.f32 %v7388_v25, %v968_v36 }
 0x213   : > { %v5936_v6 = vpop.f32.mrf.mxu1 }
 0x214   : > { %v7397_v14 = vadd.f32 %v5936_v6, %v7388_v25 }
 0x215   : > { %v978_v54 = vpop.f32.mrf.mxu1 }
 0x216   : > { %v7400_v15 = vadd.f32 %v7388_v25, %v978_v54 }
 0x217   : > { %v5939_v18 = vpop.f32.mrf.mxu1 }
 0x218   : > { %v7403_v19 = vadd.f32 %v5939_v18, %v7388_v25  ;;  %v7546_v18 = vld [vmem:[%s9564_s9] ss:$0 sm:$0xff] }
 0x219   : > { %v988_v22 = vpop.f32.mrf.mxu1 }
 0x21a   : > { %v7411_v26 = vadd.f32 %v7388_v25, %v988_v22 }
 0x21b   : > { %v7413_v27 = vpop.f32.mrf.mxu0  ;;  %v5950_v58 = vpop.f32.mrf.mxu1 }
 0x21c   : > { %v7416_v30 = vadd.f32 %v5950_v58, %v7408_v16 }
 0x21d   : > { %v918_v31 = vpop.f32.mrf.mxu0  ;;  %v1080_v55 = vpop.f32.mrf.mxu1 }
 0x21e   : > { %9638 = vst [vmem:[#allocation3_spill] sm:$0xff] %v7416_v30  ;;  %v919_v32 = vadd.f32 %v7388_v25, %v918_v31  ;;  %2165 = vrot.lane.b32.xlu0 %v7416_v30, %s6904_s26  ;;  %v7426_v38 = vadd.f32 %v7408_v16, %v1080_v55 }
 0x21f   : > { %v7421_v0 = vpop.f32.mrf.mxu0  ;;  %v5953_v33 = vpop.f32.mrf.mxu1 }
 0x220   : > { %v7423_v20 = vmul.f32 0.35355338, %v919_v32  ;;  %9640 = vst [vmem:[#allocation5_spill] sm:$0xff] %v7426_v38  ;;  %v7437_v46 = vadd.f32 %v5953_v33, %v7408_v16 }
 0x221   : > { %v7428_v39 = vpop.f32.mrf.mxu0  ;;  %v1090_v40 = vpop.f32.mrf.mxu1 }
 0x222   : > { %9639 = vst [vmem:[#allocation4_spill] sm:$0xff] %v7423_v20  ;;  %2163 = vrot.lane.b32.xlu0 %v7426_v38, %s6904_s26  ;;  %6028 = vmatprep.mubr.msk.f32.mxu1 %vm1383_vm1, %v7423_v20  ;;  %9641 = vst [vmem:[#allocation6_spill] sm:$0xff] %v7437_v46  ;;  %v7449_v50 = vadd.f32 %v7408_v16, %v1090_v40 }
 0x223   : > { %v7434_v41 = vpop.f32.mrf.mxu0  ;;  %v5956_v43 = vpop.f32.mrf.mxu1 }
 0x224   : > { %9643 = vst [vmem:[#allocation8_spill] sm:$0xff] %v7449_v50  ;;  %v7465_v53 = vadd.f32 %v5956_v43, %v7408_v16 }
 0x225   : > { %v7439_v24 = vpop.f32.mrf.mxu0  ;;  %v1100_v1 = vpop.f32.mrf.mxu1 }
 0x226   : > { %v7442_v48 = vadd.f32 %v7408_v16, %v1100_v1  ;;  %2169 = vrot.lane.b32.xlu0 %v7437_v46, %s6904_s26  ;;  %9645 = vst [vmem:[#allocation10_spill] sm:$0xff] %v7465_v53 }
 0x227   : > { %v7446_v49 = vpop.f32.mrf.mxu0  ;;  %v5959_v10 = vpop.f32.mrf.mxu1 }
 0x228   : > { %9642 = vst [vmem:[#allocation7_spill] sm:$0xff] %v7442_v48  ;;  %2171 = vrot.lane.b32.xlu1 %v7442_v48, %s6904_s26  ;;  %v7456_v28 = vadd.f32 %v5959_v10, %v7408_v16 }
 0x229   : > { %v7453_v51 = vpop.f32.mrf.mxu0  ;;  %v1110_v52 = vpop.f32.mrf.mxu1 }
 0x22a   : > { %9644 = vst [vmem:[#allocation9_spill] sm:$0xff] %v7456_v28  ;;  %2167 = vrot.lane.b32.xlu0 %v7449_v50, %s6904_s26  ;;  %v7470_v57 = vadd.f32 %v7408_v16, %v1110_v52 }
 0x22b   : > { %v7460_v29 = vpop.f32.mrf.mxu0  ;;  %v7462_v11 = vpop.f32.mrf.mxu1 }
 0x22c   : > { %2177 = vrot.lane.b32.xlu1 %v7456_v28, %s6904_s26  ;;  %9646 = vst [vmem:[#allocation11_spill] sm:$0xff] %v7470_v57 }
 0x22d   : > { %v958_v23 = vpop.f32.mrf.mxu0  ;;  %v1120_v56 = vpop.f32.mrf.mxu1 }
 0x22e   : > { %v959_v60 = vadd.f32 %v7388_v25, %v958_v23  ;;  %v7474_v61 = vadd.f32 %v7408_v16, %v1120_v56  ;;  %2173 = vrot.lane.b32.xlu0 %v7465_v53, %s6904_s26 }
 0x22f   : > { %v7478_v62 = vpop.f32.mrf.mxu1  ;;  %v7480_v44 = vpop.f32.mrf.mxu0 }
 0x230   : > { %9647 = vst [vmem:[#allocation12_spill] sm:$0xff] %v7474_v61  ;;  %v7482_v17 = vmul.f32 0.35355338, %v959_v60  ;;  %6010 = vmatprep.subr.msk.mxu1 %vm1383_vm1, %v7474_v61  ;;  %2175 = vrot.lane.b32.xlu1 %v7470_v57, %s6904_s26 }
 0x231   : > { %v7488_v59 = vpop.f32.mrf.mxu1  ;;  %v7490_v35 = vpop.f32.mrf.mxu0  ;;  %6011 = vmatpush3.xpose.msk.msra.mxu1 %vm1383_vm1, %v7474_v61 }
 0x232   : > { %2179 = vrot.lane.b32.xlu0 %v7474_v61, %s6904_s26  ;;  %6012 = vmatprep.subr.msk.mxu1 %vm1383_vm1, %v7456_v28 }
 0x233   : > { %6058 = vmatprep.mubr.msk.f32.mxu0 %vm1383_vm1, %v7482_v17  ;;  %v5968_v63 = vpop.f32.mrf.mxu1  ;;  %v7500_v2 = vpop.f32.mrf.mxu0 }
 0x234   : > { %v7503_v3 = vadd.f32 %v5968_v63, %v7408_v16  ;;  %v924_v63 = vadd.f32 %v7413_v27, %v7388_v25 }
 0x235   : > { %v1140_v4 = vpop.f32.mrf.mxu1  ;;  %v7505_v5 = vpop.f32.mrf.mxu0  ;;  %6013 = vmatpush3.xpose.msk.msra.mxu1 %vm1383_vm1, %v7456_v28 }
 0x236   : > { %9648 = vst [vmem:[#allocation13_spill] sm:$0xff] %v7503_v3  ;;  %6014 = vmatprep.subr.msk.mxu1 %vm1383_vm1, %v7470_v57  ;;  %2344 = vrot.lane.b32.xlu1 %v7503_v3, %s6904_s26  ;;  %v7623_v27 = vmul.f32 0.35355338, %v924_v63 }
 0x237   : > { %v5971_v7 = vpop.f32.mrf.mxu1  ;;  %v7513_v21 = vpop.f32.mrf.mxu0 }
 0x238   : > { %v7516_v47 = vadd.f32 %v5971_v7, %v7408_v16  ;;  %9662 = vst [vmem:[#allocation27_spill] sm:$0xff] %v7623_v27 }
 0x239   : > { %v1150_v8 = vpop.f32.mrf.mxu1  ;;  %v7518_v9 = vpop.f32.mrf.mxu0  ;;  %6015 = vmatpush3.xpose.msk.msra.mxu1 %vm1383_vm1, %v7470_v57 }
 0x23a   : > { %9649 = vst [vmem:[#allocation14_spill] sm:$0xff] %v7516_v47  ;;  %6016 = vmatprep.subr.msk.mxu1 %vm1383_vm1, %v7465_v53  ;;  %2348 = vrot.lane.b32.xlu1 %v7516_v47, %s6904_s26  ;;  %v7530_v34 = vadd.f32 %v7408_v16, %v1150_v8 }
 0x23b   : > { %v5974_v12 = vpop.f32.mrf.mxu1  ;;  %v5994_v13 = vpop.f32.mrf.mxu0 }
 0x23c   : > { %v7527_v45 = vadd.f32 %v5974_v12, %v7408_v16  ;;  %9651 = vst [vmem:[#allocation16_spill] sm:$0xff] %v7530_v34  ;;  %v929_v12 = vadd.f32 %v7388_v25, %v7428_v39 }
 0x23d   : > { %v1160_v36 = vpop.f32.mrf.mxu1  ;;  %v7532_v6 = vpop.f32.mrf.mxu0  ;;  %6017 = vmatpush3.xpose.msk.msra.mxu1 %vm1383_vm1, %v7465_v53 }
 0x23e   : > { %9650 = vst [vmem:[#allocation15_spill] sm:$0xff] %v7527_v45  ;;  %v7537_v54 = vadd.f32 %v7408_v16, %v1160_v36  ;;  %6018 = vmatprep.subr.msk.mxu1 %vm1383_vm1, %v7442_v48  ;;  %2352 = vrot.lane.b32.xlu0 %v7527_v45, %s6904_s26  ;;  %v7615_v36 = vadd.f32 %v7408_v16, %v1140_v4  ;;  %v7628_v39 = vmul.f32 0.35355338, %v929_v12 }
 0x23f   : > { %6040 = vmatprep.subr.msk.mxu0 %vm1383_vm1, %v7527_v45  ;;  %2346 = vrot.lane.b32.xlu1 %v7530_v34, %s6904_s26  ;;  %v5997_v22 = vpop.f32.mrf.mxu0  ;;  %v7632_v4 = vadd.f32 %v7478_v62, %v7408_v16  ;;  %v944_v62 = vadd.f32 %v7434_v41, %v7388_v25  ;;  %v7674_v41 = vadd.f32 %v7513_v21, %v7546_v18 }
 0x240   : > { %9652 = vst [vmem:[#allocation17_spill] sm:$0xff] %v7537_v54  ;;  %v7553_v58 = vadd.f32 %v5997_v22, %v7546_v18  ;;  %6041 = vmatpush3.xpose.msk.msra.mxu0 %vm1383_vm1, %v7527_v45  ;;  %9661 = vst [vmem:[#allocation26_spill] sm:$0xff] %v7615_v36  ;;  %v934_v22 = vadd.f32 %v7421_v0, %v7388_v25  ;;  %v7690_v21 = vadd.f32 %v7546_v18, %v7518_v9 }
 0x241   : > { %6042 = vmatprep.subr.msk.mxu0 %vm1383_vm1, %v7537_v54  ;;  %v1286_v31 = vpop.f32.mrf.mxu0  ;;  %6019 = vmatpush3.xpose.msk.msra.mxu1 %vm1383_vm1, %v7442_v48  ;;  %9663 = vst [vmem:[#allocation28_spill] sm:$0xff] %v7632_v4  ;;  %9666 = vst [vmem:[#allocation31_spill] sm:$0xff] %v7674_v41  ;;  %v7729_v9 = vadd.f32 %v7480_v44, %v7546_v18  ;;  %v7749_v44 = vmul.f32 0.35355338, %v7400_v15  ;;  %v7765_v15 = vmul.f32 0.35355338, %v7411_v26 }
 0x242   : > { %9653 = vst [vmem:[#allocation18_spill] sm:$0xff] %v7553_v58  ;;  %6020 = vmatprep.subr.msk.mxu1 %vm1383_vm1, %v7437_v46  ;;  %v7605_v7 = vadd.f32 %v7546_v18, %v1286_v31  ;;  %v939_v31 = vadd.f32 %v7388_v25, %v7439_v24  ;;  %v7648_v0 = vmul.f32 0.35355338, %v934_v22  ;;  %v7652_v24 = vadd.f32 %v7408_v16, %v7488_v59 }
 0x243   : > { %2350 = vrot.lane.b32.xlu1 %v7537_v54, %s6904_s26  ;;  %v6000_v55 = vpop.f32.mrf.mxu0  ;;  %v949_v59 = vadd.f32 %v7388_v25, %v7453_v51  ;;  %v7684_v51 = vmul.f32 0.35355338, %v944_v62  ;;  %9667 = vst [vmem:[#allocation32_spill] sm:$0xff] %v7690_v21  ;;  %9670 = vst [vmem:[#allocation35_spill] sm:$0xff] %v7729_v9 }
 0x244   : > { %v7566_v32 = vadd.f32 %v6000_v55, %v7546_v18  ;;  %6043 = vmatpush3.xpose.msk.msra.mxu0 %vm1383_vm1, %v7537_v54  ;;  %9659 = vst [vmem:[#allocation24_spill] sm:$0xff] %v7605_v7  ;;  %v7641_v55 = vadd.f32 %v5994_v13, %v7546_v18  ;;  %v7657_v13 = vmul.f32 0.35355338, %v939_v31 }
 0x245   : > { %6044 = vmatprep.subr.msk.mxu0 %vm1383_vm1, %v7516_v47  ;;  %v1296_v33 = vpop.f32.mrf.mxu0  ;;  %6021 = vmatpush3.xpose.msk.msra.mxu1 %vm1383_vm1, %v7437_v46 }
 0x246   : > { %9654 = vst [vmem:[#allocation19_spill] sm:$0xff] %v7566_v32  ;;  %v7575_v40 = vadd.f32 %v7546_v18, %v1296_v33  ;;  %6022 = vmatprep.subr.msk.mxu1 %vm1383_vm1, %v7449_v50  ;;  %9664 = vst [vmem:[#allocation29_spill] sm:$0xff] %v7641_v55  ;;  %v7661_v33 = vadd.f32 %v7546_v18, %v7532_v6  ;;  %v7681_v6 = vadd.f32 %v7462_v11, %v7408_v16 }
 0x247   : > { %v6003_v43 = vpop.f32.mrf.mxu0  ;;  %v964_v16 = vadd.f32 %v7460_v29, %v7388_v25  ;;  %v7716_v29 = vadd.f32 %v7546_v18, %v7505_v5 }
 0x248   : > { %9655 = vst [vmem:[#allocation20_spill] sm:$0xff] %v7575_v40  ;;  %v7580_v1 = vadd.f32 %v6003_v43, %v7546_v18  ;;  %6045 = vmatpush3.xpose.msk.msra.mxu0 %vm1383_vm1, %v7516_v47  ;;  %9665 = vst [vmem:[#allocation30_spill] sm:$0xff] %v7661_v33  ;;  %v954_v43 = vadd.f32 %v7446_v49, %v7388_v25  ;;  %v7704_v49 = vadd.f32 %v7500_v2, %v7546_v18 }
 0x249   : > { %6046 = vmatprep.subr.msk.mxu0 %vm1383_vm1, %v7530_v34  ;;  %v1306_v10 = vpop.f32.mrf.mxu0  ;;  %6023 = vmatpush3.xpose.msk.msra.mxu1 %vm1383_vm1, %v7449_v50  ;;  %9669 = vst [vmem:[#allocation34_spill] sm:$0xff] %v7716_v29  ;;  %v7721_v11 = vmul.f32 0.35355338, %v964_v16  ;;  %v7725_v2 = vmul.f32 0.35355338, %v7394_v37 }
 0x24a   : > { %9656 = vst [vmem:[#allocation21_spill] sm:$0xff] %v7580_v1  ;;  %v7589_v52 = vadd.f32 %v7546_v18, %v1306_v10  ;;  %6024 = vmatprep.subr.msk.mxu1 %vm1383_vm1, %v7416_v30  ;;  %v7695_v10 = vmul.f32 0.35355338, %v949_v59  ;;  %9668 = vst [vmem:[#allocation33_spill] sm:$0xff] %v7704_v49  ;;  %v7712_v25 = vmul.f32 0.35355338, %v954_v43 }
 0x24b   : > { %v6006_v23 = vpop.f32.mrf.mxu0  ;;  %v7745_v37 = vmul.f32 0.35355338, %v7391_v42  ;;  %v7762_v42 = vmul.f32 0.35355338, %v7397_v14 }
 0x24c   : > { %9657 = vst [vmem:[#allocation22_spill] sm:$0xff] %v7589_v52  ;;  %v7594_v56 = vadd.f32 %v6006_v23, %v7546_v18  ;;  %6047 = vmatpush3.xpose.msk.msra.mxu0 %vm1383_vm1, %v7530_v34  ;;  %v7739_v23 = vadd.f32 %v7546_v18, %v7490_v35  ;;  %v7772_v35 = vmul.f32 0.35355338, %v7403_v19  ;;  %v1336_v19 = vld [vmem:[%s9565_s10 + $0x8] sm:$0xff]  ;;  %v1339_v34 = vld [vmem:[%s9565_s10 + $0x20] sm:$0xff] }
 0x24d   : > { %6048 = vmatprep.subr.msk.mxu0 %vm1383_vm1, %v7503_v3  ;;  %v1316_v60 = vpop.f32.mrf.mxu0  ;;  %6025 = vmatpush3.xpose.msk.msra.mxu1 %vm1383_vm1, %v7416_v30  ;;  %v1342_v30 = vld [vmem:[%s9565_s10 + $0x38] sm:$0xff] }
 0x24e   : > { %9658 = vst [vmem:[#allocation23_spill] sm:$0xff] %v7594_v56  ;;  %v7608_v8 = vadd.f32 %v7546_v18, %v1316_v60  ;;  %6026 = vmatprep.subr.msk.mxu1 %vm1383_vm1, %v7426_v38  ;;  %9671 = vst [vmem:[#allocation36_spill] sm:$0xff] %v7739_v23 }
 0x24f   : > { %v6009_v5 = vpop.f32.mrf.mxu0 }
 0x250   : > { %9660 = vst [vmem:[#allocation25_spill] sm:$0xff] %v7608_v8  ;;  %6049 = vmatpush3.xpose.msk.msra.mxu0 %vm1383_vm1, %v7503_v3  ;;  %v7752_v60 = vadd.f32 %v6009_v5, %v7546_v18  ;;  %v1335_v5 = vld [vmem:[%s9565_s10] sm:$0xff]  ;;  %v1340_v3 = vld [vmem:[%s9565_s10 + $0x28] sm:$0xff] }
 0x251   : > { %6050 = vmatprep.subr.msk.mxu0 %vm1383_vm1, %v7615_v36  ;;  %6027 = vmatpush3.xpose.msk.msra.mxu1 %vm1383_vm1, %v7426_v38  ;;  %v7833_v47 = vpop.f32.mrf.mxu0 }
 0x252   : > { %6070 = vmatprep.subr.mxu1 %v7605_v7 }
 0x254   : > { %6051 = vmatpush3.xpose.msk.msra.mxu0 %vm1383_vm1, %v7615_v36  ;;  %6029 = vmatmul.mubr.msk.f32.vlgmr.msra.gmra.mxu1 %vm1383_vm1, %v7623_v27 }
 0x255   : > { %6052 = vmatprep.subr.msk.mxu0 %vm1383_vm1, %v7632_v4  ;;  %6031 = vmatprep.mubr.msk.f32.mxu1 %vm1383_vm1, %v7628_v39 }
 0x256   : > { %6071 = vmatpush3.msra.mxu1 %v7605_v7 }
 0x257   : > { %6072 = vmatprep.subr.mxu1 %v7641_v55 }
 0x258   : > { %6053 = vmatpush3.xpose.msk.msra.mxu0 %vm1383_vm1, %v7632_v4  ;;  %6073 = vmatpush3.msra.mxu1 %v7641_v55 }
 0x259   : > { %6032 = vmatmul.mubr.msk.f32.gmra.mxu1 %vm1383_vm1, %v7648_v0  ;;  %6054 = vmatprep.subr.msk.mxu0 %vm1383_vm1, %v7652_v24 }
 0x25a   : > { %6074 = vmatprep.subr.mxu1 %v7661_v33  ;;  %6034 = vmatprep.mubr.msk.f32.mxu1 %vm1383_vm1, %v7657_v13 }
 0x25b   : > { %6075 = vmatpush3.msra.mxu1 %v7661_v33 }
 0x25c   : > { %6076 = vmatprep.subr.mxu1 %v7674_v41  ;;  %6055 = vmatpush3.xpose.msk.msra.mxu0 %vm1383_vm1, %v7652_v24 }
 0x25d   : > { %6077 = vmatpush3.msra.mxu1 %v7674_v41  ;;  %6056 = vmatprep.subr.msk.mxu0 %vm1383_vm1, %v7681_v6 }
 0x25e   : > { %6035 = vmatmul.mubr.msk.f32.gmra.mxu1 %vm1383_vm1, %v7684_v51  ;;  %6078 = vmatprep.subr.mxu1 %v7690_v21 }
 0x25f   : > { %6037 = vmatprep.mubr.msk.f32.mxu1 %vm1383_vm1, %v7695_v10  ;;  %6079 = vmatpush3.msra.mxu1 %v7690_v21 }
 0x260   : > { %6080 = vmatprep.subr.mxu1 %v7704_v49  ;;  %6057 = vmatpush3.xpose.msk.msra.mxu0 %vm1383_vm1, %v7681_v6 }
 0x261   : > { %6081 = vmatpush3.msra.mxu1 %v7704_v49 }
 0x262   : > { %6038 = vmatmul.mubr.msk.f32.gmra.mxu1 %vm1383_vm1, %v7712_v25  ;;  %6082 = vmatprep.subr.mxu1 %v7716_v29 }
 0x263   : > { %6083 = vmatpush3.msra.mxu1 %v7716_v29  ;;  %6059 = vmatmul.mubr.msk.f32.vlgmr.msra.gmra.mxu0 %vm1383_vm1, %v7721_v11 }
 0x264   : > { %6084 = vmatprep.subr.mxu1 %v7729_v9  ;;  %6061 = vmatprep.mubr.msk.f32.mxu0 %vm1383_vm1, %v7725_v2 }
 0x265   : > { %6085 = vmatpush3.msra.mxu1 %v7729_v9 }
 0x266   : > { %6086 = vmatprep.subr.mxu1 %v7739_v23 }
 0x267   : > { %6087 = vmatpush3.msra.mxu1 %v7739_v23  ;;  %6062 = vmatmul.mubr.msk.f32.gmra.mxu0 %vm1383_vm1, %v7745_v37 }
 0x268   : > { %6100 = vmatprep.subr.mxu1 %v7752_v60  ;;  %6064 = vmatprep.mubr.msk.f32.mxu0 %vm1383_vm1, %v7749_v44 }
 0x26b   : > { %6065 = vmatmul.mubr.msk.f32.gmra.mxu0 %vm1383_vm1, %v7762_v42 }
 0x26c   : > { %6067 = vmatprep.mubr.msk.f32.mxu0 %vm1383_vm1, %v7765_v15 }
 0x26f   : > { %6068 = vmatmul.mubr.msk.f32.gmra.mxu0 %vm1383_vm1, %v7772_v35 }
 0x290   : > { %v2166_v63 = vpop.permute.xlu0 %2165 }
 0x294   : > { %v2164_v12 = vpop.permute.xlu0 %2163 }
 0x298   : > { %v2170_v22 = vpop.permute.xlu0 %2169 }
 0x29a   : > { %v2172_v31 = vpop.permute.xlu1 %2171 }
 0x29c   : > { %v2168_v14 = vpop.permute.xlu0 %2167 }
 0x29e   : > { %v2178_v26 = vpop.permute.xlu1 %2177 }
 0x2a0   : > { %v2174_v62 = vpop.permute.xlu0 %2173 }
 0x2a2   : > { %v2176_v43 = vpop.permute.xlu1 %2175 }
 0x2a4   : > { %v2180_v59 = vpop.permute.xlu0 %2179 }
 0x2a5   : > { %6130 = vmatprep.subr.msk.mxu0 %vm1383_vm1, %v2180_v59 }
 0x2a6   : > { %6131 = vmatpush3.xpose.msk.msra.mxu0 %vm1383_vm1, %v2180_v59 }
 0x2a7   : > { %6132 = vmatprep.subr.msk.mxu0 %vm1383_vm1, %v2178_v26 }
 0x2aa   : > { %6133 = vmatpush3.xpose.msk.msra.mxu0 %vm1383_vm1, %v2178_v26  ;;  %v1337_v26 = vld [vmem:[%s9565_s10 + $0x10] sm:$0xff] }
 0x2ab   : > { %6134 = vmatprep.subr.msk.mxu0 %vm1383_vm1, %v2176_v43 }
 0x2ae   : > { %6135 = vmatpush3.xpose.msk.msra.mxu0 %vm1383_vm1, %v2176_v43 }
 0x2af   : > { %6136 = vmatprep.subr.msk.mxu0 %vm1383_vm1, %v2174_v62 }
 0x2b2   : > { %6137 = vmatpush3.xpose.msk.msra.mxu0 %vm1383_vm1, %v2174_v62 }
 0x2b3   : > { %6138 = vmatprep.subr.msk.mxu0 %vm1383_vm1, %v2172_v31 }
 0x2b6   : > { %6139 = vmatpush3.xpose.msk.msra.mxu0 %vm1383_vm1, %v2172_v31 }
 0x2b7   : > { %6140 = vmatprep.subr.msk.mxu0 %vm1383_vm1, %v2170_v22 }
 0x2ba   : > { %6141 = vmatpush3.xpose.msk.msra.mxu0 %vm1383_vm1, %v2170_v22 }
 0x2bb   : > { %6142 = vmatprep.subr.msk.mxu0 %vm1383_vm1, %v2168_v14 }
 0x2be   : > { %6143 = vmatpush3.xpose.msk.msra.mxu0 %vm1383_vm1, %v2168_v14 }
 0x2bf   : > { %6144 = vmatprep.subr.msk.mxu0 %vm1383_vm1, %v2166_v63 }
 0x2c2   : > { %6145 = vmatpush3.xpose.msk.msra.mxu0 %vm1383_vm1, %v2166_v63  ;;  %v1338_v63 = vld [vmem:[%s9565_s10 + $0x18] sm:$0xff] }
 0x2c3   : > { %6146 = vmatprep.subr.msk.mxu0 %vm1383_vm1, %v2164_v12 }
 0x2c6   : > { %6147 = vmatpush3.xpose.msk.msra.mxu0 %vm1383_vm1, %v2164_v12 }
 0x314   : > { %v6030_v16 = vpop.f32.mrf.mxu1 }
 0x315   : > { %v7800_v22 = vadd.f32 %v6030_v16, %v1336_v19 }
 0x316   : > { %v1501_v14 = vpop.f32.mrf.mxu1 }
 0x317   : > { %v7802_v31 = vadd.f32 %v1501_v14, %v1335_v5  ;;  %v1700_v12 = vsel %vm1696_vm2, %v7800_v22, -inf }
 0x318   : > { %1701 = vmax.xlane.f32.xlu1 %v1700_v12 }
 0x319   : > { %v6033_v62 = vpop.f32.mrf.mxu1  ;;  %v1697_v59 = vsel %vm1696_vm2, %v7802_v31, -inf }
 0x31a   : > { %v7814_v43 = vadd.f32 %v6033_v62, %v1338_v63  ;;  %1698 = vmax.xlane.f32.xlu0 %v1697_v59 }
 0x31b   : > { %v1511_v16 = vpop.f32.mrf.mxu1 }
 0x31c   : > { %v7816_v14 = vadd.f32 %v1511_v16, %v1337_v26  ;;  %v1706_v12 = vsel %vm1696_vm2, %v7814_v43, -inf }
 0x31d   : > { %1707 = vmax.xlane.f32.xlu1 %v1706_v12 }
 0x31e   : > { %v6036_v38 = vpop.f32.mrf.mxu1  ;;  %v1703_v62 = vsel %vm1696_vm2, %v7816_v14, -inf }
 0x31f   : > { %v7828_v59 = vadd.f32 %v6036_v38, %v1340_v3  ;;  %1704 = vmax.xlane.f32.xlu0 %v1703_v62  ;;  %v1341_v38 = vld [vmem:[%s9565_s10 + $0x30] sm:$0xff] }
 0x320   : > { %v1521_v16 = vpop.f32.mrf.mxu1 }
 0x321   : > { %v7835_v50 = vadd.f32 %v1521_v16, %v1339_v34  ;;  %v1712_v12 = vsel %vm1696_vm2, %v7828_v59, -inf }
 0x322   : > { %v6039_v54 = vpop.f32.mrf.mxu1  ;;  %1713 = vmax.xlane.f32.xlu1 %v1712_v12 }
 0x323   : > { %v7842_v46 = vadd.f32 %v6039_v54, %v1342_v30  ;;  %v1709_v62 = vsel %vm1696_vm2, %v7835_v50, -inf  ;;  %v6060_v45 = vpop.f32.mrf.mxu0 }
 0x324   : > { %v1531_v48 = vpop.f32.mrf.mxu1  ;;  %1710 = vmax.xlane.f32.xlu0 %v1709_v62  ;;  %v7848_v16 = vadd.f32 %v6060_v45, %v1336_v19 }
 0x325   : > { %v7846_v53 = vadd.f32 %v1531_v48, %v1341_v38  ;;  %v1718_v57 = vsel %vm1696_vm2, %v7842_v46, -inf  ;;  %v1657_v12 = vpop.f32.mrf.mxu0 }
 0x326   : > { %1719 = vmax.xlane.f32.xlu1 %v1718_v57  ;;  %v7852_v28 = vadd.f32 %v1657_v12, %v1335_v5  ;;  %v1724_v48 = vsel %vm1696_vm2, %v7848_v16, -inf }
 0x327   : > { %v1715_v54 = vsel %vm1696_vm2, %v7846_v53, -inf  ;;  %v6063_v61 = vpop.f32.mrf.mxu0 }
 0x328   : > { %1716 = vmax.xlane.f32.xlu0 %v1715_v54  ;;  %v7856_v9 = vadd.f32 %v6063_v61, %v1338_v63  ;;  %v1721_v57 = vsel %vm1696_vm2, %v7852_v28, -inf }
 0x329   : > { %v1667_v62 = vpop.f32.mrf.mxu0 }
 0x32a   : > { %1725 = vmax.xlane.f32.xlu1 %v1724_v48  ;;  %v7860_v45 = vadd.f32 %v1667_v62, %v1337_v26  ;;  %v1730_v12 = vsel %vm1696_vm2, %v7856_v9, -inf }
 0x32b   : > { %v6066_v19 = vpop.f32.mrf.mxu0 }
 0x32c   : > { %1722 = vmax.xlane.f32.xlu0 %v1721_v57  ;;  %v7864_v5 = vadd.f32 %v6066_v19, %v1340_v3  ;;  %v1727_v48 = vsel %vm1696_vm2, %v7860_v45, -inf }
 0x32d   : > { %v1677_v54 = vpop.f32.mrf.mxu0 }
 0x32e   : > { %1731 = vmax.xlane.f32.xlu1 %v1730_v12  ;;  %v7868_v61 = vadd.f32 %v1677_v54, %v1339_v34  ;;  %v1736_v62 = vsel %vm1696_vm2, %v7864_v5, -inf }
 0x32f   : > { %v6069_v63 = vpop.f32.mrf.mxu0 }
 0x330   : > { %1728 = vmax.xlane.f32.xlu0 %v1727_v48  ;;  %v7872_v26 = vadd.f32 %v6069_v63, %v1342_v30  ;;  %v1733_v19 = vsel %vm1696_vm2, %v7868_v61, -inf  ;;  %v7888_v30 = vpop.permute.xlu1 %2344  ;;  %v7896_v48 = vpop.permute.xlu0 %2352 }
 0x331   : > { %v1687_v57 = vpop.f32.mrf.mxu0 }
 0x332   : > { %1737 = vmax.xlane.f32.xlu1 %v1736_v62  ;;  %v7876_v3 = vadd.f32 %v1687_v57, %v1341_v38  ;;  %v1742_v34 = vsel %vm1696_vm2, %v7872_v26, -inf }
 0x334   : > { %1734 = vmax.xlane.f32.xlu0 %v1733_v19  ;;  %v1739_v12 = vsel %vm1696_vm2, %v7876_v3, -inf  ;;  %v7890_v38 = vpop.permute.xlu1 %2348 }
 0x336   : > { %1743 = vmax.xlane.f32.xlu1 %v1742_v34 }
 0x338   : > { %1740 = vmax.xlane.f32.xlu0 %v1739_v12  ;;  %v7892_v54 = vpop.permute.xlu1 %2346 }
 0x33c   : > { %v7894_v63 = vpop.permute.xlu1 %2350 }
 0x347   : > { %2149 = vrot.lane.b32.xlu1 %v7623_v27, %s6904_s26 }
 0x34e   : > { %2147 = vrot.lane.b32.xlu0 %v7423_v20, %s6904_s26 }
 0x3a1   : > { %v1702_v62 = vpop.xlane.xlu1 %1701 }
 0x3a2   : > { %v1746_v57 = vsub.f32 %v7800_v22, %v1702_v62 }
 0x3a3   : > { %v1699_v19 = vpop.xlane.xlu0 %1698 }
 0x3a4   : > { %v1763_v34 = vmul.f32 1.442695, %v1746_v57  ;;  %v1745_v12 = vsub.f32 %v7802_v31, %v1699_v19 }
 0x3a6   : > { %6608 = vpow2.f32 %v1763_v34  ;;  %v1761_v27 = vmul.f32 1.442695, %v1745_v12  ;;  %v1708_v20 = vpop.xlane.xlu1 %1707 }
 0x3a7   : > { %v1748_v23 = vsub.f32 %v7814_v43, %v1708_v20 }
 0x3a8   : > { %6610 = vpow2.f32 %v1761_v27  ;;  %v1705_v21 = vpop.xlane.xlu0 %1704 }
 0x3a9   : > { %v1767_v29 = vmul.f32 1.442695, %v1748_v23  ;;  %v1747_v41 = vsub.f32 %v7816_v14, %v1705_v21 }
 0x3ab   : > { %6612 = vpow2.f32 %v1767_v29  ;;  %v1765_v49 = vmul.f32 1.442695, %v1747_v41  ;;  %v1714_v7 = vpop.xlane.xlu1 %1713 }
 0x3ac   : > { %v1750_v33 = vsub.f32 %v7828_v59, %v1714_v7 }
 0x3ad   : > { %6614 = vpow2.f32 %v1765_v49  ;;  %v1711_v22 = vpop.xlane.xlu0 %1710 }
 0x3ae   : > { %v1771_v62 = vmul.f32 1.442695, %v1750_v33  ;;  %v1749_v31 = vsub.f32 %v7835_v50, %v1711_v22 }
 0x3af   : > { %v1720_v57 = vpop.xlane.xlu1 %1719 }
 0x3b0   : > { %6616 = vpow2.f32 %v1771_v62  ;;  %v1769_v19 = vmul.f32 1.442695, %v1749_v31  ;;  %v1752_v20 = vsub.f32 %v7842_v46, %v1720_v57 }
 0x3b1   : > { %v1717_v27 = vpop.xlane.xlu0 %1716 }
 0x3b2   : > { %6618 = vpow2.f32 %v1769_v19  ;;  %v1775_v23 = vmul.f32 1.442695, %v1752_v20  ;;  %v1751_v21 = vsub.f32 %v7846_v53, %v1717_v27 }
 0x3b3   : > { %v7906_v29 = vpop.eup %6608  ;;  %v1726_v41 = vpop.xlane.xlu1 %1725 }
 0x3b4   : > { %6620 = vpow2.f32 %v1775_v23  ;;  %v1773_v7 = vmul.f32 1.442695, %v1751_v21  ;;  %v1754_v49 = vsub.f32 %v7848_v16, %v1726_v41  ;;  %v1796_v50 = vsel %vm1696_vm2, %v7906_v29, 0.0 }
 0x3b5   : > { %v7911_v33 = vpop.eup %6610  ;;  %v1723_v43 = vpop.xlane.xlu0 %1722  ;;  %1797 = vadd.xlane.f32.xlu1 %v1796_v50 }
 0x3b6   : > { %6622 = vpow2.f32 %v1773_v7  ;;  %v1779_v46 = vmul.f32 1.442695, %v1754_v49  ;;  %v1753_v14 = vsub.f32 %v7852_v28, %v1723_v43  ;;  %v1793_v53 = vsel %vm1696_vm2, %v7911_v33, 0.0 }
 0x3b7   : > { %v1732_v59 = vpop.xlane.xlu1 %1731  ;;  %1794 = vadd.xlane.f32.xlu0 %v1793_v53 }
 0x3b8   : > { %v7916_v34 = vpop.eup %6612  ;;  %6624 = vpow2.f32 %v1779_v46  ;;  %v1777_v16 = vmul.f32 1.442695, %v1753_v14 }
 0x3b9   : > { %v1729_v12 = vpop.xlane.xlu0 %1728  ;;  %v1802_v22 = vsel %vm1696_vm2, %v7916_v34, 0.0 }
 0x3ba   : > { %v7920_v62 = vpop.eup %6614  ;;  %6626 = vpow2.f32 %v1777_v16  ;;  %1803 = vadd.xlane.f32.xlu1 %v1802_v22 }
 0x3bb   : > { %v1738_v31 = vpop.xlane.xlu1 %1737  ;;  %v1799_v28 = vsel %vm1696_vm2, %v7920_v62, 0.0 }
 0x3bc   : > { %1800 = vadd.xlane.f32.xlu0 %v1799_v28 }
 0x3bd   : > { %v7924_v57 = vpop.eup %6616  ;;  %v1735_v19 = vpop.xlane.xlu0 %1734 }
 0x3be   : > { %v1808_v20 = vsel %vm1696_vm2, %v7924_v57, 0.0 }
 0x3bf   : > { %v7928_v27 = vpop.eup %6618  ;;  %1809 = vadd.xlane.f32.xlu1 %v1808_v20  ;;  %v1744_v23 = vpop.xlane.xlu1 %1743  ;;  %v1755_v20 = vsub.f32 %v7860_v45, %v1729_v12 }
 0x3c0   : > { %v1805_v21 = vsel %vm1696_vm2, %v7928_v27, 0.0 }
 0x3c1   : > { %v7932_v41 = vpop.eup %6620  ;;  %1806 = vadd.xlane.f32.xlu0 %v1805_v21  ;;  %v1741_v7 = vpop.xlane.xlu0 %1740  ;;  %v1756_v21 = vsub.f32 %v7856_v9, %v1732_v59 }
 0x3c2   : > { %v1814_v49 = vsel %vm1696_vm2, %v7932_v41, 0.0 }
 0x3c3   : > { %v7936_v50 = vpop.eup %6622  ;;  %1815 = vadd.xlane.f32.xlu1 %v1814_v49  ;;  %v2150_v53 = vpop.permute.xlu1 %2149  ;;  %v1781_v49 = vmul.f32 1.442695, %v1755_v20 }
 0x3c4   : > { %v1811_v43 = vsel %vm1696_vm2, %v7936_v50, 0.0 }
 0x3c5   : > { %v7940_v46 = vpop.eup %6624  ;;  %1812 = vadd.xlane.f32.xlu0 %v1811_v43  ;;  %v2148_v14 = vpop.permute.xlu0 %2147  ;;  %v1758_v43 = vsub.f32 %v7864_v5, %v1738_v31  ;;  %6628 = vpow2.f32 %v1781_v49 }
 0x3c6   : > { %6148 = vmatprep.mubr.msk.f32.mxu0 %vm1383_vm1, %v2148_v14  ;;  %v1820_v16 = vsel %vm1696_vm2, %v7940_v46, 0.0  ;;  %v1783_v14 = vmul.f32 1.442695, %v1756_v21 }
 0x3c7   : > { %v7945_v22 = vpop.eup %6626  ;;  %1821 = vadd.xlane.f32.xlu1 %v1820_v16  ;;  %6149 = vmatmul.mubr.msk.f32.vlgmr.msra.gmra.mxu0 %vm1383_vm1, %v2150_v53  ;;  %v1759_v53 = vsub.f32 %v7876_v3, %v1741_v7  ;;  %v1787_v16 = vmul.f32 1.442695, %v1758_v43 }
 0x3c8   : > { %v1817_v28 = vsel %vm1696_vm2, %v7945_v22, 0.0  ;;  %6630 = vpow2.f32 %v1783_v14 }
 0x3c9   : > { %1818 = vadd.xlane.f32.xlu0 %v1817_v28  ;;  %v1757_v28 = vsub.f32 %v7868_v61, %v1735_v19  ;;  %v1789_v55 = vmul.f32 1.442695, %v1759_v53  ;;  %6632 = vpow2.f32 %v1787_v16 }
 0x3cb   : > { %6634 = vpow2.f32 %v1789_v55 }
 0x3d2   : > { %v7960_v9 = vpop.eup %6628 }
 0x3d3   : > { %v1823_v3 = vsel %vm1696_vm2, %v7960_v9, 0.0 }
 0x3d5   : > { %v7962_v5 = vpop.eup %6630 }
 0x3d6   : > { %v7966_v59 = vpop.eup %6632  ;;  %v1826_v61 = vsel %vm1696_vm2, %v7962_v5, 0.0 }
 0x3d8   : > { %2340 = vrot.lane.b32.xlu1 %v7632_v4, %s6904_s26  ;;  %v1785_v4 = vmul.f32 1.442695, %v1757_v28  ;;  %v7970_v12 = vpop.eup %6634 }
 0x3d9   : > { %v1835_v55 = vsel %vm1696_vm2, %v7970_v12, 0.0 }
 0x3da   : > { %6636 = vpow2.f32 %v1785_v4 }
 0x3df   : > { %2342 = vrot.lane.b32.xlu0 %v7615_v36, %s6904_s26  ;;  %v1760_v36 = vsub.f32 %v7872_v26, %v1744_v23 }
 0x3e1   : > { %v1791_v45 = vmul.f32 1.442695, %v1760_v36  ;;  %v1832_v36 = vsel %vm1696_vm2, %v7966_v59, 0.0 }
 0x3e3   : > { %6638 = vpow2.f32 %v1791_v45 }
 0x3e7   : > { %v7974_v4 = vpop.eup %6636 }
 0x3e8   : > { %v1829_v26 = vsel %vm1696_vm2, %v7974_v4, 0.0 }
 0x3f0   : > { %v7980_v31 = vpop.eup %6638 }
 0x3f1   : > { %v1838_v19 = vsel %vm1696_vm2, %v7980_v31, 0.0 }
 0x3fc   : > { %1824 = vadd.xlane.f32.xlu1 %v1823_v3 }
 0x3fe   : > { %1827 = vadd.xlane.f32.xlu0 %v1826_v61 }
 0x400   : > { %1833 = vadd.xlane.f32.xlu1 %v1832_v36 }
 0x402   : > { %1836 = vadd.xlane.f32.xlu0 %v1835_v55  ;;  %v8021_v55 = vadd.f32 %v7546_v18, %v7833_v47 }
 0x404   : > { %1830 = vadd.xlane.f32.xlu1 %v1829_v26  ;;  %9672 = vst [vmem:[#allocation37_spill] sm:$0xff] %v8021_v55 }
 0x408   : > { %1839 = vadd.xlane.f32.xlu1 %v1838_v19 }
 0x418   : > { %2338 = vrot.lane.b32.xlu0 %v7652_v24, %s6904_s26 }
 0x419   : > { %2336 = vrot.lane.b32.xlu1 %v7681_v6, %s6904_s26 }
 0x41c   : > { %2320 = vrot.lane.b32.xlu0 %v7482_v17, %s6904_s26 }
 0x41d   : > { %2322 = vrot.lane.b32.xlu1 %v7721_v11, %s6904_s26 }
 0x420   : > { %2151 = vrot.lane.b32.xlu0 %v7628_v39, %s6904_s26 }
 0x421   : > { %2153 = vrot.lane.b32.xlu1 %v7648_v0, %s6904_s26 }
 0x424   : > { %2155 = vrot.lane.b32.xlu0 %v7657_v13, %s6904_s26 }
 0x425   : > { %2157 = vrot.lane.b32.xlu1 %v7684_v51, %s6904_s26 }
 0x428   : > { %2159 = vrot.lane.b32.xlu0 %v7695_v10, %s6904_s26 }
 0x429   : > { %2161 = vrot.lane.b32.xlu1 %v7712_v25, %s6904_s26 }
 0x42c   : > { %2324 = vrot.lane.b32.xlu0 %v7725_v2, %s6904_s26 }
 0x42d   : > { %2326 = vrot.lane.b32.xlu1 %v7745_v37, %s6904_s26 }
 0x430   : > { %2328 = vrot.lane.b32.xlu0 %v7749_v44, %s6904_s26 }
 0x431   : > { %2330 = vrot.lane.b32.xlu1 %v7762_v42, %s6904_s26 }
 0x434   : > { %2332 = vrot.lane.b32.xlu0 %v7765_v15, %s6904_s26 }
 0x435   : > { %2334 = vrot.lane.b32.xlu1 %v7772_v35, %s6904_s26 }
 0x43e   : > { %v1798_v23 = vpop.xlane.xlu1 %1797 }
 0x43f   : > { %6640 = vrcp.f32 %v1798_v23 }
 0x440   : > { %v1795_v7 = vpop.xlane.xlu0 %1794 }
 0x441   : > { %6642 = vrcp.f32 %v1795_v7 }
 0x443   : > { %v1804_v20 = vpop.xlane.xlu1 %1803 }
 0x444   : > { %6644 = vrcp.f32 %v1804_v20 }
 0x445   : > { %v1801_v21 = vpop.xlane.xlu0 %1800 }
 0x446   : > { %6646 = vrcp.f32 %v1801_v21 }
 0x448   : > { %v1810_v49 = vpop.xlane.xlu1 %1809 }
 0x449   : > { %6648 = vrcp.f32 %v1810_v49 }
 0x44a   : > { %v1807_v43 = vpop.xlane.xlu0 %1806 }
 0x44b   : > { %6650 = vrcp.f32 %v1807_v43 }
 0x44c   : > { %v1816_v14 = vpop.xlane.xlu1 %1815  ;;  %v6641_v53 = vpop.eup %6640 }
 0x44d   : > { %6652 = vrcp.f32 %v1816_v14  ;;  %v1858_v3 = vmul.f32 %v6641_v53, %v7906_v29 }
 0x44e   : > { %v6643_v16 = vpop.eup %6642  ;;  %v1813_v28 = vpop.xlane.xlu0 %1812 }
 0x44f   : > { %6654 = vrcp.f32 %v1813_v28  ;;  %v1857_v45 = vmul.f32 %v6643_v16, %v7911_v33 }
 0x450   : > { %v1822_v61 = vpop.xlane.xlu1 %1821 }
 0x451   : > { %6088 = vmatprep.mubr.msk.f32.mxu1 %vm1696_vm2, %v1857_v45  ;;  %v6645_v36 = vpop.eup %6644 }
 0x452   : > { %v1819_v26 = vpop.xlane.xlu0 %1818  ;;  %6089 = vmatmul.mubr.msk.f32.vlgmr.msra.gmra.mxu1 %vm1696_vm2, %v1858_v3  ;;  %v1860_v33 = vmul.f32 %v6645_v36, %v7916_v34 }
 0x453   : > { %v6647_v19 = vpop.eup %6646  ;;  %6656 = vrcp.f32 %v1819_v26  ;;  %6101 = vmatpush3.msra.mxu1 %v7752_v60 }
 0x454   : > { %6658 = vrcp.f32 %v1822_v61  ;;  %6102 = vmatprep.subr.mxu1 %v8021_v55  ;;  %v1859_v29 = vmul.f32 %v6647_v19, %v7920_v62 }
 0x455   : > { %6103 = vmatpush3.msra.mxu1 %v8021_v55 }
 0x456   : > { %6091 = vmatprep.mubr.msk.f32.mxu1 %vm1696_vm2, %v1859_v29  ;;  %6104 = vmatprep.subr.mxu1 %v7594_v56  ;;  %v6649_v47 = vpop.eup %6648 }
 0x457   : > { %6092 = vmatmul.mubr.msk.f32.gmra.mxu1 %vm1696_vm2, %v1860_v33  ;;  %v1862_v62 = vmul.f32 %v6649_v47, %v7924_v57 }
 0x458   : > { %v6651_v18 = vpop.eup %6650  ;;  %6105 = vmatpush3.msra.mxu1 %v7594_v56 }
 0x459   : > { %6106 = vmatprep.subr.mxu1 %v7608_v8  ;;  %v1861_v23 = vmul.f32 %v6651_v18, %v7928_v27 }
 0x45a   : > { %6107 = vmatpush3.msra.mxu1 %v7608_v8  ;;  %v6653_v7 = vpop.eup %6652 }
 0x45b   : > { %6094 = vmatprep.mubr.msk.f32.mxu1 %vm1696_vm2, %v1861_v23  ;;  %6108 = vmatprep.subr.mxu1 %v7580_v1  ;;  %v1864_v27 = vmul.f32 %v6653_v7, %v7932_v41 }
 0x45c   : > { %v6655_v34 = vpop.eup %6654  ;;  %6095 = vmatmul.mubr.msk.f32.gmra.mxu1 %vm1696_vm2, %v1862_v62 }
 0x45d   : > { %6109 = vmatpush3.msra.mxu1 %v7580_v1  ;;  %v1863_v20 = vmul.f32 %v6655_v34, %v7936_v50 }
 0x45e   : > { %6110 = vmatprep.subr.mxu1 %v7589_v52 }
 0x45f   : > { %6111 = vmatpush3.msra.mxu1 %v7589_v52  ;;  %6097 = vmatprep.mubr.msk.f32.mxu1 %vm1696_vm2, %v1863_v20 }
 0x460   : > { %v6657_v57 = vpop.eup %6656  ;;  %6112 = vmatprep.subr.mxu1 %v7566_v32  ;;  %6098 = vmatmul.mubr.msk.f32.gmra.mxu1 %vm1696_vm2, %v1864_v27 }
 0x461   : > { %v6659_v21 = vpop.eup %6658  ;;  %6113 = vmatpush3.msra.mxu1 %v7566_v32  ;;  %v1865_v49 = vmul.f32 %v6657_v57, %v7945_v22 }
 0x462   : > { %6114 = vmatprep.subr.mxu1 %v7575_v40  ;;  %v1866_v41 = vmul.f32 %v6659_v21, %v7940_v46 }
 0x463   : > { %6115 = vmatpush3.msra.mxu1 %v7575_v40  ;;  %6118 = vmatprep.mubr.msk.f32.mxu1 %vm1696_vm2, %v1865_v49 }
 0x464   : > { %6116 = vmatprep.subr.mxu1 %v7553_v58 }
 0x465   : > { %6117 = vmatpush3.msra.mxu1 %v7553_v58 }
 0x466   : > { %6119 = vmatmul.mubr.msk.f32.vlgmr.msra.gmra.mxu1 %vm1696_vm2, %v1866_v41  ;;  %6160 = vmatprep.subr.msk.mxu1 %vm1383_vm1, %v7896_v48 }
 0x467   : > { %6161 = vmatpush3.xpose.msk.msra.mxu1 %vm1383_vm1, %v7896_v48  ;;  %v2343_v48 = vpop.permute.xlu0 %2342 }
 0x468   : > { %6162 = vmatprep.subr.msk.mxu1 %vm1383_vm1, %v7894_v63 }
 0x46b   : > { %6163 = vmatpush3.xpose.msk.msra.mxu1 %vm1383_vm1, %v7894_v63  ;;  %v2341_v63 = vpop.permute.xlu1 %2340 }
 0x46c   : > { %6164 = vmatprep.subr.msk.mxu1 %vm1383_vm1, %v7890_v38 }
 0x46f   : > { %6165 = vmatpush3.xpose.msk.msra.mxu1 %vm1383_vm1, %v7890_v38 }
 0x470   : > { %6166 = vmatprep.subr.msk.mxu1 %vm1383_vm1, %v7892_v54 }
 0x473   : > { %6167 = vmatpush3.xpose.msk.msra.mxu1 %vm1383_vm1, %v7892_v54  ;;  %v8084_v54 = vld [vmem:[%s9565_s10 + $0x48] sm:$0xff] }
 0x474   : > { %6168 = vmatprep.subr.msk.mxu1 %vm1383_vm1, %v7888_v30 }
 0x477   : > { %6169 = vmatpush3.xpose.msk.msra.mxu1 %vm1383_vm1, %v7888_v30  ;;  %v8089_v30 = vld [vmem:[%s9565_s10 + $0x40] sm:$0xff] }
 0x478   : > { %6170 = vmatprep.subr.msk.mxu1 %vm1383_vm1, %v2343_v48 }
 0x47b   : > { %6171 = vmatpush3.xpose.msk.msra.mxu1 %vm1383_vm1, %v2343_v48 }
 0x47c   : > { %6172 = vmatprep.subr.msk.mxu1 %vm1383_vm1, %v2341_v63 }
 0x47f   : > { %6173 = vmatpush3.xpose.msk.msra.mxu1 %vm1383_vm1, %v2341_v63 }
 0x485   : > { %v1825_v38 = vpop.xlane.xlu1 %1824 }
 0x486   : > { %6660 = vrcp.f32 %v1825_v38 }
 0x487   : > { %v6150_v50 = vpop.f32.mrf.mxu0  ;;  %v1828_v46 = vpop.xlane.xlu0 %1827 }
 0x488   : > { %v8092_v22 = vadd.f32 %v6150_v50, %v8084_v54  ;;  %6662 = vrcp.f32 %v1828_v46 }
 0x489   : > { %v1834_v43 = vpop.xlane.xlu1 %1833  ;;  %v2281_v14 = vpop.f32.mrf.mxu0 }
 0x48a   : > { %v8095_v53 = vadd.f32 %v2281_v14, %v8089_v30  ;;  %v2496_v16 = vsel %vm1696_vm2, %v8092_v22, -inf  ;;  %6664 = vrcp.f32 %v1834_v43 }
 0x48b   : > { %2497 = vmax.xlane.f32.xlu1 %v2496_v16  ;;  %v1837_v28 = vpop.xlane.xlu0 %1836 }
 0x48c   : > { %v2493_v45 = vsel %vm1696_vm2, %v8095_v53, -inf  ;;  %6666 = vrcp.f32 %v1837_v28 }
 0x48d   : > { %v1831_v3 = vpop.xlane.xlu1 %1830  ;;  %2494 = vmax.xlane.f32.xlu0 %v2493_v45 }
 0x48e   : > { %6668 = vrcp.f32 %v1831_v3 }
 0x48f   : > { %v2339_v61 = vpop.permute.xlu0 %2338 }
 0x490   : > { %6174 = vmatprep.subr.msk.mxu1 %vm1383_vm1, %v2339_v61 }
 0x491   : > { %v1840_v36 = vpop.xlane.xlu1 %1839  ;;  %6175 = vmatpush3.xpose.msk.msra.mxu1 %vm1383_vm1, %v2339_v61 }
 0x492   : > { %6670 = vrcp.f32 %v1840_v36 }
 0x493   : > { %v6661_v26 = vpop.eup %6660  ;;  %v2321_v19 = vpop.permute.xlu0 %2320 }
 0x494   : > { %v1867_v29 = vmul.f32 %v6661_v26, %v7960_v9 }
 0x495   : > { %v6663_v33 = vpop.eup %6662  ;;  %v2337_v47 = vpop.permute.xlu1 %2336 }
 0x496   : > { %6121 = vmatprep.mubr.msk.f32.mxu1 %vm1696_vm2, %v1867_v29  ;;  %6176 = vmatprep.subr.msk.mxu1 %vm1383_vm1, %v2337_v47  ;;  %v1868_v18 = vmul.f32 %v6663_v33, %v7962_v5 }
 0x497   : > { %6177 = vmatpush3.xpose.msk.msra.mxu1 %vm1383_vm1, %v2337_v47  ;;  %v2152_v23 = vpop.permute.xlu0 %2151  ;;  %v6665_v62 = vpop.eup %6664  ;;  %v8146_v47 = vld [vmem:[%s9565_s10 + $0x58] sm:$0xff] }
 0x498   : > { %6122 = vmatmul.mubr.msk.f32.gmra.mxu1 %vm1696_vm2, %v1868_v18  ;;  %6151 = vmatprep.mubr.msk.f32.mxu0 %vm1383_vm1, %v2152_v23  ;;  %v1870_v21 = vmul.f32 %v6665_v62, %v7966_v59  ;;  %v8151_v23 = vld [vmem:[%s9565_s10 + $0x50] sm:$0xff] }
 0x499   : > { %v2323_v7 = vpop.permute.xlu1 %2322  ;;  %v6667_v34 = vpop.eup %6666 }
 0x49a   : > { %v1871_v5 = vmul.f32 %v6667_v34, %v7970_v12 }
 0x49b   : > { %v6669_v20 = vpop.eup %6668  ;;  %v2156_v9 = vpop.permute.xlu0 %2155 }
 0x49c   : > { %v1869_v27 = vmul.f32 %v6669_v20, %v7974_v4  ;;  %v8160_v20 = vld [vmem:[%s9565_s10 + $0x68] sm:$0xff] }
 0x49d   : > { %v2154_v57 = vpop.permute.xlu1 %2153 }
 0x49e   : > { %6124 = vmatprep.mubr.msk.f32.mxu1 %vm1696_vm2, %v1869_v27  ;;  %6152 = vmatmul.mubr.msk.f32.gmra.mxu0 %vm1383_vm1, %v2154_v57 }
 0x49f   : > { %v6671_v49 = vpop.eup %6670  ;;  %6125 = vmatmul.mubr.msk.f32.gmra.mxu1 %vm1696_vm2, %v1870_v21  ;;  %6154 = vmatprep.mubr.msk.f32.mxu0 %vm1383_vm1, %v2156_v9  ;;  %v2160_v41 = vpop.permute.xlu0 %2159 }
 0x4a0   : > { %6127 = vmatprep.mubr.msk.f32.mxu1 %vm1696_vm2, %v1871_v5  ;;  %v1872_v48 = vmul.f32 %v6671_v49, %v7980_v31  ;;  %v8171_v5 = vld [vmem:[%s9565_s10 + $0x60] sm:$0xff] }
 0x4a1   : > { %v2158_v4 = vpop.permute.xlu1 %2157 }
 0x4a2   : > { %6155 = vmatmul.mubr.msk.f32.gmra.mxu0 %vm1383_vm1, %v2158_v4 }
 0x4a3   : > { %6128 = vmatmul.mubr.msk.f32.gmra.mxu1 %vm1696_vm2, %v1872_v48  ;;  %6157 = vmatprep.mubr.msk.f32.mxu0 %vm1383_vm1, %v2160_v41  ;;  %v2325_v59 = vpop.permute.xlu0 %2324 }
 0x4a4   : > { %6178 = vmatprep.mubr.msk.f32.mxu1 %vm1383_vm1, %v2321_v19 }
 0x4a5   : > { %v2162_v12 = vpop.permute.xlu1 %2161 }
 0x4a6   : > { %6158 = vmatmul.mubr.msk.f32.gmra.mxu0 %vm1383_vm1, %v2162_v12 }
 0x4a7   : > { %6179 = vmatmul.mubr.msk.f32.vlgmr.msra.gmra.mxu1 %vm1383_vm1, %v2323_v7  ;;  %v2329_v63 = vpop.permute.xlu0 %2328 }
 0x4a8   : > { %6181 = vmatprep.mubr.msk.f32.mxu1 %vm1383_vm1, %v2325_v59  ;;  %v8182_v59 = vld [vmem:[%s9565_s10 + $0x78] sm:$0xff] }
 0x4a9   : > { %v2327_v38 = vpop.permute.xlu1 %2326 }
 0x4ab   : > { %6182 = vmatmul.mubr.msk.f32.gmra.mxu1 %vm1383_vm1, %v2327_v38  ;;  %v2333_v50 = vpop.permute.xlu0 %2332 }
 0x4ac   : > { %6184 = vmatprep.mubr.msk.f32.mxu1 %vm1383_vm1, %v2329_v63 }
 0x4ad   : > { %v2331_v31 = vpop.permute.xlu1 %2330 }
 0x4af   : > { %6185 = vmatmul.mubr.msk.f32.gmra.mxu1 %vm1383_vm1, %v2331_v31 }
 0x4b0   : > { %6187 = vmatprep.mubr.msk.f32.mxu1 %vm1383_vm1, %v2333_v50  ;;  %v8193_v50 = vld [vmem:[%s9565_s10 + $0x70] sm:$0xff] }
 0x4b1   : > { %v2335_v46 = vpop.permute.xlu1 %2334 }
 0x4b3   : > { %6188 = vmatmul.mubr.msk.f32.gmra.mxu1 %vm1383_vm1, %v2335_v46 }
 0x512   : > { %v6090_v43 = vpop.f32.mrf.mxu1 }
 0x513   : > { %2132 = vst.msk [vmem:[#allocation2 + $0x8] sm:$0xff] %vm1383_vm1, %v6090_v43 }
 0x514   : > { %v1963_v14 = vpop.f32.mrf.mxu1 }
 0x515   : > { %2131 = vst.msk [vmem:[#allocation2] sm:$0xff] %vm1383_vm1, %v1963_v14 }
 0x517   : > { %v6093_v16 = vpop.f32.mrf.mxu1 }
 0x518   : > { %2134 = vst.msk [vmem:[#allocation2 + $0x18] sm:$0xff] %vm1383_vm1, %v6093_v16 }
 0x519   : > { %v1973_v28 = vpop.f32.mrf.mxu1 }
 0x51a   : > { %2133 = vst.msk [vmem:[#allocation2 + $0x10] sm:$0xff] %vm1383_vm1, %v1973_v28 }
 0x51c   : > { %v6096_v45 = vpop.f32.mrf.mxu1 }
 0x51d   : > { %2136 = vst.msk [vmem:[#allocation2 + $0x28] sm:$0xff] %vm1383_vm1, %v6096_v45 }
 0x51e   : > { %v1983_v3 = vpop.f32.mrf.mxu1 }
 0x51f   : > { %2135 = vst.msk [vmem:[#allocation2 + $0x20] sm:$0xff] %vm1383_vm1, %v1983_v3  ;;  %v9673_v3 = vld [vmem:[#allocation29_spill] sm:$0xff] }
 0x520   : > { %v6099_v61 = vpop.f32.mrf.mxu1 }
 0x521   : > { %2138 = vst.msk [vmem:[#allocation2 + $0x38] sm:$0xff] %vm1383_vm1, %v6099_v61  ;;  %v9674_v61 = vld [vmem:[#allocation30_spill] sm:$0xff] }
 0x522   : > { %v1993_v36 = vpop.f32.mrf.mxu1 }
 0x523   : > { %2137 = vst.msk [vmem:[#allocation2 + $0x30] sm:$0xff] %vm1383_vm1, %v1993_v36  ;;  %v9675_v36 = vld [vmem:[#allocation24_spill] sm:$0xff] }
 0x526   : > { %v6120_v26 = vpop.f32.mrf.mxu1 }
 0x527   : > { %2140 = vst.msk [vmem:[#allocation2 + $0x48] sm:$0xff] %vm1383_vm1, %v6120_v26  ;;  %v9676_v26 = vld [vmem:[#allocation33_spill] sm:$0xff] }
 0x528   : > { %v2092_v19 = vpop.f32.mrf.mxu1 }
 0x529   : > { %2139 = vst.msk [vmem:[#allocation2 + $0x40] sm:$0xff] %vm1383_vm1, %v2092_v19  ;;  %v9677_v19 = vld [vmem:[#allocation31_spill] sm:$0xff] }
 0x558   : > { %v6123_v29 = vpop.f32.mrf.mxu1 }
 0x559   : > { %2142 = vst.msk [vmem:[#allocation2 + $0x58] sm:$0xff] %vm1383_vm1, %v6123_v29  ;;  %v9678_v29 = vld [vmem:[#allocation34_spill] sm:$0xff] }
 0x55a   : > { %v2102_v33 = vpop.f32.mrf.mxu1 }
 0x55b   : > { %2141 = vst.msk [vmem:[#allocation2 + $0x50] sm:$0xff] %vm1383_vm1, %v2102_v33  ;;  %v9679_v33 = vld [vmem:[#allocation32_spill] sm:$0xff] }
 0x55e   : > { %v6153_v18 = vpop.f32.mrf.mxu0 }
 0x55f   : > { %v8154_v62 = vadd.f32 %v6153_v18, %v8146_v47  ;;  %v6126_v7 = vpop.f32.mrf.mxu1  ;;  %v9680_v18 = vld [vmem:[#allocation36_spill] sm:$0xff] }
 0x560   : > { %2144 = vst.msk [vmem:[#allocation2 + $0x68] sm:$0xff] %vm1383_vm1, %v6126_v7  ;;  %v2291_v34 = vpop.f32.mrf.mxu0  ;;  %v9681_v7 = vld [vmem:[#allocation35_spill] sm:$0xff] }
 0x561   : > { %v8163_v9 = vadd.f32 %v2291_v34, %v8151_v23  ;;  %v2112_v27 = vpop.f32.mrf.mxu1  ;;  %v2502_v57 = vsel %vm1696_vm2, %v8154_v62, -inf  ;;  %v9682_v34 = vld [vmem:[#allocation12_spill] sm:$0xff] }
 0x562   : > { %2143 = vst.msk [vmem:[#allocation2 + $0x60] sm:$0xff] %vm1383_vm1, %v2112_v27  ;;  %2503 = vmax.xlane.f32.xlu1 %v2502_v57  ;;  %v6156_v21 = vpop.f32.mrf.mxu0  ;;  %v9683_v27 = vld [vmem:[#allocation9_spill] sm:$0xff]  ;;  %v9684_v57 = vld [vmem:[#allocation11_spill] sm:$0xff] }
 0x563   : > { %v8174_v49 = vadd.f32 %v6156_v21, %v8160_v20  ;;  %v6129_v41 = vpop.f32.mrf.mxu1  ;;  %v2499_v48 = vsel %vm1696_vm2, %v8163_v9, -inf  ;;  %v9685_v21 = vld [vmem:[#allocation10_spill] sm:$0xff] }
 0x564   : > { %2146 = vst.msk [vmem:[#allocation2 + $0x78] sm:$0xff] %vm1383_vm1, %v6129_v41  ;;  %2500 = vmax.xlane.f32.xlu0 %v2499_v48  ;;  %v2301_v4 = vpop.f32.mrf.mxu0  ;;  %v9686_v41 = vld [vmem:[#allocation7_spill] sm:$0xff] }
 0x565   : > { %v8185_v12 = vadd.f32 %v2301_v4, %v8171_v5  ;;  %v2122_v63 = vpop.f32.mrf.mxu1  ;;  %v2508_v38 = vsel %vm1696_vm2, %v8174_v49, -inf  ;;  %v9687_v48 = vld [vmem:[#allocation15_spill] sm:$0xff]  ;;  %v9688_v4 = vld [vmem:[#allocation6_spill] sm:$0xff] }
 0x566   : > { %2145 = vst.msk [vmem:[#allocation2 + $0x70] sm:$0xff] %vm1383_vm1, %v2122_v63  ;;  %2509 = vmax.xlane.f32.xlu1 %v2508_v38  ;;  %v6159_v31 = vpop.f32.mrf.mxu0  ;;  %v9689_v63 = vld [vmem:[#allocation17_spill] sm:$0xff]  ;;  %v9690_v38 = vld [vmem:[#allocation8_spill] sm:$0xff] }
 0x567   : > { %v8196_v46 = vadd.f32 %v6159_v31, %v8182_v59  ;;  %v2505_v43 = vsel %vm1696_vm2, %v8185_v12, -inf  ;;  %v9691_v31 = vld [vmem:[#allocation14_spill] sm:$0xff] }
 0x568   : > { %2506 = vmax.xlane.f32.xlu0 %v2505_v43  ;;  %v2311_v14 = vpop.f32.mrf.mxu0  ;;  %v9692_v43 = vld [vmem:[#allocation3_spill] sm:$0xff] }
 0x569   : > { %v8201_v16 = vadd.f32 %v2311_v14, %v8193_v50  ;;  %v2514_v28 = vsel %vm1696_vm2, %v8196_v46, -inf  ;;  %v9693_v14 = vld [vmem:[#allocation16_spill] sm:$0xff] }
 0x56a   : > { %2515 = vmax.xlane.f32.xlu1 %v2514_v28  ;;  %v9694_v28 = vld [vmem:[#allocation5_spill] sm:$0xff] }
 0x56b   : > { %v2511_v45 = vsel %vm1696_vm2, %v8201_v16, -inf }
 0x56c   : > { %2512 = vmax.xlane.f32.xlu0 %v2511_v45  ;;  %v9695_v45 = vld [vmem:[#allocation13_spill] sm:$0xff] }
 0x57b   : > { %2692 = vrot.lane.b32.xlu1 %v9673_v3, %s6904_s26 }
 0x57f   : > { %2690 = vrot.lane.b32.xlu1 %v9674_v61, %s6904_s26 }
 0x582   : > { %2694 = vrot.lane.b32.xlu0 %v9675_v36, %s6904_s26 }
 0x583   : > { %2684 = vrot.lane.b32.xlu1 %v9676_v26, %s6904_s26 }
 0x586   : > { %2688 = vrot.lane.b32.xlu0 %v9677_v19, %s6904_s26 }
 0x587   : > { %2682 = vrot.lane.b32.xlu1 %v9678_v29, %s6904_s26 }
 0x58a   : > { %2686 = vrot.lane.b32.xlu0 %v9679_v33, %s6904_s26 }
 0x58b   : > { %2678 = vrot.lane.b32.xlu1 %v9680_v18, %s6904_s26 }
 0x58e   : > { %2680 = vrot.lane.b32.xlu0 %v9681_v7, %s6904_s26 }
 0x58f   : > { %2859 = vrot.lane.b32.xlu1 %v7752_v60, %s6904_s26 }
 0x592   : > { %2857 = vrot.lane.b32.xlu0 %v8021_v55, %s6904_s26 }
 0x593   : > { %3112 = vrot.lane.b32.xlu1 %v9682_v34, %s6905_s25 }
 0x596   : > { %2855 = vrot.lane.b32.xlu0 %v7594_v56, %s6904_s26 }
 0x597   : > { %3110 = vrot.lane.b32.xlu1 %v9683_v27, %s6905_s25 }
 0x59a   : > { %2853 = vrot.lane.b32.xlu0 %v7608_v8, %s6904_s26 }
 0x59b   : > { %2851 = vrot.lane.b32.xlu1 %v7580_v1, %s6904_s26 }
 0x59e   : > { %2849 = vrot.lane.b32.xlu0 %v7589_v52, %s6904_s26 }
 0x59f   : > { %3108 = vrot.lane.b32.xlu1 %v9684_v57, %s6905_s25 }
 0x5a2   : > { %2847 = vrot.lane.b32.xlu0 %v7566_v32, %s6904_s26 }
 0x5a3   : > { %3106 = vrot.lane.b32.xlu1 %v9685_v21, %s6905_s25 }
 0x5a6   : > { %2845 = vrot.lane.b32.xlu0 %v7575_v40, %s6904_s26 }
 0x5a7   : > { %2843 = vrot.lane.b32.xlu1 %v7553_v58, %s6904_s26  ;;  %s9474_s26 = scalar_lea.vmem %s9568_s13, %s5267_s20 }
 0x5aa   : > { %3104 = vrot.lane.b32.xlu0 %v9686_v41, %s6905_s25 }
 0x5ab   : > { %3285 = vrot.lane.b32.xlu1 %v9687_v48, %s6905_s25  ;;  %v2498_v48 = vpop.xlane.xlu1 %2497 }
 0x5ac   : > { %v2542_v41 = vsub.f32 %v8092_v22, %v2498_v48 }
 0x5ae   : > { %3102 = vrot.lane.b32.xlu0 %v9688_v4, %s6905_s25  ;;  %v2495_v4 = vpop.xlane.xlu0 %2494 }
 0x5af   : > { %3283 = vrot.lane.b32.xlu1 %v9689_v63, %s6905_s25  ;;  %v2541_v63 = vsub.f32 %v8095_v53, %v2495_v4 }
 0x5b2   : > { %3100 = vrot.lane.b32.xlu0 %v9690_v38, %s6905_s25  ;;  %v2557_v38 = vmul.f32 1.442695, %v2541_v63 }
 0x5b3   : > { %3281 = vrot.lane.b32.xlu1 %v9691_v31, %s6905_s25  ;;  %v2559_v31 = vmul.f32 1.442695, %v2542_v41 }
 0x5b4   : > { %6672 = vpow2.f32 %v2557_v38 }
 0x5b5   : > { %6674 = vpow2.f32 %v2559_v31 }
 0x5b6   : > { %3098 = vrot.lane.b32.xlu0 %v9692_v43, %s6905_s25 }
 0x5b7   : > { %3279 = vrot.lane.b32.xlu1 %v9693_v14, %s6905_s25 }
 0x5ba   : > { %3096 = vrot.lane.b32.xlu0 %v9694_v28, %s6905_s25 }
 0x5bb   : > { %3277 = vrot.lane.b32.xlu1 %v9695_v45, %s6905_s25 }
 0x5c1   : > { %v8273_v43 = vpop.eup %6672 }
 0x5c2   : > { %v2589_v14 = vsel %vm1696_vm2, %v8273_v43, 0.0  ;;  %v8277_v28 = vpop.eup %6674 }
 0x5c3   : > { %v2592_v45 = vsel %vm1696_vm2, %v8277_v28, 0.0 }
 0x5d9   : > { %2590 = vadd.xlane.f32.xlu0 %v2589_v14 }
 0x5df   : > { %2593 = vadd.xlane.f32.xlu1 %v2592_v45 }
 0x5eb   : > { %v2504_v53 = vpop.xlane.xlu1 %2503 }
 0x5ec   : > { %v2544_v4 = vsub.f32 %v8154_v62, %v2504_v53  ;;  %v6180_v53 = vpop.f32.mrf.mxu1 }
 0x5ed   : > { %v2501_v63 = vpop.xlane.xlu0 %2500 }
 0x5ee   : > { %v2563_v22 = vmul.f32 1.442695, %v2544_v4  ;;  %v2543_v41 = vsub.f32 %v8163_v9, %v2501_v63 }
 0x5ef   : > { %v2510_v48 = vpop.xlane.xlu1 %2509 }
 0x5f0   : > { %6676 = vpow2.f32 %v2563_v22  ;;  %v2561_v38 = vmul.f32 1.442695, %v2543_v41  ;;  %v2546_v31 = vsub.f32 %v8174_v49, %v2510_v48  ;;  %v2454_v41 = vpop.f32.mrf.mxu1 }
 0x5f1   : > { %v2507_v58 = vpop.xlane.xlu0 %2506 }
 0x5f2   : > { %6678 = vpow2.f32 %v2561_v38  ;;  %v2567_v14 = vmul.f32 1.442695, %v2546_v31  ;;  %v2545_v40 = vsub.f32 %v8185_v12, %v2507_v58  ;;  %v6183_v12 = vpop.f32.mrf.mxu1 }
 0x5f3   : > { %v2516_v21 = vpop.xlane.xlu1 %2515 }
 0x5f4   : > { %6680 = vpow2.f32 %v2567_v14  ;;  %v2565_v45 = vmul.f32 1.442695, %v2545_v40  ;;  %v2548_v32 = vsub.f32 %v8196_v46, %v2516_v21  ;;  %v2464_v14 = vpop.f32.mrf.mxu1 }
 0x5f5   : > { %v2513_v62 = vpop.xlane.xlu0 %2512 }
 0x5f6   : > { %6682 = vpow2.f32 %v2565_v45  ;;  %v2571_v4 = vmul.f32 1.442695, %v2548_v32  ;;  %v2547_v9 = vsub.f32 %v8201_v16, %v2513_v62 }
 0x5f7   : > { %v2693_v63 = vpop.permute.xlu1 %2692 }
 0x5f8   : > { %6684 = vpow2.f32 %v2571_v4  ;;  %v2569_v22 = vmul.f32 1.442695, %v2547_v9 }
 0x5f9   : > { %v2695_v49 = vpop.permute.xlu0 %2694 }
 0x5fa   : > { %6686 = vpow2.f32 %v2569_v22  ;;  %6190 = vmatprep.subr.mxu0 %v2695_v49 }
 0x5fb   : > { %v2691_v48 = vpop.permute.xlu1 %2690  ;;  %6191 = vmatpush3.msra.mxu0 %v2695_v49  ;;  %v6186_v49 = vpop.f32.mrf.mxu1 }
 0x5fc   : > { %6192 = vmatprep.subr.mxu0 %v2693_v63 }
 0x5fd   : > { %v8287_v58 = vpop.eup %6676  ;;  %6193 = vmatpush3.msra.mxu0 %v2693_v63  ;;  %v2689_v40 = vpop.permute.xlu0 %2688 }
 0x5fe   : > { %6194 = vmatprep.subr.mxu0 %v2691_v48  ;;  %v2598_v32 = vsel %vm1696_vm2, %v8287_v58, 0.0 }
 0x5ff   : > { %v8291_v46 = vpop.eup %6678  ;;  %v2685_v16 = vpop.permute.xlu1 %2684  ;;  %2599 = vadd.xlane.f32.xlu0 %v2598_v32  ;;  %6195 = vmatpush3.msra.mxu0 %v2691_v48  ;;  %v8308_v32 = vadd.f32 %v6180_v53, %v8084_v54  ;;  %v8318_v54 = vadd.f32 %v2454_v41, %v8089_v30  ;;  %v8330_v30 = vadd.f32 %v2464_v14, %v8151_v23 }
 0x600   : > { %6196 = vmatprep.subr.mxu0 %v2689_v40  ;;  %v2595_v21 = vsel %vm1696_vm2, %v8291_v46, 0.0 }
 0x601   : > { %v8295_v38 = vpop.eup %6680  ;;  %2596 = vadd.xlane.f32.xlu1 %v2595_v21  ;;  %6197 = vmatpush3.msra.mxu0 %v2689_v40  ;;  %v2687_v31 = vpop.permute.xlu0 %2686  ;;  %v2520_v53 = vsel %vm1696_vm2, %v8308_v32, -inf }
 0x602   : > { %6198 = vmatprep.subr.mxu0 %v2687_v31  ;;  %v2604_v4 = vsel %vm1696_vm2, %v8295_v38, 0.0 }
 0x603   : > { %v8297_v45 = vpop.eup %6682  ;;  %v2683_v62 = vpop.permute.xlu1 %2682  ;;  %6199 = vmatpush3.msra.mxu0 %v2687_v31 }
 0x604   : > { %6200 = vmatprep.subr.mxu0 %v2685_v16  ;;  %v2601_v9 = vsel %vm1696_vm2, %v8297_v45, 0.0 }
 0x605   : > { %v8303_v63 = vpop.eup %6684  ;;  %2605 = vadd.xlane.f32.xlu1 %v2604_v4  ;;  %2602 = vadd.xlane.f32.xlu0 %v2601_v9  ;;  %v2681_v22 = vpop.permute.xlu0 %2680  ;;  %v8315_v4 = vadd.f32 %v6183_v12, %v8146_v47 }
 0x606   : > { %6201 = vmatpush3.msra.mxu0 %v2685_v16  ;;  %v2610_v21 = vsel %vm1696_vm2, %v8303_v63, 0.0  ;;  %v2474_v9 = vpop.f32.mrf.mxu1 }
 0x607   : > { %v8305_v48 = vpop.eup %6686  ;;  %6202 = vmatprep.subr.mxu0 %v2683_v62  ;;  %v2679_v40 = vpop.permute.xlu1 %2678  ;;  %v2526_v47 = vsel %vm1696_vm2, %v8315_v4, -inf  ;;  %v8342_v14 = vadd.f32 %v2474_v9, %v8171_v5 }
 0x608   : > { %6203 = vmatpush3.msra.mxu0 %v2683_v62  ;;  %v2607_v31 = vsel %vm1696_vm2, %v8305_v48, 0.0  ;;  %v8323_v62 = vadd.f32 %v6186_v49, %v8160_v20  ;;  %v2517_v20 = vsel %vm1696_vm2, %v8318_v54, -inf }
 0x609   : > { %6204 = vmatprep.subr.mxu0 %v2681_v22  ;;  %2611 = vadd.xlane.f32.xlu0 %v2610_v21  ;;  %v2858_v16 = vpop.permute.xlu0 %2857 }
 0x60a   : > { %2608 = vadd.xlane.f32.xlu1 %v2607_v31  ;;  %6205 = vmatpush3.msra.mxu0 %v2681_v22  ;;  %v6189_v22 = vpop.f32.mrf.mxu1  ;;  %v2532_v41 = vsel %vm1696_vm2, %v8323_v62, -inf }
 0x60b   : > { %6206 = vmatprep.subr.mxu0 %v2679_v40  ;;  %v2860_v57 = vpop.permute.xlu1 %2859 }
 0x60c   : > { %6207 = vmatpush3.msra.mxu0 %v2679_v40  ;;  %6220 = vmatprep.subr.mxu1 %v2860_v57  ;;  %v2523_v40 = vsel %vm1696_vm2, %v8330_v30, -inf  ;;  %v2484_v31 = vpop.f32.mrf.mxu1 }
 0x60d   : > { %6221 = vmatpush3.msra.mxu1 %v2860_v57  ;;  %2521 = vmax.xlane.f32.xlu0 %v2520_v53  ;;  %v2856_v12 = vpop.permute.xlu0 %2855  ;;  %v8337_v57 = vadd.f32 %v6189_v22, %v8182_v59 }
 0x60e   : > { %2527 = vmax.xlane.f32.xlu1 %v2526_v47  ;;  %6222 = vmatprep.subr.mxu1 %v2858_v16  ;;  %v8349_v47 = vadd.f32 %v2484_v31, %v8193_v50  ;;  %v9697_v31 = vld [vmem:[#allocation4_spill] sm:$0xff] }
 0x60f   : > { %v8327_v21 = vpop.permute.xlu1 %3112  ;;  %6223 = vmatpush3.msra.mxu1 %v2858_v16  ;;  %v2538_v59 = vsel %vm1696_vm2, %v8337_v57, -inf }
 0x610   : > { %6224 = vmatprep.subr.mxu1 %v2856_v12  ;;  %6250 = vmatprep.subr.msk.mxu0 %vm1383_vm1, %v8327_v21  ;;  %v2535_v22 = vsel %vm1696_vm2, %v8349_v47, -inf }
 0x611   : > { %2518 = vmax.xlane.f32.xlu0 %v2517_v20  ;;  %6225 = vmatpush3.msra.mxu1 %v2856_v12  ;;  %v2854_v49 = vpop.permute.xlu0 %2853  ;;  %v2529_v12 = vsel %vm1696_vm2, %v8342_v14, -inf }
 0x612   : > { %2533 = vmax.xlane.f32.xlu1 %v2532_v41  ;;  %6226 = vmatprep.subr.mxu1 %v2854_v49 }
 0x613   : > { %v3111_v23 = vpop.permute.xlu1 %3110  ;;  %6227 = vmatpush3.msra.mxu1 %v2854_v49  ;;  %v9696_v49 = vld [vmem:[#allocation27_spill] sm:$0xff] }
 0x615   : > { %2524 = vmax.xlane.f32.xlu0 %v2523_v40  ;;  %v2850_v16 = vpop.permute.xlu0 %2849 }
 0x616   : > { %2539 = vmax.xlane.f32.xlu1 %v2538_v59 }
 0x617   : > { %v2852_v53 = vpop.permute.xlu1 %2851 }
 0x618   : > { %6228 = vmatprep.subr.mxu1 %v2852_v53 }
 0x619   : > { %2530 = vmax.xlane.f32.xlu0 %v2529_v12  ;;  %6229 = vmatpush3.msra.mxu1 %v2852_v53  ;;  %v2848_v5 = vpop.permute.xlu0 %2847 }
 0x61a   : > { %6230 = vmatprep.subr.mxu1 %v2850_v16 }
 0x61b   : > { %v3109_v9 = vpop.permute.xlu1 %3108  ;;  %6231 = vmatpush3.msra.mxu1 %v2850_v16 }
 0x61c   : > { %6232 = vmatprep.subr.mxu1 %v2848_v5 }
 0x61d   : > { %2536 = vmax.xlane.f32.xlu0 %v2535_v22  ;;  %6233 = vmatpush3.msra.mxu1 %v2848_v5  ;;  %v2846_v20 = vpop.permute.xlu0 %2845 }
 0x61e   : > { %6234 = vmatprep.subr.mxu1 %v2846_v20 }
 0x61f   : > { %v3107_v50 = vpop.permute.xlu1 %3106  ;;  %6235 = vmatpush3.msra.mxu1 %v2846_v20 }
 0x621   : > { %v3105_v59 = vpop.permute.xlu0 %3104 }
 0x623   : > { %v2844_v41 = vpop.permute.xlu1 %2843 }
 0x624   : > { %6236 = vmatprep.subr.mxu1 %v2844_v41 }
 0x625   : > { %6237 = vmatpush3.msra.mxu1 %v2844_v41  ;;  %v3103_v16 = vpop.permute.xlu0 %3102 }
 0x627   : > { %3082 = vrot.lane.b32.xlu1 %v9696_v49, %s6905_s25  ;;  %v8357_v40 = vpop.permute.xlu1 %3285 }
 0x628   : > { %6280 = vmatprep.subr.msk.mxu1 %vm1383_vm1, %v8357_v40 }
 0x629   : > { %v3101_v53 = vpop.permute.xlu0 %3100 }
 0x62b   : > { %v8363_v12 = vpop.permute.xlu1 %3283 }
 0x62d   : > { %v3099_v5 = vpop.permute.xlu0 %3098 }
 0x62f   : > { %v8365_v22 = vpop.permute.xlu1 %3281 }
 0x631   : > { %v3097_v20 = vpop.permute.xlu0 %3096 }
 0x633   : > { %3080 = vrot.lane.b32.xlu0 %v9697_v31, %s6905_s25  ;;  %v8367_v41 = vpop.permute.xlu1 %3279 }
 0x637   : > { %v8369_v52 = vpop.permute.xlu1 %3277 }
 0x662   : > { %v2591_v49 = vpop.xlane.xlu0 %2590 }
 0x663   : > { %6688 = vrcp.f32 %v2591_v49 }
 0x668   : > { %v2594_v1 = vpop.xlane.xlu1 %2593 }
 0x669   : > { %6690 = vrcp.f32 %v2594_v1 }
 0x670   : > { %v6689_v8 = vpop.eup %6688 }
 0x671   : > { %v2653_v31 = vmul.f32 %v6689_v8, %v8273_v43 }
 0x673   : > { %6208 = vmatprep.mubr.msk.f32.mxu0 %vm1696_vm2, %v2653_v31 }
 0x676   : > { %v6691_v27 = vpop.eup %6690 }
 0x677   : > { %v2654_v56 = vmul.f32 %v6691_v27, %v8277_v28 }
 0x679   : > { %6209 = vmatmul.mubr.msk.f32.vlgmr.msra.gmra.mxu0 %vm1696_vm2, %v2654_v56 }
 0x67a   : > { %6251 = vmatpush3.xpose.msk.msra.mxu0 %vm1383_vm1, %v8327_v21 }
 0x67b   : > { %6252 = vmatprep.subr.msk.mxu0 %vm1383_vm1, %v3111_v23 }
 0x67e   : > { %6253 = vmatpush3.xpose.msk.msra.mxu0 %vm1383_vm1, %v3111_v23 }
 0x67f   : > { %6254 = vmatprep.subr.msk.mxu0 %vm1383_vm1, %v3109_v9 }
 0x682   : > { %6255 = vmatpush3.xpose.msk.msra.mxu0 %vm1383_vm1, %v3109_v9 }
 0x683   : > { %6256 = vmatprep.subr.msk.mxu0 %vm1383_vm1, %v3107_v50 }
 0x686   : > { %6257 = vmatpush3.xpose.msk.msra.mxu0 %vm1383_vm1, %v3107_v50 }
 0x687   : > { %6258 = vmatprep.subr.msk.mxu0 %vm1383_vm1, %v3105_v59 }
 0x688   : > { %v2600_v1 = vpop.xlane.xlu0 %2599 }
 0x689   : > { %6692 = vrcp.f32 %v2600_v1 }
 0x68a   : > { %6259 = vmatpush3.xpose.msk.msra.mxu0 %vm1383_vm1, %v3105_v59  ;;  %v2597_v56 = vpop.xlane.xlu1 %2596 }
 0x68b   : > { %6694 = vrcp.f32 %v2597_v56  ;;  %6260 = vmatprep.subr.msk.mxu0 %vm1383_vm1, %v3103_v16 }
 0x68e   : > { %6261 = vmatpush3.xpose.msk.msra.mxu0 %vm1383_vm1, %v3103_v16  ;;  %v2606_v8 = vpop.xlane.xlu1 %2605  ;;  %v2603_v27 = vpop.xlane.xlu0 %2602 }
 0x68f   : > { %6696 = vrcp.f32 %v2606_v8  ;;  %6262 = vmatprep.subr.msk.mxu0 %vm1383_vm1, %v3101_v53 }
 0x690   : > { %6698 = vrcp.f32 %v2603_v27 }
 0x692   : > { %6263 = vmatpush3.xpose.msk.msra.mxu0 %vm1383_vm1, %v3101_v53  ;;  %v2612_v43 = vpop.xlane.xlu0 %2611 }
 0x693   : > { %v2609_v28 = vpop.xlane.xlu1 %2608  ;;  %6264 = vmatprep.subr.msk.mxu0 %vm1383_vm1, %v3099_v5  ;;  %6700 = vrcp.f32 %v2612_v43 }
 0x694   : > { %6702 = vrcp.f32 %v2609_v28 }
 0x696   : > { %6265 = vmatpush3.xpose.msk.msra.mxu0 %vm1383_vm1, %v3099_v5  ;;  %v2522_v21 = vpop.xlane.xlu0 %2521  ;;  %v6693_v23 = vpop.eup %6692 }
 0x697   : > { %6266 = vmatprep.subr.msk.mxu0 %vm1383_vm1, %v3097_v20  ;;  %v2550_v9 = vsub.f32 %v8308_v32, %v2522_v21  ;;  %v2528_v49 = vpop.xlane.xlu1 %2527  ;;  %v2656_v53 = vmul.f32 %v6693_v23, %v8287_v58 }
 0x698   : > { %v6695_v50 = vpop.eup %6694 }
 0x699   : > { %v2575_v31 = vmul.f32 1.442695, %v2550_v9  ;;  %v2655_v59 = vmul.f32 %v6695_v50, %v8291_v46 }
 0x69a   : > { %6267 = vmatpush3.xpose.msk.msra.mxu0 %vm1383_vm1, %v3097_v20  ;;  %v2519_v16 = vpop.xlane.xlu0 %2518 }
 0x69b   : > { %6704 = vpow2.f32 %v2575_v31  ;;  %v2549_v1 = vsub.f32 %v8318_v54, %v2519_v16  ;;  %6211 = vmatprep.mubr.msk.f32.mxu0 %vm1696_vm2, %v2655_v59  ;;  %v2534_v43 = vpop.xlane.xlu1 %2533  ;;  %v9698_v59 = vld [vmem:[#allocation28_spill] sm:$0xff]  ;;  %v9699_v16 = vld [vmem:[#allocation26_spill] sm:$0xff] }
 0x69c   : > { %v6697_v5 = vpop.eup %6696  ;;  %6212 = vmatmul.mubr.msk.f32.gmra.mxu0 %vm1696_vm2, %v2656_v53  ;;  %v2552_v53 = vsub.f32 %v8315_v4, %v2528_v49 }
 0x69d   : > { %v6699_v56 = vpop.eup %6698  ;;  %v2573_v32 = vmul.f32 1.442695, %v2549_v1  ;;  %v2658_v8 = vmul.f32 %v6697_v5, %v8295_v38 }
 0x69e   : > { %v2525_v27 = vpop.xlane.xlu0 %2524  ;;  %v2657_v46 = vmul.f32 %v6699_v56, %v8297_v45  ;;  %v2579_v5 = vmul.f32 1.442695, %v2552_v53 }
 0x69f   : > { %6706 = vpow2.f32 %v2573_v32  ;;  %v2540_v23 = vpop.xlane.xlu1 %2539  ;;  %v2551_v1 = vsub.f32 %v8330_v30, %v2525_v27  ;;  %v2554_v32 = vsub.f32 %v8323_v62, %v2534_v43 }
 0x6a0   : > { %v6701_v20 = vpop.eup %6700  ;;  %6214 = vmatprep.mubr.msk.f32.mxu0 %vm1696_vm2, %v2657_v46  ;;  %6708 = vpow2.f32 %v2579_v5 }
 0x6a1   : > { %v6703_v58 = vpop.eup %6702  ;;  %6215 = vmatmul.mubr.msk.f32.gmra.mxu0 %vm1696_vm2, %v2658_v8  ;;  %v2660_v54 = vmul.f32 %v6701_v20, %v8303_v63  ;;  %v2577_v8 = vmul.f32 1.442695, %v2551_v1 }
 0x6a2   : > { %v2531_v28 = vpop.xlane.xlu0 %2530  ;;  %v2659_v21 = vmul.f32 %v6703_v58, %v8305_v48  ;;  %v2583_v58 = vmul.f32 1.442695, %v2554_v32 }
 0x6a3   : > { %v3083_v31 = vpop.permute.xlu1 %3082  ;;  %v2553_v56 = vsub.f32 %v8342_v14, %v2531_v28  ;;  %6710 = vpow2.f32 %v2577_v8 }
 0x6a4   : > { %6217 = vmatprep.mubr.msk.f32.mxu0 %vm1696_vm2, %v2659_v21 }
 0x6a5   : > { %6218 = vmatmul.mubr.msk.f32.gmra.mxu0 %vm1696_vm2, %v2660_v54  ;;  %v2581_v46 = vmul.f32 1.442695, %v2553_v56  ;;  %v2556_v54 = vsub.f32 %v8337_v57, %v2540_v23 }
 0x6a6   : > { %v2537_v38 = vpop.xlane.xlu0 %2536 }
 0x6a7   : > { %v2555_v20 = vsub.f32 %v8349_v47, %v2537_v38  ;;  %6712 = vpow2.f32 %v2581_v46  ;;  %v2587_v4 = vmul.f32 1.442695, %v2556_v54 }
 0x6a8   : > { %v8407_v45 = vpop.eup %6704  ;;  %6714 = vpow2.f32 %v2583_v58 }
 0x6a9   : > { %v2616_v9 = vsel %vm1696_vm2, %v8407_v45, 0.0  ;;  %v2585_v21 = vmul.f32 1.442695, %v2555_v20  ;;  %v8528_v20 = vld [vmem:[%s9565_s10 + $0x88] sm:$0xff] }
 0x6aa   : > { %2617 = vadd.xlane.f32.xlu0 %v2616_v9  ;;  %v3081_v50 = vpop.permute.xlu0 %3080 }
 0x6ab   : > { %6268 = vmatprep.mubr.msk.f32.mxu0 %vm1383_vm1, %v3081_v50  ;;  %6716 = vpow2.f32 %v2585_v21  ;;  %v8533_v21 = vld [vmem:[%s9565_s10 + $0x80] sm:$0xff] }
 0x6ac   : > { %v8412_v63 = vpop.eup %6706  ;;  %6269 = vmatmul.mubr.msk.f32.vlgmr.msra.gmra.mxu0 %vm1383_vm1, %v3083_v31  ;;  %6718 = vpow2.f32 %v2587_v4 }
 0x6ad   : > { %v2613_v48 = vsel %vm1696_vm2, %v8412_v63, 0.0  ;;  %v8427_v30 = vpop.eup %6708 }
 0x6ae   : > { %2614 = vadd.xlane.f32.xlu1 %v2613_v48  ;;  %v2622_v62 = vsel %vm1696_vm2, %v8427_v30, 0.0 }
 0x6b0   : > { %v8429_v14 = vpop.eup %6710 }
 0x6b1   : > { %v2619_v57 = vsel %vm1696_vm2, %v8429_v14, 0.0 }
 0x6b4   : > { %v8433_v49 = vpop.eup %6712 }
 0x6b5   : > { %v8435_v47 = vpop.eup %6714  ;;  %v2625_v27 = vsel %vm1696_vm2, %v8433_v49, 0.0 }
 0x6b6   : > { %v2628_v28 = vsel %vm1696_vm2, %v8435_v47, 0.0 }
 0x6b8   : > { %v8441_v43 = vpop.eup %6716 }
 0x6b9   : > { %v2631_v23 = vsel %vm1696_vm2, %v8441_v43, 0.0  ;;  %v8447_v38 = vpop.eup %6718 }
 0x6ba   : > { %v2634_v9 = vsel %vm1696_vm2, %v8447_v38, 0.0 }
 0x6bf   : > { %3273 = vrot.lane.b32.xlu1 %v9698_v59, %s6905_s25 }
 0x6c0   : > { %3275 = vrot.lane.b32.xlu0 %v9699_v16, %s6905_s25 }
 0x6df   : > { %2623 = vadd.xlane.f32.xlu0 %v2622_v62 }
 0x6e3   : > { %2620 = vadd.xlane.f32.xlu1 %v2619_v57  ;;  %2626 = vadd.xlane.f32.xlu0 %v2625_v27 }
 0x6e7   : > { %2629 = vadd.xlane.f32.xlu1 %v2628_v28  ;;  %2632 = vadd.xlane.f32.xlu0 %v2631_v23 }
 0x6eb   : > { %2635 = vadd.xlane.f32.xlu1 %v2634_v9 }
 0x6fc   : > { %3269 = vrot.lane.b32.xlu1 %v7681_v6, %s6905_s25 }
 0x6fd   : > { %3271 = vrot.lane.b32.xlu0 %v7652_v24, %s6905_s25 }
 0x700   : > { %3255 = vrot.lane.b32.xlu1 %v7721_v11, %s6905_s25 }
 0x701   : > { %3253 = vrot.lane.b32.xlu0 %v7482_v17, %s6905_s25 }
 0x704   : > { %3086 = vrot.lane.b32.xlu1 %v7648_v0, %s6905_s25 }
 0x705   : > { %3084 = vrot.lane.b32.xlu0 %v7628_v39, %s6905_s25 }
 0x708   : > { %3090 = vrot.lane.b32.xlu1 %v7684_v51, %s6905_s25 }
 0x709   : > { %3088 = vrot.lane.b32.xlu0 %v7657_v13, %s6905_s25 }
 0x70c   : > { %3094 = vrot.lane.b32.xlu1 %v7712_v25, %s6905_s25 }
 0x70d   : > { %3092 = vrot.lane.b32.xlu0 %v7695_v10, %s6905_s25 }
 0x710   : > { %3259 = vrot.lane.b32.xlu1 %v7745_v37, %s6905_s25 }
 0x711   : > { %3257 = vrot.lane.b32.xlu0 %v7725_v2, %s6905_s25 }
 0x714   : > { %3263 = vrot.lane.b32.xlu1 %v7762_v42, %s6905_s25 }
 0x715   : > { %3261 = vrot.lane.b32.xlu0 %v7749_v44, %s6905_s25 }
 0x718   : > { %3267 = vrot.lane.b32.xlu1 %v7772_v35, %s6905_s25 }
 0x719   : > { %3265 = vrot.lane.b32.xlu0 %v7765_v15, %s6905_s25 }
 0x733   : > { %v2618_v50 = vpop.xlane.xlu0 %2617 }
 0x734   : > { %6720 = vrcp.f32 %v2618_v50 }
 0x737   : > { %v2615_v31 = vpop.xlane.xlu1 %2614 }
 0x738   : > { %6722 = vrcp.f32 %v2615_v31 }
 0x741   : > { %v6721_v48 = vpop.eup %6720 }
 0x742   : > { %v2662_v5 = vmul.f32 %v6721_v48, %v8407_v45  ;;  %v8499_v45 = vpop.f32.mrf.mxu0 }
 0x743   : > { %9700 = vst [vmem:[#allocation29_spill] sm:$0xff] %v8499_v45 }
 0x745   : > { %v6723_v53 = vpop.eup %6722 }
 0x746   : > { %v2661_v1 = vmul.f32 %v6723_v53, %v8412_v63  ;;  %v8505_v63 = vpop.f32.mrf.mxu0 }
 0x747   : > { %9701 = vst [vmem:[#allocation30_spill] sm:$0xff] %v8505_v63 }
 0x748   : > { %6238 = vmatprep.mubr.msk.f32.mxu1 %vm1696_vm2, %v2661_v1 }
 0x749   : > { %6239 = vmatmul.mubr.msk.f32.vlgmr.msra.gmra.mxu1 %vm1696_vm2, %v2662_v5 }
 0x74a   : > { %6281 = vmatpush3.xpose.msk.msra.mxu1 %vm1383_vm1, %v8357_v40  ;;  %v3276_v40 = vpop.permute.xlu0 %3275 }
 0x74b   : > { %6282 = vmatprep.subr.msk.mxu1 %vm1383_vm1, %v8363_v12 }
 0x74e   : > { %6283 = vmatpush3.xpose.msk.msra.mxu1 %vm1383_vm1, %v8363_v12 }
 0x74f   : > { %6284 = vmatprep.subr.msk.mxu1 %vm1383_vm1, %v8365_v22 }
 0x752   : > { %6285 = vmatpush3.xpose.msk.msra.mxu1 %vm1383_vm1, %v8365_v22  ;;  %v3274_v22 = vpop.permute.xlu1 %3273 }
 0x753   : > { %6286 = vmatprep.subr.msk.mxu1 %vm1383_vm1, %v8367_v41 }
 0x756   : > { %6287 = vmatpush3.xpose.msk.msra.mxu1 %vm1383_vm1, %v8367_v41 }
 0x757   : > { %6288 = vmatprep.subr.msk.mxu1 %vm1383_vm1, %v8369_v52 }
 0x75a   : > { %6289 = vmatpush3.xpose.msk.msra.mxu1 %vm1383_vm1, %v8369_v52 }
 0x75b   : > { %6290 = vmatprep.subr.msk.mxu1 %vm1383_vm1, %v3276_v40 }
 0x75c   : > { %v8510_v12 = vpop.f32.mrf.mxu0 }
 0x75d   : > { %9702 = vst [vmem:[#allocation24_spill] sm:$0xff] %v8510_v12 }
 0x75e   : > { %6291 = vmatpush3.xpose.msk.msra.mxu1 %vm1383_vm1, %v3276_v40  ;;  %v8513_v56 = vpop.f32.mrf.mxu0 }
 0x75f   : > { %9703 = vst [vmem:[#allocation33_spill] sm:$0xff] %v8513_v56  ;;  %6292 = vmatprep.subr.msk.mxu1 %vm1383_vm1, %v3274_v22 }
 0x761   : > { %v8516_v41 = vpop.f32.mrf.mxu0 }
 0x762   : > { %9704 = vst [vmem:[#allocation31_spill] sm:$0xff] %v8516_v41  ;;  %6293 = vmatpush3.xpose.msk.msra.mxu1 %vm1383_vm1, %v3274_v22 }
 0x763   : > { %v8519_v32 = vpop.f32.mrf.mxu0 }
 0x764   : > { %9705 = vst [vmem:[#allocation34_spill] sm:$0xff] %v8519_v32  ;;  %v9724_v32 = vld [vmem:[#allocation3_spill] sm:$0xff] }
 0x765   : > { %v8521_v8 = vpop.f32.mrf.mxu0 }
 0x766   : > { %9706 = vst [vmem:[#allocation32_spill] sm:$0xff] %v8521_v8  ;;  %v9723_v8 = vld [vmem:[#allocation14_spill] sm:$0xff] }
 0x767   : > { %v8523_v46 = vpop.f32.mrf.mxu0 }
 0x768   : > { %v2624_v52 = vpop.xlane.xlu0 %2623  ;;  %9707 = vst [vmem:[#allocation36_spill] sm:$0xff] %v8523_v46  ;;  %v9721_v46 = vld [vmem:[#allocation17_spill] sm:$0xff] }
 0x769   : > { %6724 = vrcp.f32 %v2624_v52 }
 0x76c   : > { %v2621_v58 = vpop.xlane.xlu1 %2620  ;;  %v6270_v54 = vpop.f32.mrf.mxu0 }
 0x76d   : > { %6726 = vrcp.f32 %v2621_v58  ;;  %v8536_v4 = vadd.f32 %v6270_v54, %v8528_v20  ;;  %v2627_v62 = vpop.xlane.xlu0 %2626 }
 0x76e   : > { %6728 = vrcp.f32 %v2627_v62  ;;  %v3214_v57 = vpop.f32.mrf.mxu0 }
 0x76f   : > { %v8539_v27 = vadd.f32 %v3214_v57, %v8533_v21  ;;  %v3429_v28 = vsel %vm1696_vm2, %v8536_v4, -inf }
 0x770   : > { %v2630_v23 = vpop.xlane.xlu1 %2629  ;;  %3430 = vmax.xlane.f32.xlu1 %v3429_v28 }
 0x771   : > { %6730 = vrcp.f32 %v2630_v23  ;;  %v2633_v9 = vpop.xlane.xlu0 %2632  ;;  %v3426_v50 = vsel %vm1696_vm2, %v8539_v27, -inf }
 0x772   : > { %6732 = vrcp.f32 %v2633_v9  ;;  %3427 = vmax.xlane.f32.xlu0 %v3426_v50 }
 0x774   : > { %v2636_v31 = vpop.xlane.xlu1 %2635 }
 0x775   : > { %6734 = vrcp.f32 %v2636_v31  ;;  %v3272_v48 = vpop.permute.xlu0 %3271 }
 0x776   : > { %6294 = vmatprep.subr.msk.mxu1 %vm1383_vm1, %v3272_v48  ;;  %v6725_v1 = vpop.eup %6724 }
 0x777   : > { %6295 = vmatpush3.xpose.msk.msra.mxu1 %vm1383_vm1, %v3272_v48  ;;  %v2664_v54 = vmul.f32 %v6725_v1, %v8427_v30 }
 0x778   : > { %v3270_v53 = vpop.permute.xlu1 %3269 }
 0x779   : > { %v3254_v5 = vpop.permute.xlu0 %3253  ;;  %6296 = vmatprep.subr.msk.mxu1 %vm1383_vm1, %v3270_v53 }
 0x77a   : > { %v6727_v40 = vpop.eup %6726 }
 0x77b   : > { %v6729_v22 = vpop.eup %6728  ;;  %6297 = vmatpush3.xpose.msk.msra.mxu1 %vm1383_vm1, %v3270_v53  ;;  %v2663_v52 = vmul.f32 %v6727_v40, %v8429_v14 }
 0x77c   : > { %v3256_v58 = vpop.permute.xlu1 %3255  ;;  %v2665_v57 = vmul.f32 %v6729_v22, %v8433_v49 }
 0x77d   : > { %v3085_v62 = vpop.permute.xlu0 %3084  ;;  %6241 = vmatprep.mubr.msk.f32.mxu1 %vm1696_vm2, %v2663_v52  ;;  %v8578_v52 = vld [vmem:[%s9565_s10 + $0x98] sm:$0xff] }
 0x77e   : > { %v6731_v28 = vpop.eup %6730  ;;  %6271 = vmatprep.mubr.msk.f32.mxu0 %vm1383_vm1, %v3085_v62  ;;  %6242 = vmatmul.mubr.msk.f32.gmra.mxu1 %vm1696_vm2, %v2664_v54  ;;  %v8583_v54 = vld [vmem:[%s9565_s10 + $0x90] sm:$0xff] }
 0x77f   : > { %v6733_v23 = vpop.eup %6732  ;;  %6244 = vmatprep.mubr.msk.f32.mxu1 %vm1696_vm2, %v2665_v57  ;;  %v2666_v9 = vmul.f32 %v6731_v28, %v8435_v47  ;;  %v8591_v28 = vld [vmem:[%s9565_s10 + $0xa8] sm:$0xff] }
 0x780   : > { %v3087_v50 = vpop.permute.xlu1 %3086  ;;  %v2667_v30 = vmul.f32 %v6733_v23, %v8441_v43 }
 0x781   : > { %v3089_v14 = vpop.permute.xlu0 %3088  ;;  %6272 = vmatmul.mubr.msk.f32.gmra.mxu0 %vm1383_vm1, %v3087_v50 }
 0x782   : > { %v6735_v31 = vpop.eup %6734  ;;  %6245 = vmatmul.mubr.msk.f32.gmra.mxu1 %vm1696_vm2, %v2666_v9  ;;  %6274 = vmatprep.mubr.msk.f32.mxu0 %vm1383_vm1, %v3089_v14  ;;  %v8601_v14 = vld [vmem:[%s9565_s10 + $0xa0] sm:$0xff] }
 0x783   : > { %6247 = vmatprep.mubr.msk.f32.mxu1 %vm1696_vm2, %v2667_v30  ;;  %v2668_v49 = vmul.f32 %v6735_v31, %v8447_v38 }
 0x784   : > { %v3091_v48 = vpop.permute.xlu1 %3090 }
 0x785   : > { %v3093_v53 = vpop.permute.xlu0 %3092  ;;  %6275 = vmatmul.mubr.msk.f32.gmra.mxu0 %vm1383_vm1, %v3091_v48  ;;  %v8611_v48 = vld [vmem:[%s9565_s10 + $0xb8] sm:$0xff] }
 0x786   : > { %6248 = vmatmul.mubr.msk.f32.gmra.mxu1 %vm1696_vm2, %v2668_v49  ;;  %6277 = vmatprep.mubr.msk.f32.mxu0 %vm1383_vm1, %v3093_v53 }
 0x787   : > { %6298 = vmatprep.mubr.msk.f32.mxu1 %vm1383_vm1, %v3254_v5 }
 0x788   : > { %v3095_v47 = vpop.permute.xlu1 %3094 }
 0x789   : > { %v3258_v43 = vpop.permute.xlu0 %3257  ;;  %6278 = vmatmul.mubr.msk.f32.gmra.mxu0 %vm1383_vm1, %v3095_v47 }
 0x78a   : > { %6299 = vmatmul.mubr.msk.f32.vlgmr.msra.gmra.mxu1 %vm1383_vm1, %v3256_v58 }
 0x78b   : > { %6301 = vmatprep.mubr.msk.f32.mxu1 %vm1383_vm1, %v3258_v43 }
 0x78c   : > { %v3260_v1 = vpop.permute.xlu1 %3259 }
 0x78d   : > { %v3262_v38 = vpop.permute.xlu0 %3261 }
 0x78e   : > { %6302 = vmatmul.mubr.msk.f32.gmra.mxu1 %vm1383_vm1, %v3260_v1  ;;  %v8621_v1 = vld [vmem:[%s9565_s10 + $0xb0] sm:$0xff] }
 0x78f   : > { %6304 = vmatprep.mubr.msk.f32.mxu1 %vm1383_vm1, %v3262_v38 }
 0x790   : > { %v3264_v40 = vpop.permute.xlu1 %3263 }
 0x791   : > { %v3266_v22 = vpop.permute.xlu0 %3265 }
 0x792   : > { %6305 = vmatmul.mubr.msk.f32.gmra.mxu1 %vm1383_vm1, %v3264_v40 }
 0x793   : > { %6307 = vmatprep.mubr.msk.f32.mxu1 %vm1383_vm1, %v3266_v22 }
 0x794   : > { %v3268_v5 = vpop.permute.xlu1 %3267 }
 0x796   : > { %6308 = vmatmul.mubr.msk.f32.gmra.mxu1 %vm1383_vm1, %v3268_v5 }
 0x841   : > { %v6273_v58 = vpop.f32.mrf.mxu0 }
 0x842   : > { %v8586_v62 = vadd.f32 %v6273_v58, %v8578_v52 }
 0x843   : > { %v3224_v57 = vpop.f32.mrf.mxu0 }
 0x844   : > { %v8594_v23 = vadd.f32 %v3224_v57, %v8583_v54  ;;  %v3435_v9 = vsel %vm1696_vm2, %v8586_v62, -inf }
 0x845   : > { %3436 = vmax.xlane.f32.xlu1 %v3435_v9  ;;  %v6276_v50 = vpop.f32.mrf.mxu0  ;;  %v9708_v9 = vld [vmem:[#allocation23_spill] sm:$0xff] }
 0x846   : > { %v8604_v30 = vadd.f32 %v6276_v50, %v8591_v28  ;;  %v3432_v31 = vsel %vm1696_vm2, %v8594_v23, -inf  ;;  %v9709_v50 = vld [vmem:[#allocation9_spill] sm:$0xff] }
 0x847   : > { %3433 = vmax.xlane.f32.xlu0 %v3432_v31  ;;  %v3234_v49 = vpop.f32.mrf.mxu0  ;;  %v9710_v31 = vld [vmem:[#allocation25_spill] sm:$0xff] }
 0x848   : > { %v8614_v53 = vadd.f32 %v3234_v49, %v8601_v14  ;;  %v3441_v47 = vsel %vm1696_vm2, %v8604_v30, -inf  ;;  %v9711_v49 = vld [vmem:[#allocation21_spill] sm:$0xff] }
 0x849   : > { %3442 = vmax.xlane.f32.xlu1 %v3441_v47  ;;  %v6279_v43 = vpop.f32.mrf.mxu0  ;;  %v9712_v47 = vld [vmem:[#allocation22_spill] sm:$0xff] }
 0x84a   : > { %v8624_v38 = vadd.f32 %v6279_v43, %v8611_v48  ;;  %v3438_v40 = vsel %vm1696_vm2, %v8614_v53, -inf  ;;  %v9713_v43 = vld [vmem:[#allocation11_spill] sm:$0xff] }
 0x84b   : > { %3439 = vmax.xlane.f32.xlu0 %v3438_v40  ;;  %v3244_v22 = vpop.f32.mrf.mxu0  ;;  %v9715_v40 = vld [vmem:[#allocation10_spill] sm:$0xff] }
 0x84c   : > { %v8629_v5 = vadd.f32 %v3244_v22, %v8621_v1  ;;  %v3447_v58 = vsel %vm1696_vm2, %v8624_v38, -inf  ;;  %v9716_v22 = vld [vmem:[#allocation20_spill] sm:$0xff] }
 0x84d   : > { %3448 = vmax.xlane.f32.xlu1 %v3447_v58  ;;  %v9717_v58 = vld [vmem:[#allocation18_spill] sm:$0xff] }
 0x84e   : > { %v3444_v57 = vsel %vm1696_vm2, %v8629_v5, -inf }
 0x84f   : > { %3445 = vmax.xlane.f32.xlu0 %v3444_v57  ;;  %v9718_v57 = vld [vmem:[#allocation7_spill] sm:$0xff] }
 0x85e   : > { %3616 = vrot.lane.b32.xlu1 %v9673_v3, %s6905_s25 }
 0x862   : > { %3614 = vrot.lane.b32.xlu1 %v9674_v61, %s6905_s25 }
 0x865   : > { %3618 = vrot.lane.b32.xlu0 %v9675_v36, %s6905_s25 }
 0x866   : > { %3608 = vrot.lane.b32.xlu1 %v9676_v26, %s6905_s25 }
 0x869   : > { %3612 = vrot.lane.b32.xlu0 %v9677_v19, %s6905_s25 }
 0x86a   : > { %3606 = vrot.lane.b32.xlu1 %v9678_v29, %s6905_s25 }
 0x86d   : > { %3610 = vrot.lane.b32.xlu0 %v9679_v33, %s6905_s25 }
 0x86e   : > { %3602 = vrot.lane.b32.xlu1 %v9680_v18, %s6905_s25 }
 0x871   : > { %3604 = vrot.lane.b32.xlu0 %v9681_v7, %s6905_s25 }
 0x872   : > { %3774 = vrot.lane.b32.xlu1 %v7752_v60, %s6905_s25 }
 0x875   : > { %3772 = vrot.lane.b32.xlu0 %v8021_v55, %s6905_s25 }
 0x876   : > { %4027 = vrot.lane.b32.xlu1 %v9682_v34, %s6906_s22  ;;  %v9714_v34 = vld [vmem:[#allocation19_spill] sm:$0xff] }
 0x879   : > { %3770 = vrot.lane.b32.xlu0 %v9708_v9, %s6905_s25 }
 0x87a   : > { %4025 = vrot.lane.b32.xlu1 %v9709_v50, %s6906_s22  ;;  %v9719_v50 = vld [vmem:[#allocation15_spill] sm:$0xff] }
 0x87d   : > { %3768 = vrot.lane.b32.xlu0 %v9710_v31, %s6905_s25 }
 0x87e   : > { %3766 = vrot.lane.b32.xlu1 %v9711_v49, %s6905_s25 }
 0x881   : > { %3764 = vrot.lane.b32.xlu0 %v9712_v47, %s6905_s25 }
 0x882   : > { %4023 = vrot.lane.b32.xlu1 %v9713_v43, %s6906_s22  ;;  %v9720_v43 = vld [vmem:[#allocation6_spill] sm:$0xff] }
 0x885   : > { %3762 = vrot.lane.b32.xlu0 %v9714_v34, %s6905_s25 }
 0x886   : > { %4021 = vrot.lane.b32.xlu1 %v9715_v40, %s6906_s22  ;;  %v9722_v40 = vld [vmem:[#allocation8_spill] sm:$0xff] }
 0x889   : > { %3760 = vrot.lane.b32.xlu0 %v9716_v22, %s6905_s25 }
 0x88a   : > { %3758 = vrot.lane.b32.xlu1 %v9717_v58, %s6905_s25  ;;  %s6909_s25 = smov 24  }
 0x88d   : > { %4019 = vrot.lane.b32.xlu0 %v9718_v57, %s6906_s22  ;;  %v9725_v57 = vld [vmem:[#allocation16_spill] sm:$0xff] }
 0x88e   : > { %4200 = vrot.lane.b32.xlu1 %v9719_v50, %s6906_s22  ;;  %v9726_v50 = vld [vmem:[#allocation5_spill] sm:$0xff] }
 0x891   : > { %4017 = vrot.lane.b32.xlu0 %v9720_v43, %s6906_s22  ;;  %v9727_v43 = vld [vmem:[#allocation13_spill] sm:$0xff] }
 0x892   : > { %4198 = vrot.lane.b32.xlu1 %v9721_v46, %s6906_s22  ;;  %v9728_v46 = vld [vmem:[#allocation4_spill] sm:$0xff] }
 0x895   : > { %4015 = vrot.lane.b32.xlu0 %v9722_v40, %s6906_s22  ;;  %v9729_v40 = vld [vmem:[#allocation27_spill] sm:$0xff] }
 0x896   : > { %4196 = vrot.lane.b32.xlu1 %v9723_v8, %s6906_s22 }
 0x899   : > { %4013 = vrot.lane.b32.xlu0 %v9724_v32, %s6906_s22  ;;  %v3428_v32 = vpop.xlane.xlu0 %3427 }
 0x89a   : > { %4194 = vrot.lane.b32.xlu1 %v9725_v57, %s6906_s22  ;;  %v3474_v8 = vsub.f32 %v8539_v27, %v3428_v32  ;;  %v3431_v57 = vpop.xlane.xlu1 %3430 }
 0x89d   : > { %4011 = vrot.lane.b32.xlu0 %v9726_v50, %s6906_s22  ;;  %v3490_v50 = vmul.f32 1.442695, %v3474_v8 }
 0x89e   : > { %4192 = vrot.lane.b32.xlu1 %v9727_v43, %s6906_s22  ;;  %v3475_v43 = vsub.f32 %v8536_v4, %v3431_v57 }
 0x89f   : > { %6736 = vpow2.f32 %v3490_v50 }
 0x8a1   : > { %3995 = vrot.lane.b32.xlu0 %v9728_v46, %s6906_s22  ;;  %v3492_v46 = vmul.f32 1.442695, %v3475_v43 }
 0x8a2   : > { %3997 = vrot.lane.b32.xlu1 %v9729_v40, %s6906_s22  ;;  %v8713_v40 = vpop.f32.mrf.mxu1 }
 0x8a3   : > { %9730 = vst [vmem:[#allocation35_spill] sm:$0xff] %v8713_v40  ;;  %6738 = vpow2.f32 %v3492_v46 }
 0x8a5   : > { %4190 = vrot.lane.b32.xlu0 %v9699_v16, %s6906_s22  ;;  %v8715_v16 = vpop.f32.mrf.mxu1 }
 0x8a6   : > { %3999 = vrot.lane.b32.xlu1 %v7628_v39, %s6906_s22  ;;  %9731 = vst [vmem:[#allocation12_spill] sm:$0xff] %v8715_v16 }
 0x8a7   : > { %v8717_v39 = vpop.f32.mrf.mxu1 }
 0x8a8   : > { %9732 = vst [vmem:[#allocation28_spill] sm:$0xff] %v8717_v39 }
 0x8a9   : > { %4001 = vrot.lane.b32.xlu0 %v7648_v0, %s6906_s22  ;;  %v8721_v41 = vpop.f32.mrf.mxu1 }
 0x8aa   : > { %4188 = vrot.lane.b32.xlu1 %v9698_v59, %s6906_s22  ;;  %9733 = vst [vmem:[#allocation26_spill] sm:$0xff] %v8721_v41 }
 0x8ab   : > { %v8725_v27 = vpop.f32.mrf.mxu1 }
 0x8ac   : > { %v8719_v0 = vpop.eup %6736  ;;  %9734 = vst [vmem:[#allocation9_spill] sm:$0xff] %v8725_v27 }
 0x8ad   : > { %v3522_v59 = vsel %vm1696_vm2, %v8719_v0, 0.0  ;;  %v8729_v32 = vpop.f32.mrf.mxu1 }
 0x8ae   : > { %9735 = vst [vmem:[#allocation11_spill] sm:$0xff] %v8729_v32 }
 0x8af   : > { %v8734_v46 = vpop.f32.mrf.mxu1 }
 0x8b0   : > { %v8727_v4 = vpop.eup %6738  ;;  %9736 = vst [vmem:[#allocation10_spill] sm:$0xff] %v8734_v46 }
 0x8b1   : > { %v3525_v8 = vsel %vm1696_vm2, %v8727_v4, 0.0  ;;  %v8738_v32 = vpop.f32.mrf.mxu1 }
 0x8b2   : > { %9737 = vst [vmem:[#allocation7_spill] sm:$0xff] %v8738_v32 }
 0x8b3   : > { %v6300_v46 = vpop.f32.mrf.mxu1 }
 0x8c8   : > { %3523 = vadd.xlane.f32.xlu0 %v3522_v59 }
 0x8ce   : > { %v3437_v57 = vpop.xlane.xlu1 %3436  ;;  %3526 = vadd.xlane.f32.xlu1 %v3525_v8 }
 0x8cf   : > { %v3477_v50 = vsub.f32 %v8586_v62, %v3437_v57 }
 0x8d0   : > { %v3434_v43 = vpop.xlane.xlu0 %3433 }
 0x8d1   : > { %v3496_v41 = vmul.f32 1.442695, %v3477_v50  ;;  %v3476_v39 = vsub.f32 %v8594_v23, %v3434_v43 }
 0x8d2   : > { %v3443_v59 = vpop.xlane.xlu1 %3442 }
 0x8d3   : > { %6740 = vpow2.f32 %v3496_v41  ;;  %v3494_v27 = vmul.f32 1.442695, %v3476_v39  ;;  %v3479_v16 = vsub.f32 %v8604_v30, %v3443_v59  ;;  %v3387_v59 = vpop.f32.mrf.mxu1 }
 0x8d4   : > { %v3440_v40 = vpop.xlane.xlu0 %3439 }
 0x8d5   : > { %6742 = vpow2.f32 %v3494_v27  ;;  %v3500_v56 = vmul.f32 1.442695, %v3479_v16  ;;  %v3478_v8 = vsub.f32 %v8614_v53, %v3440_v40  ;;  %v6303_v53 = vpop.f32.mrf.mxu1 }
 0x8d6   : > { %v3449_v12 = vpop.xlane.xlu1 %3448 }
 0x8d7   : > { %6744 = vpow2.f32 %v3500_v56  ;;  %v3498_v62 = vmul.f32 1.442695, %v3478_v8  ;;  %v3481_v57 = vsub.f32 %v8624_v38, %v3449_v12 }
 0x8d8   : > { %v3446_v50 = vpop.xlane.xlu0 %3445 }
 0x8d9   : > { %6746 = vpow2.f32 %v3498_v62  ;;  %v3504_v23 = vmul.f32 1.442695, %v3481_v57  ;;  %v3480_v41 = vsub.f32 %v8629_v5, %v3446_v50  ;;  %v3397_v57 = vpop.f32.mrf.mxu1 }
 0x8da   : > { %v3617_v39 = vpop.permute.xlu1 %3616 }
 0x8db   : > { %6748 = vpow2.f32 %v3504_v23  ;;  %v3502_v30 = vmul.f32 1.442695, %v3480_v41 }
 0x8dc   : > { %v3619_v43 = vpop.permute.xlu0 %3618 }
 0x8dd   : > { %6750 = vpow2.f32 %v3502_v30  ;;  %6310 = vmatprep.subr.mxu0 %v3619_v43 }
 0x8de   : > { %v3615_v16 = vpop.permute.xlu1 %3614  ;;  %6311 = vmatpush3.msra.mxu0 %v3619_v43 }
 0x8df   : > { %6312 = vmatprep.subr.mxu0 %v3617_v39 }
 0x8e0   : > { %v8743_v56 = vpop.eup %6740  ;;  %6313 = vmatpush3.msra.mxu0 %v3617_v39  ;;  %v3613_v12 = vpop.permute.xlu0 %3612 }
 0x8e1   : > { %6314 = vmatprep.subr.mxu0 %v3615_v16  ;;  %v3531_v38 = vsel %vm1696_vm2, %v8743_v56, 0.0 }
 0x8e2   : > { %v8747_v5 = vpop.eup %6742  ;;  %v3609_v40 = vpop.permute.xlu1 %3608  ;;  %3532 = vadd.xlane.f32.xlu0 %v3531_v38  ;;  %6315 = vmatpush3.msra.mxu0 %v3615_v16 }
 0x8e3   : > { %6316 = vmatprep.subr.mxu0 %v3613_v12  ;;  %v3528_v27 = vsel %vm1696_vm2, %v8747_v5, 0.0  ;;  %v6306_v16 = vpop.f32.mrf.mxu1 }
 0x8e4   : > { %v8751_v8 = vpop.eup %6744  ;;  %3529 = vadd.xlane.f32.xlu1 %v3528_v27  ;;  %6317 = vmatpush3.msra.mxu0 %v3613_v12  ;;  %v3611_v62 = vpop.permute.xlu0 %3610  ;;  %v8764_v27 = vadd.f32 %v6300_v46, %v8528_v20  ;;  %v8774_v20 = vadd.f32 %v3387_v59, %v8533_v21  ;;  %v8786_v21 = vadd.f32 %v3397_v57, %v8583_v54 }
 0x8e5   : > { %6318 = vmatprep.subr.mxu0 %v3611_v62  ;;  %v3537_v41 = vsel %vm1696_vm2, %v8751_v8, 0.0 }
 0x8e6   : > { %v8753_v50 = vpop.eup %6746  ;;  %v3607_v23 = vpop.permute.xlu1 %3606  ;;  %6319 = vmatpush3.msra.mxu0 %v3611_v62  ;;  %v3453_v46 = vsel %vm1696_vm2, %v8764_v27, -inf }
 0x8e7   : > { %6320 = vmatprep.subr.mxu0 %v3609_v40  ;;  %v3534_v39 = vsel %vm1696_vm2, %v8753_v50, 0.0 }
 0x8e8   : > { %v8759_v30 = vpop.eup %6748  ;;  %3538 = vadd.xlane.f32.xlu1 %v3537_v41  ;;  %3535 = vadd.xlane.f32.xlu0 %v3534_v39  ;;  %v3605_v43 = vpop.permute.xlu0 %3604  ;;  %v8771_v41 = vadd.f32 %v6303_v53, %v8578_v52 }
 0x8e9   : > { %6321 = vmatpush3.msra.mxu0 %v3609_v40  ;;  %v3543_v62 = vsel %vm1696_vm2, %v8759_v30, 0.0  ;;  %v3407_v39 = vpop.f32.mrf.mxu1 }
 0x8ea   : > { %v8761_v12 = vpop.eup %6750  ;;  %6322 = vmatprep.subr.mxu0 %v3607_v23  ;;  %v3603_v38 = vpop.permute.xlu1 %3602  ;;  %v3459_v52 = vsel %vm1696_vm2, %v8771_v41, -inf  ;;  %v8800_v57 = vadd.f32 %v3407_v39, %v8601_v14 }
 0x8eb   : > { %6323 = vmatpush3.msra.mxu0 %v3607_v23  ;;  %v3540_v32 = vsel %vm1696_vm2, %v8761_v12, 0.0  ;;  %v8779_v23 = vadd.f32 %v6306_v16, %v8591_v28  ;;  %v6309_v53 = vpop.f32.mrf.mxu1 }
 0x8ec   : > { %6324 = vmatprep.subr.mxu0 %v3605_v43  ;;  %3544 = vadd.xlane.f32.xlu0 %v3543_v62  ;;  %v3773_v40 = vpop.permute.xlu0 %3772  ;;  %v8793_v28 = vadd.f32 %v6309_v53, %v8611_v48 }
 0x8ed   : > { %3541 = vadd.xlane.f32.xlu1 %v3540_v32  ;;  %6325 = vmatpush3.msra.mxu0 %v3605_v43  ;;  %v3465_v59 = vsel %vm1696_vm2, %v8779_v23, -inf  ;;  %v3417_v62 = vpop.f32.mrf.mxu1 }
 0x8ee   : > { %6326 = vmatprep.subr.mxu0 %v3603_v38  ;;  %v3775_v63 = vpop.permute.xlu1 %3774  ;;  %v3471_v48 = vsel %vm1696_vm2, %v8793_v28, -inf }
 0x8ef   : > { %6327 = vmatpush3.msra.mxu0 %v3603_v38  ;;  %6340 = vmatprep.subr.mxu1 %v3775_v63  ;;  %v3456_v38 = vsel %vm1696_vm2, %v8786_v21, -inf }
 0x8f0   : > { %6341 = vmatpush3.msra.mxu1 %v3775_v63  ;;  %3454 = vmax.xlane.f32.xlu0 %v3453_v46  ;;  %v3771_v32 = vpop.permute.xlu0 %3770  ;;  %v3450_v63 = vsel %vm1696_vm2, %v8774_v20, -inf }
 0x8f1   : > { %3460 = vmax.xlane.f32.xlu1 %v3459_v52  ;;  %6342 = vmatprep.subr.mxu1 %v3773_v40  ;;  %v8807_v52 = vadd.f32 %v3417_v62, %v8621_v1 }
 0x8f2   : > { %v8783_v43 = vpop.permute.xlu1 %4027  ;;  %6343 = vmatpush3.msra.mxu1 %v3773_v40 }
 0x8f3   : > { %6344 = vmatprep.subr.mxu1 %v3771_v32  ;;  %6370 = vmatprep.subr.msk.mxu0 %vm1383_vm1, %v8783_v43  ;;  %v3468_v53 = vsel %vm1696_vm2, %v8807_v52, -inf }
 0x8f4   : > { %3451 = vmax.xlane.f32.xlu0 %v3450_v63  ;;  %6345 = vmatpush3.msra.mxu1 %v3771_v32  ;;  %v3769_v16 = vpop.permute.xlu0 %3768  ;;  %v3462_v32 = vsel %vm1696_vm2, %v8800_v57, -inf }
 0x8f5   : > { %3466 = vmax.xlane.f32.xlu1 %v3465_v59  ;;  %6346 = vmatprep.subr.mxu1 %v3769_v16 }
 0x8f6   : > { %v8797_v54 = vpop.permute.xlu1 %4025  ;;  %6347 = vmatpush3.msra.mxu1 %v3769_v16 }
 0x8f8   : > { %3457 = vmax.xlane.f32.xlu0 %v3456_v38  ;;  %v3765_v40 = vpop.permute.xlu0 %3764 }
 0x8f9   : > { %3472 = vmax.xlane.f32.xlu1 %v3471_v48 }
 0x8fa   : > { %v3767_v46 = vpop.permute.xlu1 %3766 }
 0x8fb   : > { %6348 = vmatprep.subr.mxu1 %v3767_v46 }
 0x8fc   : > { %3463 = vmax.xlane.f32.xlu0 %v3462_v32  ;;  %6349 = vmatpush3.msra.mxu1 %v3767_v46  ;;  %v3763_v14 = vpop.permute.xlu0 %3762 }
 0x8fd   : > { %6350 = vmatprep.subr.mxu1 %v3765_v40 }
 0x8fe   : > { %v4024_v39 = vpop.permute.xlu1 %4023  ;;  %6351 = vmatpush3.msra.mxu1 %v3765_v40 }
 0x8ff   : > { %6352 = vmatprep.subr.mxu1 %v3763_v14 }
 0x900   : > { %3469 = vmax.xlane.f32.xlu0 %v3468_v53  ;;  %6353 = vmatpush3.msra.mxu1 %v3763_v14  ;;  %v3761_v63 = vpop.permute.xlu0 %3760 }
 0x901   : > { %6354 = vmatprep.subr.mxu1 %v3761_v63 }
 0x902   : > { %v4022_v1 = vpop.permute.xlu1 %4021  ;;  %6355 = vmatpush3.msra.mxu1 %v3761_v63 }
 0x904   : > { %v4020_v38 = vpop.permute.xlu0 %4019 }
 0x906   : > { %v3759_v59 = vpop.permute.xlu1 %3758 }
 0x907   : > { %6356 = vmatprep.subr.mxu1 %v3759_v59 }
 0x908   : > { %6357 = vmatpush3.msra.mxu1 %v3759_v59  ;;  %v4018_v62 = vpop.permute.xlu0 %4017 }
 0x90a   : > { %4005 = vrot.lane.b32.xlu1 %v7684_v51, %s6906_s22  ;;  %v8815_v16 = vpop.permute.xlu1 %4200 }
 0x90b   : > { %6400 = vmatprep.subr.msk.mxu1 %vm1383_vm1, %v8815_v16 }
 0x90c   : > { %v8821_v48 = vpop.permute.xlu0 %4015 }
 0x90e   : > { %v8823_v40 = vpop.permute.xlu1 %4198 }
 0x910   : > { %v8825_v46 = vpop.permute.xlu0 %4013 }
 0x912   : > { %v8827_v32 = vpop.permute.xlu1 %4196 }
 0x914   : > { %v8829_v14 = vpop.permute.xlu0 %4011 }
 0x916   : > { %4003 = vrot.lane.b32.xlu0 %v7657_v13, %s6906_s22  ;;  %v8831_v51 = vpop.permute.xlu1 %4194 }
 0x918   : > { %v8833_v53 = vpop.permute.xlu0 %3995 }
 0x91a   : > { %v8835_v63 = vpop.permute.xlu1 %4192 }
 0x91c   : > { %v8837_v59 = vpop.permute.xlu0 %4190 }
 0x91e   : > { %v8839_v13 = vpop.permute.xlu1 %3997 }
 0x920   : > { %v8841_v22 = vpop.permute.xlu0 %4001 }
 0x922   : > { %v8843_v45 = vpop.permute.xlu1 %3999 }
 0x926   : > { %v8845_v34 = vpop.permute.xlu1 %4188 }
 0x951   : > { %v3524_v58 = vpop.xlane.xlu0 %3523 }
 0x952   : > { %6752 = vrcp.f32 %v3524_v58 }
 0x957   : > { %v3527_v49 = vpop.xlane.xlu1 %3526 }
 0x958   : > { %6754 = vrcp.f32 %v3527_v49 }
 0x95f   : > { %v6753_v9 = vpop.eup %6752 }
 0x960   : > { %v3586_v47 = vmul.f32 %v6753_v9, %v8719_v0 }
 0x962   : > { %6328 = vmatprep.mubr.msk.f32.mxu0 %vm1696_vm2, %v3586_v47 }
 0x965   : > { %v6755_v31 = vpop.eup %6754 }
 0x966   : > { %v3587_v55 = vmul.f32 %v6755_v31, %v8727_v4 }
 0x968   : > { %6329 = vmatmul.mubr.msk.f32.vlgmr.msra.gmra.mxu0 %vm1696_vm2, %v3587_v55 }
 0x969   : > { %6371 = vmatpush3.xpose.msk.msra.mxu0 %vm1383_vm1, %v8783_v43 }
 0x96a   : > { %6372 = vmatprep.subr.msk.mxu0 %vm1383_vm1, %v8797_v54 }
 0x96b   : > { %v3533_v58 = vpop.xlane.xlu0 %3532 }
 0x96c   : > { %6756 = vrcp.f32 %v3533_v58 }
 0x96d   : > { %6373 = vmatpush3.xpose.msk.msra.mxu0 %vm1383_vm1, %v8797_v54  ;;  %v3530_v49 = vpop.xlane.xlu1 %3529 }
 0x96e   : > { %6758 = vrcp.f32 %v3530_v49  ;;  %6374 = vmatprep.subr.msk.mxu0 %vm1383_vm1, %v4024_v39 }
 0x971   : > { %6375 = vmatpush3.xpose.msk.msra.mxu0 %vm1383_vm1, %v4024_v39  ;;  %v3539_v9 = vpop.xlane.xlu1 %3538  ;;  %v3536_v31 = vpop.xlane.xlu0 %3535 }
 0x972   : > { %6760 = vrcp.f32 %v3539_v9  ;;  %6376 = vmatprep.subr.msk.mxu0 %vm1383_vm1, %v4022_v1 }
 0x973   : > { %6762 = vrcp.f32 %v3536_v31 }
 0x975   : > { %6377 = vmatpush3.xpose.msk.msra.mxu0 %vm1383_vm1, %v4022_v1  ;;  %v3545_v55 = vpop.xlane.xlu0 %3544 }
 0x976   : > { %v3542_v47 = vpop.xlane.xlu1 %3541  ;;  %6378 = vmatprep.subr.msk.mxu0 %vm1383_vm1, %v4020_v38  ;;  %6764 = vrcp.f32 %v3545_v55 }
 0x977   : > { %6766 = vrcp.f32 %v3542_v47 }
 0x979   : > { %6379 = vmatpush3.xpose.msk.msra.mxu0 %vm1383_vm1, %v4020_v38  ;;  %v3455_v0 = vpop.xlane.xlu0 %3454  ;;  %v6757_v4 = vpop.eup %6756 }
 0x97a   : > { %6380 = vmatprep.subr.msk.mxu0 %vm1383_vm1, %v4018_v62  ;;  %v3483_v43 = vsub.f32 %v8764_v27, %v3455_v0  ;;  %v3589_v49 = vmul.f32 %v6757_v4, %v8743_v56  ;;  %v3461_v55 = vpop.xlane.xlu1 %3460 }
 0x97b   : > { %v6759_v54 = vpop.eup %6758 }
 0x97c   : > { %v3508_v39 = vmul.f32 1.442695, %v3483_v43  ;;  %v3588_v58 = vmul.f32 %v6759_v54, %v8747_v5 }
 0x97d   : > { %6381 = vmatpush3.xpose.msk.msra.mxu0 %vm1383_vm1, %v4018_v62  ;;  %v3452_v1 = vpop.xlane.xlu0 %3451 }
 0x97e   : > { %6768 = vpow2.f32 %v3508_v39  ;;  %6382 = vmatprep.subr.msk.mxu0 %vm1383_vm1, %v8821_v48  ;;  %v3482_v38 = vsub.f32 %v8774_v20, %v3452_v1  ;;  %6331 = vmatprep.mubr.msk.f32.mxu0 %vm1696_vm2, %v3588_v58 }
 0x97f   : > { %v6761_v9 = vpop.eup %6760  ;;  %6332 = vmatmul.mubr.msk.f32.gmra.mxu0 %vm1696_vm2, %v3589_v49 }
 0x980   : > { %v6763_v27 = vpop.eup %6762  ;;  %v3506_v31 = vmul.f32 1.442695, %v3482_v38  ;;  %v3591_v5 = vmul.f32 %v6761_v9, %v8751_v8 }
 0x981   : > { %6383 = vmatpush3.xpose.msk.msra.mxu0 %vm1383_vm1, %v8821_v48  ;;  %v3458_v56 = vpop.xlane.xlu0 %3457  ;;  %v3590_v62 = vmul.f32 %v6763_v27, %v8753_v50  ;;  %v3467_v50 = vpop.xlane.xlu1 %3466 }
 0x982   : > { %6770 = vpow2.f32 %v3506_v31  ;;  %6384 = vmatprep.subr.msk.mxu0 %vm1383_vm1, %v8825_v46  ;;  %v3484_v54 = vsub.f32 %v8786_v21, %v3458_v56  ;;  %v3487_v58 = vsub.f32 %v8779_v23, %v3467_v50 }
 0x983   : > { %v6765_v20 = vpop.eup %6764  ;;  %6334 = vmatprep.mubr.msk.f32.mxu0 %vm1696_vm2, %v3590_v62 }
 0x984   : > { %v6767_v47 = vpop.eup %6766  ;;  %6335 = vmatmul.mubr.msk.f32.gmra.mxu0 %vm1696_vm2, %v3591_v5  ;;  %v3593_v0 = vmul.f32 %v6765_v20, %v8759_v30  ;;  %v3510_v1 = vmul.f32 1.442695, %v3484_v54  ;;  %v3516_v9 = vmul.f32 1.442695, %v3487_v58  ;;  %v9045_v54 = vld [vmem:[%s9565_s10 + $0xe8] sm:$0xff] }
 0x985   : > { %6385 = vmatpush3.xpose.msk.msra.mxu0 %vm1383_vm1, %v8825_v46  ;;  %v3464_v8 = vpop.xlane.xlu0 %3463  ;;  %v3592_v48 = vmul.f32 %v6767_v47, %v8761_v12  ;;  %v3473_v46 = vpop.xlane.xlu1 %3472  ;;  %v9015_v47 = vld [vmem:[%s9565_s10 + $0xc8] sm:$0xff] }
 0x986   : > { %6386 = vmatprep.subr.msk.mxu0 %vm1383_vm1, %v8829_v14  ;;  %v3486_v39 = vsub.f32 %v8800_v57, %v3464_v8 }
 0x987   : > { %6337 = vmatprep.mubr.msk.f32.mxu0 %vm1696_vm2, %v3592_v48 }
 0x988   : > { %6338 = vmatmul.mubr.msk.f32.gmra.mxu0 %vm1696_vm2, %v3593_v0  ;;  %v3514_v49 = vmul.f32 1.442695, %v3486_v39 }
 0x989   : > { %6387 = vmatpush3.xpose.msk.msra.mxu0 %vm1383_vm1, %v8829_v14  ;;  %6388 = vmatprep.mubr.msk.f32.mxu0 %vm1383_vm1, %v8833_v53  ;;  %v3470_v30 = vpop.xlane.xlu0 %3469 }
 0x98a   : > { %v3488_v38 = vsub.f32 %v8807_v52, %v3470_v30 }
 0x98b   : > { %v8893_v4 = vpop.eup %6768 }
 0x98c   : > { %6389 = vmatmul.mubr.msk.f32.vlgmr.msra.gmra.mxu0 %vm1383_vm1, %v8839_v13  ;;  %v3549_v12 = vsel %vm1696_vm2, %v8893_v4, 0.0  ;;  %v4006_v13 = vpop.permute.xlu1 %4005 }
 0x98d   : > { %6391 = vmatprep.mubr.msk.f32.mxu0 %vm1383_vm1, %v8843_v45  ;;  %3550 = vadd.xlane.f32.xlu0 %v3549_v12  ;;  %v4004_v14 = vpop.permute.xlu0 %4003  ;;  %v3485_v45 = vsub.f32 %v8771_v41, %v3461_v55 }
 0x98f   : > { %v8901_v43 = vpop.eup %6770 }
 0x990   : > { %6392 = vmatmul.mubr.msk.f32.gmra.mxu0 %vm1383_vm1, %v8841_v22  ;;  %v3546_v53 = vsel %vm1696_vm2, %v8901_v43, 0.0  ;;  %v3512_v22 = vmul.f32 1.442695, %v3485_v45 }
 0x991   : > { %6394 = vmatprep.mubr.msk.f32.mxu0 %vm1383_vm1, %v4004_v14  ;;  %3547 = vadd.xlane.f32.xlu1 %v3546_v53  ;;  %v9033_v14 = vld [vmem:[%s9565_s10 + $0xd0] sm:$0xff] }
 0x992   : > { %6772 = vpow2.f32 %v3512_v22 }
 0x993   : > { %6774 = vpow2.f32 %v3510_v1 }
 0x994   : > { %6395 = vmatmul.mubr.msk.f32.gmra.mxu0 %vm1383_vm1, %v4006_v13  ;;  %6776 = vpow2.f32 %v3514_v49  ;;  %v9040_v13 = vld [vmem:[%s9565_s10 + $0xd8] sm:$0xff] }
 0x995   : > { %6778 = vpow2.f32 %v3516_v9 }
 0x99f   : > { %v8919_v21 = vpop.eup %6772 }
 0x9a0   : > { %v8921_v57 = vpop.eup %6774  ;;  %v3555_v23 = vsel %vm1696_vm2, %v8919_v21, 0.0 }
 0x9a1   : > { %v8925_v27 = vpop.eup %6776 }
 0x9a2   : > { %4007 = vrot.lane.b32.xlu1 %v7695_v10, %s6906_s22  ;;  %v3489_v10 = vsub.f32 %v8793_v28, %v3473_v46  ;;  %v8927_v52 = vpop.eup %6778  ;;  %v3552_v28 = vsel %vm1696_vm2, %v8921_v57, 0.0  ;;  %v3558_v31 = vsel %vm1696_vm2, %v8925_v27, 0.0 }
 0x9a3   : > { %4186 = vrot.lane.b32.xlu0 %v7652_v24, %s6906_s22  ;;  %v3518_v24 = vmul.f32 1.442695, %v3488_v38  ;;  %v3561_v55 = vsel %vm1696_vm2, %v8927_v52, 0.0 }
 0x9a4   : > { %v3520_v41 = vmul.f32 1.442695, %v3489_v10 }
 0x9a5   : > { %6780 = vpow2.f32 %v3518_v24  ;;  %v9061_v24 = vld [vmem:[%s9565_s10 + $0xe0] sm:$0xff] }
 0x9a6   : > { %6782 = vpow2.f32 %v3520_v41 }
 0x9b2   : > { %v8933_v5 = vpop.eup %6780 }
 0x9b3   : > { %v3564_v56 = vsel %vm1696_vm2, %v8933_v5, 0.0  ;;  %v8939_v62 = vpop.eup %6782 }
 0x9b4   : > { %v3567_v20 = vsel %vm1696_vm2, %v8939_v62, 0.0 }
 0x9c2   : > { %3556 = vadd.xlane.f32.xlu0 %v3555_v23 }
 0x9c6   : > { %3553 = vadd.xlane.f32.xlu1 %v3552_v28  ;;  %3559 = vadd.xlane.f32.xlu0 %v3558_v31 }
 0x9ca   : > { %3562 = vadd.xlane.f32.xlu1 %v3561_v55  ;;  %3565 = vadd.xlane.f32.xlu0 %v3564_v56 }
 0x9ce   : > { %3568 = vadd.xlane.f32.xlu1 %v3567_v20 }
 0x9df   : > { %4184 = vrot.lane.b32.xlu1 %v7681_v6, %s6906_s22 }
 0x9e0   : > { %4009 = vrot.lane.b32.xlu0 %v7712_v25, %s6906_s22 }
 0x9e3   : > { %4170 = vrot.lane.b32.xlu1 %v7721_v11, %s6906_s22 }
 0x9e4   : > { %4168 = vrot.lane.b32.xlu0 %v7482_v17, %s6906_s22 }
 0x9e7   : > { %4174 = vrot.lane.b32.xlu1 %v7745_v37, %s6906_s22 }
 0x9e8   : > { %4172 = vrot.lane.b32.xlu0 %v7725_v2, %s6906_s22 }
 0x9eb   : > { %4178 = vrot.lane.b32.xlu1 %v7762_v42, %s6906_s22 }
 0x9ec   : > { %4176 = vrot.lane.b32.xlu0 %v7749_v44, %s6906_s22 }
 0x9ef   : > { %4182 = vrot.lane.b32.xlu1 %v7772_v35, %s6906_s22 }
 0x9f0   : > { %4180 = vrot.lane.b32.xlu0 %v7765_v15, %s6906_s22 }
 0xa16   : > { %v3551_v6 = vpop.xlane.xlu0 %3550 }
 0xa17   : > { %6784 = vrcp.f32 %v3551_v6 }
 0xa1a   : > { %v3548_v17 = vpop.xlane.xlu1 %3547 }
 0xa1b   : > { %6786 = vrcp.f32 %v3548_v17 }
 0xa1e   : > { %v4008_v25 = vpop.permute.xlu1 %4007 }
 0xa1f   : > { %6397 = vmatprep.mubr.msk.f32.mxu0 %vm1383_vm1, %v4008_v25 }
 0xa24   : > { %v6785_v11 = vpop.eup %6784 }
 0xa25   : > { %v3595_v42 = vmul.f32 %v6785_v11, %v8893_v4 }
 0xa28   : > { %v6787_v2 = vpop.eup %6786  ;;  %v8980_v44 = vpop.f32.mrf.mxu0 }
 0xa29   : > { %v3594_v37 = vmul.f32 %v6787_v2, %v8901_v43 }
 0xa2a   : > { %v8986_v15 = vpop.f32.mrf.mxu0 }
 0xa2b   : > { %6358 = vmatprep.mubr.msk.f32.mxu1 %vm1696_vm2, %v3594_v37 }
 0xa2c   : > { %6359 = vmatmul.mubr.msk.f32.vlgmr.msra.gmra.mxu1 %vm1696_vm2, %v3595_v42 }
 0xa2d   : > { %6401 = vmatpush3.xpose.msk.msra.mxu1 %vm1383_vm1, %v8815_v16 }
 0xa2e   : > { %6402 = vmatprep.subr.msk.mxu1 %vm1383_vm1, %v8823_v40 }
 0xa31   : > { %6403 = vmatpush3.xpose.msk.msra.mxu1 %vm1383_vm1, %v8823_v40 }
 0xa32   : > { %6404 = vmatprep.subr.msk.mxu1 %vm1383_vm1, %v8827_v32 }
 0xa35   : > { %6405 = vmatpush3.xpose.msk.msra.mxu1 %vm1383_vm1, %v8827_v32  ;;  %v4187_v32 = vpop.permute.xlu0 %4186 }
 0xa36   : > { %6406 = vmatprep.subr.msk.mxu1 %vm1383_vm1, %v8831_v51 }
 0xa39   : > { %6407 = vmatpush3.xpose.msk.msra.mxu1 %vm1383_vm1, %v8831_v51 }
 0xa3a   : > { %6408 = vmatprep.subr.msk.mxu1 %vm1383_vm1, %v8835_v63 }
 0xa3d   : > { %6409 = vmatpush3.xpose.msk.msra.mxu1 %vm1383_vm1, %v8835_v63 }
 0xa3e   : > { %6410 = vmatprep.subr.msk.mxu1 %vm1383_vm1, %v8837_v59 }
 0xa3f   : > { %v8992_v35 = vpop.f32.mrf.mxu0 }
 0xa41   : > { %6411 = vmatpush3.xpose.msk.msra.mxu1 %vm1383_vm1, %v8837_v59  ;;  %v8996_v16 = vpop.f32.mrf.mxu0 }
 0xa42   : > { %6412 = vmatprep.subr.msk.mxu1 %vm1383_vm1, %v8845_v34 }
 0xa44   : > { %v9000_v40 = vpop.f32.mrf.mxu0 }
 0xa45   : > { %6413 = vmatpush3.xpose.msk.msra.mxu1 %vm1383_vm1, %v8845_v34  ;;  %v9020_v34 = vld [vmem:[%s9565_s10 + $0xc0] sm:$0xff] }
 0xa46   : > { %v9004_v51 = vpop.f32.mrf.mxu0  ;;  %6414 = vmatprep.subr.msk.mxu1 %vm1383_vm1, %v4187_v32 }
 0xa48   : > { %v9007_v63 = vpop.f32.mrf.mxu0 }
 0xa49   : > { %6415 = vmatpush3.xpose.msk.msra.mxu1 %vm1383_vm1, %v4187_v32 }
 0xa4a   : > { %v9010_v59 = vpop.f32.mrf.mxu0 }
 0xa4b   : > { %v3557_v0 = vpop.xlane.xlu0 %3556 }
 0xa4c   : > { %v6390_v8 = vpop.f32.mrf.mxu0  ;;  %6788 = vrcp.f32 %v3557_v0 }
 0xa4d   : > { %v9023_v48 = vadd.f32 %v6390_v8, %v9015_v47 }
 0xa4e   : > { %v4129_v50 = vpop.f32.mrf.mxu0 }
 0xa4f   : > { %v9026_v30 = vadd.f32 %v4129_v50, %v9020_v34  ;;  %v4344_v4 = vsel %vm1696_vm2, %v9023_v48, -inf  ;;  %v3554_v12 = vpop.xlane.xlu1 %3553  ;;  %v3560_v46 = vpop.xlane.xlu0 %3559 }
 0xa50   : > { %v6393_v43 = vpop.f32.mrf.mxu0  ;;  %4345 = vmax.xlane.f32.xlu1 %v4344_v4  ;;  %6790 = vrcp.f32 %v3554_v12 }
 0xa51   : > { %6792 = vrcp.f32 %v3560_v46  ;;  %v4341_v53 = vsel %vm1696_vm2, %v9026_v30, -inf  ;;  %v9051_v49 = vadd.f32 %v6393_v43, %v9040_v13  ;;  %v1366_v43 = vld [vmem:[%s9565_s10 + $0xf8] sm:$0xff] }
 0xa52   : > { %v4139_v45 = vpop.f32.mrf.mxu0  ;;  %4342 = vmax.xlane.f32.xlu0 %v4341_v53 }
 0xa53   : > { %v9048_v22 = vadd.f32 %v4139_v45, %v9033_v14  ;;  %v3563_v39 = vpop.xlane.xlu1 %3562  ;;  %v3566_v58 = vpop.xlane.xlu0 %3565  ;;  %v4350_v55 = vsel %vm1696_vm2, %v9051_v49, -inf  ;;  %v9101_v45 = vld [vmem:[%s9565_s10 + $0xf0] sm:$0xff] }
 0xa54   : > { %6794 = vrcp.f32 %v3563_v39  ;;  %v6396_v1 = vpop.f32.mrf.mxu0 }
 0xa55   : > { %v9054_v38 = vadd.f32 %v6396_v1, %v9045_v54  ;;  %6796 = vrcp.f32 %v3566_v58  ;;  %v4347_v9 = vsel %vm1696_vm2, %v9048_v22, -inf }
 0xa56   : > { %4348 = vmax.xlane.f32.xlu0 %v4347_v9  ;;  %v4149_v10 = vpop.f32.mrf.mxu0 }
 0xa57   : > { %v3569_v41 = vpop.xlane.xlu1 %3568  ;;  %v4356_v23 = vsel %vm1696_vm2, %v9054_v38, -inf  ;;  %v4010_v28 = vpop.permute.xlu0 %4009  ;;  %v9067_v31 = vadd.f32 %v4149_v10, %v9061_v24 }
 0xa58   : > { %6798 = vrcp.f32 %v3569_v41  ;;  %4357 = vmax.xlane.f32.xlu1 %v4356_v23  ;;  %6398 = vmatmul.mubr.msk.f32.gmra.mxu0 %vm1383_vm1, %v4010_v28 }
 0xa59   : > { %v6789_v20 = vpop.eup %6788  ;;  %v4353_v17 = vsel %vm1696_vm2, %v9067_v31, -inf }
 0xa5a   : > { %4351 = vmax.xlane.f32.xlu0 %v4350_v55  ;;  %v3597_v2 = vmul.f32 %v6789_v20, %v8919_v21 }
 0xa5b   : > { %v4185_v56 = vpop.permute.xlu1 %4184  ;;  %v4169_v8 = vpop.permute.xlu0 %4168 }
 0xa5c   : > { %6416 = vmatprep.subr.msk.mxu1 %vm1383_vm1, %v4185_v56 }
 0xa5d   : > { %v6791_v6 = vpop.eup %6790  ;;  %6417 = vmatpush3.xpose.msk.msra.mxu1 %vm1383_vm1, %v4185_v56 }
 0xa5e   : > { %v6793_v25 = vpop.eup %6792  ;;  %4354 = vmax.xlane.f32.xlu0 %v4353_v17  ;;  %v3596_v11 = vmul.f32 %v6791_v6, %v8921_v57 }
 0xa5f   : > { %v3598_v37 = vmul.f32 %v6793_v25, %v8925_v27  ;;  %v4171_v57 = vpop.permute.xlu1 %4170  ;;  %v4173_v27 = vpop.permute.xlu0 %4172 }
 0xa60   : > { %6361 = vmatprep.mubr.msk.f32.mxu1 %vm1696_vm2, %v3596_v11 }
 0xa61   : > { %v6795_v42 = vpop.eup %6794  ;;  %6362 = vmatmul.mubr.msk.f32.gmra.mxu1 %vm1696_vm2, %v3597_v2 }
 0xa62   : > { %v6797_v32 = vpop.eup %6796  ;;  %6364 = vmatprep.mubr.msk.f32.mxu1 %vm1696_vm2, %v3598_v37  ;;  %v3599_v0 = vmul.f32 %v6795_v42, %v8927_v52 }
 0xa63   : > { %v3600_v50 = vmul.f32 %v6797_v32, %v8933_v5  ;;  %v4175_v12 = vpop.permute.xlu1 %4174  ;;  %v4177_v52 = vpop.permute.xlu0 %4176 }
 0xa65   : > { %v6799_v4 = vpop.eup %6798  ;;  %6365 = vmatmul.mubr.msk.f32.gmra.mxu1 %vm1696_vm2, %v3599_v0 }
 0xa66   : > { %6367 = vmatprep.mubr.msk.f32.mxu1 %vm1696_vm2, %v3600_v50  ;;  %v3601_v21 = vmul.f32 %v6799_v4, %v8939_v62 }
 0xa67   : > { %v4179_v5 = vpop.permute.xlu1 %4178  ;;  %v4181_v46 = vpop.permute.xlu0 %4180 }
 0xa69   : > { %6368 = vmatmul.mubr.msk.f32.gmra.mxu1 %vm1696_vm2, %v3601_v21 }
 0xa6a   : > { %6418 = vmatprep.mubr.msk.f32.mxu1 %vm1383_vm1, %v4169_v8 }
 0xa6b   : > { %v4183_v62 = vpop.permute.xlu1 %4182 }
 0xa6d   : > { %6419 = vmatmul.mubr.msk.f32.vlgmr.msra.gmra.mxu1 %vm1383_vm1, %v4171_v57 }
 0xa6e   : > { %6421 = vmatprep.mubr.msk.f32.mxu1 %vm1383_vm1, %v4173_v27 }
 0xa71   : > { %6422 = vmatmul.mubr.msk.f32.gmra.mxu1 %vm1383_vm1, %v4175_v12 }
 0xa72   : > { %6424 = vmatprep.mubr.msk.f32.mxu1 %vm1383_vm1, %v4177_v52 }
 0xa75   : > { %6425 = vmatmul.mubr.msk.f32.gmra.mxu1 %vm1383_vm1, %v4179_v5 }
 0xa76   : > { %6427 = vmatprep.mubr.msk.f32.mxu1 %vm1383_vm1, %v4181_v46 }
 0xa79   : > { %6428 = vmatmul.mubr.msk.f32.gmra.mxu1 %vm1383_vm1, %v4183_v62 }
 0xadb   : > { %v4343_v0 = vpop.xlane.xlu0 %4342 }
 0xadc   : > { %v4389_v8 = vsub.f32 %v9026_v30, %v4343_v0 }
 0xade   : > { %v4405_v57 = vmul.f32 1.442695, %v4389_v8 }
 0xaec   : > { %v9105_v1 = vpop.f32.mrf.mxu1 }
 0xaee   : > { %v9114_v23 = vpop.f32.mrf.mxu1 }
 0xb18   : > { %v6399_v53 = vpop.f32.mrf.mxu0 }
 0xb19   : > { %v9103_v39 = vadd.f32 %v6399_v53, %v1366_v43 }
 0xb1a   : > { %v4159_v58 = vpop.f32.mrf.mxu0 }
 0xb1b   : > { %v9108_v9 = vadd.f32 %v4159_v58, %v9101_v45  ;;  %v4362_v10 = vsel %vm1696_vm2, %v9103_v39, -inf }
 0xb1c   : > { %4363 = vmax.xlane.f32.xlu1 %v4362_v10 }
 0xb1d   : > { %v4359_v41 = vsel %vm1696_vm2, %v9108_v9, -inf }
 0xb1e   : > { %4360 = vmax.xlane.f32.xlu0 %v4359_v41 }
 0xb21   : > { %v9116_v28 = vpop.f32.mrf.mxu1 }
 0xb23   : > { %v9118_v55 = vpop.f32.mrf.mxu1 }
 0xb25   : > { %v9120_v56 = vpop.f32.mrf.mxu1 }
 0xb27   : > { %v9122_v20 = vpop.f32.mrf.mxu1 }
 0xb29   : > { %v9124_v6 = vpop.f32.mrf.mxu1 }
 0xb2b   : > { %v9126_v17 = vpop.f32.mrf.mxu1 }
 0xb2d   : > { %4531 = vrot.lane.b32.xlu1 %v9673_v3, %s6906_s22  ;;  %v9130_v25 = vpop.f32.mrf.mxu1 }
 0xb2f   : > { %v4302_v11 = vpop.f32.mrf.mxu1 }
 0xb30   : > { %v9185_v10 = vadd.f32 %v4302_v11, %v9020_v34 }
 0xb31   : > { %4525 = vrot.lane.b32.xlu1 %v9679_v33, %s6906_s22  ;;  %v9134_v2 = vpop.f32.mrf.mxu1 }
 0xb32   : > { %v4365_v0 = vsel %vm1696_vm2, %v9185_v10, -inf }
 0xb33   : > { %v4312_v37 = vpop.f32.mrf.mxu1 }
 0xb34   : > { %4533 = vrot.lane.b32.xlu0 %v9675_v36, %s6906_s22  ;;  %v4349_v36 = vpop.xlane.xlu0 %4348 }
 0xb35   : > { %4521 = vrot.lane.b32.xlu1 %v9678_v29, %s6906_s22  ;;  %v9140_v42 = vpop.f32.mrf.mxu1 }
 0xb37   : > { %v4322_v32 = vpop.f32.mrf.mxu1 }
 0xb38   : > { %4529 = vrot.lane.b32.xlu0 %v9674_v61, %s6906_s22  ;;  %v4346_v61 = vpop.xlane.xlu1 %4345 }
 0xb39   : > { %4517 = vrot.lane.b32.xlu1 %v9680_v18, %s6906_s22  ;;  %v6429_v3 = vpop.f32.mrf.mxu1  ;;  %v4390_v29 = vsub.f32 %v9023_v48, %v4346_v61  ;;  %v4352_v18 = vpop.xlane.xlu0 %4351 }
 0xb3a   : > { %v9146_v33 = vadd.f32 %v6429_v3, %v1366_v43  ;;  %v9190_v3 = vadd.f32 %v4312_v37, %v9033_v14  ;;  %v9738_v37 = vld [vmem:[#allocation37_spill] sm:$0xff] }
 0xb3b   : > { %v4407_v50 = vmul.f32 1.442695, %v4390_v29  ;;  %v4332_v29 = vpop.f32.mrf.mxu1 }
 0xb3c   : > { %4527 = vrot.lane.b32.xlu0 %v9677_v19, %s6906_s22  ;;  %v4392_v19 = vsub.f32 %v9051_v49, %v4352_v18  ;;  %v4358_v4 = vpop.xlane.xlu1 %4357  ;;  %v4371_v61 = vsel %vm1696_vm2, %v9190_v3, -inf  ;;  %v9200_v34 = vadd.f32 %v4332_v29, %v9101_v45 }
 0xb3d   : > { %4689 = vrot.lane.b32.xlu1 %v7752_v60, %s6906_s22  ;;  %v4391_v60 = vsub.f32 %v9048_v22, %v4349_v36  ;;  %v4355_v21 = vpop.xlane.xlu0 %4354  ;;  %6800 = vpow2.f32 %v4407_v50  ;;  %v9195_v36 = vadd.f32 %v4322_v32, %v9061_v24  ;;  %v9739_v24 = vld [vmem:[#allocation25_spill] sm:$0xff]  ;;  %v9740_v32 = vld [vmem:[#allocation22_spill] sm:$0xff] }
 0xb3e   : > { %v4411_v27 = vmul.f32 1.442695, %v4392_v19  ;;  %6802 = vpow2.f32 %v4405_v57  ;;  %v4393_v12 = vsub.f32 %v9067_v31, %v4355_v21  ;;  %v4383_v14 = vsel %vm1696_vm2, %v9200_v34, -inf }
 0xb3f   : > { %v4377_v11 = vsel %vm1696_vm2, %v9195_v36, -inf }
 0xb40   : > { %4523 = vrot.lane.b32.xlu0 %v9676_v26, %s6906_s22  ;;  %v4394_v26 = vsub.f32 %v9054_v38, %v4358_v4  ;;  %6804 = vpow2.f32 %v4411_v27  ;;  %v4413_v30 = vmul.f32 1.442695, %v4393_v12 }
 0xb42   : > { %v4415_v48 = vmul.f32 1.442695, %v4394_v26 }
 0xb44   : > { %4519 = vrot.lane.b32.xlu0 %v9681_v7, %s6906_s22  ;;  %v4409_v7 = vmul.f32 1.442695, %v4391_v60 }
 0xb46   : > { %6806 = vpow2.f32 %v4409_v7 }
 0xb47   : > { %6808 = vpow2.f32 %v4415_v48 }
 0xb48   : > { %6810 = vpow2.f32 %v4413_v30 }
 0xb4a   : > { %v9162_v49 = vpop.eup %6800 }
 0xb4b   : > { %v9164_v52 = vpop.eup %6802  ;;  %v4440_v22 = vsel %vm1696_vm2, %v9162_v49, 0.0 }
 0xb4c   : > { %v4437_v38 = vsel %vm1696_vm2, %v9164_v52, 0.0 }
 0xb4d   : > { %v9168_v5 = vpop.eup %6804 }
 0xb4e   : > { %v4446_v46 = vsel %vm1696_vm2, %v9168_v5, 0.0 }
 0xb53   : > { %v9172_v31 = vpop.eup %6806 }
 0xb54   : > { %v9176_v62 = vpop.eup %6808  ;;  %v4443_v43 = vsel %vm1696_vm2, %v9172_v31, 0.0 }
 0xb55   : > { %v9180_v53 = vpop.eup %6810  ;;  %v4452_v58 = vsel %vm1696_vm2, %v9176_v62, 0.0 }
 0xb56   : > { %v4449_v41 = vsel %vm1696_vm2, %v9180_v53, 0.0 }
 0xb61   : > { %4441 = vadd.xlane.f32.xlu1 %v4440_v22 }
 0xb63   : > { %4438 = vadd.xlane.f32.xlu0 %v4437_v38 }
 0xb65   : > { %4447 = vadd.xlane.f32.xlu1 %v4446_v46  ;;  %v9222_v46 = vadd.f32 %v9130_v25, %v9015_v47  ;;  %v9234_v47 = vadd.f32 %v9140_v42, %v9045_v54  ;;  %v9743_v54 = vld [vmem:[#allocation19_spill] sm:$0xff] }
 0xb67   : > { %4444 = vadd.xlane.f32.xlu0 %v4443_v43 }
 0xb69   : > { %4453 = vadd.xlane.f32.xlu1 %v4452_v58  ;;  %v9228_v58 = vadd.f32 %v9134_v2, %v9040_v13  ;;  %v4386_v13 = vsel %vm1696_vm2, %v9146_v33, -inf  ;;  %v9741_v2 = vld [vmem:[#allocation23_spill] sm:$0xff] }
 0xb6b   : > { %4450 = vadd.xlane.f32.xlu0 %v4449_v41  ;;  %v4368_v41 = vsel %vm1696_vm2, %v9222_v46, -inf  ;;  %v4374_v25 = vsel %vm1696_vm2, %v9228_v58, -inf }
 0xb6f   : > { %4366 = vmax.xlane.f32.xlu0 %v4365_v0  ;;  %v4380_v0 = vsel %vm1696_vm2, %v9234_v47, -inf }
 0xb73   : > { %4372 = vmax.xlane.f32.xlu0 %v4371_v61  ;;  %v9742_v61 = vld [vmem:[#allocation21_spill] sm:$0xff] }
 0xb77   : > { %4378 = vmax.xlane.f32.xlu0 %v4377_v11 }
 0xb7b   : > { %4384 = vmax.xlane.f32.xlu0 %v4383_v14 }
 0xb91   : > { %4687 = vrot.lane.b32.xlu0 %v9738_v37, %s6906_s22 }
 0xb95   : > { %4683 = vrot.lane.b32.xlu0 %v9739_v24, %s6906_s22 }
 0xb99   : > { %4679 = vrot.lane.b32.xlu0 %v9740_v32, %s6906_s22 }
 0xba5   : > { %v4364_v18 = vpop.xlane.xlu1 %4363 }
 0xba6   : > { %v4396_v45 = vsub.f32 %v9103_v39, %v4364_v18 }
 0xba7   : > { %v4361_v8 = vpop.xlane.xlu0 %4360 }
 0xba8   : > { %v4419_v50 = vmul.f32 1.442695, %v4396_v45  ;;  %v4395_v19 = vsub.f32 %v9108_v9, %v4361_v8 }
 0xba9   : > { %v4532_v4 = vpop.permute.xlu1 %4531 }
 0xbaa   : > { %6812 = vpow2.f32 %v4419_v50  ;;  %v4417_v57 = vmul.f32 1.442695, %v4395_v19 }
 0xbab   : > { %v4534_v60 = vpop.permute.xlu0 %4533 }
 0xbac   : > { %6814 = vpow2.f32 %v4417_v57  ;;  %6430 = vmatprep.subr.mxu0 %v4534_v60 }
 0xbad   : > { %v4526_v21 = vpop.permute.xlu1 %4525  ;;  %6431 = vmatpush3.msra.mxu0 %v4534_v60 }
 0xbae   : > { %6432 = vmatprep.subr.mxu0 %v4532_v4 }
 0xbaf   : > { %6433 = vmatpush3.msra.mxu0 %v4532_v4  ;;  %v4530_v26 = vpop.permute.xlu0 %4529 }
 0xbb0   : > { %6434 = vmatprep.subr.mxu0 %v4530_v26 }
 0xbb1   : > { %v4522_v27 = vpop.permute.xlu1 %4521  ;;  %6435 = vmatpush3.msra.mxu0 %v4530_v26 }
 0xbb3   : > { %v4528_v7 = vpop.permute.xlu0 %4527 }
 0xbb4   : > { %6436 = vmatprep.subr.mxu0 %v4528_v7 }
 0xbb5   : > { %v4518_v39 = vpop.permute.xlu1 %4517  ;;  %6437 = vmatpush3.msra.mxu0 %v4528_v7 }
 0xbb6   : > { %6438 = vmatprep.subr.mxu0 %v4526_v21 }
 0xbb7   : > { %v9214_v9 = vpop.eup %6812  ;;  %6439 = vmatpush3.msra.mxu0 %v4526_v21  ;;  %v4524_v12 = vpop.permute.xlu0 %4523 }
 0xbb8   : > { %6440 = vmatprep.subr.mxu0 %v4524_v12  ;;  %v4458_v48 = vsel %vm1696_vm2, %v9214_v9, 0.0 }
 0xbb9   : > { %v9218_v30 = vpop.eup %6814  ;;  %v4690_v22 = vpop.permute.xlu1 %4689  ;;  %4459 = vadd.xlane.f32.xlu1 %v4458_v48  ;;  %6441 = vmatpush3.msra.mxu0 %v4524_v12 }
 0xbba   : > { %6442 = vmatprep.subr.mxu0 %v4522_v27  ;;  %6460 = vmatprep.subr.mxu1 %v4690_v22  ;;  %v4455_v43 = vsel %vm1696_vm2, %v9218_v30, 0.0 }
 0xbbb   : > { %6443 = vmatpush3.msra.mxu0 %v4522_v27  ;;  %6461 = vmatpush3.msra.mxu1 %v4690_v22  ;;  %v4520_v38 = vpop.permute.xlu0 %4519 }
 0xbbc   : > { %6444 = vmatprep.subr.mxu0 %v4520_v38 }
 0xbbd   : > { %4456 = vadd.xlane.f32.xlu1 %v4455_v43  ;;  %6445 = vmatpush3.msra.mxu0 %v4520_v38 }
 0xbbe   : > { %6446 = vmatprep.subr.mxu0 %v4518_v39 }
 0xbbf   : > { %6447 = vmatpush3.msra.mxu0 %v4518_v39 }
 0xbc1   : > { %4369 = vmax.xlane.f32.xlu1 %v4368_v41 }
 0xbc5   : > { %4375 = vmax.xlane.f32.xlu1 %v4374_v25 }
 0xbc9   : > { %4381 = vmax.xlane.f32.xlu1 %v4380_v0 }
 0xbcd   : > { %4387 = vmax.xlane.f32.xlu1 %v4386_v13 }
 0xbde   : > { %4685 = vrot.lane.b32.xlu1 %v9741_v2, %s6906_s22 }
 0xbe2   : > { %4681 = vrot.lane.b32.xlu1 %v9742_v61, %s6906_s22 }
 0xbe6   : > { %4677 = vrot.lane.b32.xlu1 %v9743_v54, %s6906_s22 }
 0xbea   : > { %v4442_v42 = vpop.xlane.xlu1 %4441 }
 0xbeb   : > { %6816 = vrcp.f32 %v4442_v42 }
 0xbec   : > { %v4439_v29 = vpop.xlane.xlu0 %4438 }
 0xbed   : > { %6818 = vrcp.f32 %v4439_v29 }
 0xbee   : > { %v4448_v11 = vpop.xlane.xlu1 %4447 }
 0xbef   : > { %6820 = vrcp.f32 %v4448_v11 }
 0xbf0   : > { %v4445_v14 = vpop.xlane.xlu0 %4444 }
 0xbf1   : > { %6822 = vrcp.f32 %v4445_v14 }
 0xbf2   : > { %v4454_v37 = vpop.xlane.xlu1 %4453 }
 0xbf3   : > { %6824 = vrcp.f32 %v4454_v37 }
 0xbf4   : > { %v4451_v24 = vpop.xlane.xlu0 %4450 }
 0xbf5   : > { %6826 = vrcp.f32 %v4451_v24 }
 0xbf8   : > { %v4367_v32 = vpop.xlane.xlu0 %4366  ;;  %v6817_v18 = vpop.eup %6816 }
 0xbf9   : > { %v4397_v45 = vsub.f32 %v9185_v10, %v4367_v32  ;;  %v4502_v4 = vmul.f32 %v6817_v18, %v9162_v49 }
 0xbfa   : > { %v6819_v8 = vpop.eup %6818 }
 0xbfb   : > { %v4421_v50 = vmul.f32 1.442695, %v4397_v45  ;;  %v4501_v19 = vmul.f32 %v6819_v8, %v9164_v52 }
 0xbfc   : > { %v4373_v57 = vpop.xlane.xlu0 %4372  ;;  %v6821_v60 = vpop.eup %6820 }
 0xbfd   : > { %6828 = vpow2.f32 %v4421_v50  ;;  %v4399_v21 = vsub.f32 %v9190_v3, %v4373_v57  ;;  %6448 = vmatprep.mubr.msk.f32.mxu0 %vm1696_vm2, %v4501_v19  ;;  %v4504_v39 = vmul.f32 %v6821_v60, %v9168_v5 }
 0xbfe   : > { %v6823_v26 = vpop.eup %6822  ;;  %6449 = vmatmul.mubr.msk.f32.vlgmr.msra.gmra.mxu0 %vm1696_vm2, %v4502_v4 }
 0xbff   : > { %v4425_v27 = vmul.f32 1.442695, %v4399_v21  ;;  %v4503_v7 = vmul.f32 %v6823_v26, %v9172_v31 }
 0xc00   : > { %v4379_v10 = vpop.xlane.xlu0 %4378  ;;  %v6825_v12 = vpop.eup %6824 }
 0xc01   : > { %6830 = vpow2.f32 %v4425_v27  ;;  %v4401_v49 = vsub.f32 %v9195_v36, %v4379_v10  ;;  %6451 = vmatprep.mubr.msk.f32.mxu0 %vm1696_vm2, %v4503_v7  ;;  %v4506_v38 = vmul.f32 %v6825_v12, %v9176_v62 }
 0xc02   : > { %v6827_v52 = vpop.eup %6826  ;;  %6452 = vmatmul.mubr.msk.f32.gmra.mxu0 %vm1696_vm2, %v4504_v39 }
 0xc03   : > { %v4429_v3 = vmul.f32 1.442695, %v4401_v49  ;;  %v4505_v48 = vmul.f32 %v6827_v52, %v9180_v53  ;;  %v9744_v49 = vld [vmem:[#allocation18_spill] sm:$0xff]  ;;  %v9745_v52 = vld [vmem:[#allocation29_spill] sm:$0xff] }
 0xc04   : > { %v4385_v22 = vpop.xlane.xlu0 %4384 }
 0xc05   : > { %6832 = vpow2.f32 %v4429_v3  ;;  %6454 = vmatprep.mubr.msk.f32.mxu0 %vm1696_vm2, %v4505_v48  ;;  %v4403_v29 = vsub.f32 %v9200_v34, %v4385_v22  ;;  %v9746_v3 = vld [vmem:[#allocation20_spill] sm:$0xff]  ;;  %v9747_v48 = vld [vmem:[#allocation30_spill] sm:$0xff] }
 0xc06   : > { %6455 = vmatmul.mubr.msk.f32.gmra.mxu0 %vm1696_vm2, %v4506_v38 }
 0xc07   : > { %v4433_v18 = vmul.f32 1.442695, %v4403_v29  ;;  %v9753_v29 = vld [vmem:[#allocation36_spill] sm:$0xff] }
 0xc08   : > { %v4688_v5 = vpop.permute.xlu0 %4687 }
 0xc09   : > { %6462 = vmatprep.subr.mxu1 %v4688_v5 }
 0xc0a   : > { %v9263_v31 = vpop.eup %6828  ;;  %6463 = vmatpush3.msra.mxu1 %v4688_v5 }
 0xc0b   : > { %v4461_v36 = vsel %vm1696_vm2, %v9263_v31, 0.0 }
 0xc0c   : > { %4462 = vadd.xlane.f32.xlu1 %v4461_v36  ;;  %v4929_v36 = vld [vmem:[%s9566_s11 + $0x18] sm:$0xff] }
 0xc0d   : > { %6490 = vmatprep.subr.mxu0 %v4929_v36 }
 0xc0e   : > { %v9267_v43 = vpop.eup %6830  ;;  %6491 = vmatpush3.msra.mxu0 %v4929_v36 }
 0xc0f   : > { %v4467_v53 = vsel %vm1696_vm2, %v9267_v43, 0.0 }
 0xc10   : > { %4468 = vadd.xlane.f32.xlu1 %v4467_v53 }
 0xc12   : > { %v9271_v62 = vpop.eup %6832 }
 0xc13   : > { %v4473_v41 = vsel %vm1696_vm2, %v9271_v62, 0.0 }
 0xc14   : > { %4474 = vadd.xlane.f32.xlu1 %v4473_v41 }
 0xc42   : > { %v4460_v25 = vpop.xlane.xlu1 %4459 }
 0xc43   : > { %6834 = vrcp.f32 %v4460_v25  ;;  %v9748_v25 = vld [vmem:[#allocation24_spill] sm:$0xff] }
 0xc46   : > { %v4457_v0 = vpop.xlane.xlu1 %4456 }
 0xc47   : > { %6836 = vrcp.f32 %v4457_v0  ;;  %v9749_v0 = vld [vmem:[#allocation33_spill] sm:$0xff] }
 0xc4a   : > { %v4370_v13 = vpop.xlane.xlu1 %4369 }
 0xc4b   : > { %v4398_v2 = vsub.f32 %v9222_v46, %v4370_v13 }
 0xc4d   : > { %v4423_v61 = vmul.f32 1.442695, %v4398_v2 }
 0xc4e   : > { %v4376_v54 = vpop.xlane.xlu1 %4375 }
 0xc4f   : > { %6838 = vpow2.f32 %v4423_v61  ;;  %v4400_v42 = vsub.f32 %v9228_v58, %v4376_v54  ;;  %v4684_v58 = vpop.permute.xlu0 %4683  ;;  %v9750_v61 = vld [vmem:[#allocation31_spill] sm:$0xff]  ;;  %v9751_v54 = vld [vmem:[#allocation34_spill] sm:$0xff] }
 0xc50   : > { %v6835_v37 = vpop.eup %6834 }
 0xc51   : > { %v4427_v11 = vmul.f32 1.442695, %v4400_v42  ;;  %v4508_v46 = vmul.f32 %v6835_v37, %v9214_v9 }
 0xc52   : > { %v4382_v14 = vpop.xlane.xlu1 %4381 }
 0xc53   : > { %6840 = vpow2.f32 %v4427_v11  ;;  %v4402_v24 = vsub.f32 %v9234_v47, %v4382_v14  ;;  %v4680_v57 = vpop.permute.xlu0 %4679 }
 0xc54   : > { %v6837_v32 = vpop.eup %6836 }
 0xc55   : > { %v4431_v45 = vmul.f32 1.442695, %v4402_v24  ;;  %v4507_v8 = vmul.f32 %v6837_v32, %v9218_v30 }
 0xc56   : > { %v4388_v50 = vpop.xlane.xlu1 %4387 }
 0xc57   : > { %6842 = vpow2.f32 %v4431_v45  ;;  %v4404_v19 = vsub.f32 %v9146_v33, %v4388_v50  ;;  %6457 = vmatprep.mubr.msk.f32.mxu0 %vm1696_vm2, %v4507_v8 }
 0xc58   : > { %6458 = vmatmul.mubr.msk.f32.gmra.mxu0 %vm1696_vm2, %v4508_v46  ;;  %6844 = vpow2.f32 %v4433_v18 }
 0xc59   : > { %v4435_v34 = vmul.f32 1.442695, %v4404_v19 }
 0xc5a   : > { %v4686_v4 = vpop.permute.xlu1 %4685 }
 0xc5b   : > { %6846 = vpow2.f32 %v4435_v34  ;;  %6464 = vmatprep.subr.mxu1 %v4686_v4 }
 0xc5c   : > { %v9284_v47 = vpop.eup %6838  ;;  %6465 = vmatpush3.msra.mxu1 %v4686_v4 }
 0xc5d   : > { %6466 = vmatprep.subr.mxu1 %v4684_v58  ;;  %v4464_v9 = vsel %vm1696_vm2, %v9284_v47, 0.0 }
 0xc5e   : > { %4465 = vadd.xlane.f32.xlu0 %v4464_v9  ;;  %v4682_v30 = vpop.permute.xlu1 %4681  ;;  %6467 = vmatpush3.msra.mxu1 %v4684_v58 }
 0xc5f   : > { %6468 = vmatprep.subr.mxu1 %v4682_v30 }
 0xc60   : > { %v9288_v33 = vpop.eup %6840  ;;  %6469 = vmatpush3.msra.mxu1 %v4682_v30 }
 0xc61   : > { %6470 = vmatprep.subr.mxu1 %v4680_v57  ;;  %v4470_v60 = vsel %vm1696_vm2, %v9288_v33, 0.0 }
 0xc62   : > { %4471 = vadd.xlane.f32.xlu0 %v4470_v60  ;;  %v4678_v21 = vpop.permute.xlu1 %4677  ;;  %6471 = vmatpush3.msra.mxu1 %v4680_v57 }
 0xc63   : > { %6472 = vmatprep.subr.mxu1 %v4678_v21 }
 0xc64   : > { %v9292_v26 = vpop.eup %6842  ;;  %6473 = vmatpush3.msra.mxu1 %v4678_v21 }
 0xc65   : > { %v4476_v27 = vsel %vm1696_vm2, %v9292_v26, 0.0  ;;  %v9296_v7 = vpop.eup %6844 }
 0xc66   : > { %4477 = vadd.xlane.f32.xlu0 %v4476_v27  ;;  %v4479_v12 = vsel %vm1696_vm2, %v9296_v7, 0.0 }
 0xc68   : > { %v9298_v10 = vpop.eup %6846 }
 0xc69   : > { %v4482_v39 = vsel %vm1696_vm2, %v9298_v10, 0.0 }
 0xc6a   : > { %4483 = vadd.xlane.f32.xlu1 %v4482_v39  ;;  %4480 = vadd.xlane.f32.xlu0 %v4479_v12  ;;  %v9754_v12 = vld [vmem:[#allocation35_spill] sm:$0xff] }
 0xc7b   : > { %4673 = vrot.lane.b32.xlu1 %v9744_v49, %s6906_s22  ;;  %v9758_v49 = vld [vmem:[#allocation9_spill] sm:$0xff] }
 0xc7f   : > { %3017 = vrot.lane.b32.xlu1 %v9745_v52, %s6907_s18 }
 0xc80   : > { %4675 = vrot.lane.b32.xlu0 %v9746_v3, %s6906_s22  ;;  %v9761_v3 = vld [vmem:[#allocation7_spill] sm:$0xff] }
 0xc83   : > { %3932 = vrot.lane.b32.xlu1 %v8980_v44, %s6908_s21  ;;  %v4928_v44 = vld [vmem:[%s9566_s11 + $0x10] sm:$0xff] }
 0xc84   : > { %3015 = vrot.lane.b32.xlu0 %v9747_v48, %s6907_s18  ;;  %6492 = vmatprep.subr.mxu0 %v4928_v44 }
 0xc85   : > { %6493 = vmatpush3.msra.mxu0 %v4928_v44 }
 0xc88   : > { %3930 = vrot.lane.b32.xlu0 %v8986_v15, %s6908_s21  ;;  %v4927_v15 = vld [vmem:[%s9566_s11 + $0x8] sm:$0xff] }
 0xc89   : > { %6494 = vmatprep.subr.mxu0 %v4927_v15 }
 0xc8a   : > { %6495 = vmatpush3.msra.mxu0 %v4927_v15 }
 0xc95   : > { %v4463_v22 = vpop.xlane.xlu1 %4462 }
 0xc96   : > { %6848 = vrcp.f32 %v4463_v22 }
 0xca3   : > { %v6849_v38 = vpop.eup %6848 }
 0xca4   : > { %v4509_v5 = vmul.f32 %v6849_v38, %v9263_v31  ;;  %v4926_v31 = vld [vmem:[%s9566_s11] sm:$0xff] }
 0xca5   : > { %6496 = vmatprep.subr.mxu0 %v4926_v31 }
 0xca6   : > { %6478 = vmatprep.mubr.msk.f32.mxu1 %vm1696_vm2, %v4509_v5  ;;  %6497 = vmatpush3.msra.mxu0 %v4926_v31 }
 0xcbe   : > { %v6450_v53 = vpop.f32.mrf.mxu0 }
 0xcbf   : > { %4847 = vrot.lane.b32.xlu1 %v6450_v53, %s6909_s25 }
 0xcc0   : > { %v4634_v41 = vpop.f32.mrf.mxu0 }
 0xcc1   : > { %4845 = vrot.lane.b32.xlu0 %v4634_v41, %s6909_s25 }
 0xcc2   : > { %v6453_v13 = vpop.f32.mrf.mxu0 }
 0xcc3   : > { %3021 = vrot.lane.b32.xlu1 %v9748_v25, %s6907_s18 }
 0xcc4   : > { %v4644_v2 = vpop.f32.mrf.mxu0 }
 0xcc5   : > { %3019 = vrot.lane.b32.xlu0 %v9749_v0, %s6907_s18 }
 0xcc6   : > { %v6456_v42 = vpop.f32.mrf.mxu0 }
 0xcc7   : > { %3936 = vrot.lane.b32.xlu1 %v8992_v35, %s6908_s21 }
 0xcc8   : > { %v4654_v35 = vpop.f32.mrf.mxu0 }
 0xcc9   : > { %3934 = vrot.lane.b32.xlu0 %v8996_v16, %s6908_s21  ;;  %v9752_v16 = vld [vmem:[#allocation32_spill] sm:$0xff] }
 0xccb   : > { %4851 = vrot.lane.b32.xlu1 %v6453_v13, %s6909_s25 }
 0xccd   : > { %4849 = vrot.lane.b32.xlu0 %v4644_v2, %s6909_s25 }
 0xccf   : > { %3025 = vrot.lane.b32.xlu1 %v9750_v61, %s6907_s18 }
 0xcd1   : > { %3023 = vrot.lane.b32.xlu0 %v9751_v54, %s6907_s18 }
 0xcd3   : > { %3940 = vrot.lane.b32.xlu1 %v9000_v40, %s6908_s21  ;;  %v4469_v40 = vpop.xlane.xlu1 %4468 }
 0xcd5   : > { %3938 = vrot.lane.b32.xlu0 %v9004_v51, %s6908_s21 }
 0xcd7   : > { %4855 = vrot.lane.b32.xlu1 %v6456_v42, %s6909_s25  ;;  %v4475_v14 = vpop.xlane.xlu1 %4474 }
 0xcd9   : > { %4853 = vrot.lane.b32.xlu0 %v4654_v35, %s6909_s25 }
 0xcdb   : > { %3029 = vrot.lane.b32.xlu1 %v9752_v16, %s6907_s18 }
 0xcdd   : > { %3027 = vrot.lane.b32.xlu0 %v9753_v29, %s6907_s18 }
 0xcdf   : > { %3944 = vrot.lane.b32.xlu1 %v9007_v63, %s6908_s21 }
 0xce1   : > { %3942 = vrot.lane.b32.xlu0 %v9010_v59, %s6908_s21 }
 0xce7   : > { %v4466_v11 = vpop.xlane.xlu0 %4465 }
 0xce8   : > { %6850 = vrcp.f32 %v4466_v11 }
 0xce9   : > { %6852 = vrcp.f32 %v4469_v40 }
 0xceb   : > { %v4472_v51 = vpop.xlane.xlu0 %4471 }
 0xcec   : > { %6854 = vrcp.f32 %v4472_v51 }
 0xced   : > { %6856 = vrcp.f32 %v4475_v14 }
 0xcef   : > { %v4478_v37 = vpop.xlane.xlu0 %4477 }
 0xcf0   : > { %6858 = vrcp.f32 %v4478_v37 }
 0xcf3   : > { %v4484_v24 = vpop.xlane.xlu1 %4483  ;;  %v4481_v32 = vpop.xlane.xlu0 %4480 }
 0xcf4   : > { %6860 = vrcp.f32 %v4481_v32 }
 0xcf5   : > { %6862 = vrcp.f32 %v4484_v24  ;;  %v6851_v18 = vpop.eup %6850 }
 0xcf6   : > { %v6853_v8 = vpop.eup %6852  ;;  %v4510_v59 = vmul.f32 %v6851_v18, %v9284_v47 }
 0xcf7   : > { %v4674_v45 = vpop.permute.xlu1 %4673  ;;  %v4676_v63 = vpop.permute.xlu0 %4675  ;;  %v4511_v34 = vmul.f32 %v6853_v8, %v9267_v43 }
 0xcf8   : > { %6474 = vmatprep.subr.mxu1 %v4676_v63 }
 0xcf9   : > { %6475 = vmatpush3.msra.mxu1 %v4676_v63  ;;  %v6855_v50 = vpop.eup %6854 }
 0xcfa   : > { %6476 = vmatprep.subr.mxu1 %v4674_v45  ;;  %v6857_v58 = vpop.eup %6856  ;;  %v4512_v4 = vmul.f32 %v6855_v50, %v9288_v33 }
 0xcfb   : > { %v3018_v46 = vpop.permute.xlu1 %3017  ;;  %6477 = vmatpush3.msra.mxu1 %v4674_v45  ;;  %v3016_v19 = vpop.permute.xlu0 %3015  ;;  %v4513_v57 = vmul.f32 %v6857_v58, %v9271_v62 }
 0xcfc   : > { %3065 = vst.msk [vmem:[#allocation2 + $0x8] sm:$0xff] %vm3063_vm3, %v3018_v46  ;;  %3064 = vst.msk [vmem:[#allocation2] sm:$0xff] %vm3063_vm3, %v3016_v19  ;;  %6479 = vmatmul.mubr.msk.f32.vlgmr.msra.gmra.mxu1 %vm1696_vm2, %v4510_v59 }
 0xcfd   : > { %6481 = vmatprep.mubr.msk.f32.mxu1 %vm1696_vm2, %v4511_v34  ;;  %v6859_v47 = vpop.eup %6858 }
 0xcfe   : > { %v4514_v60 = vmul.f32 %v6859_v47, %v9292_v26  ;;  %v9755_v26 = vld [vmem:[#allocation12_spill] sm:$0xff] }
 0xcff   : > { %v3933_v9 = vpop.permute.xlu1 %3932  ;;  %v3931_v30 = vpop.permute.xlu0 %3930 }
 0xd00   : > { %3980 = vst.msk [vmem:[#allocation2 + $0x8] sm:$0xff] %vm3978_vm4, %v3933_v9  ;;  %3979 = vst.msk [vmem:[#allocation2] sm:$0xff] %vm3978_vm4, %v3931_v30  ;;  %6482 = vmatmul.mubr.msk.f32.gmra.mxu1 %vm1696_vm2, %v4512_v4 }
 0xd01   : > { %6484 = vmatprep.mubr.msk.f32.mxu1 %vm1696_vm2, %v4513_v57  ;;  %v6861_v43 = vpop.eup %6860 }
 0xd02   : > { %v6863_v21 = vpop.eup %6862  ;;  %v4515_v27 = vmul.f32 %v6861_v43, %v9296_v7  ;;  %v9756_v7 = vld [vmem:[#allocation28_spill] sm:$0xff] }
 0xd03   : > { %v4516_v62 = vmul.f32 %v6863_v21, %v9298_v10  ;;  %v9757_v10 = vld [vmem:[#allocation26_spill] sm:$0xff] }
 0xd04   : > { %6485 = vmatmul.mubr.msk.f32.gmra.mxu1 %vm1696_vm2, %v4514_v60 }
 0xd05   : > { %6487 = vmatprep.mubr.msk.f32.mxu1 %vm1696_vm2, %v4515_v27  ;;  %v9467_v27 = vld [vmem:[%s9567_s12] ss:$0 sm:$0xff] }
 0xd08   : > { %6488 = vmatmul.mubr.msk.f32.gmra.mxu1 %vm1696_vm2, %v4516_v62 }
 0xd18   : > { %v6459_v33 = vpop.f32.mrf.mxu0 }
 0xd19   : > { %4859 = vrot.lane.b32.xlu1 %v6459_v33, %s6909_s25 }
 0xd1a   : > { %v4664_v39 = vpop.f32.mrf.mxu0 }
 0xd1b   : > { %4857 = vrot.lane.b32.xlu0 %v4664_v39, %s6909_s25 }
 0xd1d   : > { %3033 = vrot.lane.b32.xlu1 %v9754_v12, %s6907_s18 }
 0xd1f   : > { %3031 = vrot.lane.b32.xlu0 %v9755_v26, %s6907_s18 }
 0xd21   : > { %3948 = vrot.lane.b32.xlu1 %v9105_v1, %s6908_s21  ;;  %v9759_v1 = vld [vmem:[#allocation11_spill] sm:$0xff] }
 0xd23   : > { %3946 = vrot.lane.b32.xlu0 %v9114_v23, %s6908_s21 }
 0xd25   : > { %3037 = vrot.lane.b32.xlu1 %v9756_v7, %s6907_s18 }
 0xd27   : > { %3035 = vrot.lane.b32.xlu0 %v9757_v10, %s6907_s18 }
 0xd29   : > { %3952 = vrot.lane.b32.xlu1 %v9116_v28, %s6908_s21 }
 0xd2b   : > { %3950 = vrot.lane.b32.xlu0 %v9118_v55, %s6908_s21  ;;  %v9760_v55 = vld [vmem:[#allocation10_spill] sm:$0xff] }
 0xd2d   : > { %3041 = vrot.lane.b32.xlu1 %v9758_v49, %s6907_s18 }
 0xd2f   : > { %3039 = vrot.lane.b32.xlu0 %v9759_v1, %s6907_s18 }
 0xd31   : > { %3956 = vrot.lane.b32.xlu1 %v9120_v56, %s6908_s21  ;;  %v4848_v23 = vpop.permute.xlu1 %4847 }
 0xd32   : > { %4895 = vst.msk [vmem:[#allocation2 + $0x8] sm:$0xff] %vm4893_vm5, %v4848_v23 }
 0xd33   : > { %3954 = vrot.lane.b32.xlu0 %v9122_v20, %s6908_s21  ;;  %v4846_v28 = vpop.permute.xlu0 %4845 }
 0xd34   : > { %4894 = vst.msk [vmem:[#allocation2] sm:$0xff] %vm4893_vm5, %v4846_v28 }
 0xd35   : > { %3045 = vrot.lane.b32.xlu1 %v9760_v55, %s6907_s18  ;;  %v3022_v52 = vpop.permute.xlu1 %3021 }
 0xd36   : > { %3067 = vst.msk [vmem:[#allocation2 + $0x18] sm:$0xff] %vm3063_vm3, %v3022_v52 }
 0xd37   : > { %3043 = vrot.lane.b32.xlu0 %v9761_v3, %s6907_s18  ;;  %v3020_v48 = vpop.permute.xlu0 %3019 }
 0xd38   : > { %3066 = vst.msk [vmem:[#allocation2 + $0x10] sm:$0xff] %vm3063_vm3, %v3020_v48 }
 0xd39   : > { %3960 = vrot.lane.b32.xlu1 %v9124_v6, %s6908_s21  ;;  %v3937_v56 = vpop.permute.xlu1 %3936  ;;  %v4911_v38 = vld [vmem:[#allocation2 + $0x8] sm:$0xff] }
 0xd3a   : > { %3982 = vst.msk [vmem:[#allocation2 + $0x18] sm:$0xff] %vm3978_vm4, %v3937_v56 }
 0xd3b   : > { %3958 = vrot.lane.b32.xlu0 %v9126_v17, %s6908_s21  ;;  %v3935_v20 = vpop.permute.xlu0 %3934  ;;  %v4910_v22 = vld [vmem:[#allocation2] sm:$0xff] }
 0xd3c   : > { %3981 = vst.msk [vmem:[#allocation2 + $0x10] sm:$0xff] %vm3978_vm4, %v3935_v20  ;;  %6498 = vmatprep.mubr.msk.f32.mxu0 %vm535_vm0, %v4910_v22 }
 0xd3d   : > { %v4852_v5 = vpop.permute.xlu1 %4851  ;;  %6499 = vmatmul.mubr.msk.f32.vlgmr.msra.gmra.mxu0 %vm535_vm0, %v4911_v38 }
 0xd3e   : > { %4897 = vst.msk [vmem:[#allocation2 + $0x18] sm:$0xff] %vm4893_vm5, %v4852_v5 }
 0xd3f   : > { %v4850_v36 = vpop.permute.xlu0 %4849 }
 0xd40   : > { %4896 = vst.msk [vmem:[#allocation2 + $0x10] sm:$0xff] %vm4893_vm5, %v4850_v36 }
 0xd41   : > { %v3026_v6 = vpop.permute.xlu1 %3025 }
 0xd42   : > { %3069 = vst.msk [vmem:[#allocation2 + $0x28] sm:$0xff] %vm3063_vm3, %v3026_v6 }
 0xd43   : > { %v3024_v44 = vpop.permute.xlu0 %3023 }
 0xd44   : > { %3068 = vst.msk [vmem:[#allocation2 + $0x20] sm:$0xff] %vm3063_vm3, %v3024_v44 }
 0xd45   : > { %v3941_v17 = vpop.permute.xlu1 %3940  ;;  %v4913_v53 = vld [vmem:[#allocation2 + $0x18] sm:$0xff] }
 0xd46   : > { %3984 = vst.msk [vmem:[#allocation2 + $0x28] sm:$0xff] %vm3978_vm4, %v3941_v17 }
 0xd47   : > { %v3939_v15 = vpop.permute.xlu0 %3938  ;;  %v4912_v31 = vld [vmem:[#allocation2 + $0x10] sm:$0xff] }
 0xd48   : > { %3983 = vst.msk [vmem:[#allocation2 + $0x20] sm:$0xff] %vm3978_vm4, %v3939_v15  ;;  %6501 = vmatprep.mubr.msk.f32.mxu0 %vm535_vm0, %v4912_v31 }
 0xd49   : > { %v4856_v41 = vpop.permute.xlu1 %4855  ;;  %6502 = vmatmul.mubr.msk.f32.gmra.mxu0 %vm535_vm0, %v4913_v53 }
 0xd4a   : > { %4899 = vst.msk [vmem:[#allocation2 + $0x28] sm:$0xff] %vm4893_vm5, %v4856_v41 }
 0xd4b   : > { %v4854_v25 = vpop.permute.xlu0 %4853 }
 0xd4c   : > { %4898 = vst.msk [vmem:[#allocation2 + $0x20] sm:$0xff] %vm4893_vm5, %v4854_v25 }
 0xd4d   : > { %v3030_v0 = vpop.permute.xlu1 %3029 }
 0xd4e   : > { %3071 = vst.msk [vmem:[#allocation2 + $0x38] sm:$0xff] %vm3063_vm3, %v3030_v0 }
 0xd4f   : > { %v3028_v13 = vpop.permute.xlu0 %3027 }
 0xd50   : > { %3070 = vst.msk [vmem:[#allocation2 + $0x30] sm:$0xff] %vm3063_vm3, %v3028_v13 }
 0xd51   : > { %v3945_v2 = vpop.permute.xlu1 %3944  ;;  %v4915_v42 = vld [vmem:[#allocation2 + $0x28] sm:$0xff] }
 0xd52   : > { %3986 = vst.msk [vmem:[#allocation2 + $0x38] sm:$0xff] %vm3978_vm4, %v3945_v2 }
 0xd53   : > { %v3943_v61 = vpop.permute.xlu0 %3942  ;;  %v4914_v54 = vld [vmem:[#allocation2 + $0x20] sm:$0xff] }
 0xd54   : > { %3985 = vst.msk [vmem:[#allocation2 + $0x30] sm:$0xff] %vm3978_vm4, %v3943_v61  ;;  %6504 = vmatprep.mubr.msk.f32.mxu0 %vm535_vm0, %v4914_v54 }
 0xd55   : > { %6505 = vmatmul.mubr.msk.f32.gmra.mxu0 %vm535_vm0, %v4915_v42 }
 0xd8b   : > { %v4860_v35 = vpop.permute.xlu1 %4859 }
 0xd8c   : > { %4901 = vst.msk [vmem:[#allocation2 + $0x38] sm:$0xff] %vm4893_vm5, %v4860_v35 }
 0xd8d   : > { %v4858_v16 = vpop.permute.xlu0 %4857 }
 0xd8e   : > { %4900 = vst.msk [vmem:[#allocation2 + $0x30] sm:$0xff] %vm4893_vm5, %v4858_v16 }
 0xd8f   : > { %v3034_v29 = vpop.permute.xlu1 %3033 }
 0xd90   : > { %3073 = vst.msk [vmem:[#allocation2 + $0x48] sm:$0xff] %vm3063_vm3, %v3034_v29 }
 0xd91   : > { %v3032_v40 = vpop.permute.xlu0 %3031 }
 0xd92   : > { %3072 = vst.msk [vmem:[#allocation2 + $0x40] sm:$0xff] %vm3063_vm3, %v3032_v40 }
 0xd93   : > { %v3949_v11 = vpop.permute.xlu1 %3948  ;;  %v4917_v37 = vld [vmem:[#allocation2 + $0x38] sm:$0xff] }
 0xd94   : > { %3988 = vst.msk [vmem:[#allocation2 + $0x48] sm:$0xff] %vm3978_vm4, %v3949_v11 }
 0xd95   : > { %v3947_v51 = vpop.permute.xlu0 %3946  ;;  %v4916_v14 = vld [vmem:[#allocation2 + $0x30] sm:$0xff] }
 0xd96   : > { %3987 = vst.msk [vmem:[#allocation2 + $0x40] sm:$0xff] %vm3978_vm4, %v3947_v51  ;;  %6507 = vmatprep.mubr.msk.f32.mxu0 %vm535_vm0, %v4916_v14 }
 0xd97   : > { %v3038_v24 = vpop.permute.xlu1 %3037  ;;  %6508 = vmatmul.mubr.msk.f32.gmra.mxu0 %vm535_vm0, %v4917_v37 }
 0xd98   : > { %3075 = vst.msk [vmem:[#allocation2 + $0x58] sm:$0xff] %vm3063_vm3, %v3038_v24 }
 0xd99   : > { %v3036_v32 = vpop.permute.xlu0 %3035 }
 0xd9a   : > { %3074 = vst.msk [vmem:[#allocation2 + $0x50] sm:$0xff] %vm3063_vm3, %v3036_v32 }
 0xd9b   : > { %v3953_v18 = vpop.permute.xlu1 %3952 }
 0xd9c   : > { %3990 = vst.msk [vmem:[#allocation2 + $0x58] sm:$0xff] %vm3978_vm4, %v3953_v18 }
 0xd9d   : > { %v3951_v45 = vpop.permute.xlu0 %3950 }
 0xd9e   : > { %3989 = vst.msk [vmem:[#allocation2 + $0x50] sm:$0xff] %vm3978_vm4, %v3951_v45 }
 0xd9f   : > { %v3042_v63 = vpop.permute.xlu1 %3041 }
 0xda0   : > { %3077 = vst.msk [vmem:[#allocation2 + $0x68] sm:$0xff] %vm3063_vm3, %v3042_v63 }
 0xda1   : > { %v3040_v8 = vpop.permute.xlu0 %3039 }
 0xda2   : > { %3076 = vst.msk [vmem:[#allocation2 + $0x60] sm:$0xff] %vm3063_vm3, %v3040_v8 }
 0xda3   : > { %v3957_v59 = vpop.permute.xlu1 %3956 }
 0xda4   : > { %3992 = vst.msk [vmem:[#allocation2 + $0x68] sm:$0xff] %vm3978_vm4, %v3957_v59 }
 0xda5   : > { %v3955_v50 = vpop.permute.xlu0 %3954 }
 0xda6   : > { %3991 = vst.msk [vmem:[#allocation2 + $0x60] sm:$0xff] %vm3978_vm4, %v3955_v50 }
 0xda7   : > { %v3046_v46 = vpop.permute.xlu1 %3045 }
 0xda8   : > { %3079 = vst.msk [vmem:[#allocation2 + $0x78] sm:$0xff] %vm3063_vm3, %v3046_v46 }
 0xda9   : > { %v3044_v19 = vpop.permute.xlu0 %3043 }
 0xdaa   : > { %3078 = vst.msk [vmem:[#allocation2 + $0x70] sm:$0xff] %vm3063_vm3, %v3044_v19 }
 0xdab   : > { %v3961_v34 = vpop.permute.xlu1 %3960 }
 0xdac   : > { %3994 = vst.msk [vmem:[#allocation2 + $0x78] sm:$0xff] %vm3978_vm4, %v3961_v34 }
 0xdad   : > { %v3959_v58 = vpop.permute.xlu0 %3958 }
 0xdae   : > { %3993 = vst.msk [vmem:[#allocation2 + $0x70] sm:$0xff] %vm3978_vm4, %v3959_v58 }
 0xdbc   : > { %v6480_v4 = vpop.f32.mrf.mxu1 }
 0xdbd   : > { %4863 = vrot.lane.b32.xlu1 %v6480_v4, %s6909_s25 }
 0xdbe   : > { %v4790_v47 = vpop.f32.mrf.mxu1 }
 0xdbf   : > { %4861 = vrot.lane.b32.xlu0 %v4790_v47, %s6909_s25 }
 0xdc0   : > { %v6483_v9 = vpop.f32.mrf.mxu1 }
 0xdc1   : > { %4867 = vrot.lane.b32.xlu1 %v6483_v9, %s6909_s25 }
 0xdc2   : > { %v4800_v30 = vpop.f32.mrf.mxu1 }
 0xdc3   : > { %4865 = vrot.lane.b32.xlu0 %v4800_v30, %s6909_s25 }
 0xdc4   : > { %v6486_v57 = vpop.f32.mrf.mxu1 }
 0xdc5   : > { %4871 = vrot.lane.b32.xlu1 %v6486_v57, %s6909_s25 }
 0xdc6   : > { %v4810_v43 = vpop.f32.mrf.mxu1 }
 0xdc7   : > { %4869 = vrot.lane.b32.xlu0 %v4810_v43, %s6909_s25 }
 0xdc8   : > { %v6489_v60 = vpop.f32.mrf.mxu1 }
 0xdc9   : > { %4875 = vrot.lane.b32.xlu1 %v6489_v60, %s6909_s25 }
 0xdca   : > { %v4820_v21 = vpop.f32.mrf.mxu1 }
 0xdcb   : > { %4873 = vrot.lane.b32.xlu0 %v4820_v21, %s6909_s25 }
 0xdfd   : > { %v6500_v62 = vpop.f32.mrf.mxu0 }
 0xdfe   : > { %v5057_v33 = vadd.f32 %v6500_v62, %v9467_v27 }
 0xdff   : > { %v5051_v39 = vpop.f32.mrf.mxu0 }
 0xe00   : > { %5132 = vst.msk [vmem:[%s9474_s26 + $0x10] sm:$0xff] %vm535_vm0, %v5057_v33  ;;  %v5052_v12 = vadd.f32 %v9467_v27, %v5051_v39 }
 0xe02   : > { %5130 = vst.msk [vmem:[%s9474_s26] sm:$0xff] %vm535_vm0, %v5052_v12 }
 0xe09   : > { %v6503_v26 = vpop.f32.mrf.mxu0 }
 0xe0a   : > { %v5067_v7 = vadd.f32 %v6503_v26, %v9467_v27 }
 0xe0b   : > { %v5061_v10 = vpop.f32.mrf.mxu0 }
 0xe0c   : > { %5136 = vst.msk [vmem:[%s9474_s26 + $0x30] sm:$0xff] %vm535_vm0, %v5067_v7  ;;  %v5062_v49 = vadd.f32 %v9467_v27, %v5061_v10 }
 0xe0e   : > { %5134 = vst.msk [vmem:[%s9474_s26 + $0x20] sm:$0xff] %vm535_vm0, %v5062_v49 }
 0xe15   : > { %v6506_v1 = vpop.f32.mrf.mxu0 }
 0xe16   : > { %v5077_v23 = vadd.f32 %v6506_v1, %v9467_v27 }
 0xe17   : > { %v5071_v28 = vpop.f32.mrf.mxu0 }
 0xe18   : > { %5140 = vst.msk [vmem:[%s9474_s26 + $0x50] sm:$0xff] %vm535_vm0, %v5077_v23  ;;  %v5072_v55 = vadd.f32 %v9467_v27, %v5071_v28 }
 0xe1a   : > { %5138 = vst.msk [vmem:[%s9474_s26 + $0x40] sm:$0xff] %vm535_vm0, %v5072_v55 }
 0xe2f   : > { %v4864_v52 = vpop.permute.xlu1 %4863 }
 0xe30   : > { %4903 = vst.msk [vmem:[#allocation2 + $0x48] sm:$0xff] %vm4893_vm5, %v4864_v52 }
 0xe31   : > { %v4862_v3 = vpop.permute.xlu0 %4861 }
 0xe32   : > { %4902 = vst.msk [vmem:[#allocation2 + $0x40] sm:$0xff] %vm4893_vm5, %v4862_v3 }
 0xe33   : > { %v4868_v48 = vpop.permute.xlu1 %4867 }
 0xe34   : > { %4905 = vst.msk [vmem:[#allocation2 + $0x58] sm:$0xff] %vm4893_vm5, %v4868_v48 }
 0xe35   : > { %v4866_v56 = vpop.permute.xlu0 %4865 }
 0xe36   : > { %4904 = vst.msk [vmem:[#allocation2 + $0x50] sm:$0xff] %vm4893_vm5, %v4866_v56 }
 0xe37   : > { %v4872_v20 = vpop.permute.xlu1 %4871  ;;  %v4919_v5 = vld [vmem:[#allocation2 + $0x48] sm:$0xff] }
 0xe38   : > { %4907 = vst.msk [vmem:[#allocation2 + $0x68] sm:$0xff] %vm4893_vm5, %v4872_v20 }
 0xe39   : > { %v4870_v22 = vpop.permute.xlu0 %4869  ;;  %v4918_v38 = vld [vmem:[#allocation2 + $0x40] sm:$0xff] }
 0xe3a   : > { %4906 = vst.msk [vmem:[#allocation2 + $0x60] sm:$0xff] %vm4893_vm5, %v4870_v22  ;;  %6510 = vmatprep.mubr.msk.f32.mxu0 %vm535_vm0, %v4918_v38 }
 0xe3b   : > { %v4876_v36 = vpop.permute.xlu1 %4875  ;;  %6511 = vmatmul.mubr.msk.f32.gmra.mxu0 %vm535_vm0, %v4919_v5  ;;  %v4921_v17 = vld [vmem:[#allocation2 + $0x58] sm:$0xff] }
 0xe3c   : > { %4909 = vst.msk [vmem:[#allocation2 + $0x78] sm:$0xff] %vm4893_vm5, %v4876_v36 }
 0xe3d   : > { %v4874_v6 = vpop.permute.xlu0 %4873  ;;  %v4920_v44 = vld [vmem:[#allocation2 + $0x50] sm:$0xff] }
 0xe3e   : > { %4908 = vst.msk [vmem:[#allocation2 + $0x70] sm:$0xff] %vm4893_vm5, %v4874_v6  ;;  %6513 = vmatprep.mubr.msk.f32.mxu0 %vm535_vm0, %v4920_v44 }
 0xe3f   : > { %6514 = vmatmul.mubr.msk.f32.gmra.mxu0 %vm535_vm0, %v4921_v17  ;;  %v4923_v31 = vld [vmem:[#allocation2 + $0x68] sm:$0xff] }
 0xe41   : > { %v4922_v15 = vld [vmem:[#allocation2 + $0x60] sm:$0xff] }
 0xe42   : > { %6516 = vmatprep.mubr.msk.f32.mxu0 %vm535_vm0, %v4922_v15 }
 0xe43   : > { %6517 = vmatmul.mubr.msk.f32.gmra.mxu0 %vm535_vm0, %v4923_v31  ;;  %v4925_v41 = vld [vmem:[#allocation2 + $0x78] sm:$0xff] }
 0xe45   : > { %v4924_v53 = vld [vmem:[#allocation2 + $0x70] sm:$0xff] }
 0xe46   : > { %6519 = vmatprep.mubr.msk.f32.mxu0 %vm535_vm0, %v4924_v53 }
 0xe47   : > { %6520 = vmatmul.mubr.msk.f32.gmra.mxu0 %vm535_vm0, %v4925_v41 }
 0xe57   : > { %v6509_v25 = vpop.f32.mrf.mxu0 }
 0xe58   : > { %v5087_v0 = vadd.f32 %v6509_v25, %v9467_v27 }
 0xe59   : > { %v5081_v13 = vpop.f32.mrf.mxu0 }
 0xe5a   : > { %5144 = vst.msk [vmem:[%s9474_s26 + $0x70] sm:$0xff] %vm535_vm0, %v5087_v0  ;;  %v5082_v2 = vadd.f32 %v9467_v27, %v5081_v13 }
 0xe5c   : > { %5142 = vst.msk [vmem:[%s9474_s26 + $0x60] sm:$0xff] %vm535_vm0, %v5082_v2 }
 0xefb   : > { %v6512_v61 = vpop.f32.mrf.mxu0 }
 0xefc   : > { %v5097_v54 = vadd.f32 %v6512_v61, %v9467_v27 }
 0xefd   : > { %v5091_v42 = vpop.f32.mrf.mxu0 }
 0xefe   : > { %5133 = vst.msk [vmem:[%s9474_s26 + $0x18] sm:$0xff] %vm535_vm0, %v5097_v54  ;;  %v5092_v35 = vadd.f32 %v9467_v27, %v5091_v42 }
 0xeff   : > { %v6515_v16 = vpop.f32.mrf.mxu0 }
 0xf00   : > { %5131 = vst.msk [vmem:[%s9474_s26 + $0x8] sm:$0xff] %vm535_vm0, %v5092_v35  ;;  %v5107_v29 = vadd.f32 %v6515_v16, %v9467_v27 }
 0xf01   : > { %v5101_v40 = vpop.f32.mrf.mxu0 }
 0xf02   : > { %5137 = vst.msk [vmem:[%s9474_s26 + $0x38] sm:$0xff] %vm535_vm0, %v5107_v29  ;;  %v5102_v11 = vadd.f32 %v9467_v27, %v5101_v40 }
 0xf03   : > { %v6518_v51 = vpop.f32.mrf.mxu0 }
 0xf04   : > { %5135 = vst.msk [vmem:[%s9474_s26 + $0x28] sm:$0xff] %vm535_vm0, %v5102_v11  ;;  %v5117_v14 = vadd.f32 %v6518_v51, %v9467_v27 }
 0xf05   : > { %v5111_v37 = vpop.f32.mrf.mxu0 }
 0xf06   : > { %5141 = vst.msk [vmem:[%s9474_s26 + $0x58] sm:$0xff] %vm535_vm0, %v5117_v14  ;;  %v5112_v24 = vadd.f32 %v9467_v27, %v5111_v37 }
 0xf07   : > { %v6521_v32 = vpop.f32.mrf.mxu0 }
 0xf08   : > { %5139 = vst.msk [vmem:[%s9474_s26 + $0x48] sm:$0xff] %vm535_vm0, %v5112_v24  ;;  %v5127_v18 = vadd.f32 %v6521_v32, %v9467_v27 }
 0xf09   : > { %v5121_v45 = vpop.f32.mrf.mxu0 }
 0xf0a   : > { %5145 = vst.msk [vmem:[%s9474_s26 + $0x78] sm:$0xff] %vm535_vm0, %v5127_v18  ;;  %v5122_v63 = vadd.f32 %v9467_v27, %v5121_v45 }
 0xf0c   : > { %5143 = vst.msk [vmem:[%s9474_s26 + $0x68] sm:$0xff] %vm535_vm0, %v5122_v63 }
 0xf0d PF: > { %s23_s29 = sadd.s32 1, %s6902_s29   ;;  %s9762_s25 = smov %s6894_s27 }
 0xf0e   : > { %p20_p8 = scmp.ge.s32.totalorder %s23_s29, 6   ;;  %s9763_s26 = smov %s6898_s28 }
 0xf0f   : > { %s9764_s27 = smov %s9767_s30  ;;  %s9765_s28 = smov %s9771_s14 }
 0xf10   :  { %22 = sbr.rel (!%p20_p8) target bundleno = 3 (0x3), region = 105 }

</bundles_post_ra>
